<compile_context>
chip_gen: v7x
topology: tpu7x:2x2x1
jax: 0.10.0
libtpu: 0.0.40
codegen_flags: <defaults>
</compile_context>

<pallas_src>
from functools import partial

import jax
import jax.numpy as jnp
from jax.experimental import pallas as pl
from jax.experimental.pallas import tpu as pltpu

EPS = 1e-5


# --------------------------------------------------------------------------
# Scoped-VMEM limit: raise toward physical capacity, with a safe fallback.
# --------------------------------------------------------------------------
def _default_vmem_limit():
    try:
        cap = int(pltpu.get_tpu_info().vmem_capacity_bytes)
        lim = min(cap - (16 << 20), 100 << 20)       # headroom; ~100 MiB cap
        return int(lim) if lim >= (16 << 20) else None
    except Exception:                                 # off-TPU / older API
        return None


_VMEM_LIMIT = _default_vmem_limit()


def _compiler_params(dimension_semantics=None):
    kwargs = {}
    if dimension_semantics is not None:
        kwargs["dimension_semantics"] = dimension_semantics
    if _VMEM_LIMIT is not None:
        kwargs["vmem_limit_bytes"] = _VMEM_LIMIT
    return pltpu.CompilerParams(**kwargs) if kwargs else None


# --------------------------------------------------------------------------
# Pallas kernels
# --------------------------------------------------------------------------
def _conv_relu_pool_kernel(w_ref, p_ref, b_ref, o_ref):
    """pooled = relu(maxpool2x2(W @ patches) + b), lane-dense per Mp tile.

    w: (Cout, K) [compute dtype], p: (4, K, tm) [compute dtype, one slab per
    2x2 pool quadrant], b: (Cout, 1) f32, out: (Cout, tm) f32.
    Four per-quad dots with a running max keep the peak intermediate at
    2x(Cout, tm); bias + ReLU run once on the pooled (Cout, tm) result.
    """
    w = w_ref[...]
    run = jnp.dot(w, p_ref[0], preferred_element_type=jnp.float32)
    for q in range(1, 4):
        run = jnp.maximum(
            run, jnp.dot(w, p_ref[q], preferred_element_type=jnp.float32))
    o_ref[...] = jnp.maximum(run + b_ref[...], 0.0).astype(o_ref.dtype)


def conv_relu_pool(w_mat, patches, bias, cout, mp, *, block_m=2048):
    """Fused conv-as-matmul + 2x2 maxpool + bias + relu, gridded over Mp."""
    k = patches.shape[1]
    # Largest tile that evenly divides Mp (falls back to a single block).
    bm = block_m if (mp > block_m and mp % block_m == 0) else mp
    return pl.pallas_call(
        _conv_relu_pool_kernel,
        out_shape=jax.ShapeDtypeStruct((cout, mp), jnp.float32),
        grid=(mp // bm,),
        in_specs=[
            pl.BlockSpec((cout, k), lambda i: (0, 0)),
            pl.BlockSpec((4, k, bm), lambda i: (0, 0, i)),
            pl.BlockSpec((cout, 1), lambda i: (0, 0)),
        ],
        out_specs=pl.BlockSpec((cout, bm), lambda i: (0, i)),
        compiler_params=_compiler_params(("parallel",)),
    )(w_mat, patches, bias.reshape(cout, 1))


def _fc_head_kernel(x_ref, w1_ref, b1_ref, g1_ref, be1_ref,
                    w2_ref, b2_ref, g2_ref, be2_ref, o_ref):
    """FC head in (features, batch) orientation, whole batch in one block.

    x: (1024, B) f32.  fc1 -> BN (one-pass batch stats, biased var) -> relu ->
    fc2 -> BN -> log-softmax over features.  Batch stats are lane reductions
    (single pass: sum and sum-of-squares); softmax reduces over sublanes.
    Output: (84, B).
    """
    x = x_ref[...]
    inv_b = 1.0 / x.shape[1]

    h = jnp.dot(w1_ref[...], x, preferred_element_type=jnp.float32) + b1_ref[...]
    mu1 = jnp.sum(h, axis=1, keepdims=True) * inv_b
    ex2 = jnp.sum(h * h, axis=1, keepdims=True) * inv_b
    var1 = ex2 - mu1 * mu1
    h = (h - mu1) * jax.lax.rsqrt(var1 + EPS) * g1_ref[...] + be1_ref[...]
    h = jnp.maximum(h, 0.0)

    z = jnp.dot(w2_ref[...], h, preferred_element_type=jnp.float32) + b2_ref[...]
    mu2 = jnp.sum(z, axis=1, keepdims=True) * inv_b
    ez2 = jnp.sum(z * z, axis=1, keepdims=True) * inv_b
    var2 = ez2 - mu2 * mu2
    z = (z - mu2) * jax.lax.rsqrt(var2 + EPS) * g2_ref[...] + be2_ref[...]

    m = jnp.max(z, axis=0, keepdims=True)
    zs = z - m
    lse = jnp.log(jnp.sum(jnp.exp(zs), axis=0, keepdims=True))
    o_ref[...] = (zs - lse).astype(o_ref.dtype)


# --------------------------------------------------------------------------
# Glue (pool-ordered im2col, forward, reference, params)
# --------------------------------------------------------------------------
def pool_im2col(x_cbhw, ksize=5, pad=2, batch_minor=False, dtype=jnp.float32):
    """im2col for a stride-1 'same' conv followed by a 2x2/2 max-pool.

    x: (Cin, B, H, W).  Returns (4, Cin*k*k, Mp) with Mp = B*(H//2)*(W//2):
    one (K, Mp) slab per 2x2 pool quadrant (dh, dw), so pooling is a running
    max over the leading axis.  Rows (K) are ordered (cin, kh, kw) to match
    conv_w.reshape(Cout, -1).  Per-quad columns are ordered (b, h2, w2), or
    (h2, w2, b) when batch_minor=True.
    """
    C, B, H, W = x_cbhw.shape
    xp = jnp.pad(x_cbhw, ((0, 0), (0, 0), (pad, pad), (pad, pad)))
    if batch_minor:
        xp = xp.transpose(0, 2, 3, 1)                    # (C, Hp, Wp, B)
    quads = []
    for dh in range(2):
        for dw in range(2):
            taps = []
            for kh in range(ksize):
                for kw in range(ksize):
                    if batch_minor:
                        s = xp[:, kh + dh:kh + dh + H:2,
                               kw + dw:kw + dw + W:2, :]     # (C, H/2, W/2, B)
                    else:
                        s = xp[:, :, kh + dh:kh + dh + H:2,
                               kw + dw:kw + dw + W:2]        # (C, B, H/2, W/2)
                    taps.append(s.reshape(C, -1))
            quads.append(jnp.stack(taps, axis=1).reshape(C * ksize * ksize, -1))
    return jnp.stack(quads, axis=0).astype(dtype)            # (4, K, Mp)


@partial(jax.jit, static_argnames=("compute_dtype",))
def lenet5_bn_forward(x_nchw, params, compute_dtype=jnp.bfloat16):
    B = x_nchw.shape[0]
    cd = compute_dtype

    # conv1 (1->6, k=5, pad=2) + relu + maxpool, lane-dense -> (6, B*16*16)
    p1 = pool_im2col(x_nchw.transpose(1, 0, 2, 3), dtype=cd)     # (4, 25, B*256)
    y1 = conv_relu_pool(params["conv1_w"].reshape(6, 25).astype(cd), p1,
                        params["conv1_b"], 6, B * 16 * 16)

    # conv2 (6->16) + relu + maxpool, batch-minor columns -> (16, 64*B)
    p2 = pool_im2col(y1.reshape(6, B, 16, 16), batch_minor=True,
                     dtype=cd)                                    # (4, 150, 64*B)
    y2 = conv_relu_pool(params["conv2_w"].reshape(16, 150).astype(cd), p2,
                        params["conv2_b"], 16, 64 * B)

    # y2[ci, (h2*8+w2)*B + b] row-major-reshapes (free, HBM side) to the
    # transposed PyTorch flatten x.view(B, -1).T, i.e. flat_T[ci*64+h2*8+w2, b].
    flat_t = y2.reshape(16 * 64, B)

    out_t = pl.pallas_call(
        _fc_head_kernel,
        out_shape=jax.ShapeDtypeStruct((84, B), jnp.float32),
        compiler_params=_compiler_params(),
    )(flat_t,
      params["fc1_w"], params["fc1_b"].reshape(-1, 1),
      params["fc1_bn_g"].reshape(-1, 1), params["fc1_bn_b"].reshape(-1, 1),
      params["fc2_w"], params["fc2_b"].reshape(-1, 1),
      params["fc2_bn_g"].reshape(-1, 1), params["fc2_bn_b"].reshape(-1, 1))
    return out_t.T                                               # (B, 84)


def reference_forward(x, params):
    """Pure-JAX f32 reference (mirrors the PyTorch forward)."""
    hi = jax.lax.Precision.HIGHEST

    def conv(x, w, b):
        y = jax.lax.conv_general_dilated(
            x, w, (1, 1), ((2, 2), (2, 2)),
            dimension_numbers=("NCHW", "OIHW", "NCHW"), precision=hi)
        return y + b.reshape(1, -1, 1, 1)

    def maxpool(x):
        return jax.lax.reduce_window(x, -jnp.inf, jax.lax.max,
                                     (1, 1, 2, 2), (1, 1, 2, 2), "VALID")

    def bn(h, g, b):
        mu = h.mean(0)
        var = ((h - mu) ** 2).mean(0)
        return (h - mu) / jnp.sqrt(var + EPS) * g + b

    h = jnp.maximum(conv(x, params["conv1_w"], params["conv1_b"]), 0.0)
    h = maxpool(h)
    h = jnp.maximum(conv(h, params["conv2_w"], params["conv2_b"]), 0.0)
    h = maxpool(h)
    h = h.reshape(x.shape[0], -1)
    h = jnp.maximum(
        bn(jnp.dot(h, params["fc1_w"].T, precision=hi) + params["fc1_b"],
           params["fc1_bn_g"], params["fc1_bn_b"]), 0.0)
    z = bn(jnp.dot(h, params["fc2_w"].T, precision=hi) + params["fc2_b"],
           params["fc2_bn_g"], params["fc2_bn_b"])
    return jax.nn.log_softmax(z, axis=1)


def init_params(key):
    ks = jax.random.split(key, 8)
    n = lambda k, s, sc: (sc * jax.random.normal(k, s, jnp.float32))
    return {
        "conv1_w": n(ks[0], (6, 1, 5, 5), 0.2),
        "conv1_b": n(ks[1], (6,), 0.1),
        "conv2_w": n(ks[2], (16, 6, 5, 5), 0.1),
        "conv2_b": n(ks[3], (16,), 0.1),
        "fc1_w": n(ks[4], (120, 1024), 0.05),
        "fc1_b": n(ks[5], (120,), 0.1),
        "fc1_bn_g": jnp.ones((120,), jnp.float32),
        "fc1_bn_b": jnp.zeros((120,), jnp.float32),
        "fc2_w": n(ks[6], (84, 120), 0.1),
        "fc2_b": n(ks[7], (84,), 0.1),
        "fc2_bn_g": jnp.ones((84,), jnp.float32),
        "fc2_bn_b": jnp.zeros((84,), jnp.float32),
    }


if __name__ == "__main__":
    key = jax.random.PRNGKey(0)
    k_x, k_p = jax.random.split(key)
    # fc1 expects 16 * 8 * 8 = 1024 features -> input spatial must be 32x32.
    # Even batch keeps the conv2 output lane-dense (64*B multiple of 128).
    B = 16
    x = jax.random.normal(k_x, (B, 1, 32, 32), jnp.float32)
    params = init_params(k_p)

    ref = jax.block_until_ready(reference_forward(x, params))

    # Exact-semantics check: f32 compute path vs the f32 reference.
    out_f32 = jax.block_until_ready(
        lenet5_bn_forward(x, params, compute_dtype=jnp.float32))
    assert out_f32.shape == (B, 84)
    assert jnp.allclose(out_f32, ref, atol=1e-3, rtol=1e-3), (
        float(jnp.max(jnp.abs(out_f32 - ref))))

    # Optimized (default) path: bf16 conv patches/weights, f32 accumulation.
    out_bf16 = jax.block_until_ready(lenet5_bn_forward(x, params))
    assert out_bf16.shape == (B, 84)
    assert jnp.allclose(out_bf16, ref, atol=1e-1, rtol=5e-2), (
        float(jnp.max(jnp.abs(out_bf16 - ref))))

    print("KERNEL_OK")
</pallas_src>

<mosaic_0001>
module attributes {stable_mosaic.version = 11 : i64} {
  func.func @_conv_relu_pool_kernel(%arg0: i32, %arg1: memref<6x25xf32, #tpu.memory_space<vmem>>, %arg2: memref<4x25x2048xf32, #tpu.memory_space<vmem>>, %arg3: memref<6x1xf32, #tpu.memory_space<vmem>>, %arg4: memref<6x2048xf32, #tpu.memory_space<vmem>>) attributes {dimension_semantics = [#tpu.dimension_semantics<parallel>], iteration_bounds = array<i64: 2>, scalar_prefetch = 0 : i64, scratch_operands = 0 : i64, tpu.core_type = #tpu.core_type<tc>, window_params = [{pipeline_mode = #tpu.pipeline_mode<synchronous>, transform_indices = @transform_0, window_bounds = array<i64: 6, 25>}, {transform_indices = @transform_1, window_bounds = array<i64: 4, 25, 2048>}, {pipeline_mode = #tpu.pipeline_mode<synchronous>, transform_indices = @transform_2, window_bounds = array<i64: 6, 1>}, {transform_indices = @transform_3, window_bounds = array<i64: 6, 2048>}]} {
    %c0 = arith.constant 0 : index
    %c0_0 = arith.constant 0 : index
    %0 = vector.load %arg1[%c0, %c0_0] : memref<6x25xf32, #tpu.memory_space<vmem>>, vector<6x25xf32>
    %c0_1 = arith.constant 0 : index
    %c0_2 = arith.constant 0 : index
    %c0_3 = arith.constant 0 : index
    %1 = vector.load %arg2[%c0_1, %c0_2, %c0_3] : memref<4x25x2048xf32, #tpu.memory_space<vmem>>, vector<1x25x2048xf32>
    %2 = vector.shape_cast %1 : vector<1x25x2048xf32> to vector<25x2048xf32>
    %cst = arith.constant dense<0.000000e+00> : vector<6x2048xf32>
    %3 = tpu.matmul %0, %2, %cst {dimension_numbers = #tpu.dot_dimension_numbers<[1], [0], [0], [1], [0, 0, 1, 1], [], []>} : vector<6x25xf32>, vector<25x2048xf32>, vector<6x2048xf32> -> vector<6x2048xf32>
    %c1 = arith.constant 1 : index
    %c0_4 = arith.constant 0 : index
    %c0_5 = arith.constant 0 : index
    %4 = vector.load %arg2[%c1, %c0_4, %c0_5] : memref<4x25x2048xf32, #tpu.memory_space<vmem>>, vector<1x25x2048xf32>
    %5 = vector.shape_cast %4 : vector<1x25x2048xf32> to vector<25x2048xf32>
    %cst_6 = arith.constant dense<0.000000e+00> : vector<6x2048xf32>
    %6 = tpu.matmul %0, %5, %cst_6 {dimension_numbers = #tpu.dot_dimension_numbers<[1], [0], [0], [1], [0, 0, 1, 1], [], []>} : vector<6x25xf32>, vector<25x2048xf32>, vector<6x2048xf32> -> vector<6x2048xf32>
    %7 = arith.maximumf %3, %6 : vector<6x2048xf32>
    %c2 = arith.constant 2 : index
    %c0_7 = arith.constant 0 : index
    %c0_8 = arith.constant 0 : index
    %8 = vector.load %arg2[%c2, %c0_7, %c0_8] : memref<4x25x2048xf32, #tpu.memory_space<vmem>>, vector<1x25x2048xf32>
    %9 = vector.shape_cast %8 : vector<1x25x2048xf32> to vector<25x2048xf32>
    %cst_9 = arith.constant dense<0.000000e+00> : vector<6x2048xf32>
    %10 = tpu.matmul %0, %9, %cst_9 {dimension_numbers = #tpu.dot_dimension_numbers<[1], [0], [0], [1], [0, 0, 1, 1], [], []>} : vector<6x25xf32>, vector<25x2048xf32>, vector<6x2048xf32> -> vector<6x2048xf32>
    %11 = arith.maximumf %7, %10 : vector<6x2048xf32>
    %c3 = arith.constant 3 : index
    %c0_10 = arith.constant 0 : index
    %c0_11 = arith.constant 0 : index
    %12 = vector.load %arg2[%c3, %c0_10, %c0_11] : memref<4x25x2048xf32, #tpu.memory_space<vmem>>, vector<1x25x2048xf32>
    %13 = vector.shape_cast %12 : vector<1x25x2048xf32> to vector<25x2048xf32>
    %cst_12 = arith.constant dense<0.000000e+00> : vector<6x2048xf32>
    %14 = tpu.matmul %0, %13, %cst_12 {dimension_numbers = #tpu.dot_dimension_numbers<[1], [0], [0], [1], [0, 0, 1, 1], [], []>} : vector<6x25xf32>, vector<25x2048xf32>, vector<6x2048xf32> -> vector<6x2048xf32>
    %15 = arith.maximumf %11, %14 : vector<6x2048xf32>
    %c0_13 = arith.constant 0 : index
    %c0_14 = arith.constant 0 : index
    %16 = vector.load %arg3[%c0_13, %c0_14] : memref<6x1xf32, #tpu.memory_space<vmem>>, vector<6x1xf32>
    %17 = vector.broadcast %16 : vector<6x1xf32> to vector<6x2048xf32>
    %18 = arith.addf %15, %17 : vector<6x2048xf32>
    %cst_15 = arith.constant 0.000000e+00 : f32
    %19 = vector.broadcast %cst_15 : f32 to vector<6x2048xf32>
    %20 = arith.maximumf %18, %19 : vector<6x2048xf32>
    %c0_16 = arith.constant 0 : index
    %c0_17 = arith.constant 0 : index
    %21 = vector.load %arg4[%c0_16, %c0_17] : memref<6x2048xf32, #tpu.memory_space<vmem>>, vector<6x2048xf32>
    tpu.vector_store %arg4[%c0_16, %c0_17], %20 {strides = array<i32>} : memref<6x2048xf32, #tpu.memory_space<vmem>>, vector<6x2048xf32>,
    return
  }
  func.func @transform_0(%arg0: i32) -> (i32, i32) {
    %c0_i32 = arith.constant 0 : i32
    %c0_i32_0 = arith.constant 0 : i32
    %c0_i32_1 = arith.constant 0 : i32
    return %c0_i32, %c0_i32_0 : i32, i32
  }
  func.func @transform_1(%arg0: i32) -> (i32, i32, i32) {
    %c0_i32 = arith.constant 0 : i32
    %c0_i32_0 = arith.constant 0 : i32
    %c0_i32_1 = arith.constant 0 : i32
    return %c0_i32, %c0_i32_0, %arg0 : i32, i32, i32
  }
  func.func @transform_2(%arg0: i32) -> (i32, i32) {
    %c0_i32 = arith.constant 0 : i32
    %c0_i32_0 = arith.constant 0 : i32
    %c0_i32_1 = arith.constant 0 : i32
    return %c0_i32, %c0_i32_0 : i32, i32
  }
  func.func @transform_3(%arg0: i32) -> (i32, i32) {
    %c0_i32 = arith.constant 0 : i32
    %c0_i32_0 = arith.constant 0 : i32
    return %c0_i32, %arg0 : i32, i32
  }
}

module attributes {stable_mosaic.version = 11 : i64} {
  func.func @_conv_relu_pool_kernel(%arg0: i32, %arg1: memref<16x150xf32, #tpu.memory_space<vmem>>, %arg2: memref<4x150x1024xf32, #tpu.memory_space<vmem>>, %arg3: memref<16x1xf32, #tpu.memory_space<vmem>>, %arg4: memref<16x1024xf32, #tpu.memory_space<vmem>>) attributes {dimension_semantics = [#tpu.dimension_semantics<parallel>], iteration_bounds = array<i64: 1>, scalar_prefetch = 0 : i64, scratch_operands = 0 : i64, tpu.core_type = #tpu.core_type<tc>, window_params = [{pipeline_mode = #tpu.pipeline_mode<synchronous>, transform_indices = @transform_0, window_bounds = array<i64: 16, 150>}, {transform_indices = @transform_1, window_bounds = array<i64: 4, 150, 1024>}, {pipeline_mode = #tpu.pipeline_mode<synchronous>, transform_indices = @transform_2, window_bounds = array<i64: 16, 1>}, {transform_indices = @transform_3, window_bounds = array<i64: 16, 1024>}]} {
    %c0 = arith.constant 0 : index
    %c0_0 = arith.constant 0 : index
    %0 = vector.load %arg1[%c0, %c0_0] : memref<16x150xf32, #tpu.memory_space<vmem>>, vector<16x150xf32>
    %c0_1 = arith.constant 0 : index
    %c0_2 = arith.constant 0 : index
    %c0_3 = arith.constant 0 : index
    %1 = vector.load %arg2[%c0_1, %c0_2, %c0_3] : memref<4x150x1024xf32, #tpu.memory_space<vmem>>, vector<1x150x1024xf32>
    %2 = vector.shape_cast %1 : vector<1x150x1024xf32> to vector<150x1024xf32>
    %cst = arith.constant dense<0.000000e+00> : vector<16x1024xf32>
    %3 = tpu.matmul %0, %2, %cst {dimension_numbers = #tpu.dot_dimension_numbers<[1], [0], [0], [1], [0, 0, 1, 1], [], []>} : vector<16x150xf32>, vector<150x1024xf32>, vector<16x1024xf32> -> vector<16x1024xf32>
    %c1 = arith.constant 1 : index
    %c0_4 = arith.constant 0 : index
    %c0_5 = arith.constant 0 : index
    %4 = vector.load %arg2[%c1, %c0_4, %c0_5] : memref<4x150x1024xf32, #tpu.memory_space<vmem>>, vector<1x150x1024xf32>
    %5 = vector.shape_cast %4 : vector<1x150x1024xf32> to vector<150x1024xf32>
    %cst_6 = arith.constant dense<0.000000e+00> : vector<16x1024xf32>
    %6 = tpu.matmul %0, %5, %cst_6 {dimension_numbers = #tpu.dot_dimension_numbers<[1], [0], [0], [1], [0, 0, 1, 1], [], []>} : vector<16x150xf32>, vector<150x1024xf32>, vector<16x1024xf32> -> vector<16x1024xf32>
    %7 = arith.maximumf %3, %6 : vector<16x1024xf32>
    %c2 = arith.constant 2 : index
    %c0_7 = arith.constant 0 : index
    %c0_8 = arith.constant 0 : index
    %8 = vector.load %arg2[%c2, %c0_7, %c0_8] : memref<4x150x1024xf32, #tpu.memory_space<vmem>>, vector<1x150x1024xf32>
    %9 = vector.shape_cast %8 : vector<1x150x1024xf32> to vector<150x1024xf32>
    %cst_9 = arith.constant dense<0.000000e+00> : vector<16x1024xf32>
    %10 = tpu.matmul %0, %9, %cst_9 {dimension_numbers = #tpu.dot_dimension_numbers<[1], [0], [0], [1], [0, 0, 1, 1], [], []>} : vector<16x150xf32>, vector<150x1024xf32>, vector<16x1024xf32> -> vector<16x1024xf32>
    %11 = arith.maximumf %7, %10 : vector<16x1024xf32>
    %c3 = arith.constant 3 : index
    %c0_10 = arith.constant 0 : index
    %c0_11 = arith.constant 0 : index
    %12 = vector.load %arg2[%c3, %c0_10, %c0_11] : memref<4x150x1024xf32, #tpu.memory_space<vmem>>, vector<1x150x1024xf32>
    %13 = vector.shape_cast %12 : vector<1x150x1024xf32> to vector<150x1024xf32>
    %cst_12 = arith.constant dense<0.000000e+00> : vector<16x1024xf32>
    %14 = tpu.matmul %0, %13, %cst_12 {dimension_numbers = #tpu.dot_dimension_numbers<[1], [0], [0], [1], [0, 0, 1, 1], [], []>} : vector<16x150xf32>, vector<150x1024xf32>, vector<16x1024xf32> -> vector<16x1024xf32>
    %15 = arith.maximumf %11, %14 : vector<16x1024xf32>
    %c0_13 = arith.constant 0 : index
    %c0_14 = arith.constant 0 : index
    %16 = vector.load %arg3[%c0_13, %c0_14] : memref<16x1xf32, #tpu.memory_space<vmem>>, vector<16x1xf32>
    %17 = vector.broadcast %16 : vector<16x1xf32> to vector<16x1024xf32>
    %18 = arith.addf %15, %17 : vector<16x1024xf32>
    %cst_15 = arith.constant 0.000000e+00 : f32
    %19 = vector.broadcast %cst_15 : f32 to vector<16x1024xf32>
    %20 = arith.maximumf %18, %19 : vector<16x1024xf32>
    %c0_16 = arith.constant 0 : index
    %c0_17 = arith.constant 0 : index
    %21 = vector.load %arg4[%c0_16, %c0_17] : memref<16x1024xf32, #tpu.memory_space<vmem>>, vector<16x1024xf32>
    tpu.vector_store %arg4[%c0_16, %c0_17], %20 {strides = array<i32>} : memref<16x1024xf32, #tpu.memory_space<vmem>>, vector<16x1024xf32>,
    return
  }
  func.func @transform_0(%arg0: i32) -> (i32, i32) {
    %c0_i32 = arith.constant 0 : i32
    %c0_i32_0 = arith.constant 0 : i32
    %c0_i32_1 = arith.constant 0 : i32
    return %c0_i32, %c0_i32_0 : i32, i32
  }
  func.func @transform_1(%arg0: i32) -> (i32, i32, i32) {
    %c0_i32 = arith.constant 0 : i32
    %c0_i32_0 = arith.constant 0 : i32
    %c0_i32_1 = arith.constant 0 : i32
    return %c0_i32, %c0_i32_0, %arg0 : i32, i32, i32
  }
  func.func @transform_2(%arg0: i32) -> (i32, i32) {
    %c0_i32 = arith.constant 0 : i32
    %c0_i32_0 = arith.constant 0 : i32
    %c0_i32_1 = arith.constant 0 : i32
    return %c0_i32, %c0_i32_0 : i32, i32
  }
  func.func @transform_3(%arg0: i32) -> (i32, i32) {
    %c0_i32 = arith.constant 0 : i32
    %c0_i32_0 = arith.constant 0 : i32
    return %c0_i32, %arg0 : i32, i32
  }
}

module attributes {stable_mosaic.version = 11 : i64} {
  func.func @_fc_head_kernel(%arg0: memref<1024x16xf32, #tpu.memory_space<vmem>>, %arg1: memref<120x1024xf32, #tpu.memory_space<vmem>>, %arg2: memref<120x1xf32, #tpu.memory_space<vmem>>, %arg3: memref<120x1xf32, #tpu.memory_space<vmem>>, %arg4: memref<120x1xf32, #tpu.memory_space<vmem>>, %arg5: memref<84x120xf32, #tpu.memory_space<vmem>>, %arg6: memref<84x1xf32, #tpu.memory_space<vmem>>, %arg7: memref<84x1xf32, #tpu.memory_space<vmem>>, %arg8: memref<84x1xf32, #tpu.memory_space<vmem>>, %arg9: memref<84x16xf32, #tpu.memory_space<vmem>>) attributes {dimension_semantics = [], scalar_prefetch = 0 : i64, scratch_operands = 0 : i64, tpu.core_type = #tpu.core_type<tc>} {
    %c0 = arith.constant 0 : index
    %c0_0 = arith.constant 0 : index
    %0 = vector.load %arg0[%c0, %c0_0] : memref<1024x16xf32, #tpu.memory_space<vmem>>, vector<1024x16xf32>
    %c0_1 = arith.constant 0 : index
    %c0_2 = arith.constant 0 : index
    %1 = vector.load %arg1[%c0_1, %c0_2] : memref<120x1024xf32, #tpu.memory_space<vmem>>, vector<120x1024xf32>
    %cst = arith.constant dense<0.000000e+00> : vector<120x16xf32>
    %2 = tpu.matmul %1, %0, %cst {dimension_numbers = #tpu.dot_dimension_numbers<[1], [0], [0], [1], [0, 0, 1, 1], [], []>} : vector<120x1024xf32>, vector<1024x16xf32>, vector<120x16xf32> -> vector<120x16xf32>
    %c0_3 = arith.constant 0 : index
    %c0_4 = arith.constant 0 : index
    %3 = vector.load %arg2[%c0_3, %c0_4] : memref<120x1xf32, #tpu.memory_space<vmem>>, vector<120x1xf32>
    %4 = vector.broadcast %3 : vector<120x1xf32> to vector<120x16xf32>
    %5 = arith.addf %2, %4 : vector<120x16xf32>
    %cst_5 = arith.constant dense<0.000000e+00> : vector<120xf32>
    %6 = vector.multi_reduction <add>, %5, %cst_5 [1] : vector<120x16xf32> to vector<120xf32>
    %7 = vector.shape_cast %6 : vector<120xf32> to vector<120x1xf32>
    %cst_6 = arith.constant 6.250000e-02 : f32
    %8 = vector.broadcast %cst_6 : f32 to vector<120x1xf32>
    %9 = arith.mulf %7, %8 : vector<120x1xf32>
    %10 = arith.mulf %5, %5 : vector<120x16xf32>
    %cst_7 = arith.constant dense<0.000000e+00> : vector<120xf32>
    %11 = vector.multi_reduction <add>, %10, %cst_7 [1] : vector<120x16xf32> to vector<120xf32>
    %12 = vector.shape_cast %11 : vector<120xf32> to vector<120x1xf32>
    %cst_8 = arith.constant 6.250000e-02 : f32
    %13 = vector.broadcast %cst_8 : f32 to vector<120x1xf32>
    %14 = arith.mulf %12, %13 : vector<120x1xf32>
    %15 = arith.mulf %9, %9 : vector<120x1xf32>
    %16 = arith.subf %14, %15 : vector<120x1xf32>
    %17 = vector.broadcast %9 : vector<120x1xf32> to vector<120x16xf32>
    %18 = arith.subf %5, %17 : vector<120x16xf32>
    %cst_9 = arith.constant 9.99999974E-6 : f32
    %19 = vector.broadcast %cst_9 : f32 to vector<120x1xf32>
    %20 = arith.addf %16, %19 : vector<120x1xf32>
    %21 = math.rsqrt %20 : vector<120x1xf32>
    %22 = vector.broadcast %21 : vector<120x1xf32> to vector<120x16xf32>
    %23 = arith.mulf %18, %22 : vector<120x16xf32>
    %c0_10 = arith.constant 0 : index
    %c0_11 = arith.constant 0 : index
    %24 = vector.load %arg3[%c0_10, %c0_11] : memref<120x1xf32, #tpu.memory_space<vmem>>, vector<120x1xf32>
    %25 = vector.broadcast %24 : vector<120x1xf32> to vector<120x16xf32>
    %26 = arith.mulf %23, %25 : vector<120x16xf32>
    %c0_12 = arith.constant 0 : index
    %c0_13 = arith.constant 0 : index
    %27 = vector.load %arg4[%c0_12, %c0_13] : memref<120x1xf32, #tpu.memory_space<vmem>>, vector<120x1xf32>
    %28 = vector.broadcast %27 : vector<120x1xf32> to vector<120x16xf32>
    %29 = arith.addf %26, %28 : vector<120x16xf32>
    %cst_14 = arith.constant 0.000000e+00 : f32
    %30 = vector.broadcast %cst_14 : f32 to vector<120x16xf32>
    %31 = arith.maximumf %29, %30 : vector<120x16xf32>
    %c0_15 = arith.constant 0 : index
    %c0_16 = arith.constant 0 : index
    %32 = vector.load %arg5[%c0_15, %c0_16] : memref<84x120xf32, #tpu.memory_space<vmem>>, vector<84x120xf32>
    %cst_17 = arith.constant dense<0.000000e+00> : vector<84x16xf32>
    %33 = tpu.matmul %32, %31, %cst_17 {dimension_numbers = #tpu.dot_dimension_numbers<[1], [0], [0], [1], [0, 0, 1, 1], [], []>} : vector<84x120xf32>, vector<120x16xf32>, vector<84x16xf32> -> vector<84x16xf32>
    %c0_18 = arith.constant 0 : index
    %c0_19 = arith.constant 0 : index
    %34 = vector.load %arg6[%c0_18, %c0_19] : memref<84x1xf32, #tpu.memory_space<vmem>>, vector<84x1xf32>
    %35 = vector.broadcast %34 : vector<84x1xf32> to vector<84x16xf32>
    %36 = arith.addf %33, %35 : vector<84x16xf32>
    %cst_20 = arith.constant dense<0.000000e+00> : vector<84xf32>
    %37 = vector.multi_reduction <add>, %36, %cst_20 [1] : vector<84x16xf32> to vector<84xf32>
    %38 = vector.shape_cast %37 : vector<84xf32> to vector<84x1xf32>
    %cst_21 = arith.constant 6.250000e-02 : f32
    %39 = vector.broadcast %cst_21 : f32 to vector<84x1xf32>
    %40 = arith.mulf %38, %39 : vector<84x1xf32>
    %41 = arith.mulf %36, %36 : vector<84x16xf32>
    %cst_22 = arith.constant dense<0.000000e+00> : vector<84xf32>
    %42 = vector.multi_reduction <add>, %41, %cst_22 [1] : vector<84x16xf32> to vector<84xf32>
    %43 = vector.shape_cast %42 : vector<84xf32> to vector<84x1xf32>
    %cst_23 = arith.constant 6.250000e-02 : f32
    %44 = vector.broadcast %cst_23 : f32 to vector<84x1xf32>
    %45 = arith.mulf %43, %44 : vector<84x1xf32>
    %46 = arith.mulf %40, %40 : vector<84x1xf32>
    %47 = arith.subf %45, %46 : vector<84x1xf32>
    %48 = vector.broadcast %40 : vector<84x1xf32> to vector<84x16xf32>
    %49 = arith.subf %36, %48 : vector<84x16xf32>
    %cst_24 = arith.constant 9.99999974E-6 : f32
    %50 = vector.broadcast %cst_24 : f32 to vector<84x1xf32>
    %51 = arith.addf %47, %50 : vector<84x1xf32>
    %52 = math.rsqrt %51 : vector<84x1xf32>
    %53 = vector.broadcast %52 : vector<84x1xf32> to vector<84x16xf32>
    %54 = arith.mulf %49, %53 : vector<84x16xf32>
    %c0_25 = arith.constant 0 : index
    %c0_26 = arith.constant 0 : index
    %55 = vector.load %arg7[%c0_25, %c0_26] : memref<84x1xf32, #tpu.memory_space<vmem>>, vector<84x1xf32>
    %56 = vector.broadcast %55 : vector<84x1xf32> to vector<84x16xf32>
    %57 = arith.mulf %54, %56 : vector<84x16xf32>
    %c0_27 = arith.constant 0 : index
    %c0_28 = arith.constant 0 : index
    %58 = vector.load %arg8[%c0_27, %c0_28] : memref<84x1xf32, #tpu.memory_space<vmem>>, vector<84x1xf32>
    %59 = vector.broadcast %58 : vector<84x1xf32> to vector<84x16xf32>
    %60 = arith.addf %57, %59 : vector<84x16xf32>
    %cst_29 = arith.constant dense<0xFF800000> : vector<16xf32>
    %61 = vector.multi_reduction <maximumf>, %60, %cst_29 [0] : vector<84x16xf32> to vector<16xf32>
    %62 = vector.shape_cast %61 : vector<16xf32> to vector<1x16xf32>
    %63 = vector.broadcast %62 : vector<1x16xf32> to vector<84x16xf32>
    %64 = arith.subf %60, %63 : vector<84x16xf32>
    %65 = math.exp %64 : vector<84x16xf32>
    %cst_30 = arith.constant dense<0.000000e+00> : vector<16xf32>
    %66 = vector.multi_reduction <add>, %65, %cst_30 [0] : vector<84x16xf32> to vector<16xf32>
    %67 = vector.shape_cast %66 : vector<16xf32> to vector<1x16xf32>
    %68 = math.log %67 : vector<1x16xf32>
    %69 = vector.broadcast %68 : vector<1x16xf32> to vector<84x16xf32>
    %70 = arith.subf %64, %69 : vector<84x16xf32>
    %c0_31 = arith.constant 0 : index
    %c0_32 = arith.constant 0 : index
    %71 = vector.load %arg9[%c0_31, %c0_32] : memref<84x16xf32, #tpu.memory_space<vmem>>, vector<84x16xf32>
    tpu.vector_store %arg9[%c0_31, %c0_32], %70 {strides = array<i32>} : memref<84x16xf32, #tpu.memory_space<vmem>>, vector<84x16xf32>,
    return
  }
}

</mosaic_0001>

<bundles_post_ra>
// kernel: lenet5_bn_forward.3
= control target key start
LH: loop header
LB: loop body
LE: loop exit
PB: predicated region body
PF: predicated region fallthrough
CT: control target
= control target key end

     0   :  { %s4294_s12 = smov 0   ;;  %s4296_s13 = smov 0   ;;  %s5427_s0 = inlined_call_operand.vmem [shape: f32[6,25], index: 0, kind: input, shape index: {}]   ;;  %s5428_s1 = inlined_call_operand.vmem [shape: f32[4,25,4096], index: 1, kind: input, shape index: {}]   ;;  %s5429_s2 = inlined_call_operand.vmem [shape: f32[6,1], index: 2, kind: input, shape index: {}]   ;;  %s5430_s3 = inlined_call_operand.vmem [shape: f32[6,4096], index: 3, kind: output, shape index: {}]  }
   0x1   :  { %s4298_s14 = smov 0  }
   0x2 LB: > { %s3596_s15 = sadd.s32 4294967295, %s4269_s14   ;;  %s4311_s16 = sadd.s32 1, %s4269_s14   ;;  %s4269_s14 = sphi %s4298_s14, %s5435_s14   ;;  %s4265_s13 = sphi %s4296_s13, %s5434_s13   ;;  %s4261_s12 = sphi %s4294_s12, %s5433_s12  }
   0x3   : > { %s38_s17 = ssub.s32 %s4269_s14, %s4311_s16  ;;  %s41_s18 = sadd.s32 1, %s4265_s13 }
   0x4   : > { %p39_p0 = scmp.eq.s32.totalorder %s38_s17, 0  ;;  %p48_p1 = scmp.ne.s32.totalorder %s4265_s13, %s4261_s12 }
   0x5   : > { %p49_p2 = scmp.eq.s32.totalorder %s4269_s14, 0  ;;  %p3599_p4 = scmp.ge.s32.totalorder %s4269_s14, 2 }
   0x6   : > { %s4320_s19 = scalar_select %p39_p0, %s4265_s13, %s41_s18  }
   0x7   : > { %p50_p3 = por %p49_p2, %p48_p1  ;;  %127 = sbr.rel (%p3599_p4) target bundleno = 146 (0x92), region = 24 }
   0xe   : > { %130 = sbr.rel (!%p50_p3) target bundleno = 146 (0x92), region = 28  ;;  %s132_s20 = sand.u32 (%p50_p3), 1, %s4265_s13  }
   0xf   : > { %s3897_s21 = sshll.u32 (%p50_p3), %s4269_s14, 7  ;;  %s3600_s22 = sshll.u32 (%p50_p3), %s132_s20, 11 }
  0x10   : > { %s4328_s25 = scalar_lea.vmem (%p50_p3), %s5428_s1, %s3897_s21  ;;  %s4333_s26 = scalar_lea.vmem (%p50_p3), [#allocation2], %s3600_s22 }
  0x11   : > { %v150_v0 = vld [vmem:[%s4328_s25] sm:$0xff] (%p50_p3)  ;;  %v152_v1 = vld [vmem:[%s4328_s25 + $0x8] sm:$0xff] (%p50_p3)  ;;  %v154_v2 = vld [vmem:[%s4328_s25 + $0x10] sm:$0xff] (%p50_p3) }
  0x12   : > { %151 = vst [vmem:[%s4333_s26] sm:$0xff] (%p50_p3), %v150_v0  ;;  %153 = vst [vmem:[%s4333_s26 + $0x8] sm:$0xff] (%p50_p3), %v152_v1  ;;  %v156_v3 = vld [vmem:[%s4328_s25 + $0x18] sm:$0xff] (%p50_p3)  ;;  %v158_v4 = vld [vmem:[%s4328_s25 + $0x20] sm:$0xff] (%p50_p3) }
  0x13   : > { %155 = vst [vmem:[%s4333_s26 + $0x10] sm:$0xff] (%p50_p3), %v154_v2  ;;  %v160_v5 = vld [vmem:[%s4328_s25 + $0x28] sm:$0xff] (%p50_p3)  ;;  %157 = vst [vmem:[%s4333_s26 + $0x18] sm:$0xff] (%p50_p3), %v156_v3  ;;  %v162_v6 = vld [vmem:[%s4328_s25 + $0x30] sm:$0xff] (%p50_p3) }
  0x14   : > { %159 = vst [vmem:[%s4333_s26 + $0x20] sm:$0xff] (%p50_p3), %v158_v4  ;;  %161 = vst [vmem:[%s4333_s26 + $0x28] sm:$0xff] (%p50_p3), %v160_v5  ;;  %v164_v7 = vld [vmem:[%s4328_s25 + $0x38] sm:$0xff] (%p50_p3)  ;;  %v166_v8 = vld [vmem:[%s4328_s25 + $0x40] sm:$0xff] (%p50_p3) }
  0x15   : > { %163 = vst [vmem:[%s4333_s26 + $0x30] sm:$0xff] %v162_v6  ;;  %165 = vst [vmem:[%s4333_s26 + $0x38] sm:$0xff] %v164_v7  ;;  %v168_v9 = vld [vmem:[%s4328_s25 + $0x48] sm:$0xff]  ;;  %v170_v10 = vld [vmem:[%s4328_s25 + $0x50] sm:$0xff] }
  0x16   : > { %167 = vst [vmem:[%s4333_s26 + $0x40] sm:$0xff] %v166_v8  ;;  %v172_v11 = vld [vmem:[%s4328_s25 + $0x58] sm:$0xff]  ;;  %169 = vst [vmem:[%s4333_s26 + $0x48] sm:$0xff] %v168_v9  ;;  %v174_v12 = vld [vmem:[%s4328_s25 + $0x60] sm:$0xff] }
  0x17   : > { %171 = vst [vmem:[%s4333_s26 + $0x50] sm:$0xff] %v170_v10  ;;  %173 = vst [vmem:[%s4333_s26 + $0x58] sm:$0xff] %v172_v11  ;;  %v176_v13 = vld [vmem:[%s4328_s25 + $0x68] sm:$0xff]  ;;  %v178_v14 = vld [vmem:[%s4328_s25 + $0x70] sm:$0xff] }
  0x18   : > { %175 = vst [vmem:[%s4333_s26 + $0x60] sm:$0xff] %v174_v12  ;;  %177 = vst [vmem:[%s4333_s26 + $0x68] sm:$0xff] %v176_v13  ;;  %v180_v15 = vld [vmem:[%s4328_s25 + $0x78] sm:$0xff]  ;;  %v182_v16 = vld [vmem:[%s4328_s25 + $0x100] sm:$0xff] }
  0x19   : > { %179 = vst [vmem:[%s4333_s26 + $0x70] sm:$0xff] %v178_v14  ;;  %v184_v17 = vld [vmem:[%s4328_s25 + $0x108] sm:$0xff]  ;;  %181 = vst [vmem:[%s4333_s26 + $0x78] sm:$0xff] %v180_v15  ;;  %v186_v18 = vld [vmem:[%s4328_s25 + $0x110] sm:$0xff] }
  0x1a   : > { %183 = vst [vmem:[%s4333_s26 + $0x80] sm:$0xff] %v182_v16  ;;  %185 = vst [vmem:[%s4333_s26 + $0x88] sm:$0xff] %v184_v17  ;;  %v188_v19 = vld [vmem:[%s4328_s25 + $0x118] sm:$0xff]  ;;  %v190_v20 = vld [vmem:[%s4328_s25 + $0x120] sm:$0xff] }
  0x1b   : > { %187 = vst [vmem:[%s4333_s26 + $0x90] sm:$0xff] %v186_v18  ;;  %189 = vst [vmem:[%s4333_s26 + $0x98] sm:$0xff] %v188_v19  ;;  %v192_v21 = vld [vmem:[%s4328_s25 + $0x128] sm:$0xff]  ;;  %v194_v22 = vld [vmem:[%s4328_s25 + $0x130] sm:$0xff] }
  0x1c   : > { %191 = vst [vmem:[%s4333_s26 + $0xa0] sm:$0xff] %v190_v20  ;;  %v196_v23 = vld [vmem:[%s4328_s25 + $0x138] sm:$0xff]  ;;  %193 = vst [vmem:[%s4333_s26 + $0xa8] sm:$0xff] %v192_v21  ;;  %v198_v24 = vld [vmem:[%s4328_s25 + $0x140] sm:$0xff] }
  0x1d   : > { %195 = vst [vmem:[%s4333_s26 + $0xb0] sm:$0xff] %v194_v22  ;;  %197 = vst [vmem:[%s4333_s26 + $0xb8] sm:$0xff] %v196_v23  ;;  %v200_v25 = vld [vmem:[%s4328_s25 + $0x148] sm:$0xff]  ;;  %v202_v26 = vld [vmem:[%s4328_s25 + $0x150] sm:$0xff] }
  0x1e   : > { %199 = vst [vmem:[%s4333_s26 + $0xc0] sm:$0xff] %v198_v24  ;;  %201 = vst [vmem:[%s4333_s26 + $0xc8] sm:$0xff] %v200_v25  ;;  %v204_v27 = vld [vmem:[%s4328_s25 + $0x158] sm:$0xff]  ;;  %v206_v28 = vld [vmem:[%s4328_s25 + $0x160] sm:$0xff] }
  0x1f   : > { %203 = vst [vmem:[%s4333_s26 + $0xd0] sm:$0xff] %v202_v26  ;;  %v208_v29 = vld [vmem:[%s4328_s25 + $0x168] sm:$0xff]  ;;  %205 = vst [vmem:[%s4333_s26 + $0xd8] sm:$0xff] %v204_v27  ;;  %v210_v30 = vld [vmem:[%s4328_s25 + $0x170] sm:$0xff] }
  0x20   : > { %207 = vst [vmem:[%s4333_s26 + $0xe0] sm:$0xff] %v206_v28  ;;  %209 = vst [vmem:[%s4333_s26 + $0xe8] sm:$0xff] %v208_v29  ;;  %v212_v31 = vld [vmem:[%s4328_s25 + $0x178] sm:$0xff]  ;;  %v214_v32 = vld [vmem:[%s4328_s25 + $0x200] sm:$0xff] }
  0x21   : > { %211 = vst [vmem:[%s4333_s26 + $0xf0] sm:$0xff] %v210_v30  ;;  %213 = vst [vmem:[%s4333_s26 + $0xf8] sm:$0xff] %v212_v31  ;;  %v216_v33 = vld [vmem:[%s4328_s25 + $0x208] sm:$0xff]  ;;  %v218_v34 = vld [vmem:[%s4328_s25 + $0x210] sm:$0xff] }
  0x22   : > { %215 = vst [vmem:[%s4333_s26 + $0x100] sm:$0xff] %v214_v32  ;;  %v220_v35 = vld [vmem:[%s4328_s25 + $0x218] sm:$0xff]  ;;  %217 = vst [vmem:[%s4333_s26 + $0x108] sm:$0xff] %v216_v33  ;;  %v222_v36 = vld [vmem:[%s4328_s25 + $0x220] sm:$0xff] }
  0x23   : > { %219 = vst [vmem:[%s4333_s26 + $0x110] sm:$0xff] %v218_v34  ;;  %221 = vst [vmem:[%s4333_s26 + $0x118] sm:$0xff] %v220_v35  ;;  %v224_v37 = vld [vmem:[%s4328_s25 + $0x228] sm:$0xff]  ;;  %v226_v38 = vld [vmem:[%s4328_s25 + $0x230] sm:$0xff] }
  0x24   : > { %223 = vst [vmem:[%s4333_s26 + $0x120] sm:$0xff] %v222_v36  ;;  %225 = vst [vmem:[%s4333_s26 + $0x128] sm:$0xff] %v224_v37  ;;  %v228_v39 = vld [vmem:[%s4328_s25 + $0x238] sm:$0xff]  ;;  %v230_v40 = vld [vmem:[%s4328_s25 + $0x240] sm:$0xff] }
  0x25   : > { %227 = vst [vmem:[%s4333_s26 + $0x130] sm:$0xff] %v226_v38  ;;  %v232_v41 = vld [vmem:[%s4328_s25 + $0x248] sm:$0xff]  ;;  %229 = vst [vmem:[%s4333_s26 + $0x138] sm:$0xff] %v228_v39  ;;  %v234_v42 = vld [vmem:[%s4328_s25 + $0x250] sm:$0xff] }
  0x26   : > { %231 = vst [vmem:[%s4333_s26 + $0x140] sm:$0xff] %v230_v40  ;;  %233 = vst [vmem:[%s4333_s26 + $0x148] sm:$0xff] %v232_v41  ;;  %v236_v43 = vld [vmem:[%s4328_s25 + $0x258] sm:$0xff]  ;;  %v238_v44 = vld [vmem:[%s4328_s25 + $0x260] sm:$0xff] }
  0x27   : > { %235 = vst [vmem:[%s4333_s26 + $0x150] sm:$0xff] %v234_v42  ;;  %237 = vst [vmem:[%s4333_s26 + $0x158] sm:$0xff] %v236_v43  ;;  %v240_v45 = vld [vmem:[%s4328_s25 + $0x268] sm:$0xff]  ;;  %v242_v46 = vld [vmem:[%s4328_s25 + $0x270] sm:$0xff] }
  0x28   : > { %239 = vst [vmem:[%s4333_s26 + $0x160] sm:$0xff] %v238_v44  ;;  %v244_v47 = vld [vmem:[%s4328_s25 + $0x278] sm:$0xff]  ;;  %241 = vst [vmem:[%s4333_s26 + $0x168] sm:$0xff] %v240_v45  ;;  %v246_v48 = vld [vmem:[%s4328_s25 + $0x300] sm:$0xff] }
  0x29   : > { %243 = vst [vmem:[%s4333_s26 + $0x170] sm:$0xff] %v242_v46  ;;  %245 = vst [vmem:[%s4333_s26 + $0x178] sm:$0xff] %v244_v47  ;;  %v248_v49 = vld [vmem:[%s4328_s25 + $0x308] sm:$0xff]  ;;  %v250_v50 = vld [vmem:[%s4328_s25 + $0x310] sm:$0xff] }
  0x2a   : > { %247 = vst [vmem:[%s4333_s26 + $0x180] sm:$0xff] %v246_v48  ;;  %249 = vst [vmem:[%s4333_s26 + $0x188] sm:$0xff] %v248_v49  ;;  %v252_v51 = vld [vmem:[%s4328_s25 + $0x318] sm:$0xff]  ;;  %v254_v52 = vld [vmem:[%s4328_s25 + $0x320] sm:$0xff] }
  0x2b   : > { %251 = vst [vmem:[%s4333_s26 + $0x190] sm:$0xff] %v250_v50  ;;  %v256_v53 = vld [vmem:[%s4328_s25 + $0x328] sm:$0xff]  ;;  %253 = vst [vmem:[%s4333_s26 + $0x198] sm:$0xff] %v252_v51  ;;  %v258_v54 = vld [vmem:[%s4328_s25 + $0x330] sm:$0xff] }
  0x2c   : > { %255 = vst [vmem:[%s4333_s26 + $0x1a0] sm:$0xff] %v254_v52  ;;  %257 = vst [vmem:[%s4333_s26 + $0x1a8] sm:$0xff] %v256_v53  ;;  %v260_v55 = vld [vmem:[%s4328_s25 + $0x338] sm:$0xff]  ;;  %v262_v56 = vld [vmem:[%s4328_s25 + $0x340] sm:$0xff] }
  0x2d   : > { %259 = vst [vmem:[%s4333_s26 + $0x1b0] sm:$0xff] %v258_v54  ;;  %261 = vst [vmem:[%s4333_s26 + $0x1b8] sm:$0xff] %v260_v55  ;;  %v264_v57 = vld [vmem:[%s4328_s25 + $0x348] sm:$0xff]  ;;  %v266_v58 = vld [vmem:[%s4328_s25 + $0x350] sm:$0xff] }
  0x2e   : > { %263 = vst [vmem:[%s4333_s26 + $0x1c0] sm:$0xff] %v262_v56  ;;  %v268_v59 = vld [vmem:[%s4328_s25 + $0x358] sm:$0xff]  ;;  %265 = vst [vmem:[%s4333_s26 + $0x1c8] sm:$0xff] %v264_v57  ;;  %v270_v60 = vld [vmem:[%s4328_s25 + $0x360] sm:$0xff] }
  0x2f   : > { %267 = vst [vmem:[%s4333_s26 + $0x1d0] sm:$0xff] %v266_v58  ;;  %269 = vst [vmem:[%s4333_s26 + $0x1d8] sm:$0xff] %v268_v59  ;;  %v272_v61 = vld [vmem:[%s4328_s25 + $0x368] sm:$0xff]  ;;  %v274_v62 = vld [vmem:[%s4328_s25 + $0x370] sm:$0xff] }
  0x30   : > { %271 = vst [vmem:[%s4333_s26 + $0x1e0] sm:$0xff] %v270_v60  ;;  %273 = vst [vmem:[%s4333_s26 + $0x1e8] sm:$0xff] %v272_v61  ;;  %v276_v63 = vld [vmem:[%s4328_s25 + $0x378] sm:$0xff]  ;;  %v278_v0 = vld [vmem:[%s4328_s25 + $0x400] sm:$0xff] }
  0x31   : > { %275 = vst [vmem:[%s4333_s26 + $0x1f0] sm:$0xff] %v274_v62  ;;  %v280_v1 = vld [vmem:[%s4328_s25 + $0x408] sm:$0xff]  ;;  %277 = vst [vmem:[%s4333_s26 + $0x1f8] sm:$0xff] %v276_v63  ;;  %v282_v2 = vld [vmem:[%s4328_s25 + $0x410] sm:$0xff] }
  0x32   : > { %279 = vst [vmem:[%s4333_s26 + $0x200] sm:$0xff] %v278_v0  ;;  %281 = vst [vmem:[%s4333_s26 + $0x208] sm:$0xff] %v280_v1  ;;  %v284_v3 = vld [vmem:[%s4328_s25 + $0x418] sm:$0xff]  ;;  %v286_v4 = vld [vmem:[%s4328_s25 + $0x420] sm:$0xff] }
  0x33   : > { %283 = vst [vmem:[%s4333_s26 + $0x210] sm:$0xff] %v282_v2  ;;  %285 = vst [vmem:[%s4333_s26 + $0x218] sm:$0xff] %v284_v3  ;;  %v288_v5 = vld [vmem:[%s4328_s25 + $0x428] sm:$0xff]  ;;  %v290_v6 = vld [vmem:[%s4328_s25 + $0x430] sm:$0xff] }
  0x34   : > { %287 = vst [vmem:[%s4333_s26 + $0x220] sm:$0xff] %v286_v4  ;;  %v292_v7 = vld [vmem:[%s4328_s25 + $0x438] sm:$0xff]  ;;  %289 = vst [vmem:[%s4333_s26 + $0x228] sm:$0xff] %v288_v5  ;;  %v294_v8 = vld [vmem:[%s4328_s25 + $0x440] sm:$0xff] }
  0x35   : > { %291 = vst [vmem:[%s4333_s26 + $0x230] sm:$0xff] %v290_v6  ;;  %293 = vst [vmem:[%s4333_s26 + $0x238] sm:$0xff] %v292_v7  ;;  %v296_v9 = vld [vmem:[%s4328_s25 + $0x448] sm:$0xff]  ;;  %v298_v10 = vld [vmem:[%s4328_s25 + $0x450] sm:$0xff] }
  0x36   : > { %295 = vst [vmem:[%s4333_s26 + $0x240] sm:$0xff] %v294_v8  ;;  %297 = vst [vmem:[%s4333_s26 + $0x248] sm:$0xff] %v296_v9  ;;  %v300_v11 = vld [vmem:[%s4328_s25 + $0x458] sm:$0xff]  ;;  %v302_v12 = vld [vmem:[%s4328_s25 + $0x460] sm:$0xff] }
  0x37   : > { %299 = vst [vmem:[%s4333_s26 + $0x250] sm:$0xff] %v298_v10  ;;  %v304_v13 = vld [vmem:[%s4328_s25 + $0x468] sm:$0xff]  ;;  %301 = vst [vmem:[%s4333_s26 + $0x258] sm:$0xff] %v300_v11  ;;  %v306_v14 = vld [vmem:[%s4328_s25 + $0x470] sm:$0xff] }
  0x38   : > { %303 = vst [vmem:[%s4333_s26 + $0x260] sm:$0xff] %v302_v12  ;;  %305 = vst [vmem:[%s4333_s26 + $0x268] sm:$0xff] %v304_v13  ;;  %v308_v15 = vld [vmem:[%s4328_s25 + $0x478] sm:$0xff]  ;;  %v310_v16 = vld [vmem:[%s4328_s25 + $0x500] sm:$0xff] }
  0x39   : > { %307 = vst [vmem:[%s4333_s26 + $0x270] sm:$0xff] %v306_v14  ;;  %309 = vst [vmem:[%s4333_s26 + $0x278] sm:$0xff] %v308_v15  ;;  %v312_v17 = vld [vmem:[%s4328_s25 + $0x508] sm:$0xff]  ;;  %v314_v18 = vld [vmem:[%s4328_s25 + $0x510] sm:$0xff] }
  0x3a   : > { %311 = vst [vmem:[%s4333_s26 + $0x280] sm:$0xff] %v310_v16  ;;  %v316_v19 = vld [vmem:[%s4328_s25 + $0x518] sm:$0xff]  ;;  %313 = vst [vmem:[%s4333_s26 + $0x288] sm:$0xff] %v312_v17  ;;  %v318_v20 = vld [vmem:[%s4328_s25 + $0x520] sm:$0xff] }
  0x3b   : > { %315 = vst [vmem:[%s4333_s26 + $0x290] sm:$0xff] %v314_v18  ;;  %317 = vst [vmem:[%s4333_s26 + $0x298] sm:$0xff] %v316_v19  ;;  %v320_v21 = vld [vmem:[%s4328_s25 + $0x528] sm:$0xff]  ;;  %v322_v22 = vld [vmem:[%s4328_s25 + $0x530] sm:$0xff] }
  0x3c   : > { %319 = vst [vmem:[%s4333_s26 + $0x2a0] sm:$0xff] %v318_v20  ;;  %321 = vst [vmem:[%s4333_s26 + $0x2a8] sm:$0xff] %v320_v21  ;;  %v324_v23 = vld [vmem:[%s4328_s25 + $0x538] sm:$0xff]  ;;  %v326_v24 = vld [vmem:[%s4328_s25 + $0x540] sm:$0xff] }
  0x3d   : > { %323 = vst [vmem:[%s4333_s26 + $0x2b0] sm:$0xff] %v322_v22  ;;  %v328_v25 = vld [vmem:[%s4328_s25 + $0x548] sm:$0xff]  ;;  %325 = vst [vmem:[%s4333_s26 + $0x2b8] sm:$0xff] %v324_v23  ;;  %v330_v26 = vld [vmem:[%s4328_s25 + $0x550] sm:$0xff] }
  0x3e   : > { %327 = vst [vmem:[%s4333_s26 + $0x2c0] sm:$0xff] %v326_v24  ;;  %329 = vst [vmem:[%s4333_s26 + $0x2c8] sm:$0xff] %v328_v25  ;;  %v332_v27 = vld [vmem:[%s4328_s25 + $0x558] sm:$0xff]  ;;  %v334_v28 = vld [vmem:[%s4328_s25 + $0x560] sm:$0xff] }
  0x3f   : > { %331 = vst [vmem:[%s4333_s26 + $0x2d0] sm:$0xff] %v330_v26  ;;  %333 = vst [vmem:[%s4333_s26 + $0x2d8] sm:$0xff] %v332_v27  ;;  %v336_v29 = vld [vmem:[%s4328_s25 + $0x568] sm:$0xff]  ;;  %v338_v30 = vld [vmem:[%s4328_s25 + $0x570] sm:$0xff] }
  0x40   : > { %335 = vst [vmem:[%s4333_s26 + $0x2e0] sm:$0xff] %v334_v28  ;;  %v340_v31 = vld [vmem:[%s4328_s25 + $0x578] sm:$0xff]  ;;  %337 = vst [vmem:[%s4333_s26 + $0x2e8] sm:$0xff] %v336_v29  ;;  %v342_v32 = vld [vmem:[%s4328_s25 + $0x600] sm:$0xff] }
  0x41   : > { %339 = vst [vmem:[%s4333_s26 + $0x2f0] sm:$0xff] %v338_v30  ;;  %341 = vst [vmem:[%s4333_s26 + $0x2f8] sm:$0xff] %v340_v31  ;;  %v344_v33 = vld [vmem:[%s4328_s25 + $0x608] sm:$0xff]  ;;  %v346_v34 = vld [vmem:[%s4328_s25 + $0x610] sm:$0xff] }
  0x42   : > { %343 = vst [vmem:[%s4333_s26 + $0x300] sm:$0xff] %v342_v32  ;;  %345 = vst [vmem:[%s4333_s26 + $0x308] sm:$0xff] %v344_v33  ;;  %v348_v35 = vld [vmem:[%s4328_s25 + $0x618] sm:$0xff]  ;;  %v350_v36 = vld [vmem:[%s4328_s25 + $0x620] sm:$0xff] }
  0x43   : > { %347 = vst [vmem:[%s4333_s26 + $0x310] sm:$0xff] %v346_v34  ;;  %v352_v37 = vld [vmem:[%s4328_s25 + $0x628] sm:$0xff]  ;;  %349 = vst [vmem:[%s4333_s26 + $0x318] sm:$0xff] %v348_v35  ;;  %v354_v38 = vld [vmem:[%s4328_s25 + $0x630] sm:$0xff] }
  0x44   : > { %351 = vst [vmem:[%s4333_s26 + $0x320] sm:$0xff] %v350_v36  ;;  %353 = vst [vmem:[%s4333_s26 + $0x328] sm:$0xff] %v352_v37  ;;  %v356_v39 = vld [vmem:[%s4328_s25 + $0x638] sm:$0xff]  ;;  %v358_v40 = vld [vmem:[%s4328_s25 + $0x640] sm:$0xff] }
  0x45   : > { %355 = vst [vmem:[%s4333_s26 + $0x330] sm:$0xff] %v354_v38  ;;  %357 = vst [vmem:[%s4333_s26 + $0x338] sm:$0xff] %v356_v39  ;;  %v360_v41 = vld [vmem:[%s4328_s25 + $0x648] sm:$0xff]  ;;  %v362_v42 = vld [vmem:[%s4328_s25 + $0x650] sm:$0xff] }
  0x46   : > { %359 = vst [vmem:[%s4333_s26 + $0x340] sm:$0xff] %v358_v40  ;;  %v364_v43 = vld [vmem:[%s4328_s25 + $0x658] sm:$0xff]  ;;  %361 = vst [vmem:[%s4333_s26 + $0x348] sm:$0xff] %v360_v41  ;;  %v366_v44 = vld [vmem:[%s4328_s25 + $0x660] sm:$0xff] }
  0x47   : > { %363 = vst [vmem:[%s4333_s26 + $0x350] sm:$0xff] %v362_v42  ;;  %365 = vst [vmem:[%s4333_s26 + $0x358] sm:$0xff] %v364_v43  ;;  %v368_v45 = vld [vmem:[%s4328_s25 + $0x668] sm:$0xff]  ;;  %v370_v46 = vld [vmem:[%s4328_s25 + $0x670] sm:$0xff] }
  0x48   : > { %367 = vst [vmem:[%s4333_s26 + $0x360] sm:$0xff] %v366_v44  ;;  %369 = vst [vmem:[%s4333_s26 + $0x368] sm:$0xff] %v368_v45  ;;  %v372_v47 = vld [vmem:[%s4328_s25 + $0x678] sm:$0xff]  ;;  %v374_v48 = vld [vmem:[%s4328_s25 + $0x700] sm:$0xff] }
  0x49   : > { %371 = vst [vmem:[%s4333_s26 + $0x370] sm:$0xff] %v370_v46  ;;  %v376_v49 = vld [vmem:[%s4328_s25 + $0x708] sm:$0xff]  ;;  %373 = vst [vmem:[%s4333_s26 + $0x378] sm:$0xff] %v372_v47  ;;  %v378_v50 = vld [vmem:[%s4328_s25 + $0x710] sm:$0xff] }
  0x4a   : > { %375 = vst [vmem:[%s4333_s26 + $0x380] sm:$0xff] %v374_v48  ;;  %377 = vst [vmem:[%s4333_s26 + $0x388] sm:$0xff] %v376_v49  ;;  %v380_v51 = vld [vmem:[%s4328_s25 + $0x718] sm:$0xff]  ;;  %v382_v52 = vld [vmem:[%s4328_s25 + $0x720] sm:$0xff] }
  0x4b   : > { %379 = vst [vmem:[%s4333_s26 + $0x390] sm:$0xff] %v378_v50  ;;  %381 = vst [vmem:[%s4333_s26 + $0x398] sm:$0xff] %v380_v51  ;;  %v384_v53 = vld [vmem:[%s4328_s25 + $0x728] sm:$0xff]  ;;  %v386_v54 = vld [vmem:[%s4328_s25 + $0x730] sm:$0xff] }
  0x4c   : > { %383 = vst [vmem:[%s4333_s26 + $0x3a0] sm:$0xff] %v382_v52  ;;  %v388_v55 = vld [vmem:[%s4328_s25 + $0x738] sm:$0xff]  ;;  %385 = vst [vmem:[%s4333_s26 + $0x3a8] sm:$0xff] %v384_v53  ;;  %v390_v56 = vld [vmem:[%s4328_s25 + $0x740] sm:$0xff] }
  0x4d   : > { %387 = vst [vmem:[%s4333_s26 + $0x3b0] sm:$0xff] %v386_v54  ;;  %389 = vst [vmem:[%s4333_s26 + $0x3b8] sm:$0xff] %v388_v55  ;;  %v392_v57 = vld [vmem:[%s4328_s25 + $0x748] sm:$0xff]  ;;  %v394_v58 = vld [vmem:[%s4328_s25 + $0x750] sm:$0xff] }
  0x4e   : > { %391 = vst [vmem:[%s4333_s26 + $0x3c0] sm:$0xff] %v390_v56  ;;  %393 = vst [vmem:[%s4333_s26 + $0x3c8] sm:$0xff] %v392_v57  ;;  %v396_v59 = vld [vmem:[%s4328_s25 + $0x758] sm:$0xff]  ;;  %v398_v60 = vld [vmem:[%s4328_s25 + $0x760] sm:$0xff] }
  0x4f   : > { %395 = vst [vmem:[%s4333_s26 + $0x3d0] sm:$0xff] %v394_v58  ;;  %v400_v61 = vld [vmem:[%s4328_s25 + $0x768] sm:$0xff]  ;;  %397 = vst [vmem:[%s4333_s26 + $0x3d8] sm:$0xff] %v396_v59  ;;  %v402_v62 = vld [vmem:[%s4328_s25 + $0x770] sm:$0xff] }
  0x50   : > { %399 = vst [vmem:[%s4333_s26 + $0x3e0] sm:$0xff] %v398_v60  ;;  %401 = vst [vmem:[%s4333_s26 + $0x3e8] sm:$0xff] %v400_v61  ;;  %v404_v63 = vld [vmem:[%s4328_s25 + $0x778] sm:$0xff]  ;;  %v406_v0 = vld [vmem:[%s4328_s25 + $0x800] sm:$0xff] }
  0x51   : > { %403 = vst [vmem:[%s4333_s26 + $0x3f0] sm:$0xff] %v402_v62  ;;  %405 = vst [vmem:[%s4333_s26 + $0x3f8] sm:$0xff] %v404_v63  ;;  %v408_v1 = vld [vmem:[%s4328_s25 + $0x808] sm:$0xff]  ;;  %v410_v2 = vld [vmem:[%s4328_s25 + $0x810] sm:$0xff] }
  0x52   : > { %407 = vst [vmem:[%s4333_s26 + $0x400] sm:$0xff] %v406_v0  ;;  %v412_v3 = vld [vmem:[%s4328_s25 + $0x818] sm:$0xff]  ;;  %409 = vst [vmem:[%s4333_s26 + $0x408] sm:$0xff] %v408_v1  ;;  %v414_v4 = vld [vmem:[%s4328_s25 + $0x820] sm:$0xff] }
  0x53   : > { %411 = vst [vmem:[%s4333_s26 + $0x410] sm:$0xff] %v410_v2  ;;  %413 = vst [vmem:[%s4333_s26 + $0x418] sm:$0xff] %v412_v3  ;;  %v416_v5 = vld [vmem:[%s4328_s25 + $0x828] sm:$0xff]  ;;  %v418_v6 = vld [vmem:[%s4328_s25 + $0x830] sm:$0xff] }
  0x54   : > { %415 = vst [vmem:[%s4333_s26 + $0x420] sm:$0xff] %v414_v4  ;;  %417 = vst [vmem:[%s4333_s26 + $0x428] sm:$0xff] %v416_v5  ;;  %v420_v7 = vld [vmem:[%s4328_s25 + $0x838] sm:$0xff]  ;;  %v422_v8 = vld [vmem:[%s4328_s25 + $0x840] sm:$0xff] }
  0x55   : > { %419 = vst [vmem:[%s4333_s26 + $0x430] sm:$0xff] %v418_v6  ;;  %v424_v9 = vld [vmem:[%s4328_s25 + $0x848] sm:$0xff]  ;;  %421 = vst [vmem:[%s4333_s26 + $0x438] sm:$0xff] %v420_v7  ;;  %v426_v10 = vld [vmem:[%s4328_s25 + $0x850] sm:$0xff] }
  0x56   : > { %423 = vst [vmem:[%s4333_s26 + $0x440] sm:$0xff] %v422_v8  ;;  %425 = vst [vmem:[%s4333_s26 + $0x448] sm:$0xff] %v424_v9  ;;  %v428_v11 = vld [vmem:[%s4328_s25 + $0x858] sm:$0xff]  ;;  %v430_v12 = vld [vmem:[%s4328_s25 + $0x860] sm:$0xff] }
  0x57   : > { %427 = vst [vmem:[%s4333_s26 + $0x450] sm:$0xff] %v426_v10  ;;  %429 = vst [vmem:[%s4333_s26 + $0x458] sm:$0xff] %v428_v11  ;;  %v432_v13 = vld [vmem:[%s4328_s25 + $0x868] sm:$0xff]  ;;  %v434_v14 = vld [vmem:[%s4328_s25 + $0x870] sm:$0xff] }
  0x58   : > { %431 = vst [vmem:[%s4333_s26 + $0x460] sm:$0xff] %v430_v12  ;;  %v436_v15 = vld [vmem:[%s4328_s25 + $0x878] sm:$0xff]  ;;  %433 = vst [vmem:[%s4333_s26 + $0x468] sm:$0xff] %v432_v13  ;;  %v438_v16 = vld [vmem:[%s4328_s25 + $0x900] sm:$0xff] }
  0x59   : > { %435 = vst [vmem:[%s4333_s26 + $0x470] sm:$0xff] %v434_v14  ;;  %437 = vst [vmem:[%s4333_s26 + $0x478] sm:$0xff] %v436_v15  ;;  %v440_v17 = vld [vmem:[%s4328_s25 + $0x908] sm:$0xff]  ;;  %v442_v18 = vld [vmem:[%s4328_s25 + $0x910] sm:$0xff] }
  0x5a   : > { %439 = vst [vmem:[%s4333_s26 + $0x480] sm:$0xff] %v438_v16  ;;  %441 = vst [vmem:[%s4333_s26 + $0x488] sm:$0xff] %v440_v17  ;;  %v444_v19 = vld [vmem:[%s4328_s25 + $0x918] sm:$0xff]  ;;  %v446_v20 = vld [vmem:[%s4328_s25 + $0x920] sm:$0xff] }
  0x5b   : > { %443 = vst [vmem:[%s4333_s26 + $0x490] sm:$0xff] %v442_v18  ;;  %v448_v21 = vld [vmem:[%s4328_s25 + $0x928] sm:$0xff]  ;;  %445 = vst [vmem:[%s4333_s26 + $0x498] sm:$0xff] %v444_v19  ;;  %v450_v22 = vld [vmem:[%s4328_s25 + $0x930] sm:$0xff] }
  0x5c   : > { %447 = vst [vmem:[%s4333_s26 + $0x4a0] sm:$0xff] %v446_v20  ;;  %449 = vst [vmem:[%s4333_s26 + $0x4a8] sm:$0xff] %v448_v21  ;;  %v452_v23 = vld [vmem:[%s4328_s25 + $0x938] sm:$0xff]  ;;  %v454_v24 = vld [vmem:[%s4328_s25 + $0x940] sm:$0xff] }
  0x5d   : > { %451 = vst [vmem:[%s4333_s26 + $0x4b0] sm:$0xff] %v450_v22  ;;  %453 = vst [vmem:[%s4333_s26 + $0x4b8] sm:$0xff] %v452_v23  ;;  %v456_v25 = vld [vmem:[%s4328_s25 + $0x948] sm:$0xff]  ;;  %v458_v26 = vld [vmem:[%s4328_s25 + $0x950] sm:$0xff] }
  0x5e   : > { %455 = vst [vmem:[%s4333_s26 + $0x4c0] sm:$0xff] %v454_v24  ;;  %v460_v27 = vld [vmem:[%s4328_s25 + $0x958] sm:$0xff]  ;;  %457 = vst [vmem:[%s4333_s26 + $0x4c8] sm:$0xff] %v456_v25  ;;  %v462_v28 = vld [vmem:[%s4328_s25 + $0x960] sm:$0xff] }
  0x5f   : > { %459 = vst [vmem:[%s4333_s26 + $0x4d0] sm:$0xff] %v458_v26  ;;  %461 = vst [vmem:[%s4333_s26 + $0x4d8] sm:$0xff] %v460_v27  ;;  %v464_v29 = vld [vmem:[%s4328_s25 + $0x968] sm:$0xff]  ;;  %v466_v30 = vld [vmem:[%s4328_s25 + $0x970] sm:$0xff] }
  0x60   : > { %463 = vst [vmem:[%s4333_s26 + $0x4e0] sm:$0xff] %v462_v28  ;;  %465 = vst [vmem:[%s4333_s26 + $0x4e8] sm:$0xff] %v464_v29  ;;  %v468_v31 = vld [vmem:[%s4328_s25 + $0x978] sm:$0xff]  ;;  %v470_v32 = vld [vmem:[%s4328_s25 + $0xa00] sm:$0xff] }
  0x61   : > { %467 = vst [vmem:[%s4333_s26 + $0x4f0] sm:$0xff] %v466_v30  ;;  %v472_v33 = vld [vmem:[%s4328_s25 + $0xa08] sm:$0xff]  ;;  %469 = vst [vmem:[%s4333_s26 + $0x4f8] sm:$0xff] %v468_v31  ;;  %v474_v34 = vld [vmem:[%s4328_s25 + $0xa10] sm:$0xff] }
  0x62   : > { %471 = vst [vmem:[%s4333_s26 + $0x500] sm:$0xff] %v470_v32  ;;  %473 = vst [vmem:[%s4333_s26 + $0x508] sm:$0xff] %v472_v33  ;;  %v476_v35 = vld [vmem:[%s4328_s25 + $0xa18] sm:$0xff]  ;;  %v478_v36 = vld [vmem:[%s4328_s25 + $0xa20] sm:$0xff] }
  0x63   : > { %475 = vst [vmem:[%s4333_s26 + $0x510] sm:$0xff] %v474_v34  ;;  %477 = vst [vmem:[%s4333_s26 + $0x518] sm:$0xff] %v476_v35  ;;  %v480_v37 = vld [vmem:[%s4328_s25 + $0xa28] sm:$0xff]  ;;  %v482_v38 = vld [vmem:[%s4328_s25 + $0xa30] sm:$0xff] }
  0x64   : > { %479 = vst [vmem:[%s4333_s26 + $0x520] sm:$0xff] %v478_v36  ;;  %v484_v39 = vld [vmem:[%s4328_s25 + $0xa38] sm:$0xff]  ;;  %481 = vst [vmem:[%s4333_s26 + $0x528] sm:$0xff] %v480_v37  ;;  %v486_v40 = vld [vmem:[%s4328_s25 + $0xa40] sm:$0xff] }
  0x65   : > { %483 = vst [vmem:[%s4333_s26 + $0x530] sm:$0xff] %v482_v38  ;;  %485 = vst [vmem:[%s4333_s26 + $0x538] sm:$0xff] %v484_v39  ;;  %v488_v41 = vld [vmem:[%s4328_s25 + $0xa48] sm:$0xff]  ;;  %v490_v42 = vld [vmem:[%s4328_s25 + $0xa50] sm:$0xff] }
  0x66   : > { %487 = vst [vmem:[%s4333_s26 + $0x540] sm:$0xff] %v486_v40  ;;  %489 = vst [vmem:[%s4333_s26 + $0x548] sm:$0xff] %v488_v41  ;;  %v492_v43 = vld [vmem:[%s4328_s25 + $0xa58] sm:$0xff]  ;;  %v494_v44 = vld [vmem:[%s4328_s25 + $0xa60] sm:$0xff] }
  0x67   : > { %491 = vst [vmem:[%s4333_s26 + $0x550] sm:$0xff] %v490_v42  ;;  %v496_v45 = vld [vmem:[%s4328_s25 + $0xa68] sm:$0xff]  ;;  %493 = vst [vmem:[%s4333_s26 + $0x558] sm:$0xff] %v492_v43  ;;  %v498_v46 = vld [vmem:[%s4328_s25 + $0xa70] sm:$0xff] }
  0x68   : > { %495 = vst [vmem:[%s4333_s26 + $0x560] sm:$0xff] %v494_v44  ;;  %497 = vst [vmem:[%s4333_s26 + $0x568] sm:$0xff] %v496_v45  ;;  %v500_v47 = vld [vmem:[%s4328_s25 + $0xa78] sm:$0xff]  ;;  %v502_v48 = vld [vmem:[%s4328_s25 + $0xb00] sm:$0xff] }
  0x69   : > { %499 = vst [vmem:[%s4333_s26 + $0x570] sm:$0xff] %v498_v46  ;;  %501 = vst [vmem:[%s4333_s26 + $0x578] sm:$0xff] %v500_v47  ;;  %v504_v49 = vld [vmem:[%s4328_s25 + $0xb08] sm:$0xff]  ;;  %v506_v50 = vld [vmem:[%s4328_s25 + $0xb10] sm:$0xff] }
  0x6a   : > { %503 = vst [vmem:[%s4333_s26 + $0x580] sm:$0xff] %v502_v48  ;;  %v508_v51 = vld [vmem:[%s4328_s25 + $0xb18] sm:$0xff]  ;;  %505 = vst [vmem:[%s4333_s26 + $0x588] sm:$0xff] %v504_v49  ;;  %v510_v52 = vld [vmem:[%s4328_s25 + $0xb20] sm:$0xff] }
  0x6b   : > { %507 = vst [vmem:[%s4333_s26 + $0x590] sm:$0xff] %v506_v50  ;;  %509 = vst [vmem:[%s4333_s26 + $0x598] sm:$0xff] %v508_v51  ;;  %v512_v53 = vld [vmem:[%s4328_s25 + $0xb28] sm:$0xff]  ;;  %v514_v54 = vld [vmem:[%s4328_s25 + $0xb30] sm:$0xff] }
  0x6c   : > { %511 = vst [vmem:[%s4333_s26 + $0x5a0] sm:$0xff] %v510_v52  ;;  %513 = vst [vmem:[%s4333_s26 + $0x5a8] sm:$0xff] %v512_v53  ;;  %v516_v55 = vld [vmem:[%s4328_s25 + $0xb38] sm:$0xff]  ;;  %v518_v56 = vld [vmem:[%s4328_s25 + $0xb40] sm:$0xff] }
  0x6d   : > { %515 = vst [vmem:[%s4333_s26 + $0x5b0] sm:$0xff] %v514_v54  ;;  %v520_v57 = vld [vmem:[%s4328_s25 + $0xb48] sm:$0xff]  ;;  %517 = vst [vmem:[%s4333_s26 + $0x5b8] sm:$0xff] %v516_v55  ;;  %v522_v58 = vld [vmem:[%s4328_s25 + $0xb50] sm:$0xff] }
  0x6e   : > { %519 = vst [vmem:[%s4333_s26 + $0x5c0] sm:$0xff] %v518_v56  ;;  %521 = vst [vmem:[%s4333_s26 + $0x5c8] sm:$0xff] %v520_v57  ;;  %v524_v59 = vld [vmem:[%s4328_s25 + $0xb58] sm:$0xff]  ;;  %v526_v60 = vld [vmem:[%s4328_s25 + $0xb60] sm:$0xff] }
  0x6f   : > { %523 = vst [vmem:[%s4333_s26 + $0x5d0] sm:$0xff] %v522_v58  ;;  %525 = vst [vmem:[%s4333_s26 + $0x5d8] sm:$0xff] %v524_v59  ;;  %v528_v61 = vld [vmem:[%s4328_s25 + $0xb68] sm:$0xff]  ;;  %v530_v62 = vld [vmem:[%s4328_s25 + $0xb70] sm:$0xff] }
  0x70   : > { %527 = vst [vmem:[%s4333_s26 + $0x5e0] sm:$0xff] %v526_v60  ;;  %v532_v63 = vld [vmem:[%s4328_s25 + $0xb78] sm:$0xff]  ;;  %529 = vst [vmem:[%s4333_s26 + $0x5e8] sm:$0xff] %v528_v61  ;;  %v534_v0 = vld [vmem:[%s4328_s25 + $0xc00] sm:$0xff] }
  0x71   : > { %531 = vst [vmem:[%s4333_s26 + $0x5f0] sm:$0xff] %v530_v62  ;;  %533 = vst [vmem:[%s4333_s26 + $0x5f8] sm:$0xff] %v532_v63  ;;  %v536_v1 = vld [vmem:[%s4328_s25 + $0xc08] sm:$0xff]  ;;  %v538_v2 = vld [vmem:[%s4328_s25 + $0xc10] sm:$0xff] }
  0x72   : > { %535 = vst [vmem:[%s4333_s26 + $0x600] sm:$0xff] %v534_v0  ;;  %537 = vst [vmem:[%s4333_s26 + $0x608] sm:$0xff] %v536_v1  ;;  %v540_v3 = vld [vmem:[%s4328_s25 + $0xc18] sm:$0xff]  ;;  %v542_v4 = vld [vmem:[%s4328_s25 + $0xc20] sm:$0xff] }
  0x73   : > { %539 = vst [vmem:[%s4333_s26 + $0x610] sm:$0xff] %v538_v2  ;;  %v544_v5 = vld [vmem:[%s4328_s25 + $0xc28] sm:$0xff]  ;;  %541 = vst [vmem:[%s4333_s26 + $0x618] sm:$0xff] %v540_v3  ;;  %v546_v6 = vld [vmem:[%s4328_s25 + $0xc30] sm:$0xff] }
  0x74   : > { %543 = vst [vmem:[%s4333_s26 + $0x620] sm:$0xff] %v542_v4  ;;  %545 = vst [vmem:[%s4333_s26 + $0x628] sm:$0xff] %v544_v5  ;;  %v548_v7 = vld [vmem:[%s4328_s25 + $0xc38] sm:$0xff]  ;;  %v550_v8 = vld [vmem:[%s4328_s25 + $0xc40] sm:$0xff] }
  0x75   : > { %547 = vst [vmem:[%s4333_s26 + $0x630] sm:$0xff] %v546_v6  ;;  %549 = vst [vmem:[%s4333_s26 + $0x638] sm:$0xff] %v548_v7  ;;  %v552_v9 = vld [vmem:[%s4328_s25 + $0xc48] sm:$0xff]  ;;  %v554_v10 = vld [vmem:[%s4328_s25 + $0xc50] sm:$0xff] }
  0x76   : > { %551 = vst [vmem:[%s4333_s26 + $0x640] sm:$0xff] %v550_v8  ;;  %v556_v11 = vld [vmem:[%s4328_s25 + $0xc58] sm:$0xff]  ;;  %553 = vst [vmem:[%s4333_s26 + $0x648] sm:$0xff] %v552_v9  ;;  %v558_v12 = vld [vmem:[%s4328_s25 + $0xc60] sm:$0xff] }
  0x77   : > { %555 = vst [vmem:[%s4333_s26 + $0x650] sm:$0xff] %v554_v10  ;;  %557 = vst [vmem:[%s4333_s26 + $0x658] sm:$0xff] %v556_v11  ;;  %v560_v13 = vld [vmem:[%s4328_s25 + $0xc68] sm:$0xff]  ;;  %v562_v14 = vld [vmem:[%s4328_s25 + $0xc70] sm:$0xff] }
  0x78   : > { %559 = vst [vmem:[%s4333_s26 + $0x660] sm:$0xff] %v558_v12  ;;  %561 = vst [vmem:[%s4333_s26 + $0x668] sm:$0xff] %v560_v13  ;;  %v564_v15 = vld [vmem:[%s4328_s25 + $0xc78] sm:$0xff]  ;;  %v566_v16 = vld [vmem:[%s4328_s25 + $0xd00] sm:$0xff] }
  0x79   : > { %563 = vst [vmem:[%s4333_s26 + $0x670] sm:$0xff] %v562_v14  ;;  %v568_v17 = vld [vmem:[%s4328_s25 + $0xd08] sm:$0xff]  ;;  %565 = vst [vmem:[%s4333_s26 + $0x678] sm:$0xff] %v564_v15  ;;  %v570_v18 = vld [vmem:[%s4328_s25 + $0xd10] sm:$0xff] }
  0x7a   : > { %567 = vst [vmem:[%s4333_s26 + $0x680] sm:$0xff] %v566_v16  ;;  %569 = vst [vmem:[%s4333_s26 + $0x688] sm:$0xff] %v568_v17  ;;  %v572_v19 = vld [vmem:[%s4328_s25 + $0xd18] sm:$0xff]  ;;  %v574_v20 = vld [vmem:[%s4328_s25 + $0xd20] sm:$0xff] }
  0x7b   : > { %571 = vst [vmem:[%s4333_s26 + $0x690] sm:$0xff] %v570_v18  ;;  %573 = vst [vmem:[%s4333_s26 + $0x698] sm:$0xff] %v572_v19  ;;  %v576_v21 = vld [vmem:[%s4328_s25 + $0xd28] sm:$0xff]  ;;  %v578_v22 = vld [vmem:[%s4328_s25 + $0xd30] sm:$0xff] }
  0x7c   : > { %575 = vst [vmem:[%s4333_s26 + $0x6a0] sm:$0xff] %v574_v20  ;;  %v580_v23 = vld [vmem:[%s4328_s25 + $0xd38] sm:$0xff]  ;;  %577 = vst [vmem:[%s4333_s26 + $0x6a8] sm:$0xff] %v576_v21  ;;  %v582_v24 = vld [vmem:[%s4328_s25 + $0xd40] sm:$0xff] }
  0x7d   : > { %579 = vst [vmem:[%s4333_s26 + $0x6b0] sm:$0xff] %v578_v22  ;;  %581 = vst [vmem:[%s4333_s26 + $0x6b8] sm:$0xff] %v580_v23  ;;  %v584_v25 = vld [vmem:[%s4328_s25 + $0xd48] sm:$0xff]  ;;  %v586_v26 = vld [vmem:[%s4328_s25 + $0xd50] sm:$0xff] }
  0x7e   : > { %583 = vst [vmem:[%s4333_s26 + $0x6c0] sm:$0xff] %v582_v24  ;;  %585 = vst [vmem:[%s4333_s26 + $0x6c8] sm:$0xff] %v584_v25  ;;  %v588_v27 = vld [vmem:[%s4328_s25 + $0xd58] sm:$0xff]  ;;  %v590_v28 = vld [vmem:[%s4328_s25 + $0xd60] sm:$0xff] }
  0x7f   : > { %587 = vst [vmem:[%s4333_s26 + $0x6d0] sm:$0xff] %v586_v26  ;;  %v592_v29 = vld [vmem:[%s4328_s25 + $0xd68] sm:$0xff]  ;;  %589 = vst [vmem:[%s4333_s26 + $0x6d8] sm:$0xff] %v588_v27  ;;  %v594_v30 = vld [vmem:[%s4328_s25 + $0xd70] sm:$0xff] }
  0x80   : > { %591 = vst [vmem:[%s4333_s26 + $0x6e0] sm:$0xff] %v590_v28  ;;  %593 = vst [vmem:[%s4333_s26 + $0x6e8] sm:$0xff] %v592_v29  ;;  %v596_v31 = vld [vmem:[%s4328_s25 + $0xd78] sm:$0xff]  ;;  %v598_v32 = vld [vmem:[%s4328_s25 + $0xe00] sm:$0xff] }
  0x81   : > { %595 = vst [vmem:[%s4333_s26 + $0x6f0] sm:$0xff] %v594_v30  ;;  %597 = vst [vmem:[%s4333_s26 + $0x6f8] sm:$0xff] %v596_v31  ;;  %v600_v33 = vld [vmem:[%s4328_s25 + $0xe08] sm:$0xff]  ;;  %v602_v34 = vld [vmem:[%s4328_s25 + $0xe10] sm:$0xff] }
  0x82   : > { %599 = vst [vmem:[%s4333_s26 + $0x700] sm:$0xff] %v598_v32  ;;  %v604_v35 = vld [vmem:[%s4328_s25 + $0xe18] sm:$0xff]  ;;  %601 = vst [vmem:[%s4333_s26 + $0x708] sm:$0xff] %v600_v33  ;;  %v606_v36 = vld [vmem:[%s4328_s25 + $0xe20] sm:$0xff] }
  0x83   : > { %603 = vst [vmem:[%s4333_s26 + $0x710] sm:$0xff] %v602_v34  ;;  %605 = vst [vmem:[%s4333_s26 + $0x718] sm:$0xff] %v604_v35  ;;  %v608_v37 = vld [vmem:[%s4328_s25 + $0xe28] sm:$0xff]  ;;  %v610_v38 = vld [vmem:[%s4328_s25 + $0xe30] sm:$0xff] }
  0x84   : > { %607 = vst [vmem:[%s4333_s26 + $0x720] sm:$0xff] %v606_v36  ;;  %609 = vst [vmem:[%s4333_s26 + $0x728] sm:$0xff] %v608_v37  ;;  %v612_v39 = vld [vmem:[%s4328_s25 + $0xe38] sm:$0xff]  ;;  %v614_v40 = vld [vmem:[%s4328_s25 + $0xe40] sm:$0xff] }
  0x85   : > { %611 = vst [vmem:[%s4333_s26 + $0x730] sm:$0xff] %v610_v38  ;;  %v616_v41 = vld [vmem:[%s4328_s25 + $0xe48] sm:$0xff]  ;;  %613 = vst [vmem:[%s4333_s26 + $0x738] sm:$0xff] %v612_v39  ;;  %v618_v42 = vld [vmem:[%s4328_s25 + $0xe50] sm:$0xff] }
  0x86   : > { %615 = vst [vmem:[%s4333_s26 + $0x740] sm:$0xff] %v614_v40  ;;  %617 = vst [vmem:[%s4333_s26 + $0x748] sm:$0xff] %v616_v41  ;;  %v620_v43 = vld [vmem:[%s4328_s25 + $0xe58] sm:$0xff]  ;;  %v622_v44 = vld [vmem:[%s4328_s25 + $0xe60] sm:$0xff] }
  0x87   : > { %619 = vst [vmem:[%s4333_s26 + $0x750] sm:$0xff] %v618_v42  ;;  %621 = vst [vmem:[%s4333_s26 + $0x758] sm:$0xff] %v620_v43  ;;  %v624_v45 = vld [vmem:[%s4328_s25 + $0xe68] sm:$0xff]  ;;  %v626_v46 = vld [vmem:[%s4328_s25 + $0xe70] sm:$0xff] }
  0x88   : > { %623 = vst [vmem:[%s4333_s26 + $0x760] sm:$0xff] %v622_v44  ;;  %v628_v47 = vld [vmem:[%s4328_s25 + $0xe78] sm:$0xff]  ;;  %625 = vst [vmem:[%s4333_s26 + $0x768] sm:$0xff] %v624_v45  ;;  %v630_v48 = vld [vmem:[%s4328_s25 + $0xf00] sm:$0xff] }
  0x89   : > { %627 = vst [vmem:[%s4333_s26 + $0x770] sm:$0xff] %v626_v46  ;;  %629 = vst [vmem:[%s4333_s26 + $0x778] sm:$0xff] %v628_v47  ;;  %v632_v49 = vld [vmem:[%s4328_s25 + $0xf08] sm:$0xff]  ;;  %v634_v50 = vld [vmem:[%s4328_s25 + $0xf10] sm:$0xff] }
  0x8a   : > { %631 = vst [vmem:[%s4333_s26 + $0x780] sm:$0xff] %v630_v48  ;;  %633 = vst [vmem:[%s4333_s26 + $0x788] sm:$0xff] %v632_v49  ;;  %v636_v51 = vld [vmem:[%s4328_s25 + $0xf18] sm:$0xff]  ;;  %v638_v52 = vld [vmem:[%s4328_s25 + $0xf20] sm:$0xff] }
  0x8b   : > { %635 = vst [vmem:[%s4333_s26 + $0x790] sm:$0xff] %v634_v50  ;;  %v640_v53 = vld [vmem:[%s4328_s25 + $0xf28] sm:$0xff]  ;;  %637 = vst [vmem:[%s4333_s26 + $0x798] sm:$0xff] %v636_v51  ;;  %v642_v54 = vld [vmem:[%s4328_s25 + $0xf30] sm:$0xff] }
  0x8c   : > { %639 = vst [vmem:[%s4333_s26 + $0x7a0] sm:$0xff] %v638_v52  ;;  %641 = vst [vmem:[%s4333_s26 + $0x7a8] sm:$0xff] %v640_v53  ;;  %v644_v55 = vld [vmem:[%s4328_s25 + $0xf38] sm:$0xff]  ;;  %v646_v56 = vld [vmem:[%s4328_s25 + $0xf40] sm:$0xff] }
  0x8d   : > { %643 = vst [vmem:[%s4333_s26 + $0x7b0] sm:$0xff] %v642_v54  ;;  %645 = vst [vmem:[%s4333_s26 + $0x7b8] sm:$0xff] %v644_v55  ;;  %v648_v57 = vld [vmem:[%s4328_s25 + $0xf48] sm:$0xff]  ;;  %v650_v58 = vld [vmem:[%s4328_s25 + $0xf50] sm:$0xff] }
  0x8e   : > { %647 = vst [vmem:[%s4333_s26 + $0x7c0] sm:$0xff] %v646_v56  ;;  %v652_v59 = vld [vmem:[%s4328_s25 + $0xf58] sm:$0xff]  ;;  %649 = vst [vmem:[%s4333_s26 + $0x7c8] sm:$0xff] %v648_v57  ;;  %v654_v60 = vld [vmem:[%s4328_s25 + $0xf60] sm:$0xff] }
  0x8f   : > { %651 = vst [vmem:[%s4333_s26 + $0x7d0] sm:$0xff] %v650_v58  ;;  %653 = vst [vmem:[%s4333_s26 + $0x7d8] sm:$0xff] %v652_v59  ;;  %v656_v61 = vld [vmem:[%s4328_s25 + $0xf68] sm:$0xff]  ;;  %v658_v62 = vld [vmem:[%s4328_s25 + $0xf70] sm:$0xff] }
  0x90   : > { %655 = vst [vmem:[%s4333_s26 + $0x7e0] sm:$0xff] %v654_v60  ;;  %657 = vst [vmem:[%s4333_s26 + $0x7e8] sm:$0xff] %v656_v61  ;;  %v660_v63 = vld [vmem:[%s4328_s25 + $0xf78] sm:$0xff] }
  0x91   : > { %659 = vst [vmem:[%s4333_s26 + $0x7f0] sm:$0xff] %v658_v62  ;;  %661 = vst [vmem:[%s4333_s26 + $0x7f8] sm:$0xff] %v660_v63 }
  0x92 PF: > { %p3603_p5 = scmp.ge.s32.totalorder %s4269_s14, 1  ;;  %p666_p6 = scmp.lt.s32.totalorder %s4269_s14, 3 }
  0x94   : > { %p667_p7 = pnand %p3603_p5, %p666_p6 }
  0x95   : > { %s673_s27 = sand.u32 (!%p667_p7), 1, %s4261_s12   ;;  %vm772_vm0 = vcmask (!%p667_p7), 1040384   ;;  %v4271_v0 = vmov (!%p667_p7), 0.0   ;;  %vm4272_vm1 = vmmov (!%p667_p7), 1   ;;  %v4273_v27 = vmov (!%p667_p7), 0   ;;  %s3605_s9 = sshll.u32 (!%p667_p7), %s3596_s15, 4 }
  0x96   : > { %670 = sbr.rel (%p667_p7) target bundleno = 505 (0x1f9), region = 51  ;;  %s3604_s28 = sshll.u32 (!%p667_p7), %s673_s27, 11  ;;  %885 = vmatprep.mubr.f32.mxu0 (!%p667_p7), %v4271_v0  ;;  %956 = vmatprep.mubr.f32.mxu1 (!%p667_p7), %v4271_v0  ;;  %vm4849_vm2 = vmpackc.low (!%p667_p7), %vm772_vm0, %vm4272_vm1  ;;  %v4880_v29 = vld [vmem:[%s5427_s0] sm:$0x3f] (!%p667_p7)  ;;  %vm768_vm3 = vcmask (!%p667_p7), 203776  }
  0x97   : > { %s4853_s29 = scalar_lea.vmem (!%p667_p7), [#allocation2], %s3604_s28  ;;  %4245 = vset.pattern.permute.xlu0 (!%p667_p7), %v4273_v27  ;;  %p698_p8 = scmp.lt.s32.totalorder (!%p667_p7), %s3605_s9, 31 }
  0x98   : > { %v705_v2 = vld [vmem:[%s4853_s29 + $0x8] sm:$0xff] (!%p667_p7)  ;;  %v707_v4 = vld [vmem:[%s4853_s29 + $0x18] sm:$0xff] (!%p667_p7)  ;;  %v704_v7 = vld [vmem:[%s4853_s29] sm:$0xff] (!%p667_p7) }
  0x99   : > { %v721_v3 = vld [vmem:[%s4853_s29 + $0x88] sm:$0xff] (!%p667_p7)  ;;  %v723_v6 = vld [vmem:[%s4853_s29 + $0x98] sm:$0xff] (!%p667_p7)  ;;  %v720_v8 = vld [vmem:[%s4853_s29 + $0x80] sm:$0xff] (!%p667_p7) }
  0x9a   : > { %v3898_v5 = vpack.c.bf16 (!%p667_p7), %v721_v3, %v705_v2  ;;  %v3908_v9 = vpack.c.bf16 (!%p667_p7), %v723_v6, %v707_v4  ;;  %v3900_v10 = vpack.c.bf16 (!%p667_p7), %v720_v8, %v704_v7  ;;  %v706_v11 = vld [vmem:[%s4853_s29 + $0x10] sm:$0xff] (!%p667_p7)  ;;  %v737_v13 = vld [vmem:[%s4853_s29 + $0x108] sm:$0xff] (!%p667_p7)  ;;  %v739_v16 = vld [vmem:[%s4853_s29 + $0x118] sm:$0xff] (!%p667_p7) }
  0x9b   : > { %v722_v12 = vld [vmem:[%s4853_s29 + $0x90] sm:$0xff] (!%p667_p7)  ;;  %v753_v15 = vld [vmem:[%s4853_s29 + $0x188] sm:$0x1] (!%p667_p7)  ;;  %v755_v17 = vld [vmem:[%s4853_s29 + $0x198] sm:$0x1] (!%p667_p7) }
  0x9c   : > { %3899 = vmatprep.subr.bf16.mxu0 (!%p667_p7), %v3898_v5  ;;  %v3910_v14 = vpack.c.bf16 (!%p667_p7), %v722_v12, %v706_v11  ;;  %3909 = vmatprep.subr.bf16.mxu1 (!%p667_p7), %v3908_v9  ;;  %v3902_v18 = vpack.c.bf16 (!%p667_p7), %v753_v15, %v737_v13  ;;  %v3912_v19 = vpack.c.bf16 (!%p667_p7), %v755_v17, %v739_v16  ;;  %v736_v20 = vld [vmem:[%s4853_s29 + $0x100] sm:$0xff] (!%p667_p7)  ;;  %v738_v22 = vld [vmem:[%s4853_s29 + $0x110] sm:$0xff] (!%p667_p7)  ;;  %v709_v25 = vld [vmem:[%s4853_s29 + $0x28] sm:$0xff] (!%p667_p7) }
  0x9d   : > { %3901 = vmatpush1.bf16.msra.mxu0 %v3900_v10  ;;  %v752_v21 = vld [vmem:[%s4853_s29 + $0x180] sm:$0x1]  ;;  %v754_v24 = vld [vmem:[%s4853_s29 + $0x190] sm:$0x1]  ;;  %v725_v26 = vld [vmem:[%s4853_s29 + $0xa8] sm:$0xff]  ;;  %s5437_s9 = smov (!%p698_p8, %s3605_s9), 31 }
  0x9e   : > { %3911 = vmatpush1.bf16.msra.mxu1 %v3910_v14  ;;  %v3905_v23 = vpack.c.bf16 %v752_v21, %v736_v20  ;;  %3904 = vmatprep.subr.msk.bf16.mxu0 %vm4849_vm2, %v3902_v18  ;;  %v3915_v28 = vpack.c.bf16 %v754_v24, %v738_v22  ;;  %v3918_v30 = vpack.c.bf16 %v725_v26, %v709_v25  ;;  %v711_v31 = vld [vmem:[%s4853_s29 + $0x38] sm:$0xff]  ;;  %v708_v33 = vld [vmem:[%s4853_s29 + $0x20] sm:$0xff]  ;;  %v710_v36 = vld [vmem:[%s4853_s29 + $0x30] sm:$0xff]  ;;  %s3606_s10 = sshll.u32 %s5437_s9, 3 }
  0x9f   : > { %3914 = vmatprep.subr.msk.bf16.mxu1 %vm4849_vm2, %v3912_v19  ;;  %v727_v32 = vld [vmem:[%s4853_s29 + $0xb8] sm:$0xff]  ;;  %v724_v35 = vld [vmem:[%s4853_s29 + $0xa0] sm:$0xff]  ;;  %v726_v37 = vld [vmem:[%s4853_s29 + $0xb0] sm:$0xff]  ;;  %s5376_s14 = scalar_lea.vmem %s5430_s3, %s3606_s10 }
  0xa0   : > { %v3928_v34 = vpack.c.bf16 %v727_v32, %v711_v31  ;;  %v3920_v38 = vpack.c.bf16 %v724_v35, %v708_v33  ;;  %v741_v39 = vld [vmem:[%s4853_s29 + $0x128] sm:$0xff]  ;;  %v743_v41 = vld [vmem:[%s4853_s29 + $0x138] sm:$0xff]  ;;  %v3930_v42 = vpack.c.bf16 %v726_v37, %v710_v36  ;;  %v740_v45 = vld [vmem:[%s4853_s29 + $0x120] sm:$0xff] }
  0xa1   : > { %3907 = vmatpush1.bf16.msk.msra.mxu0 %vm4849_vm2, %v3905_v23  ;;  %v757_v40 = vld [vmem:[%s4853_s29 + $0x1a8] sm:$0x1]  ;;  %v759_v44 = vld [vmem:[%s4853_s29 + $0x1b8] sm:$0x1]  ;;  %v756_v46 = vld [vmem:[%s4853_s29 + $0x1a0] sm:$0x1] }
  0xa2   : > { %3917 = vmatpush1.bf16.msk.msra.mxu1 %vm4849_vm2, %v3915_v28  ;;  %3919 = vmatprep.subr.bf16.mxu0 %v3918_v30  ;;  %v3922_v43 = vpack.c.bf16 %v757_v40, %v741_v39  ;;  %v3932_v47 = vpack.c.bf16 %v759_v44, %v743_v41  ;;  %v742_v48 = vld [vmem:[%s4853_s29 + $0x130] sm:$0xff]  ;;  %v713_v50 = vld [vmem:[%s4853_s29 + $0x48] sm:$0xff]  ;;  %v715_v52 = vld [vmem:[%s4853_s29 + $0x58] sm:$0xff]  ;;  %v3925_v54 = vpack.c.bf16 %v756_v46, %v740_v45 }
  0xa3   : > { %3929 = vmatprep.subr.bf16.mxu1 %v3928_v34  ;;  %v758_v49 = vld [vmem:[%s4853_s29 + $0x1b0] sm:$0x1]  ;;  %v729_v51 = vld [vmem:[%s4853_s29 + $0xc8] sm:$0xff]  ;;  %v731_v53 = vld [vmem:[%s4853_s29 + $0xd8] sm:$0xff] }
  0xa4   : > { %3609 = vmatmul.mubr.msk.f32.vlgmr.msra.gmra.mrb[0].mxu0 %vm768_vm3, %v4880_v29  ;;  %v3935_v55 = vpack.c.bf16 %v758_v49, %v742_v48  ;;  %v3938_v56 = vpack.c.bf16 %v729_v51, %v713_v50  ;;  %v712_v57 = vld [vmem:[%s4853_s29 + $0x40] sm:$0xff]  ;;  %v714_v59 = vld [vmem:[%s4853_s29 + $0x50] sm:$0xff]  ;;  %v3948_v60 = vpack.c.bf16 %v731_v53, %v715_v52  ;;  %v745_v62 = vld [vmem:[%s4853_s29 + $0x148] sm:$0xff] }
  0xa5   : > { %3612 = vmatmul.mubr.msk.f32.vlgmr.msra.gmra.mrb[0].mxu1 %vm768_vm3, %v4880_v29  ;;  %3921 = vmatpush1.bf16.msra.mxu0 %v3920_v38  ;;  %v728_v58 = vld [vmem:[%s4853_s29 + $0xc0] sm:$0xff]  ;;  %v730_v61 = vld [vmem:[%s4853_s29 + $0xd0] sm:$0xff]  ;;  %v761_v63 = vld [vmem:[%s4853_s29 + $0x1c8] sm:$0x1] }
  0xa6   : > { %3931 = vmatpush1.bf16.msra.mxu1 %v3930_v42  ;;  %3924 = vmatprep.subr.msk.bf16.mxu0 %vm4849_vm2, %v3922_v43  ;;  %v747_v2 = vld [vmem:[%s4853_s29 + $0x158] sm:$0xff]  ;;  %v3940_v4 = vpack.c.bf16 %v728_v58, %v712_v57  ;;  %v3950_v5 = vpack.c.bf16 %v730_v61, %v714_v59  ;;  %v3942_v6 = vpack.c.bf16 %v761_v63, %v745_v62  ;;  %v744_v7 = vld [vmem:[%s4853_s29 + $0x140] sm:$0xff]  ;;  %v746_v9 = vld [vmem:[%s4853_s29 + $0x150] sm:$0xff] }
  0xa7   : > { %3934 = vmatprep.subr.msk.bf16.mxu1 %vm4849_vm2, %v3932_v47  ;;  %1027 = vmatprep.mubr.f32.mxu0 %v4271_v0  ;;  %v763_v3 = vld [vmem:[%s4853_s29 + $0x1d8] sm:$0x1]  ;;  %v760_v8 = vld [vmem:[%s4853_s29 + $0x1c0] sm:$0x1]  ;;  %v762_v11 = vld [vmem:[%s4853_s29 + $0x1d0] sm:$0x1] }
  0xa8   : > { %1098 = vmatprep.mubr.f32.mxu1 %v4271_v0  ;;  %v3952_v10 = vpack.c.bf16 %v763_v3, %v747_v2  ;;  %v717_v12 = vld [vmem:[%s4853_s29 + $0x68] sm:$0xff]  ;;  %v719_v14 = vld [vmem:[%s4853_s29 + $0x78] sm:$0xff]  ;;  %v3945_v16 = vpack.c.bf16 %v760_v8, %v744_v7  ;;  %v3955_v17 = vpack.c.bf16 %v762_v11, %v746_v9  ;;  %v716_v19 = vld [vmem:[%s4853_s29 + $0x60] sm:$0xff] }
  0xa9   : > { %3927 = vmatpush1.bf16.msk.msra.mxu0 %vm4849_vm2, %v3925_v54  ;;  %v733_v13 = vld [vmem:[%s4853_s29 + $0xe8] sm:$0xff]  ;;  %v735_v15 = vld [vmem:[%s4853_s29 + $0xf8] sm:$0xff]  ;;  %v732_v20 = vld [vmem:[%s4853_s29 + $0xe0] sm:$0xff] }
  0xaa   : > { %3937 = vmatpush1.bf16.msk.msra.mxu1 %vm4849_vm2, %v3935_v55  ;;  %3939 = vmatprep.subr.bf16.mxu0 %v3938_v56  ;;  %v3958_v18 = vpack.c.bf16 %v733_v13, %v717_v12  ;;  %v718_v21 = vld [vmem:[%s4853_s29 + $0x70] sm:$0xff]  ;;  %v3968_v22 = vpack.c.bf16 %v735_v15, %v719_v14  ;;  %v749_v24 = vld [vmem:[%s4853_s29 + $0x168] sm:$0xff]  ;;  %v751_v26 = vld [vmem:[%s4853_s29 + $0x178] sm:$0xff]  ;;  %v3960_v28 = vpack.c.bf16 %v732_v20, %v716_v19 }
  0xab   : > { %3949 = vmatprep.subr.bf16.mxu1 %v3948_v60  ;;  %v734_v23 = vld [vmem:[%s4853_s29 + $0xf0] sm:$0xff]  ;;  %v765_v25 = vld [vmem:[%s4853_s29 + $0x1e8] sm:$0x1]  ;;  %v767_v27 = vld [vmem:[%s4853_s29 + $0x1f8] sm:$0x1] }
  0xac   : > { %3615 = vmatmul.mubr.msk.f32.vlgmr.msra.gmra.mrb[2].mxu0 %vm768_vm3, %v4880_v29  ;;  %v3970_v30 = vpack.c.bf16 %v734_v23, %v718_v21  ;;  %v3962_v31 = vpack.c.bf16 %v765_v25, %v749_v24  ;;  %v748_v32 = vld [vmem:[%s4853_s29 + $0x160] sm:$0xff]  ;;  %v750_v34 = vld [vmem:[%s4853_s29 + $0x170] sm:$0xff]  ;;  %v3972_v35 = vpack.c.bf16 %v767_v27, %v751_v26  ;;  %v3632_v37 = vld [vmem:[%s4853_s29 + $0x208] sm:$0xff] }
  0xad   : > { %3618 = vmatmul.mubr.msk.f32.vlgmr.msra.gmra.mrb[2].mxu1 %vm768_vm3, %v4880_v29  ;;  %3941 = vmatpush1.bf16.msra.mxu0 %v3940_v4  ;;  %v764_v33 = vld [vmem:[%s4853_s29 + $0x1e0] sm:$0x1]  ;;  %v766_v36 = vld [vmem:[%s4853_s29 + $0x1f0] sm:$0x1]  ;;  %v3648_v38 = vld [vmem:[%s4853_s29 + $0x288] sm:$0xff] }
  0xae   : > { %3951 = vmatpush1.bf16.msra.mxu1 %v3950_v5  ;;  %3944 = vmatprep.subr.msk.bf16.mxu0 %vm4849_vm2, %v3942_v6  ;;  %v3634_v39 = vld [vmem:[%s4853_s29 + $0x218] sm:$0xff]  ;;  %v3965_v41 = vpack.c.bf16 %v764_v33, %v748_v32  ;;  %v3975_v42 = vpack.c.bf16 %v766_v36, %v750_v34  ;;  %v3978_v43 = vpack.c.bf16 %v3648_v38, %v3632_v37  ;;  %v3631_v44 = vld [vmem:[%s4853_s29 + $0x200] sm:$0xff]  ;;  %v3633_v46 = vld [vmem:[%s4853_s29 + $0x210] sm:$0xff] }
  0xaf   : > { %3954 = vmatprep.subr.msk.bf16.mxu1 %vm4849_vm2, %v3952_v10  ;;  %1169 = vmatprep.mubr.f32.mxu0 %v4271_v0  ;;  %v3650_v40 = vld [vmem:[%s4853_s29 + $0x298] sm:$0xff]  ;;  %v3647_v45 = vld [vmem:[%s4853_s29 + $0x280] sm:$0xff]  ;;  %v3649_v48 = vld [vmem:[%s4853_s29 + $0x290] sm:$0xff] }
  0xb0   : > { %1240 = vmatprep.mubr.f32.mxu1 %v4271_v0  ;;  %v3988_v47 = vpack.c.bf16 %v3650_v40, %v3634_v39  ;;  %v3664_v49 = vld [vmem:[%s4853_s29 + $0x308] sm:$0xff]  ;;  %v3666_v51 = vld [vmem:[%s4853_s29 + $0x318] sm:$0xff]  ;;  %v3980_v53 = vpack.c.bf16 %v3647_v45, %v3631_v44  ;;  %v3990_v54 = vpack.c.bf16 %v3649_v48, %v3633_v46  ;;  %v3663_v56 = vld [vmem:[%s4853_s29 + $0x300] sm:$0xff] }
  0xb1   : > { %3947 = vmatpush1.bf16.msk.msra.mxu0 %vm4849_vm2, %v3945_v16  ;;  %v3680_v50 = vld [vmem:[%s4853_s29 + $0x388] sm:$0x1]  ;;  %v3682_v52 = vld [vmem:[%s4853_s29 + $0x398] sm:$0x1]  ;;  %v3679_v57 = vld [vmem:[%s4853_s29 + $0x380] sm:$0x1] }
  0xb2   : > { %3957 = vmatpush1.bf16.msk.msra.mxu1 %vm4849_vm2, %v3955_v17  ;;  %3959 = vmatprep.subr.bf16.mxu0 %v3958_v18  ;;  %v3982_v55 = vpack.c.bf16 %v3680_v50, %v3664_v49  ;;  %v3665_v58 = vld [vmem:[%s4853_s29 + $0x310] sm:$0xff]  ;;  %v3992_v59 = vpack.c.bf16 %v3682_v52, %v3666_v51  ;;  %v3636_v61 = vld [vmem:[%s4853_s29 + $0x228] sm:$0xff]  ;;  %v3638_v63 = vld [vmem:[%s4853_s29 + $0x238] sm:$0xff]  ;;  %v3985_v3 = vpack.c.bf16 %v3679_v57, %v3663_v56 }
  0xb3   : > { %3969 = vmatprep.subr.bf16.mxu1 %v3968_v22  ;;  %v3681_v60 = vld [vmem:[%s4853_s29 + $0x390] sm:$0x1]  ;;  %v3652_v62 = vld [vmem:[%s4853_s29 + $0x2a8] sm:$0xff]  ;;  %v3654_v2 = vld [vmem:[%s4853_s29 + $0x2b8] sm:$0xff] }
  0xb4   : > { %3621 = vmatmul.mubr.msk.f32.vlgmr.msra.gmra.mrb[4].mxu0 %vm768_vm3, %v4880_v29  ;;  %v3995_v4 = vpack.c.bf16 %v3681_v60, %v3665_v58  ;;  %v3998_v5 = vpack.c.bf16 %v3652_v62, %v3636_v61  ;;  %v3635_v6 = vld [vmem:[%s4853_s29 + $0x220] sm:$0xff]  ;;  %v3637_v8 = vld [vmem:[%s4853_s29 + $0x230] sm:$0xff]  ;;  %v4008_v9 = vpack.c.bf16 %v3654_v2, %v3638_v63  ;;  %v3668_v11 = vld [vmem:[%s4853_s29 + $0x328] sm:$0xff] }
  0xb5   : > { %3624 = vmatmul.mubr.msk.f32.vlgmr.msra.gmra.mrb[4].mxu1 %vm768_vm3, %v4880_v29  ;;  %3961 = vmatpush1.bf16.msra.mxu0 %v3960_v28  ;;  %v3651_v7 = vld [vmem:[%s4853_s29 + $0x2a0] sm:$0xff]  ;;  %v3653_v10 = vld [vmem:[%s4853_s29 + $0x2b0] sm:$0xff]  ;;  %v3684_v12 = vld [vmem:[%s4853_s29 + $0x3a8] sm:$0x1] }
  0xb6   : > { %3971 = vmatpush1.bf16.msra.mxu1 %v3970_v30  ;;  %3964 = vmatprep.subr.msk.bf16.mxu0 %vm4849_vm2, %v3962_v31  ;;  %v3670_v13 = vld [vmem:[%s4853_s29 + $0x338] sm:$0xff]  ;;  %v4000_v15 = vpack.c.bf16 %v3651_v7, %v3635_v6  ;;  %v4010_v16 = vpack.c.bf16 %v3653_v10, %v3637_v8  ;;  %v4002_v17 = vpack.c.bf16 %v3684_v12, %v3668_v11  ;;  %v3667_v18 = vld [vmem:[%s4853_s29 + $0x320] sm:$0xff]  ;;  %v3669_v20 = vld [vmem:[%s4853_s29 + $0x330] sm:$0xff] }
  0xb7   : > { %3974 = vmatprep.subr.msk.bf16.mxu1 %vm4849_vm2, %v3972_v35  ;;  %1311 = vmatprep.mubr.f32.mxu0 %v4271_v0  ;;  %v3686_v14 = vld [vmem:[%s4853_s29 + $0x3b8] sm:$0x1]  ;;  %v3683_v19 = vld [vmem:[%s4853_s29 + $0x3a0] sm:$0x1]  ;;  %v3685_v22 = vld [vmem:[%s4853_s29 + $0x3b0] sm:$0x1] }
  0xb8   : > { %1382 = vmatprep.mubr.f32.mxu1 %v4271_v0  ;;  %v4012_v21 = vpack.c.bf16 %v3686_v14, %v3670_v13  ;;  %v3640_v23 = vld [vmem:[%s4853_s29 + $0x248] sm:$0xff]  ;;  %v3642_v25 = vld [vmem:[%s4853_s29 + $0x258] sm:$0xff]  ;;  %v4005_v27 = vpack.c.bf16 %v3683_v19, %v3667_v18  ;;  %v4015_v28 = vpack.c.bf16 %v3685_v22, %v3669_v20  ;;  %v3639_v31 = vld [vmem:[%s4853_s29 + $0x240] sm:$0xff] }
  0xb9   : > { %3967 = vmatpush1.bf16.msk.msra.mxu0 %vm4849_vm2, %v3965_v41  ;;  %v3656_v24 = vld [vmem:[%s4853_s29 + $0x2c8] sm:$0xff]  ;;  %v3658_v26 = vld [vmem:[%s4853_s29 + $0x2d8] sm:$0xff]  ;;  %v3655_v32 = vld [vmem:[%s4853_s29 + $0x2c0] sm:$0xff] }
  0xba   : > { %3977 = vmatpush1.bf16.msk.msra.mxu1 %vm4849_vm2, %v3975_v42  ;;  %3979 = vmatprep.subr.bf16.mxu0 %v3978_v43  ;;  %v4018_v30 = vpack.c.bf16 %v3656_v24, %v3640_v23  ;;  %v3641_v33 = vld [vmem:[%s4853_s29 + $0x250] sm:$0xff]  ;;  %v4028_v34 = vpack.c.bf16 %v3658_v26, %v3642_v25  ;;  %v3672_v36 = vld [vmem:[%s4853_s29 + $0x348] sm:$0xff]  ;;  %v3674_v38 = vld [vmem:[%s4853_s29 + $0x358] sm:$0xff]  ;;  %v4020_v40 = vpack.c.bf16 %v3655_v32, %v3639_v31 }
  0xbb   : > { %3989 = vmatprep.subr.bf16.mxu1 %v3988_v47  ;;  %v3657_v35 = vld [vmem:[%s4853_s29 + $0x2d0] sm:$0xff]  ;;  %v3688_v37 = vld [vmem:[%s4853_s29 + $0x3c8] sm:$0x1]  ;;  %v3690_v39 = vld [vmem:[%s4853_s29 + $0x3d8] sm:$0x1] }
  0xbc   : > { %3627 = vmatmul.mubr.msk.f32.vlgmr.msra.gmra.mrb[6].mxu0 %vm768_vm3, %v4880_v29  ;;  %v4030_v41 = vpack.c.bf16 %v3657_v35, %v3641_v33  ;;  %v4022_v42 = vpack.c.bf16 %v3688_v37, %v3672_v36  ;;  %v3671_v43 = vld [vmem:[%s4853_s29 + $0x340] sm:$0xff]  ;;  %v3673_v45 = vld [vmem:[%s4853_s29 + $0x350] sm:$0xff]  ;;  %v4032_v46 = vpack.c.bf16 %v3690_v39, %v3674_v38  ;;  %v3644_v48 = vld [vmem:[%s4853_s29 + $0x268] sm:$0xff] }
  0xbd   : > { %3630 = vmatmul.mubr.msk.f32.vlgmr.msra.gmra.mrb[6].mxu1 %vm768_vm3, %v4880_v29  ;;  %3981 = vmatpush1.bf16.msra.mxu0 %v3980_v53  ;;  %v3687_v44 = vld [vmem:[%s4853_s29 + $0x3c0] sm:$0x1]  ;;  %v3689_v47 = vld [vmem:[%s4853_s29 + $0x3d0] sm:$0x1]  ;;  %v3660_v49 = vld [vmem:[%s4853_s29 + $0x2e8] sm:$0xff] }
  0xbe   : > { %3991 = vmatpush1.bf16.msra.mxu1 %v3990_v54  ;;  %3984 = vmatprep.subr.msk.bf16.mxu0 %vm4849_vm2, %v3982_v55  ;;  %v3646_v50 = vld [vmem:[%s4853_s29 + $0x278] sm:$0xff]  ;;  %v4025_v52 = vpack.c.bf16 %v3687_v44, %v3671_v43  ;;  %v4035_v53 = vpack.c.bf16 %v3689_v47, %v3673_v45  ;;  %v4038_v54 = vpack.c.bf16 %v3660_v49, %v3644_v48  ;;  %v3643_v55 = vld [vmem:[%s4853_s29 + $0x260] sm:$0xff]  ;;  %v3645_v57 = vld [vmem:[%s4853_s29 + $0x270] sm:$0xff] }
  0xbf   : > { %3994 = vmatprep.subr.msk.bf16.mxu1 %vm4849_vm2, %v3992_v59  ;;  %1566 = vmatprep.mubr.f32.mxu0 %v4271_v0  ;;  %v3662_v51 = vld [vmem:[%s4853_s29 + $0x2f8] sm:$0xff]  ;;  %v3659_v56 = vld [vmem:[%s4853_s29 + $0x2e0] sm:$0xff]  ;;  %v3661_v59 = vld [vmem:[%s4853_s29 + $0x2f0] sm:$0xff] }
  0xc0   : > { %1637 = vmatprep.mubr.f32.mxu1 %v4271_v0  ;;  %v4048_v58 = vpack.c.bf16 %v3662_v51, %v3646_v50  ;;  %v3676_v60 = vld [vmem:[%s4853_s29 + $0x368] sm:$0xff]  ;;  %v3678_v62 = vld [vmem:[%s4853_s29 + $0x378] sm:$0xff]  ;;  %v4040_v2 = vpack.c.bf16 %v3659_v56, %v3643_v55  ;;  %v3691_v6 = vld [vmem:[%s4853_s29 + $0x3e0] sm:$0x1] }
  0xc1   : > { %3987 = vmatpush1.bf16.msk.msra.mxu0 %vm4849_vm2, %v3985_v3  ;;  %v3692_v61 = vld [vmem:[%s4853_s29 + $0x3e8] sm:$0x1]  ;;  %v3694_v63 = vld [vmem:[%s4853_s29 + $0x3f8] sm:$0x1]  ;;  %v4050_v3 = vpack.c.bf16 %v3661_v59, %v3645_v57  ;;  %v3677_v7 = vld [vmem:[%s4853_s29 + $0x370] sm:$0xff] }
  0xc2   : > { %3997 = vmatpush1.bf16.msk.msra.mxu1 %vm4849_vm2, %v3995_v4  ;;  %3999 = vmatprep.subr.bf16.mxu0 %v3998_v5  ;;  %v4042_v4 = vpack.c.bf16 %v3692_v61, %v3676_v60  ;;  %v3675_v5 = vld [vmem:[%s4853_s29 + $0x360] sm:$0xff]  ;;  %v4052_v8 = vpack.c.bf16 %v3694_v63, %v3678_v62  ;;  %v3720_v10 = vld [vmem:[%s4853_s29 + $0x408] sm:$0xff]  ;;  %v3722_v12 = vld [vmem:[%s4853_s29 + $0x418] sm:$0xff] }
  0xc3   : > { %4009 = vmatprep.subr.bf16.mxu1 %v4008_v9  ;;  %v3693_v9 = vld [vmem:[%s4853_s29 + $0x3f0] sm:$0x1]  ;;  %v3736_v11 = vld [vmem:[%s4853_s29 + $0x488] sm:$0xff]  ;;  %v3738_v13 = vld [vmem:[%s4853_s29 + $0x498] sm:$0xff]  ;;  %v4045_v14 = vpack.c.bf16 %v3691_v6, %v3675_v5 }
  0xc4   : > { %3697 = vmatmul.mubr.msk.f32.vlgmr.msra.gmra.mrb[8].mxu0 %vm768_vm3, %v4880_v29  ;;  %v3735_v18 = vld [vmem:[%s4853_s29 + $0x480] sm:$0xff]  ;;  %v3721_v19 = vld [vmem:[%s4853_s29 + $0x410] sm:$0xff]  ;;  %v4068_v20 = vpack.c.bf16 %v3738_v13, %v3722_v12  ;;  %v3752_v22 = vld [vmem:[%s4853_s29 + $0x508] sm:$0xff] }
  0xc5   : > { %3700 = vmatmul.mubr.msk.f32.vlgmr.msra.gmra.mrb[8].mxu1 %vm768_vm3, %v4880_v29  ;;  %4001 = vmatpush1.bf16.msra.mxu0 %v4000_v15  ;;  %v4055_v15 = vpack.c.bf16 %v3693_v9, %v3677_v7  ;;  %v3768_v23 = vld [vmem:[%s4853_s29 + $0x588] sm:$0x1]  ;;  %v3754_v24 = vld [vmem:[%s4853_s29 + $0x518] sm:$0xff]  ;;  %v3767_v31 = vld [vmem:[%s4853_s29 + $0x580] sm:$0x1] }
  0xc6   : > { %4011 = vmatpush1.bf16.msra.mxu1 %v4010_v16  ;;  %4004 = vmatprep.subr.msk.bf16.mxu0 %vm4849_vm2, %v4002_v17  ;;  %v4058_v16 = vpack.c.bf16 %v3736_v11, %v3720_v10  ;;  %v3719_v17 = vld [vmem:[%s4853_s29 + $0x400] sm:$0xff]  ;;  %v3770_v25 = vld [vmem:[%s4853_s29 + $0x598] sm:$0x1]  ;;  %v3753_v32 = vld [vmem:[%s4853_s29 + $0x510] sm:$0xff] }
  0xc7   : > { %4014 = vmatprep.subr.msk.bf16.mxu1 %vm4849_vm2, %v4012_v21  ;;  %1708 = vmatprep.mubr.f32.mxu0 %v4271_v0  ;;  %v3737_v21 = vld [vmem:[%s4853_s29 + $0x490] sm:$0xff]  ;;  %v4060_v26 = vpack.c.bf16 %v3735_v18, %v3719_v17  ;;  %v4072_v33 = vpack.c.bf16 %v3770_v25, %v3754_v24  ;;  %v3724_v35 = vld [vmem:[%s4853_s29 + $0x428] sm:$0xff]  ;;  %v3726_v37 = vld [vmem:[%s4853_s29 + $0x438] sm:$0xff] }
  0xc8   : > { %1779 = vmatprep.mubr.f32.mxu1 %v4271_v0  ;;  %v3740_v36 = vld [vmem:[%s4853_s29 + $0x4a8] sm:$0xff]  ;;  %v3742_v38 = vld [vmem:[%s4853_s29 + $0x4b8] sm:$0xff]  ;;  %v3739_v43 = vld [vmem:[%s4853_s29 + $0x4a0] sm:$0xff] }
  0xc9   : > { %4007 = vmatpush1.bf16.msk.msra.mxu0 %vm4849_vm2, %v4005_v27  ;;  %v4070_v27 = vpack.c.bf16 %v3737_v21, %v3721_v19  ;;  %v3725_v44 = vld [vmem:[%s4853_s29 + $0x430] sm:$0xff]  ;;  %v4088_v45 = vpack.c.bf16 %v3742_v38, %v3726_v37  ;;  %v3756_v47 = vld [vmem:[%s4853_s29 + $0x528] sm:$0xff]  ;;  %v3758_v49 = vld [vmem:[%s4853_s29 + $0x538] sm:$0xff] }
  0xca   : > { %4017 = vmatpush1.bf16.msk.msra.mxu1 %vm4849_vm2, %v4015_v28  ;;  %4019 = vmatprep.subr.bf16.mxu0 %v4018_v30  ;;  %v4062_v28 = vpack.c.bf16 %v3768_v23, %v3752_v22  ;;  %v3751_v30 = vld [vmem:[%s4853_s29 + $0x500] sm:$0xff]  ;;  %v3772_v48 = vld [vmem:[%s4853_s29 + $0x5a8] sm:$0x1]  ;;  %v3774_v50 = vld [vmem:[%s4853_s29 + $0x5b8] sm:$0x1] }
  0xcb   : > { %4029 = vmatprep.subr.bf16.mxu1 %v4028_v34  ;;  %v3769_v34 = vld [vmem:[%s4853_s29 + $0x590] sm:$0x1]  ;;  %v4065_v39 = vpack.c.bf16 %v3767_v31, %v3751_v30  ;;  %v3771_v55 = vld [vmem:[%s4853_s29 + $0x5a0] sm:$0x1]  ;;  %v4092_v57 = vpack.c.bf16 %v3774_v50, %v3758_v49  ;;  %v3728_v59 = vld [vmem:[%s4853_s29 + $0x448] sm:$0xff] }
  0xcc   : > { %3703 = vmatmul.mubr.msk.f32.vlgmr.msra.gmra.mrb[10].mxu0 %vm768_vm3, %v4880_v29  ;;  %v3757_v56 = vld [vmem:[%s4853_s29 + $0x530] sm:$0xff]  ;;  %v3744_v60 = vld [vmem:[%s4853_s29 + $0x4c8] sm:$0xff]  ;;  %v3730_v61 = vld [vmem:[%s4853_s29 + $0x458] sm:$0xff] }
  0xcd   : > { %3706 = vmatmul.mubr.msk.f32.vlgmr.msra.gmra.mrb[10].mxu1 %vm768_vm3, %v4880_v29  ;;  %4021 = vmatpush1.bf16.msra.mxu0 %v4020_v40  ;;  %v4075_v40 = vpack.c.bf16 %v3769_v34, %v3753_v32  ;;  %v3746_v62 = vld [vmem:[%s4853_s29 + $0x4d8] sm:$0xff]  ;;  %v3743_v5 = vld [vmem:[%s4853_s29 + $0x4c0] sm:$0xff]  ;;  %v3729_v6 = vld [vmem:[%s4853_s29 + $0x450] sm:$0xff] }
  0xce   : > { %4031 = vmatpush1.bf16.msra.mxu1 %v4030_v41  ;;  %4024 = vmatprep.subr.msk.bf16.mxu0 %vm4849_vm2, %v4022_v42  ;;  %v4078_v41 = vpack.c.bf16 %v3740_v36, %v3724_v35  ;;  %v3723_v42 = vld [vmem:[%s4853_s29 + $0x420] sm:$0xff]  ;;  %v4108_v7 = vpack.c.bf16 %v3746_v62, %v3730_v61  ;;  %v3760_v9 = vld [vmem:[%s4853_s29 + $0x548] sm:$0xff]  ;;  %v3762_v11 = vld [vmem:[%s4853_s29 + $0x558] sm:$0xff] }
  0xcf   : > { %4034 = vmatprep.subr.msk.bf16.mxu1 %vm4849_vm2, %v4032_v46  ;;  %1850 = vmatprep.mubr.f32.mxu0 %v4271_v0  ;;  %v3741_v46 = vld [vmem:[%s4853_s29 + $0x4b0] sm:$0xff]  ;;  %v4080_v51 = vpack.c.bf16 %v3739_v43, %v3723_v42  ;;  %v3776_v10 = vld [vmem:[%s4853_s29 + $0x5c8] sm:$0x1]  ;;  %v3778_v12 = vld [vmem:[%s4853_s29 + $0x5d8] sm:$0x1] }
  0xd0   : > { %1921 = vmatprep.mubr.f32.mxu1 %v4271_v0  ;;  %v3775_v17 = vld [vmem:[%s4853_s29 + $0x5c0] sm:$0x1]  ;;  %v3761_v18 = vld [vmem:[%s4853_s29 + $0x550] sm:$0xff]  ;;  %v4112_v19 = vpack.c.bf16 %v3778_v12, %v3762_v11  ;;  %v3732_v21 = vld [vmem:[%s4853_s29 + $0x468] sm:$0xff] }
  0xd1   : > { %4027 = vmatpush1.bf16.msk.msra.mxu0 %vm4849_vm2, %v4025_v52  ;;  %v4090_v52 = vpack.c.bf16 %v3741_v46, %v3725_v44  ;;  %v3748_v22 = vld [vmem:[%s4853_s29 + $0x4e8] sm:$0xff]  ;;  %v3734_v23 = vld [vmem:[%s4853_s29 + $0x478] sm:$0xff]  ;;  %v3747_v30 = vld [vmem:[%s4853_s29 + $0x4e0] sm:$0xff] }
  0xd2   : > { %4037 = vmatpush1.bf16.msk.msra.mxu1 %vm4849_vm2, %v4035_v53  ;;  %4039 = vmatprep.subr.bf16.mxu0 %v4038_v54  ;;  %v4082_v53 = vpack.c.bf16 %v3772_v48, %v3756_v47  ;;  %v3755_v54 = vld [vmem:[%s4853_s29 + $0x520] sm:$0xff]  ;;  %v3750_v24 = vld [vmem:[%s4853_s29 + $0x4f8] sm:$0xff]  ;;  %v3733_v31 = vld [vmem:[%s4853_s29 + $0x470] sm:$0xff] }
  0xd3   : > { %4049 = vmatprep.subr.bf16.mxu1 %v4048_v58  ;;  %v3773_v58 = vld [vmem:[%s4853_s29 + $0x5b0] sm:$0x1]  ;;  %v4085_v63 = vpack.c.bf16 %v3771_v55, %v3755_v54  ;;  %v3480_v32 = vld [vmem:[%s5429_s2] sm:$0x3f]  ;;  %v3764_v35 = vld [vmem:[%s4853_s29 + $0x568] sm:$0xff] }
  0xd4   : > { %3709 = vmatmul.mubr.msk.f32.vlgmr.msra.gmra.mrb[12].mxu0 %vm768_vm3, %v4880_v29  ;;  %v3749_v34 = vld [vmem:[%s4853_s29 + $0x4f0] sm:$0xff]  ;;  %v3780_v36 = vld [vmem:[%s4853_s29 + $0x5e8] sm:$0x1]  ;;  %v3766_v37 = vld [vmem:[%s4853_s29 + $0x578] sm:$0xff]  ;;  %3483 = vperm.xlu0 %4245, %v3480_v32  }
  0xd5   : > { %3712 = vmatmul.mubr.msk.f32.vlgmr.msra.gmra.mrb[12].mxu1 %vm768_vm3, %v4880_v29  ;;  %4041 = vmatpush1.bf16.msra.mxu0 %v4040_v2  ;;  %v4095_v2 = vpack.c.bf16 %v3773_v58, %v3757_v56  ;;  %v3782_v38 = vld [vmem:[%s4853_s29 + $0x5f8] sm:$0x1]  ;;  %v3763_v42 = vld [vmem:[%s4853_s29 + $0x560] sm:$0xff]  ;;  %v3765_v44 = vld [vmem:[%s4853_s29 + $0x570] sm:$0xff] }
  0xd6   : > { %4051 = vmatpush1.bf16.msra.mxu1 %v4050_v3  ;;  %4044 = vmatprep.subr.msk.bf16.mxu0 %vm4849_vm2, %v4042_v4  ;;  %v4098_v3 = vpack.c.bf16 %v3744_v60, %v3728_v59  ;;  %v3727_v4 = vld [vmem:[%s4853_s29 + $0x440] sm:$0xff]  ;;  %v3781_v46 = vld [vmem:[%s4853_s29 + $0x5f0] sm:$0x1]  ;;  %v3808_v47 = vld [vmem:[%s4853_s29 + $0x608] sm:$0xff] }
  0xd7   : > { %4054 = vmatprep.subr.msk.bf16.mxu1 %vm4849_vm2, %v4052_v8  ;;  %1992 = vmatprep.mubr.f32.mxu0 %v4271_v0  ;;  %v3745_v8 = vld [vmem:[%s4853_s29 + $0x4d0] sm:$0xff]  ;;  %v4100_v13 = vpack.c.bf16 %v3743_v5, %v3727_v4  ;;  %v3779_v43 = vld [vmem:[%s4853_s29 + $0x5e0] sm:$0x1]  ;;  %v3824_v48 = vld [vmem:[%s4853_s29 + $0x688] sm:$0xff] }
  0xd8   : > { %2063 = vmatprep.mubr.f32.mxu1 %v4271_v0  ;;  %v3810_v49 = vld [vmem:[%s4853_s29 + $0x618] sm:$0xff]  ;;  %v3807_v54 = vld [vmem:[%s4853_s29 + $0x600] sm:$0xff]  ;;  %v3809_v56 = vld [vmem:[%s4853_s29 + $0x610] sm:$0xff] }
  0xd9   : > { %4047 = vmatpush1.bf16.msk.msra.mxu0 %vm4849_vm2, %v4045_v14  ;;  %v4110_v14 = vpack.c.bf16 %v3745_v8, %v3729_v6  ;;  %v3826_v50 = vld [vmem:[%s4853_s29 + $0x698] sm:$0xff]  ;;  %v3823_v55 = vld [vmem:[%s4853_s29 + $0x680] sm:$0xff]  ;;  %v3825_v58 = vld [vmem:[%s4853_s29 + $0x690] sm:$0xff] }
  0xda   : > { %4057 = vmatpush1.bf16.msk.msra.mxu1 %vm4849_vm2, %v4055_v15  ;;  %4059 = vmatprep.subr.bf16.mxu0 %v4058_v16  ;;  %v4102_v15 = vpack.c.bf16 %v3776_v10, %v3760_v9  ;;  %v3759_v16 = vld [vmem:[%s4853_s29 + $0x540] sm:$0xff]  ;;  %v3840_v59 = vld [vmem:[%s4853_s29 + $0x708] sm:$0xff]  ;;  %v3842_v61 = vld [vmem:[%s4853_s29 + $0x718] sm:$0xff] }
  0xdb   : > { %4069 = vmatprep.subr.bf16.mxu1 %v4068_v20  ;;  %v3777_v20 = vld [vmem:[%s4853_s29 + $0x5d0] sm:$0x1]  ;;  %v4105_v25 = vpack.c.bf16 %v3775_v17, %v3759_v16  ;;  %v3856_v60 = vld [vmem:[%s4853_s29 + $0x788] sm:$0x1]  ;;  %v3858_v62 = vld [vmem:[%s4853_s29 + $0x798] sm:$0x1] }
  0xdc   : > { %3715 = vmatmul.mubr.msk.f32.vlgmr.msra.gmra.mrb[14].mxu0 %vm768_vm3, %v4880_v29  ;;  %v3839_v4 = vld [vmem:[%s4853_s29 + $0x700] sm:$0xff]  ;;  %v3841_v6 = vld [vmem:[%s4853_s29 + $0x710] sm:$0xff]  ;;  %v3812_v9 = vld [vmem:[%s4853_s29 + $0x628] sm:$0xff] }
  0xdd   : > { %3718 = vmatmul.mubr.msk.f32.vlgmr.msra.gmra.mrb[14].mxu1 %vm768_vm3, %v4880_v29  ;;  %4061 = vmatpush1.bf16.msra.mxu0 %v4060_v26  ;;  %v3731_v26 = vld [vmem:[%s4853_s29 + $0x460] sm:$0xff]  ;;  %v3857_v8 = vld [vmem:[%s4853_s29 + $0x790] sm:$0x1]  ;;  %v3828_v10 = vld [vmem:[%s4853_s29 + $0x6a8] sm:$0xff] }
  0xde   : > { %4071 = vmatpush1.bf16.msra.mxu1 %v4070_v27  ;;  %4064 = vmatprep.subr.msk.bf16.mxu0 %vm4849_vm2, %v4062_v28  ;;  %v4115_v27 = vpack.c.bf16 %v3777_v20, %v3761_v18  ;;  %v4118_v28 = vpack.c.bf16 %v3748_v22, %v3732_v21  ;;  %v3855_v5 = vld [vmem:[%s4853_s29 + $0x780] sm:$0x1]  ;;  %v3814_v11 = vld [vmem:[%s4853_s29 + $0x638] sm:$0xff]  ;;  %v3813_v18 = vld [vmem:[%s4853_s29 + $0x630] sm:$0xff] }
  0xdf   : > { %4074 = vmatprep.subr.msk.bf16.mxu1 %vm4849_vm2, %v4072_v33  ;;  %2263 = vmatprep.mubr.f32.mxu0 %v4271_v0  ;;  %v4128_v33 = vpack.c.bf16 %v3750_v24, %v3734_v23  ;;  %v3830_v12 = vld [vmem:[%s4853_s29 + $0x6b8] sm:$0xff]  ;;  %v3811_v16 = vld [vmem:[%s4853_s29 + $0x620] sm:$0xff]  ;;  %v3829_v20 = vld [vmem:[%s4853_s29 + $0x6b0] sm:$0xff] }
  0xe0   : > { %2334 = vmatprep.mubr.f32.mxu1 %v4271_v0  ;;  %v3827_v17 = vld [vmem:[%s4853_s29 + $0x6a0] sm:$0xff]  ;;  %v3844_v21 = vld [vmem:[%s4853_s29 + $0x728] sm:$0xff]  ;;  %v3846_v23 = vld [vmem:[%s4853_s29 + $0x738] sm:$0xff] }
  0xe1   : > { %4067 = vmatpush1.bf16.msk.msra.mxu0 %vm4849_vm2, %v4065_v39  ;;  %v4120_v39 = vpack.c.bf16 %v3747_v30, %v3731_v26  ;;  %v3860_v22 = vld [vmem:[%s4853_s29 + $0x7a8] sm:$0x1]  ;;  %v3862_v24 = vld [vmem:[%s4853_s29 + $0x7b8] sm:$0x1]  ;;  %v4170_v26 = vpack.c.bf16 %v3829_v20, %v3813_v18  ;;  %v3859_v30 = vld [vmem:[%s4853_s29 + $0x7a0] sm:$0x1] }
  0xe2   : > { %4077 = vmatpush1.bf16.msk.msra.mxu1 %vm4849_vm2, %v4075_v40  ;;  %4079 = vmatprep.subr.bf16.mxu0 %v4078_v41  ;;  %v4130_v40 = vpack.c.bf16 %v3749_v34, %v3733_v31  ;;  %v4122_v41 = vpack.c.bf16 %v3780_v36, %v3764_v35  ;;  %v3845_v31 = vld [vmem:[%s4853_s29 + $0x730] sm:$0xff]  ;;  %v4172_v32 = vpack.c.bf16 %v3862_v24, %v3846_v23  ;;  %v3816_v34 = vld [vmem:[%s4853_s29 + $0x648] sm:$0xff]  ;;  %v3818_v36 = vld [vmem:[%s4853_s29 + $0x658] sm:$0xff] }
  0xe3   : > { %4089 = vmatprep.subr.bf16.mxu1 %v4088_v45  ;;  %v4132_v45 = vpack.c.bf16 %v3782_v38, %v3766_v37  ;;  %v3832_v35 = vld [vmem:[%s4853_s29 + $0x6c8] sm:$0xff]  ;;  %v3834_v37 = vld [vmem:[%s4853_s29 + $0x6d8] sm:$0xff]  ;;  %v3869_v18 = vld [vmem:[%s4853_s29 + $0x7f0] sm:$0x1] }
  0xe4   : > { %3785 = vmatmul.mubr.msk.f32.vlgmr.msra.gmra.mrb[16].mxu0 %vm768_vm3, %v4880_v29 }
  0xe5   : > { %3788 = vmatmul.mubr.msk.f32.vlgmr.msra.gmra.mrb[16].mxu1 %vm768_vm3, %v4880_v29  ;;  %4081 = vmatpush1.bf16.msra.mxu0 %v4080_v51  ;;  %v4125_v51 = vpack.c.bf16 %v3779_v43, %v3763_v42  ;;  %v3831_v42 = vld [vmem:[%s4853_s29 + $0x6c0] sm:$0xff]  ;;  %v3817_v43 = vld [vmem:[%s4853_s29 + $0x650] sm:$0xff] }
  0xe6   : > { %4091 = vmatpush1.bf16.msra.mxu1 %v4090_v52  ;;  %4084 = vmatprep.subr.msk.bf16.mxu0 %vm4849_vm2, %v4082_v53  ;;  %v4135_v52 = vpack.c.bf16 %v3781_v46, %v3765_v44  ;;  %v4138_v53 = vpack.c.bf16 %v3824_v48, %v3808_v47  ;;  %v4188_v44 = vpack.c.bf16 %v3834_v37, %v3818_v36  ;;  %v3848_v46 = vld [vmem:[%s4853_s29 + $0x748] sm:$0xff]  ;;  %v3850_v48 = vld [vmem:[%s4853_s29 + $0x758] sm:$0xff] }
  0xe7   : > { %4094 = vmatprep.subr.msk.bf16.mxu1 %vm4849_vm2, %v4092_v57  ;;  %2405 = vmatprep.mubr.f32.mxu0 %v4271_v0  ;;  %v4148_v57 = vpack.c.bf16 %v3826_v50, %v3810_v49  ;;  %v3864_v47 = vld [vmem:[%s4853_s29 + $0x7c8] sm:$0x1]  ;;  %v3866_v49 = vld [vmem:[%s4853_s29 + $0x7d8] sm:$0x1] }
  0xe8   : > { %2476 = vmatprep.mubr.f32.mxu1 %v4271_v0 }
  0xe9   : > { %4087 = vmatpush1.bf16.msk.msra.mxu0 %vm4849_vm2, %v4085_v63  ;;  %v4140_v63 = vpack.c.bf16 %v3823_v55, %v3807_v54  ;;  %v3863_v54 = vld [vmem:[%s4853_s29 + $0x7c0] sm:$0x1]  ;;  %v3849_v55 = vld [vmem:[%s4853_s29 + $0x750] sm:$0xff] }
  0xea   : > { %4097 = vmatpush1.bf16.msk.msra.mxu1 %vm4849_vm2, %v4095_v2  ;;  %4099 = vmatprep.subr.bf16.mxu0 %v4098_v3  ;;  %v4150_v2 = vpack.c.bf16 %v3825_v58, %v3809_v56  ;;  %v4142_v3 = vpack.c.bf16 %v3856_v60, %v3840_v59  ;;  %v4192_v56 = vpack.c.bf16 %v3866_v49, %v3850_v48  ;;  %v3820_v58 = vld [vmem:[%s4853_s29 + $0x668] sm:$0xff]  ;;  %v3822_v60 = vld [vmem:[%s4853_s29 + $0x678] sm:$0xff] }
  0xeb   : > { %4109 = vmatprep.subr.bf16.mxu1 %v4108_v7  ;;  %v4152_v7 = vpack.c.bf16 %v3858_v62, %v3842_v61  ;;  %v3836_v59 = vld [vmem:[%s4853_s29 + $0x6e8] sm:$0xff]  ;;  %v3838_v61 = vld [vmem:[%s4853_s29 + $0x6f8] sm:$0xff] }
  0xec   : > { %3791 = vmatmul.mubr.msk.f32.vlgmr.msra.gmra.mrb[18].mxu0 %vm768_vm3, %v4880_v29 }
  0xed   : > { %3794 = vmatmul.mubr.msk.f32.vlgmr.msra.gmra.mrb[18].mxu1 %vm768_vm3, %v4880_v29  ;;  %4101 = vmatpush1.bf16.msra.mxu0 %v4100_v13  ;;  %v4145_v13 = vpack.c.bf16 %v3855_v5, %v3839_v4  ;;  %v3835_v4 = vld [vmem:[%s4853_s29 + $0x6e0] sm:$0xff]  ;;  %v3821_v5 = vld [vmem:[%s4853_s29 + $0x670] sm:$0xff] }
  0xee   : > { %4111 = vmatpush1.bf16.msra.mxu1 %v4110_v14  ;;  %4104 = vmatprep.subr.msk.bf16.mxu0 %vm4849_vm2, %v4102_v15  ;;  %v4155_v14 = vpack.c.bf16 %v3857_v8, %v3841_v6  ;;  %v4158_v15 = vpack.c.bf16 %v3828_v10, %v3812_v9  ;;  %v3837_v6 = vld [vmem:[%s4853_s29 + $0x6f0] sm:$0xff]  ;;  %v3868_v8 = vld [vmem:[%s4853_s29 + $0x7e8] sm:$0x1]  ;;  %v3854_v9 = vld [vmem:[%s4853_s29 + $0x778] sm:$0xff] }
  0xef   : > { %4114 = vmatprep.subr.msk.bf16.mxu1 %vm4849_vm2, %v4112_v19  ;;  %2547 = vmatprep.mubr.f32.mxu0 %v4271_v0  ;;  %v4168_v19 = vpack.c.bf16 %v3830_v12, %v3814_v11  ;;  %v3870_v10 = vld [vmem:[%s4853_s29 + $0x7f8] sm:$0x1]  ;;  %v4210_v12 = vpack.c.bf16 %v3837_v6, %v3821_v5 }
  0xf0   : > { %2618 = vmatprep.mubr.f32.mxu1 %v4271_v0 }
  0xf1   : > { %4107 = vmatpush1.bf16.msk.msra.mxu0 %vm4849_vm2, %v4105_v25  ;;  %v4160_v25 = vpack.c.bf16 %v3827_v17, %v3811_v16  ;;  %v4212_v16 = vpack.c.bf16 %v3870_v10, %v3854_v9  ;;  %v3853_v17 = vld [vmem:[%s4853_s29 + $0x770] sm:$0xff] }
  0xf2   : > { %4117 = vmatpush1.bf16.msk.msra.mxu1 %vm4849_vm2, %v4115_v27  ;;  %4119 = vmatprep.subr.bf16.mxu0 %v4118_v28  ;;  %v4162_v27 = vpack.c.bf16 %v3860_v22, %v3844_v21  ;;  %v3843_v28 = vld [vmem:[%s4853_s29 + $0x720] sm:$0xff]  ;;  %v4215_v21 = vpack.c.bf16 %v3869_v18, %v3853_v17 }
  0xf3   : > { %4129 = vmatprep.subr.bf16.mxu1 %v4128_v33  ;;  %v3861_v33 = vld [vmem:[%s4853_s29 + $0x7b0] sm:$0x1]  ;;  %v4165_v38 = vpack.c.bf16 %v3859_v30, %v3843_v28 }
  0xf4   : > { %3797 = vmatmul.mubr.msk.f32.vlgmr.msra.gmra.mrb[20].mxu0 %vm768_vm3, %v4880_v29 }
  0xf5   : > { %3800 = vmatmul.mubr.msk.f32.vlgmr.msra.gmra.mrb[20].mxu1 %vm768_vm3, %v4880_v29  ;;  %4121 = vmatpush1.bf16.msra.mxu0 %v4120_v39  ;;  %v4175_v39 = vpack.c.bf16 %v3861_v33, %v3845_v31 }
  0xf6   : > { %4131 = vmatpush1.bf16.msra.mxu1 %v4130_v40  ;;  %4124 = vmatprep.subr.msk.bf16.mxu0 %vm4849_vm2, %v4122_v41  ;;  %v4178_v40 = vpack.c.bf16 %v3832_v35, %v3816_v34  ;;  %v3815_v41 = vld [vmem:[%s4853_s29 + $0x640] sm:$0xff] }
  0xf7   : > { %4134 = vmatprep.subr.msk.bf16.mxu1 %vm4849_vm2, %v4132_v45  ;;  %2689 = vmatprep.mubr.f32.mxu0 %v4271_v0  ;;  %v3833_v45 = vld [vmem:[%s4853_s29 + $0x6d0] sm:$0xff]  ;;  %v4180_v50 = vpack.c.bf16 %v3831_v42, %v3815_v41 }
  0xf8   : > { %2760 = vmatprep.mubr.f32.mxu1 %v4271_v0 }
  0xf9   : > { %4127 = vmatpush1.bf16.msk.msra.mxu0 %vm4849_vm2, %v4125_v51  ;;  %v4190_v51 = vpack.c.bf16 %v3833_v45, %v3817_v43 }
  0xfa   : > { %4137 = vmatpush1.bf16.msk.msra.mxu1 %vm4849_vm2, %v4135_v52  ;;  %4139 = vmatprep.subr.bf16.mxu0 %v4138_v53  ;;  %v4182_v52 = vpack.c.bf16 %v3864_v47, %v3848_v46  ;;  %v3847_v53 = vld [vmem:[%s4853_s29 + $0x740] sm:$0xff] }
  0xfb   : > { %4149 = vmatprep.subr.bf16.mxu1 %v4148_v57  ;;  %v3865_v57 = vld [vmem:[%s4853_s29 + $0x7d0] sm:$0x1]  ;;  %v4185_v62 = vpack.c.bf16 %v3863_v54, %v3847_v53 }
  0xfc   : > { %3803 = vmatmul.mubr.msk.f32.vlgmr.msra.gmra.mrb[22].mxu0 %vm768_vm3, %v4880_v29 }
  0xfd   : > { %3806 = vmatmul.mubr.msk.f32.vlgmr.msra.gmra.mrb[22].mxu1 %vm768_vm3, %v4880_v29  ;;  %4141 = vmatpush1.bf16.msra.mxu0 %v4140_v63  ;;  %v4195_v63 = vpack.c.bf16 %v3865_v57, %v3849_v55 }
  0xfe   : > { %4151 = vmatpush1.bf16.msra.mxu1 %v4150_v2  ;;  %4144 = vmatprep.subr.msk.bf16.mxu0 %vm4849_vm2, %v4142_v3  ;;  %v4198_v2 = vpack.c.bf16 %v3836_v59, %v3820_v58  ;;  %v3819_v3 = vld [vmem:[%s4853_s29 + $0x660] sm:$0xff] }
  0xff   : > { %4154 = vmatprep.subr.msk.bf16.mxu1 %vm4849_vm2, %v4152_v7  ;;  %2960 = vmatprep.mubr.f32.mxu0 %v4271_v0  ;;  %v3852_v7 = vld [vmem:[%s4853_s29 + $0x768] sm:$0xff]  ;;  %v4200_v11 = vpack.c.bf16 %v3835_v4, %v3819_v3 }
 0x100   : > { %3031 = vmatprep.mubr.f32.mxu1 %v4271_v0 }
 0x101   : > { %4147 = vmatpush1.bf16.msk.msra.mxu0 %vm4849_vm2, %v4145_v13  ;;  %v4202_v13 = vpack.c.bf16 %v3868_v8, %v3852_v7 }
 0x102   : > { %4157 = vmatpush1.bf16.msk.msra.mxu1 %vm4849_vm2, %v4155_v14  ;;  %4159 = vmatprep.subr.bf16.mxu0 %v4158_v15  ;;  %v3851_v14 = vld [vmem:[%s4853_s29 + $0x760] sm:$0xff] }
 0x103   : > { %4169 = vmatprep.subr.bf16.mxu1 %v4168_v19  ;;  %v3867_v15 = vld [vmem:[%s4853_s29 + $0x7e0] sm:$0x1] }
 0x104   : > { %3873 = vmatmul.mubr.msk.f32.vlgmr.msra.gmra.mrb[24].mxu0 %vm768_vm3, %v4880_v29  ;;  %v4246_v19 = vld [vmem:[%s5427_s0] sm:$0x3f]  ;;  %v4205_v20 = vpack.c.bf16 %v3867_v15, %v3851_v14 }
 0x105   : > { %3876 = vmatmul.mubr.msk.f32.vlgmr.msra.gmra.mrb[24].mxu1 %vm768_vm3, %v4880_v29  ;;  %4161 = vmatpush1.bf16.msra.mxu0 %v4160_v25 }
 0x106   : > { %4171 = vmatpush1.bf16.msra.mxu1 %v4170_v26  ;;  %4164 = vmatprep.subr.msk.bf16.mxu0 %vm4849_vm2, %v4162_v27 }
 0x107   : > { %4174 = vmatprep.subr.msk.bf16.mxu1 %vm4849_vm2, %v4172_v32  ;;  %3102 = vmatprep.mubr.f32.mxu0 %v4271_v0 }
 0x108   : > { %3173 = vmatprep.mubr.f32.mxu1 %v4271_v0 }
 0x109   : > { %4167 = vmatpush1.bf16.msk.msra.mxu0 %vm4849_vm2, %v4165_v38 }
 0x10a   : > { %4177 = vmatpush1.bf16.msk.msra.mxu1 %vm4849_vm2, %v4175_v39  ;;  %4179 = vmatprep.subr.bf16.mxu0 %v4178_v40 }
 0x10b   : > { %4189 = vmatprep.subr.bf16.mxu1 %v4188_v44 }
 0x10c   : > { %3879 = vmatmul.mubr.msk.f32.vlgmr.msra.gmra.mrb[26].mxu0 %vm768_vm3, %v4880_v29 }
 0x10d   : > { %3882 = vmatmul.mubr.msk.f32.vlgmr.msra.gmra.mrb[26].mxu1 %vm768_vm3, %v4880_v29  ;;  %4181 = vmatpush1.bf16.msra.mxu0 %v4180_v50  ;;  %v4208_v29 = vpack.c.bf16 %v3838_v61, %v3822_v60 }
 0x10e   : > { %4191 = vmatpush1.bf16.msra.mxu1 %v4190_v51  ;;  %4184 = vmatprep.subr.msk.bf16.mxu0 %vm4849_vm2, %v4182_v52 }
 0x10f   : > { %4194 = vmatprep.subr.msk.bf16.mxu1 %vm4849_vm2, %v4192_v56  ;;  %3244 = vmatprep.mubr.f32.mxu0 %v4271_v0 }
 0x110   : > { %3315 = vmatprep.mubr.f32.mxu1 %v4271_v0 }
 0x111   : > { %4187 = vmatpush1.bf16.msk.msra.mxu0 %vm4849_vm2, %v4185_v62 }
 0x112   : > { %4197 = vmatpush1.bf16.msk.msra.mxu1 %vm4849_vm2, %v4195_v63  ;;  %4199 = vmatprep.subr.bf16.mxu0 %v4198_v2 }
 0x113   : > { %4209 = vmatprep.subr.bf16.mxu1 %v4208_v29 }
 0x114   : > { %3885 = vmatmul.mubr.msk.f32.vlgmr.msra.gmra.mrb[28].mxu0 %vm768_vm3, %v4246_v19 }
 0x115   : > { %3888 = vmatmul.mubr.msk.f32.vlgmr.msra.gmra.mrb[28].mxu1 %vm768_vm3, %v4246_v19  ;;  %4201 = vmatpush1.bf16.msra.mxu0 %v4200_v11 }
 0x116   : > { %4211 = vmatpush1.bf16.msra.mxu1 %v4210_v12  ;;  %4204 = vmatprep.subr.msk.bf16.mxu0 %vm4849_vm2, %v4202_v13 }
 0x117   : > { %4214 = vmatprep.subr.msk.bf16.mxu1 %vm4849_vm2, %v4212_v16  ;;  %3386 = vmatprep.mubr.f32.mxu0 %v4271_v0 }
 0x118   : > { %3457 = vmatprep.mubr.f32.mxu1 %v4271_v0 }
 0x119   : > { %4207 = vmatpush1.bf16.msk.msra.mxu0 %vm4849_vm2, %v4205_v20 }
 0x11a   : > { %4217 = vmatpush1.bf16.msk.msra.mxu1 %vm4849_vm2, %v4215_v21 }
 0x11c   : > { %3891 = vmatmul.mubr.msk.f32.vlgmr.msra.gmra.mrb[30].mxu0 %vm768_vm3, %v4246_v19 }
 0x11d   : > { %3894 = vmatmul.mubr.msk.f32.vlgmr.msra.gmra.mrb[30].mxu1 %vm768_vm3, %v4246_v19 }
 0x177   : > { %v887_v22 = vpop.f32.mrb[0].mxu0 }
 0x178   : > { %v958_v23 = vpop.f32.mrb[0].mxu1  ;;  %v889_v24 = vpop.f32.mrb[1].mxu0 }
 0x179   : > { %v960_v25 = vpop.f32.mrb[1].mxu1 }
 0x17f   : > { %v1029_v26 = vpop.f32.mrb[2].mxu0 }
 0x180   : > { %v1100_v27 = vpop.f32.mrb[2].mxu1  ;;  %v1031_v28 = vpop.f32.mrb[3].mxu0 }
 0x181   : > { %v1102_v30 = vpop.f32.mrb[3].mxu1 }
 0x187   : > { %v1171_v31 = vpop.f32.mrb[4].mxu0 }
 0x188   : > { %v1242_v0 = vpop.f32.mrb[4].mxu1  ;;  %v1173_v32 = vpop.f32.mrb[5].mxu0 }
 0x189   : > { %v1244_v33 = vpop.f32.mrb[5].mxu1 }
 0x18f   : > { %v5340_v34 = vpop.f32.mrb[6].mxu0 }
 0x190   : > { %v5342_v1 = vpop.f32.mrb[6].mxu1  ;;  %v5344_v35 = vpop.f32.mrb[7].mxu0 }
 0x191   : > { %v5346_v36 = vpop.f32.mrb[7].mxu1 }
 0x197   : > { %v1568_v37 = vpop.f32.mrb[8].mxu0 }
 0x198   : > { %v2070_v38 = vmax.f32 %v887_v22, %v1568_v37  ;;  %v1639_v39 = vpop.f32.mrb[8].mxu1  ;;  %v1570_v40 = vpop.f32.mrb[9].mxu0 }
 0x199   : > { %v2072_v41 = vmax.f32 %v958_v23, %v1639_v39  ;;  %v2071_v42 = vmax.f32 %v889_v24, %v1570_v40  ;;  %v1641_v43 = vpop.f32.mrb[9].mxu1 }
 0x19a   : > { %v2073_v44 = vmax.f32 %v960_v25, %v1641_v43 }
 0x19f   : > { %v1710_v45 = vpop.f32.mrb[10].mxu0 }
 0x1a0   : > { %v2074_v46 = vmax.f32 %v1029_v26, %v1710_v45  ;;  %v1781_v47 = vpop.f32.mrb[10].mxu1  ;;  %v1712_v48 = vpop.f32.mrb[11].mxu0 }
 0x1a1   : > { %v2076_v49 = vmax.f32 %v1100_v27, %v1781_v47  ;;  %v2075_v50 = vmax.f32 %v1031_v28, %v1712_v48  ;;  %v1783_v51 = vpop.f32.mrb[11].mxu1 }
 0x1a2   : > { %v2077_v52 = vmax.f32 %v1102_v30, %v1783_v51 }
 0x1a7   : > { %v1852_v53 = vpop.f32.mrb[12].mxu0 }
 0x1a8   : > { %v2078_v54 = vmax.f32 %v1171_v31, %v1852_v53  ;;  %v1923_v55 = vpop.f32.mrb[12].mxu1  ;;  %v1854_v56 = vpop.f32.mrb[13].mxu0 }
 0x1a9   : > { %v2080_v57 = vmax.f32 %v1242_v0, %v1923_v55  ;;  %v2079_v58 = vmax.f32 %v1173_v32, %v1854_v56  ;;  %v1925_v59 = vpop.f32.mrb[13].mxu1 }
 0x1aa   : > { %v2081_v60 = vmax.f32 %v1244_v33, %v1925_v59 }
 0x1af   : > { %v1994_v61 = vpop.f32.mrb[14].mxu0 }
 0x1b0   : > { %v2082_v62 = vmax.f32 %v5340_v34, %v1994_v61  ;;  %v2065_v63 = vpop.f32.mrb[14].mxu1  ;;  %v1996_v2 = vpop.f32.mrb[15].mxu0 }
 0x1b1   : > { %v2084_v3 = vmax.f32 %v5342_v1, %v2065_v63  ;;  %v2083_v4 = vmax.f32 %v5344_v35, %v1996_v2  ;;  %v2067_v5 = vpop.f32.mrb[15].mxu1 }
 0x1b2   : > { %v2085_v29 = vmax.f32 %v5346_v36, %v2067_v5 }
 0x1b7   : > { %v2265_v6 = vpop.f32.mrb[16].mxu0 }
 0x1b8   : > { %v2767_v7 = vmax.f32 %v2070_v38, %v2265_v6  ;;  %v2336_v8 = vpop.f32.mrb[16].mxu1  ;;  %v2267_v9 = vpop.f32.mrb[17].mxu0 }
 0x1b9   : > { %v2769_v10 = vmax.f32 %v2072_v41, %v2336_v8  ;;  %v2768_v11 = vmax.f32 %v2071_v42, %v2267_v9  ;;  %v2338_v12 = vpop.f32.mrb[17].mxu1  ;;  %v5370_v38 = vpop.permute.xlu0 %3483 }
 0x1ba   : > { %v2770_v13 = vmax.f32 %v2073_v44, %v2338_v12 }
 0x1bf   : > { %v2407_v14 = vpop.f32.mrb[18].mxu0 }
 0x1c0   : > { %v2771_v15 = vmax.f32 %v2074_v46, %v2407_v14  ;;  %v2478_v16 = vpop.f32.mrb[18].mxu1  ;;  %v2409_v17 = vpop.f32.mrb[19].mxu0 }
 0x1c1   : > { %v2773_v18 = vmax.f32 %v2076_v49, %v2478_v16  ;;  %v2772_v19 = vmax.f32 %v2075_v50, %v2409_v17  ;;  %v2480_v20 = vpop.f32.mrb[19].mxu1 }
 0x1c2   : > { %v2774_v21 = vmax.f32 %v2077_v52, %v2480_v20 }
 0x1c7   : > { %v2549_v22 = vpop.f32.mrb[20].mxu0 }
 0x1c8   : > { %v5352_v23 = vmax.f32 %v2078_v54, %v2549_v22  ;;  %v2620_v24 = vpop.f32.mrb[20].mxu1  ;;  %v2551_v25 = vpop.f32.mrb[21].mxu0 }
 0x1c9   : > { %v5354_v26 = vmax.f32 %v2080_v57, %v2620_v24  ;;  %v5356_v27 = vmax.f32 %v2079_v58, %v2551_v25  ;;  %v2622_v28 = vpop.f32.mrb[21].mxu1 }
 0x1ca   : > { %v5358_v30 = vmax.f32 %v2081_v60, %v2622_v28 }
 0x1cf   : > { %v2691_v31 = vpop.f32.mrb[22].mxu0 }
 0x1d0   : > { %v5362_v0 = vmax.f32 %v2082_v62, %v2691_v31  ;;  %v2762_v32 = vpop.f32.mrb[22].mxu1  ;;  %v2693_v33 = vpop.f32.mrb[23].mxu0 }
 0x1d1   : > { %v5364_v34 = vmax.f32 %v2084_v3, %v2762_v32  ;;  %v5366_v1 = vmax.f32 %v2083_v4, %v2693_v33  ;;  %v2764_v35 = vpop.f32.mrb[23].mxu1 }
 0x1d2   : > { %v5368_v36 = vmax.f32 %v2085_v29, %v2764_v35 }
 0x1d7   : > { %v2962_v37 = vpop.f32.mrb[24].mxu0 }
 0x1d8   : > { %v3464_v39 = vmax.f32 %v2767_v7, %v2962_v37  ;;  %v3033_v40 = vpop.f32.mrb[24].mxu1  ;;  %v2964_v41 = vpop.f32.mrb[25].mxu0 }
 0x1d9   : > { %v3466_v42 = vmax.f32 %v2769_v10, %v3033_v40  ;;  %v3465_v43 = vmax.f32 %v2768_v11, %v2964_v41  ;;  %v3035_v44 = vpop.f32.mrb[25].mxu1 }
 0x1da   : > { %v3467_v45 = vmax.f32 %v2770_v13, %v3035_v44  ;;  %v3486_v46 = vadd.f32 %v5370_v38, %v3464_v39 }
 0x1db   : > { %v3487_v47 = vadd.f32 %v5370_v38, %v3465_v43  ;;  %v3488_v48 = vadd.f32 %v5370_v38, %v3466_v42 }
 0x1dc   : > { %v3489_v49 = vadd.f32 %v5370_v38, %v3467_v45  ;;  %v3502_v50 = vmax.f32 %v3486_v46, 0.0 }
 0x1dd   : > { %v3503_v51 = vmax.f32 %v3487_v47, 0.0  ;;  %v3504_v52 = vmax.f32 %v3488_v48, 0.0 }
 0x1de   : > { %v3505_v53 = vmax.f32 %v3489_v49, 0.0  ;;  %3518 = vst [vmem:[%s5376_s14] sm:$0x3f] %v3502_v50 }
 0x1df   : > { %3519 = vst [vmem:[%s5376_s14 + $0x8] sm:$0x3f] %v3503_v51  ;;  %3520 = vst [vmem:[%s5376_s14 + $0x10] sm:$0x3f] %v3504_v52  ;;  %v3104_v54 = vpop.f32.mrb[26].mxu0 }
 0x1e0   : > { %3521 = vst [vmem:[%s5376_s14 + $0x18] sm:$0x3f] %v3505_v53  ;;  %v3468_v55 = vmax.f32 %v2771_v15, %v3104_v54  ;;  %v3175_v56 = vpop.f32.mrb[26].mxu1  ;;  %v3106_v57 = vpop.f32.mrb[27].mxu0 }
 0x1e1   : > { %v3470_v58 = vmax.f32 %v2773_v18, %v3175_v56  ;;  %v3469_v59 = vmax.f32 %v2772_v19, %v3106_v57  ;;  %v3177_v60 = vpop.f32.mrb[27].mxu1 }
 0x1e2   : > { %v3490_v61 = vadd.f32 %v5370_v38, %v3468_v55  ;;  %v3471_v62 = vmax.f32 %v2774_v21, %v3177_v60 }
 0x1e3   : > { %v3492_v63 = vadd.f32 %v5370_v38, %v3470_v58  ;;  %v3491_v2 = vadd.f32 %v5370_v38, %v3469_v59 }
 0x1e4   : > { %v3506_v3 = vmax.f32 %v3490_v61, 0.0  ;;  %v3493_v4 = vadd.f32 %v5370_v38, %v3471_v62 }
 0x1e5   : > { %v3508_v5 = vmax.f32 %v3492_v63, 0.0  ;;  %v3507_v29 = vmax.f32 %v3491_v2, 0.0 }
 0x1e6   : > { %3522 = vst [vmem:[%s5376_s14 + $0x20] sm:$0x3f] %v3506_v3  ;;  %v3509_v6 = vmax.f32 %v3493_v4, 0.0 }
 0x1e7   : > { %3524 = vst [vmem:[%s5376_s14 + $0x30] sm:$0x3f] %v3508_v5  ;;  %3523 = vst [vmem:[%s5376_s14 + $0x28] sm:$0x3f] %v3507_v29  ;;  %v3246_v7 = vpop.f32.mrb[28].mxu0 }
 0x1e8   : > { %3525 = vst [vmem:[%s5376_s14 + $0x38] sm:$0x3f] %v3509_v6  ;;  %v3472_v8 = vmax.f32 %v5352_v23, %v3246_v7  ;;  %v3317_v9 = vpop.f32.mrb[28].mxu1  ;;  %v3248_v10 = vpop.f32.mrb[29].mxu0 }
 0x1e9   : > { %v3474_v11 = vmax.f32 %v5354_v26, %v3317_v9  ;;  %v3473_v12 = vmax.f32 %v5356_v27, %v3248_v10  ;;  %v3319_v13 = vpop.f32.mrb[29].mxu1 }
 0x1ea   : > { %v3494_v14 = vadd.f32 %v5370_v38, %v3472_v8  ;;  %v3475_v15 = vmax.f32 %v5358_v30, %v3319_v13 }
 0x1eb   : > { %v3496_v16 = vadd.f32 %v5370_v38, %v3474_v11  ;;  %v3495_v17 = vadd.f32 %v5370_v38, %v3473_v12 }
 0x1ec   : > { %v3510_v18 = vmax.f32 %v3494_v14, 0.0  ;;  %v3497_v19 = vadd.f32 %v5370_v38, %v3475_v15 }
 0x1ed   : > { %v3512_v20 = vmax.f32 %v3496_v16, 0.0  ;;  %v3511_v21 = vmax.f32 %v3495_v17, 0.0 }
 0x1ee   : > { %3526 = vst [vmem:[%s5376_s14 + $0x40] sm:$0x3f] %v3510_v18  ;;  %v3513_v22 = vmax.f32 %v3497_v19, 0.0 }
 0x1ef   : > { %3528 = vst [vmem:[%s5376_s14 + $0x50] sm:$0x3f] %v3512_v20  ;;  %3527 = vst [vmem:[%s5376_s14 + $0x48] sm:$0x3f] %v3511_v21  ;;  %v3388_v23 = vpop.f32.mrb[30].mxu0 }
 0x1f0   : > { %3529 = vst [vmem:[%s5376_s14 + $0x58] sm:$0x3f] %v3513_v22  ;;  %v3476_v24 = vmax.f32 %v5362_v0, %v3388_v23  ;;  %v3459_v25 = vpop.f32.mrb[30].mxu1  ;;  %v3390_v26 = vpop.f32.mrb[31].mxu0 }
 0x1f1   : > { %v3478_v27 = vmax.f32 %v5364_v34, %v3459_v25  ;;  %v3477_v28 = vmax.f32 %v5366_v1, %v3390_v26  ;;  %v3461_v30 = vpop.f32.mrb[31].mxu1 }
 0x1f2   : > { %v3498_v31 = vadd.f32 %v5370_v38, %v3476_v24  ;;  %v3479_v32 = vmax.f32 %v5368_v36, %v3461_v30 }
 0x1f3   : > { %v3500_v33 = vadd.f32 %v5370_v38, %v3478_v27  ;;  %v3499_v35 = vadd.f32 %v5370_v38, %v3477_v28 }
 0x1f4   : > { %v3514_v37 = vmax.f32 %v3498_v31, 0.0  ;;  %v3501_v0 = vadd.f32 %v5370_v38, %v3479_v32 }
 0x1f5   : > { %v3516_v39 = vmax.f32 %v3500_v33, 0.0  ;;  %v3515_v40 = vmax.f32 %v3499_v35, 0.0 }
 0x1f6   : > { %3530 = vst [vmem:[%s5376_s14 + $0x60] sm:$0x3f] %v3514_v37  ;;  %v3517_v41 = vmax.f32 %v3501_v0, 0.0 }
 0x1f7   : > { %3532 = vst [vmem:[%s5376_s14 + $0x70] sm:$0x3f] %v3516_v39  ;;  %3531 = vst [vmem:[%s5376_s14 + $0x68] sm:$0x3f] %v3515_v40 }
 0x1f8   : > { %3533 = vst [vmem:[%s5376_s14 + $0x78] sm:$0x3f] %v3517_v41 }
 0x1f9 PF: > { %p10_p9 = scmp.ge.s32.totalorder %s4311_s16, 4   ;;  %s5433_s12 = smov %s4265_s13 }
 0x1fa   : > { %s5434_s13 = smov %s4320_s19  ;;  %s5435_s14 = smov %s4311_s16 }
 0x1fb   :  { %12 = sbr.rel (!%p10_p9) target bundleno = 2 (0x2), region = 93 }

// kernel: lenet5_bn_forward.4
= control target key start
LH: loop header
LB: loop body
LE: loop exit
PB: predicated region body
PF: predicated region fallthrough
CT: control target
= control target key end

     0   :  { %vm170_vm0 = vcmask 179200   ;;  %vm177_vm1 = vcmask 1045504   ;;  %s5318_s1 = inlined_call_operand.vmem [shape: f32[4,150,1024], index: 1, kind: input, shape index: {}]   ;;  %s5319_s0 = inlined_call_operand.vmem [shape: f32[16,150], index: 0, kind: input, shape index: {}]   ;;  %s5320_s2 = inlined_call_operand.vmem [shape: f32[16,1], index: 2, kind: input, shape index: {}]   ;;  %s5321_s3 = inlined_call_operand.vmem [shape: f32[16,1024], index: 3, kind: output, shape index: {}]  }
   0x1   :  { %v19_v0 = vld [vmem:[%s5318_s1 + $0x8] sm:$0xff]  ;;  %v21_v2 = vld [vmem:[%s5318_s1 + $0x18] sm:$0xff]  ;;  %v18_v5 = vld [vmem:[%s5318_s1] sm:$0xff] }
   0x2   :  { %v27_v1 = vld [vmem:[%s5318_s1 + $0x48] sm:$0xff]  ;;  %v29_v4 = vld [vmem:[%s5318_s1 + $0x58] sm:$0xff]  ;;  %v26_v6 = vld [vmem:[%s5318_s1 + $0x40] sm:$0xff] }
   0x3   :  { %v2597_v3 = vpack.c.bf16 %v27_v1, %v19_v0  ;;  %v2633_v7 = vpack.c.bf16 %v29_v4, %v21_v2  ;;  %v2599_v8 = vpack.c.bf16 %v26_v6, %v18_v5  ;;  %v20_v9 = vld [vmem:[%s5318_s1 + $0x10] sm:$0xff]  ;;  %v35_v11 = vld [vmem:[%s5318_s1 + $0x88] sm:$0xff]  ;;  %v37_v14 = vld [vmem:[%s5318_s1 + $0x98] sm:$0xff] }
   0x4   :  { %v28_v10 = vld [vmem:[%s5318_s1 + $0x50] sm:$0xff]  ;;  %v43_v13 = vld [vmem:[%s5318_s1 + $0xc8] sm:$0xff]  ;;  %v45_v15 = vld [vmem:[%s5318_s1 + $0xd8] sm:$0xff] }
   0x5   :  { %2598 = vmatprep.subr.bf16.mxu0 %v2597_v3  ;;  %v2635_v12 = vpack.c.bf16 %v28_v10, %v20_v9  ;;  %2634 = vmatprep.subr.bf16.mxu1 %v2633_v7  ;;  %v2601_v16 = vpack.c.bf16 %v43_v13, %v35_v11  ;;  %v2637_v17 = vpack.c.bf16 %v45_v15, %v37_v14  ;;  %v34_v18 = vld [vmem:[%s5318_s1 + $0x80] sm:$0xff]  ;;  %v36_v20 = vld [vmem:[%s5318_s1 + $0x90] sm:$0xff]  ;;  %v51_v23 = vld [vmem:[%s5318_s1 + $0x108] sm:$0xff] }
   0x6   :  { %2600 = vmatpush1.bf16.msra.mxu0 %v2599_v8  ;;  %v42_v19 = vld [vmem:[%s5318_s1 + $0xc0] sm:$0xff]  ;;  %v44_v22 = vld [vmem:[%s5318_s1 + $0xd0] sm:$0xff]  ;;  %v59_v24 = vld [vmem:[%s5318_s1 + $0x148] sm:$0xff] }
   0x7   :  { %2636 = vmatpush1.bf16.msra.mxu1 %v2635_v12  ;;  %v2603_v21 = vpack.c.bf16 %v42_v19, %v34_v18  ;;  %2602 = vmatprep.subr.bf16.mxu0 %v2601_v16  ;;  %v2639_v25 = vpack.c.bf16 %v44_v22, %v36_v20  ;;  %v2605_v26 = vpack.c.bf16 %v59_v24, %v51_v23  ;;  %v53_v27 = vld [vmem:[%s5318_s1 + $0x118] sm:$0xff]  ;;  %v50_v29 = vld [vmem:[%s5318_s1 + $0x100] sm:$0xff]  ;;  %v52_v32 = vld [vmem:[%s5318_s1 + $0x110] sm:$0xff] }
   0x8   :  { %2638 = vmatprep.subr.bf16.mxu1 %v2637_v17  ;;  %v61_v28 = vld [vmem:[%s5318_s1 + $0x158] sm:$0xff]  ;;  %v58_v31 = vld [vmem:[%s5318_s1 + $0x140] sm:$0xff]  ;;  %v60_v33 = vld [vmem:[%s5318_s1 + $0x150] sm:$0xff] }
   0x9   :  { %v2641_v30 = vpack.c.bf16 %v61_v28, %v53_v27  ;;  %v2607_v34 = vpack.c.bf16 %v58_v31, %v50_v29  ;;  %v67_v35 = vld [vmem:[%s5318_s1 + $0x188] sm:$0xff]  ;;  %v69_v37 = vld [vmem:[%s5318_s1 + $0x198] sm:$0xff]  ;;  %v2643_v38 = vpack.c.bf16 %v60_v33, %v52_v32  ;;  %v66_v41 = vld [vmem:[%s5318_s1 + $0x180] sm:$0xff] }
   0xa   :  { %2604 = vmatpush1.bf16.msra.mxu0 %v2603_v21  ;;  %v75_v36 = vld [vmem:[%s5318_s1 + $0x1c8] sm:$0xff]  ;;  %v77_v40 = vld [vmem:[%s5318_s1 + $0x1d8] sm:$0xff]  ;;  %v74_v42 = vld [vmem:[%s5318_s1 + $0x1c0] sm:$0xff] }
   0xb   :  { %2640 = vmatpush1.bf16.msra.mxu1 %v2639_v25  ;;  %2606 = vmatprep.subr.bf16.mxu0 %v2605_v26  ;;  %v2609_v39 = vpack.c.bf16 %v75_v36, %v67_v35  ;;  %v2645_v43 = vpack.c.bf16 %v77_v40, %v69_v37  ;;  %v68_v44 = vld [vmem:[%s5318_s1 + $0x190] sm:$0xff]  ;;  %v83_v46 = vld [vmem:[%s5318_s1 + $0x208] sm:$0xff]  ;;  %v85_v48 = vld [vmem:[%s5318_s1 + $0x218] sm:$0xff]  ;;  %v2611_v50 = vpack.c.bf16 %v74_v42, %v66_v41 }
   0xc   :  { %2642 = vmatprep.subr.bf16.mxu1 %v2641_v30  ;;  %v76_v45 = vld [vmem:[%s5318_s1 + $0x1d0] sm:$0xff]  ;;  %v91_v47 = vld [vmem:[%s5318_s1 + $0x248] sm:$0xff]  ;;  %v93_v49 = vld [vmem:[%s5318_s1 + $0x258] sm:$0xff] }
   0xd   :  { %v2647_v51 = vpack.c.bf16 %v76_v45, %v68_v44  ;;  %v2613_v52 = vpack.c.bf16 %v91_v47, %v83_v46  ;;  %v82_v53 = vld [vmem:[%s5318_s1 + $0x200] sm:$0xff]  ;;  %v84_v55 = vld [vmem:[%s5318_s1 + $0x210] sm:$0xff]  ;;  %v2649_v56 = vpack.c.bf16 %v93_v49, %v85_v48  ;;  %v99_v58 = vld [vmem:[%s5318_s1 + $0x288] sm:$0xff] }
   0xe   :  { %2608 = vmatpush1.bf16.msra.mxu0 %v2607_v34  ;;  %v90_v54 = vld [vmem:[%s5318_s1 + $0x240] sm:$0xff]  ;;  %v92_v57 = vld [vmem:[%s5318_s1 + $0x250] sm:$0xff]  ;;  %v107_v59 = vld [vmem:[%s5318_s1 + $0x2c8] sm:$0xff] }
   0xf   :  { %2644 = vmatpush1.bf16.msra.mxu1 %v2643_v38  ;;  %2610 = vmatprep.subr.bf16.mxu0 %v2609_v39  ;;  %v101_v60 = vld [vmem:[%s5318_s1 + $0x298] sm:$0xff]  ;;  %v2615_v62 = vpack.c.bf16 %v90_v54, %v82_v53  ;;  %v2651_v63 = vpack.c.bf16 %v92_v57, %v84_v55  ;;  %v2617_v0 = vpack.c.bf16 %v107_v59, %v99_v58  ;;  %v98_v1 = vld [vmem:[%s5318_s1 + $0x280] sm:$0xff]  ;;  %v100_v3 = vld [vmem:[%s5318_s1 + $0x290] sm:$0xff] }
  0x10   :  { %2646 = vmatprep.subr.bf16.mxu1 %v2645_v43  ;;  %v109_v61 = vld [vmem:[%s5318_s1 + $0x2d8] sm:$0xff]  ;;  %v106_v2 = vld [vmem:[%s5318_s1 + $0x2c0] sm:$0xff]  ;;  %v108_v5 = vld [vmem:[%s5318_s1 + $0x2d0] sm:$0xff] }
  0x11   :  { %v2653_v4 = vpack.c.bf16 %v109_v61, %v101_v60  ;;  %v115_v6 = vld [vmem:[%s5318_s1 + $0x308] sm:$0xff]  ;;  %v117_v8 = vld [vmem:[%s5318_s1 + $0x318] sm:$0xff]  ;;  %v2619_v10 = vpack.c.bf16 %v106_v2, %v98_v1  ;;  %v2655_v11 = vpack.c.bf16 %v108_v5, %v100_v3  ;;  %v114_v13 = vld [vmem:[%s5318_s1 + $0x300] sm:$0xff] }
  0x12   :  { %2612 = vmatpush1.bf16.msra.mxu0 %v2611_v50  ;;  %v123_v7 = vld [vmem:[%s5318_s1 + $0x348] sm:$0xff]  ;;  %v125_v9 = vld [vmem:[%s5318_s1 + $0x358] sm:$0xff]  ;;  %v122_v14 = vld [vmem:[%s5318_s1 + $0x340] sm:$0xff] }
  0x13   :  { %2648 = vmatpush1.bf16.msra.mxu1 %v2647_v51  ;;  %2614 = vmatprep.subr.bf16.mxu0 %v2613_v52  ;;  %v2621_v12 = vpack.c.bf16 %v123_v7, %v115_v6  ;;  %v116_v15 = vld [vmem:[%s5318_s1 + $0x310] sm:$0xff]  ;;  %v2657_v16 = vpack.c.bf16 %v125_v9, %v117_v8  ;;  %v131_v18 = vld [vmem:[%s5318_s1 + $0x388] sm:$0xff]  ;;  %v133_v20 = vld [vmem:[%s5318_s1 + $0x398] sm:$0xff]  ;;  %v2623_v22 = vpack.c.bf16 %v122_v14, %v114_v13 }
  0x14   :  { %2650 = vmatprep.subr.bf16.mxu1 %v2649_v56  ;;  %v124_v17 = vld [vmem:[%s5318_s1 + $0x350] sm:$0xff]  ;;  %v139_v19 = vld [vmem:[%s5318_s1 + $0x3c8] sm:$0xff]  ;;  %v141_v21 = vld [vmem:[%s5318_s1 + $0x3d8] sm:$0xff] }
  0x15   :  { %v130_v23 = vld [vmem:[%s5318_s1 + $0x380] sm:$0xff]  ;;  %v2659_v24 = vpack.c.bf16 %v124_v17, %v116_v15  ;;  %v2625_v25 = vpack.c.bf16 %v139_v19, %v131_v18  ;;  %v132_v27 = vld [vmem:[%s5318_s1 + $0x390] sm:$0xff]  ;;  %v3392_v28 = vld [vmem:[%s5319_s0 + $0x8] sm:$0xff]  ;;  %v2661_v29 = vpack.c.bf16 %v141_v21, %v133_v20 }
  0x16   :  { %2616 = vmatpush1.bf16.msra.mxu0 %v2615_v62  ;;  %v138_v26 = vld [vmem:[%s5318_s1 + $0x3c0] sm:$0xff]  ;;  %v140_v30 = vld [vmem:[%s5318_s1 + $0x3d0] sm:$0xff]  ;;  %v147_v31 = vld [vmem:[%s5318_s1 + $0x408] sm:$0xff]  ;;  %2079 = vmatprep.mubr.msk.f32.mxu0 %vm170_vm0, %v3392_v28 }
  0x17   :  { %2652 = vmatpush1.bf16.msra.mxu1 %v2651_v63  ;;  %2618 = vmatprep.subr.bf16.mxu0 %v2617_v0  ;;  %v155_v32 = vld [vmem:[%s5318_s1 + $0x448] sm:$0xff]  ;;  %v149_v33 = vld [vmem:[%s5318_s1 + $0x418] sm:$0xff]  ;;  %v2627_v35 = vpack.c.bf16 %v138_v26, %v130_v23  ;;  %v2663_v36 = vpack.c.bf16 %v140_v30, %v132_v27  ;;  %v146_v38 = vld [vmem:[%s5318_s1 + $0x400] sm:$0xff] }
  0x18   :  { %2654 = vmatprep.subr.bf16.mxu1 %v2653_v4  ;;  %v157_v34 = vld [vmem:[%s5318_s1 + $0x458] sm:$0xff]  ;;  %2083 = vmatprep.mubr.msk.f32.mxu1 %vm170_vm0, %v3392_v28  ;;  %v2629_v37 = vpack.c.bf16 %v155_v32, %v147_v31  ;;  %v154_v39 = vld [vmem:[%s5318_s1 + $0x440] sm:$0xff]  ;;  %v148_v41 = vld [vmem:[%s5318_s1 + $0x410] sm:$0xff] }
  0x19   :  { %v2665_v40 = vpack.c.bf16 %v157_v34, %v149_v33  ;;  %v156_v42 = vld [vmem:[%s5318_s1 + $0x450] sm:$0xff]  ;;  %v2631_v43 = vpack.c.bf16 %v154_v39, %v146_v38  ;;  %v163_v45 = vld [vmem:[%s5318_s1 + $0x488] sm:$0x3f]  ;;  %v165_v46 = vld [vmem:[%s5318_s1 + $0x498] sm:$0x3f] }
  0x1a   :  { %2620 = vmatpush1.bf16.msra.mxu0 %v2619_v10  ;;  %v2667_v44 = vpack.c.bf16 %v156_v42, %v148_v41  ;;  %v23_v47 = vld [vmem:[%s5318_s1 + $0x28] sm:$0xff]  ;;  %v162_v48 = vld [vmem:[%s5318_s1 + $0x480] sm:$0x3f]  ;;  %v25_v50 = vld [vmem:[%s5318_s1 + $0x38] sm:$0xff] }
  0x1b   :  { %2656 = vmatpush1.bf16.msra.mxu1 %v2655_v11  ;;  %2622 = vmatprep.subr.bf16.mxu0 %v2621_v12  ;;  %v31_v49 = vld [vmem:[%s5318_s1 + $0x68] sm:$0xff]  ;;  %v33_v51 = vld [vmem:[%s5318_s1 + $0x78] sm:$0xff]  ;;  %v164_v52 = vld [vmem:[%s5318_s1 + $0x490] sm:$0x3f] }
  0x1c   :  { %2658 = vmatprep.subr.bf16.mxu1 %v2657_v16  ;;  %v22_v53 = vld [vmem:[%s5318_s1 + $0x20] sm:$0xff]  ;;  %v24_v55 = vld [vmem:[%s5318_s1 + $0x30] sm:$0xff]  ;;  %v39_v57 = vld [vmem:[%s5318_s1 + $0xa8] sm:$0xff]  ;;  %v2669_v60 = vpack.c.bf16 %v31_v49, %v23_v47  ;;  %v2705_v63 = vpack.c.bf16 %v33_v51, %v25_v50 }
  0x1d   :  { %v30_v54 = vld [vmem:[%s5318_s1 + $0x60] sm:$0xff]  ;;  %v32_v56 = vld [vmem:[%s5318_s1 + $0x70] sm:$0xff]  ;;  %v47_v58 = vld [vmem:[%s5318_s1 + $0xe8] sm:$0xff] }
  0x1e   :  { %2624 = vmatpush1.bf16.msra.mxu0 %v2623_v22  ;;  %v3472_v59 = vld [vmem:[%s5319_s0] sm:$0xff]  ;;  %v41_v61 = vld [vmem:[%s5318_s1 + $0xb8] sm:$0xff]  ;;  %v2671_v0 = vpack.c.bf16 %v30_v54, %v22_v53  ;;  %v2707_v1 = vpack.c.bf16 %v32_v56, %v24_v55  ;;  %v2673_v2 = vpack.c.bf16 %v47_v58, %v39_v57  ;;  %v40_v5 = vld [vmem:[%s5318_s1 + $0xb0] sm:$0xff] }
  0x1f   :  { %2660 = vmatpush1.bf16.msra.mxu1 %v2659_v24  ;;  %2626 = vmatprep.subr.bf16.mxu0 %v2625_v25  ;;  %v49_v62 = vld [vmem:[%s5318_s1 + $0xf8] sm:$0xff]  ;;  %v38_v3 = vld [vmem:[%s5318_s1 + $0xa0] sm:$0xff]  ;;  %v48_v7 = vld [vmem:[%s5318_s1 + $0xf0] sm:$0xff] }
  0x20   :  { %2662 = vmatprep.subr.bf16.mxu1 %v2661_v29  ;;  %v46_v4 = vld [vmem:[%s5318_s1 + $0xe0] sm:$0xff]  ;;  %v2709_v6 = vpack.c.bf16 %v49_v62, %v41_v61  ;;  %v55_v8 = vld [vmem:[%s5318_s1 + $0x128] sm:$0xff]  ;;  %v57_v10 = vld [vmem:[%s5318_s1 + $0x138] sm:$0xff]  ;;  %v2711_v13 = vpack.c.bf16 %v48_v7, %v40_v5 }
  0x21   :  { %v63_v9 = vld [vmem:[%s5318_s1 + $0x168] sm:$0xff]  ;;  %v65_v11 = vld [vmem:[%s5318_s1 + $0x178] sm:$0xff]  ;;  %v2675_v12 = vpack.c.bf16 %v46_v4, %v38_v3  ;;  %v54_v15 = vld [vmem:[%s5318_s1 + $0x120] sm:$0xff] }
  0x22   :  { %2628 = vmatpush1.bf16.msra.mxu0 %v2627_v35  ;;  %v2677_v14 = vpack.c.bf16 %v63_v9, %v55_v8  ;;  %v62_v16 = vld [vmem:[%s5318_s1 + $0x160] sm:$0xff]  ;;  %v56_v17 = vld [vmem:[%s5318_s1 + $0x130] sm:$0xff]  ;;  %v2713_v18 = vpack.c.bf16 %v65_v11, %v57_v10  ;;  %v71_v20 = vld [vmem:[%s5318_s1 + $0x1a8] sm:$0xff] }
  0x23   :  { %2664 = vmatpush1.bf16.msra.mxu1 %v2663_v36  ;;  %2630 = vmatprep.subr.bf16.mxu0 %v2629_v37  ;;  %v64_v19 = vld [vmem:[%s5318_s1 + $0x170] sm:$0xff]  ;;  %v79_v21 = vld [vmem:[%s5318_s1 + $0x1e8] sm:$0xff]  ;;  %v73_v22 = vld [vmem:[%s5318_s1 + $0x1b8] sm:$0xff]  ;;  %v2679_v24 = vpack.c.bf16 %v62_v16, %v54_v15 }
  0x24   :  { %2666 = vmatprep.subr.bf16.mxu1 %v2665_v40  ;;  %v81_v23 = vld [vmem:[%s5318_s1 + $0x1f8] sm:$0xff]  ;;  %v70_v25 = vld [vmem:[%s5318_s1 + $0x1a0] sm:$0xff]  ;;  %v2715_v26 = vpack.c.bf16 %v64_v19, %v56_v17  ;;  %v2681_v27 = vpack.c.bf16 %v79_v21, %v71_v20  ;;  %v72_v30 = vld [vmem:[%s5318_s1 + $0x1b0] sm:$0xff] }
  0x25   :  { %v78_v29 = vld [vmem:[%s5318_s1 + $0x1e0] sm:$0xff]  ;;  %v3544_v31 = vld [vmem:[%s5319_s0 + $0x18] sm:$0xff]  ;;  %v2717_v32 = vpack.c.bf16 %v81_v23, %v73_v22  ;;  %v80_v33 = vld [vmem:[%s5318_s1 + $0x1f0] sm:$0xff] }
  0x26   :  { %2632 = vmatpush1.bf16.msra.mxu0 %v2631_v43  ;;  %v87_v34 = vld [vmem:[%s5318_s1 + $0x228] sm:$0xff]  ;;  %v89_v36 = vld [vmem:[%s5318_s1 + $0x238] sm:$0xff]  ;;  %v3568_v38 = vld [vmem:[%s5319_s0 + $0x10] sm:$0xff]  ;;  %v2683_v39 = vpack.c.bf16 %v78_v29, %v70_v25  ;;  %v2719_v40 = vpack.c.bf16 %v80_v33, %v72_v30 }
  0x27   :  { %2668 = vmatpush1.bf16.msra.mxu1 %v2667_v44  ;;  %2077 = vmatprep.subr.msk.mxu0 %vm177_vm1, %v163_v45  ;;  %v95_v35 = vld [vmem:[%s5318_s1 + $0x268] sm:$0xff]  ;;  %v97_v37 = vld [vmem:[%s5318_s1 + $0x278] sm:$0xff]  ;;  %v86_v42 = vld [vmem:[%s5318_s1 + $0x220] sm:$0xff] }
  0x28   :  { %2081 = vmatprep.subr.msk.mxu1 %vm177_vm1, %v165_v46  ;;  %v2685_v41 = vpack.c.bf16 %v95_v35, %v87_v34  ;;  %v94_v43 = vld [vmem:[%s5318_s1 + $0x260] sm:$0xff]  ;;  %v88_v44 = vld [vmem:[%s5318_s1 + $0x230] sm:$0xff]  ;;  %v2721_v45 = vpack.c.bf16 %v97_v37, %v89_v36  ;;  %v103_v47 = vld [vmem:[%s5318_s1 + $0x2a8] sm:$0xff] }
  0x29   :  { %v96_v46 = vld [vmem:[%s5318_s1 + $0x270] sm:$0xff]  ;;  %v105_v49 = vld [vmem:[%s5318_s1 + $0x2b8] sm:$0xff]  ;;  %v2687_v51 = vpack.c.bf16 %v94_v43, %v86_v42  ;;  %v102_v54 = vld [vmem:[%s5318_s1 + $0x2a0] sm:$0xff] }
  0x2a   :  { %2078 = vmatpush1.msk.msra.mxu0 %vm177_vm1, %v162_v48  ;;  %v111_v48 = vld [vmem:[%s5318_s1 + $0x2e8] sm:$0xff]  ;;  %v113_v50 = vld [vmem:[%s5318_s1 + $0x2f8] sm:$0xff]  ;;  %v110_v55 = vld [vmem:[%s5318_s1 + $0x2e0] sm:$0xff] }
  0x2b   :  { %2082 = vmatpush1.msk.msra.mxu1 %vm177_vm1, %v164_v52  ;;  %267 = vmatmul.mubr.f32.vlgmr.msra.gmra.mrb[0].mxu0 %v3472_v59  ;;  %v2723_v52 = vpack.c.bf16 %v96_v46, %v88_v44  ;;  %v2689_v53 = vpack.c.bf16 %v111_v48, %v103_v47  ;;  %v104_v56 = vld [vmem:[%s5318_s1 + $0x2b0] sm:$0xff]  ;;  %v2725_v57 = vpack.c.bf16 %v113_v50, %v105_v49  ;;  %v127_v61 = vld [vmem:[%s5318_s1 + $0x368] sm:$0xff]  ;;  %v121_v62 = vld [vmem:[%s5318_s1 + $0x338] sm:$0xff] }
  0x2c   :  { %344 = vmatmul.mubr.f32.vlgmr.msra.gmra.mrb[0].mxu1 %v3472_v59  ;;  %2670 = vmatprep.subr.bf16.mxu0 %v2669_v60  ;;  %v112_v58 = vld [vmem:[%s5318_s1 + $0x2f0] sm:$0xff]  ;;  %v119_v60 = vld [vmem:[%s5318_s1 + $0x328] sm:$0xff]  ;;  %v118_v3 = vld [vmem:[%s5318_s1 + $0x320] sm:$0xff] }
  0x2d   :  { %2706 = vmatprep.subr.bf16.mxu1 %v2705_v63  ;;  %2672 = vmatpush1.bf16.msra.mxu0 %v2671_v0  ;;  %v129_v63 = vld [vmem:[%s5318_s1 + $0x378] sm:$0xff]  ;;  %v2691_v0 = vpack.c.bf16 %v110_v55, %v102_v54  ;;  %v126_v4 = vld [vmem:[%s5318_s1 + $0x360] sm:$0xff]  ;;  %v120_v5 = vld [vmem:[%s5318_s1 + $0x330] sm:$0xff] }
  0x2e   :  { %2708 = vmatpush1.bf16.msra.mxu1 %v2707_v1  ;;  %2674 = vmatprep.subr.bf16.mxu0 %v2673_v2  ;;  %v2727_v1 = vpack.c.bf16 %v112_v58, %v104_v56  ;;  %v2693_v2 = vpack.c.bf16 %v127_v61, %v119_v60  ;;  %v128_v7 = vld [vmem:[%s5318_s1 + $0x370] sm:$0xff]  ;;  %v135_v8 = vld [vmem:[%s5318_s1 + $0x3a8] sm:$0xff]  ;;  %v137_v10 = vld [vmem:[%s5318_s1 + $0x3b8] sm:$0xff] }
  0x2f   :  { %2710 = vmatprep.subr.bf16.mxu1 %v2709_v6  ;;  %2080 = vmatprep.mubr.msk.f32.mxu0 %vm170_vm0, %v3544_v31  ;;  %v2729_v6 = vpack.c.bf16 %v129_v63, %v121_v62  ;;  %v143_v9 = vld [vmem:[%s5318_s1 + $0x3e8] sm:$0xff]  ;;  %v145_v11 = vld [vmem:[%s5318_s1 + $0x3f8] sm:$0xff]  ;;  %v134_v15 = vld [vmem:[%s5318_s1 + $0x3a0] sm:$0xff] }
  0x30   :  { %2084 = vmatprep.mubr.msk.f32.mxu1 %vm170_vm0, %v3544_v31  ;;  %273 = vmatmul.mubr.f32.gmra.mrb[2].mxu0 %v3568_v38  ;;  %v142_v16 = vld [vmem:[%s5318_s1 + $0x3e0] sm:$0xff]  ;;  %v136_v17 = vld [vmem:[%s5318_s1 + $0x3b0] sm:$0xff]  ;;  %v151_v20 = vld [vmem:[%s5318_s1 + $0x428] sm:$0xff] }
  0x31   :  { %2676 = vmatpush1.bf16.msra.mxu0 %v2675_v12  ;;  %350 = vmatmul.mubr.f32.gmra.mrb[2].mxu1 %v3568_v38  ;;  %v2695_v12 = vpack.c.bf16 %v126_v4, %v118_v3  ;;  %v144_v19 = vld [vmem:[%s5318_s1 + $0x3f0] sm:$0xff]  ;;  %v159_v21 = vld [vmem:[%s5318_s1 + $0x468] sm:$0xff]  ;;  %v153_v22 = vld [vmem:[%s5318_s1 + $0x438] sm:$0xff] }
  0x32   :  { %2712 = vmatpush1.bf16.msra.mxu1 %v2711_v13  ;;  %2678 = vmatprep.subr.bf16.mxu0 %v2677_v14  ;;  %v2731_v13 = vpack.c.bf16 %v128_v7, %v120_v5  ;;  %v2697_v14 = vpack.c.bf16 %v143_v9, %v135_v8  ;;  %v161_v23 = vld [vmem:[%s5318_s1 + $0x478] sm:$0xff]  ;;  %v2735_v25 = vpack.c.bf16 %v144_v19, %v136_v17  ;;  %v158_v29 = vld [vmem:[%s5318_s1 + $0x460] sm:$0xff]  ;;  %v160_v33 = vld [vmem:[%s5318_s1 + $0x470] sm:$0xff] }
  0x33   :  { %2714 = vmatprep.subr.bf16.mxu1 %v2713_v18  ;;  %2087 = vmatprep.mubr.msk.f32.mxu0 %vm170_vm0, %v3392_v28  ;;  %v2733_v18 = vpack.c.bf16 %v145_v11, %v137_v10  ;;  %v2737_v30 = vpack.c.bf16 %v161_v23, %v153_v22  ;;  %v167_v36 = vld [vmem:[%s5318_s1 + $0x4a8] sm:$0x3f]  ;;  %v169_v37 = vld [vmem:[%s5318_s1 + $0x4b8] sm:$0x3f]  ;;  %v2093_v44 = vld [vmem:[%s5318_s1 + $0x4c0] sm:$0xff] }
  0x34   :  { %2091 = vmatprep.mubr.msk.f32.mxu1 %vm170_vm0, %v3392_v28  ;;  %v2096_v42 = vld [vmem:[%s5318_s1 + $0x4d8] sm:$0xff]  ;;  %v2095_v46 = vld [vmem:[%s5318_s1 + $0x4d0] sm:$0xff]  ;;  %v2110_v48 = vld [vmem:[%s5318_s1 + $0x548] sm:$0xff] }
  0x35   :  { %2680 = vmatpush1.bf16.msra.mxu0 %v2679_v24  ;;  %v2699_v24 = vpack.c.bf16 %v142_v16, %v134_v15  ;;  %v2104_v43 = vld [vmem:[%s5318_s1 + $0x518] sm:$0xff]  ;;  %v2103_v47 = vld [vmem:[%s5318_s1 + $0x510] sm:$0xff]  ;;  %v2118_v49 = vld [vmem:[%s5318_s1 + $0x588] sm:$0xff] }
  0x36   :  { %2716 = vmatpush1.bf16.msra.mxu1 %v2715_v26  ;;  %2682 = vmatprep.subr.bf16.mxu0 %v2681_v27  ;;  %v2701_v26 = vpack.c.bf16 %v159_v21, %v151_v20  ;;  %v150_v27 = vld [vmem:[%s5318_s1 + $0x420] sm:$0xff]  ;;  %v168_v50 = vld [vmem:[%s5318_s1 + $0x4b0] sm:$0x3f]  ;;  %v2777_v54 = vpack.c.bf16 %v2104_v43, %v2096_v42  ;;  %v2779_v56 = vpack.c.bf16 %v2103_v47, %v2095_v46  ;;  %v2136_v3 = vld [vmem:[%s5318_s1 + $0x618] sm:$0xff] }
  0x37   :  { %2718 = vmatprep.subr.bf16.mxu1 %v2717_v32  ;;  %v152_v32 = vld [vmem:[%s5318_s1 + $0x430] sm:$0xff]  ;;  %v2703_v34 = vpack.c.bf16 %v158_v29, %v150_v27  ;;  %v2109_v58 = vld [vmem:[%s5318_s1 + $0x540] sm:$0xff]  ;;  %v2152_v15 = vld [vmem:[%s5318_s1 + $0x698] sm:$0xff] }
  0x38   :  { %v2739_v35 = vpack.c.bf16 %v160_v33, %v152_v32  ;;  %v2117_v60 = vld [vmem:[%s5318_s1 + $0x580] sm:$0xff]  ;;  %v2111_v61 = vld [vmem:[%s5318_s1 + $0x550] sm:$0xff]  ;;  %v2168_v27 = vld [vmem:[%s5318_s1 + $0x718] sm:$0xff] }
  0x39   :  { %2684 = vmatpush1.bf16.msra.mxu0 %v2683_v39  ;;  %v2094_v39 = vld [vmem:[%s5318_s1 + $0x4c8] sm:$0xff]  ;;  %v2119_v63 = vld [vmem:[%s5318_s1 + $0x590] sm:$0xff]  ;;  %v2747_v4 = vpack.c.bf16 %v2117_v60, %v2109_v58  ;;  %v2125_v7 = vld [vmem:[%s5318_s1 + $0x5c0] sm:$0xff] }
  0x3a   :  { %2720 = vmatpush1.bf16.msra.mxu1 %v2719_v40  ;;  %2686 = vmatprep.subr.bf16.mxu0 %v2685_v41  ;;  %v166_v40 = vld [vmem:[%s5318_s1 + $0x4a0] sm:$0x3f]  ;;  %v2102_v41 = vld [vmem:[%s5318_s1 + $0x508] sm:$0xff]  ;;  %v2783_v5 = vpack.c.bf16 %v2119_v63, %v2111_v61  ;;  %v2127_v9 = vld [vmem:[%s5318_s1 + $0x5d0] sm:$0xff] }
  0x3b   :  { %2722 = vmatprep.subr.bf16.mxu1 %v2721_v45  ;;  %v2101_v45 = vld [vmem:[%s5318_s1 + $0x500] sm:$0xff]  ;;  %v2135_v11 = vld [vmem:[%s5318_s1 + $0x610] sm:$0xff]  ;;  %v2184_v42 = vld [vmem:[%s5318_s1 + $0x798] sm:$0xff] }
  0x3c   :  { %v2743_v55 = vpack.c.bf16 %v2101_v45, %v2093_v44  ;;  %v2133_v8 = vld [vmem:[%s5318_s1 + $0x600] sm:$0xff]  ;;  %v2787_v17 = vpack.c.bf16 %v2135_v11, %v2127_v9  ;;  %v2143_v21 = vld [vmem:[%s5318_s1 + $0x650] sm:$0xff] }
  0x3d   :  { %2688 = vmatpush1.bf16.msra.mxu0 %v2687_v51  ;;  %v2741_v51 = vpack.c.bf16 %v2102_v41, %v2094_v39  ;;  %v2751_v16 = vpack.c.bf16 %v2133_v8, %v2125_v7  ;;  %v2141_v19 = vld [vmem:[%s5318_s1 + $0x640] sm:$0xff]  ;;  %v2151_v23 = vld [vmem:[%s5318_s1 + $0x690] sm:$0xff]  ;;  %v2174_v39 = vld [vmem:[%s5318_s1 + $0x748] sm:$0xff] }
  0x3e   :  { %2724 = vmatpush1.bf16.msra.mxu1 %v2723_v52  ;;  %2690 = vmatprep.subr.bf16.mxu0 %v2689_v53  ;;  %v2112_v52 = vld [vmem:[%s5318_s1 + $0x558] sm:$0xff]  ;;  %v2149_v20 = vld [vmem:[%s5318_s1 + $0x680] sm:$0xff]  ;;  %v2191_v61 = vld [vmem:[%s5318_s1 + $0x7d0] sm:$0xff] }
  0x3f   :  { %2726 = vmatprep.subr.bf16.mxu1 %v2725_v57  ;;  %v2120_v53 = vld [vmem:[%s5318_s1 + $0x598] sm:$0xff]  ;;  %v2745_v57 = vpack.c.bf16 %v2118_v49, %v2110_v48  ;;  %v2755_v29 = vpack.c.bf16 %v2149_v20, %v2141_v19  ;;  %v2157_v33 = vld [vmem:[%s5318_s1 + $0x6c0] sm:$0xff]  ;;  %v2175_v48 = vld [vmem:[%s5318_s1 + $0x750] sm:$0xff] }
  0x40   :  { %v2781_v62 = vpack.c.bf16 %v2120_v53, %v2112_v52  ;;  %v2176_v41 = vld [vmem:[%s5318_s1 + $0x758] sm:$0xff]  ;;  %v2173_v46 = vld [vmem:[%s5318_s1 + $0x740] sm:$0xff]  ;;  %v2198_v52 = vld [vmem:[%s5318_s1 + $0x808] sm:$0xff] }
  0x41   :  { %2692 = vmatpush1.bf16.msra.mxu0 %v2691_v0  ;;  %v2126_v0 = vld [vmem:[%s5318_s1 + $0x5c8] sm:$0xff]  ;;  %v2181_v47 = vld [vmem:[%s5318_s1 + $0x780] sm:$0xff]  ;;  %v2797_v49 = vpack.c.bf16 %v2184_v42, %v2176_v41  ;;  %v2192_v53 = vld [vmem:[%s5318_s1 + $0x7d8] sm:$0xff] }
  0x42   :  { %2728 = vmatpush1.bf16.msra.mxu1 %v2727_v1  ;;  %2694 = vmatprep.subr.bf16.mxu0 %v2693_v2  ;;  %v2134_v1 = vld [vmem:[%s5318_s1 + $0x608] sm:$0xff]  ;;  %v2128_v2 = vld [vmem:[%s5318_s1 + $0x5d8] sm:$0xff]  ;;  %v2189_v58 = vld [vmem:[%s5318_s1 + $0x7c0] sm:$0xff] }
  0x43   :  { %2730 = vmatprep.subr.bf16.mxu1 %v2729_v6  ;;  %v2749_v6 = vpack.c.bf16 %v2134_v1, %v2126_v0  ;;  %v2785_v10 = vpack.c.bf16 %v2136_v3, %v2128_v2  ;;  %v2197_v60 = vld [vmem:[%s5318_s1 + $0x800] sm:$0xff]  ;;  %v2199_v63 = vld [vmem:[%s5318_s1 + $0x810] sm:$0xff]  ;;  %v2206_v0 = vld [vmem:[%s5318_s1 + $0x848] sm:$0xff] }
  0x44   :  { %v2214_v1 = vld [vmem:[%s5318_s1 + $0x888] sm:$0xff]  ;;  %v2208_v2 = vld [vmem:[%s5318_s1 + $0x858] sm:$0xff]  ;;  %v2205_v7 = vld [vmem:[%s5318_s1 + $0x840] sm:$0xff] }
  0x45   :  { %2696 = vmatpush1.bf16.msra.mxu0 %v2695_v12  ;;  %v2142_v12 = vld [vmem:[%s5318_s1 + $0x648] sm:$0xff]  ;;  %v2216_v3 = vld [vmem:[%s5318_s1 + $0x898] sm:$0xff]  ;;  %v2213_v8 = vld [vmem:[%s5318_s1 + $0x880] sm:$0xff] }
  0x46   :  { %2732 = vmatpush1.bf16.msra.mxu1 %v2731_v13  ;;  %2698 = vmatprep.subr.bf16.mxu0 %v2697_v14  ;;  %v2150_v13 = vld [vmem:[%s5318_s1 + $0x688] sm:$0xff]  ;;  %v2144_v14 = vld [vmem:[%s5318_s1 + $0x658] sm:$0xff]  ;;  %v2207_v9 = vld [vmem:[%s5318_s1 + $0x850] sm:$0xff] }
  0x47   :  { %2734 = vmatprep.subr.bf16.mxu1 %v2733_v18  ;;  %v2753_v18 = vpack.c.bf16 %v2150_v13, %v2142_v12  ;;  %v2789_v22 = vpack.c.bf16 %v2152_v15, %v2144_v14  ;;  %v2215_v11 = vld [vmem:[%s5318_s1 + $0x890] sm:$0xff]  ;;  %v2222_v12 = vld [vmem:[%s5318_s1 + $0x8c8] sm:$0xff]  ;;  %v2224_v14 = vld [vmem:[%s5318_s1 + $0x8d8] sm:$0xff] }
  0x48   :  { %v2230_v13 = vld [vmem:[%s5318_s1 + $0x908] sm:$0xff]  ;;  %v2232_v15 = vld [vmem:[%s5318_s1 + $0x918] sm:$0xff]  ;;  %v2221_v19 = vld [vmem:[%s5318_s1 + $0x8c0] sm:$0xff] }
  0x49   :  { %2700 = vmatpush1.bf16.msra.mxu0 %v2699_v24  ;;  %v2158_v24 = vld [vmem:[%s5318_s1 + $0x6c8] sm:$0xff]  ;;  %v2229_v20 = vld [vmem:[%s5318_s1 + $0x900] sm:$0xff] }
  0x4a   :  { %2736 = vmatpush1.bf16.msra.mxu1 %v2735_v25  ;;  %2702 = vmatprep.subr.bf16.mxu0 %v2701_v26  ;;  %v2166_v25 = vld [vmem:[%s5318_s1 + $0x708] sm:$0xff]  ;;  %v2160_v26 = vld [vmem:[%s5318_s1 + $0x6d8] sm:$0xff] }
  0x4b   :  { %2738 = vmatprep.subr.bf16.mxu1 %v2737_v30  ;;  %v2791_v30 = vpack.c.bf16 %v2151_v23, %v2143_v21  ;;  %v2757_v32 = vpack.c.bf16 %v2166_v25, %v2158_v24  ;;  %v2809_v21 = vpack.c.bf16 %v2232_v15, %v2224_v14  ;;  %v2231_v23 = vld [vmem:[%s5318_s1 + $0x910] sm:$0xff]  ;;  %v2775_v24 = vpack.c.bf16 %v2229_v20, %v2221_v19  ;;  %v2114_v42 = vld [vmem:[%s5318_s1 + $0x568] sm:$0xff]  ;;  %v2172_v19 = vld [vmem:[%s5318_s1 + $0x738] sm:$0xff] }
  0x4c   :  { %v2155_v15 = vld [vmem:[%s5318_s1 + $0x6b0] sm:$0xff] }
  0x4d   :  { %2704 = vmatpush1.bf16.msra.mxu0 %v2703_v34  ;;  %v2165_v34 = vld [vmem:[%s5318_s1 + $0x700] sm:$0xff] }
  0x4e   :  { %2740 = vmatpush1.bf16.msra.mxu1 %v2739_v35  ;;  %2085 = vmatprep.subr.msk.mxu0 %vm177_vm1, %v167_v36  ;;  %v2159_v35 = vld [vmem:[%s5318_s1 + $0x6d0] sm:$0xff]  ;;  %v2793_v36 = vpack.c.bf16 %v2168_v27, %v2160_v26  ;;  %v2759_v43 = vpack.c.bf16 %v2165_v34, %v2157_v33  ;;  %v2238_v26 = vld [vmem:[%s5318_s1 + $0x948] sm:$0x3f]  ;;  %v2240_v27 = vld [vmem:[%s5318_s1 + $0x958] sm:$0x3f] }
  0x4f   :  { %2089 = vmatprep.subr.msk.mxu1 %vm177_vm1, %v169_v37  ;;  %v2167_v37 = vld [vmem:[%s5318_s1 + $0x710] sm:$0xff]  ;;  %v2108_v33 = vld [vmem:[%s5318_s1 + $0x538] sm:$0xff]  ;;  %v2097_v34 = vld [vmem:[%s5318_s1 + $0x4e0] sm:$0xff] }
  0x50   :  { %v2795_v44 = vpack.c.bf16 %v2167_v37, %v2159_v35  ;;  %v2105_v35 = vld [vmem:[%s5318_s1 + $0x520] sm:$0xff]  ;;  %v2099_v37 = vld [vmem:[%s5318_s1 + $0x4f0] sm:$0xff] }
  0x51   :  { %2086 = vmatpush1.msk.msra.mxu0 %vm177_vm1, %v166_v40  ;;  %v2182_v40 = vld [vmem:[%s5318_s1 + $0x788] sm:$0xff] }
  0x52   :  { %2090 = vmatpush1.msk.msra.mxu1 %vm177_vm1, %v168_v50  ;;  %421 = vmatmul.mubr.f32.vlgmr.msra.gmra.mrb[4].mxu0 %v3472_v59  ;;  %v2761_v45 = vpack.c.bf16 %v2182_v40, %v2174_v39  ;;  %v2183_v50 = vld [vmem:[%s5318_s1 + $0x790] sm:$0xff] }
  0x53   :  { %498 = vmatmul.mubr.f32.vlgmr.msra.gmra.mrb[4].mxu1 %v3472_v59  ;;  %2742 = vmatprep.subr.bf16.mxu0 %v2741_v51  ;;  %v2190_v51 = vld [vmem:[%s5318_s1 + $0x7c8] sm:$0xff]  ;;  %v2107_v39 = vld [vmem:[%s5318_s1 + $0x530] sm:$0xff] }
  0x54   :  { %2778 = vmatprep.subr.bf16.mxu1 %v2777_v54  ;;  %2744 = vmatpush1.bf16.msra.mxu0 %v2743_v55  ;;  %v2200_v54 = vld [vmem:[%s5318_s1 + $0x818] sm:$0xff]  ;;  %v2763_v55 = vpack.c.bf16 %v2181_v47, %v2173_v46  ;;  %v2239_v40 = vld [vmem:[%s5318_s1 + $0x950] sm:$0x3f] }
  0x55   :  { %2780 = vmatpush1.bf16.msra.mxu1 %v2779_v56  ;;  %2746 = vmatprep.subr.bf16.mxu0 %v2745_v57  ;;  %v2799_v56 = vpack.c.bf16 %v2183_v50, %v2175_v48  ;;  %v2765_v57 = vpack.c.bf16 %v2198_v52, %v2190_v51  ;;  %v2116_v46 = vld [vmem:[%s5318_s1 + $0x578] sm:$0xff]  ;;  %v2851_v48 = vpack.c.bf16 %v2107_v39, %v2099_v37  ;;  %v2121_v50 = vld [vmem:[%s5318_s1 + $0x5a0] sm:$0xff]  ;;  %v2115_v51 = vld [vmem:[%s5318_s1 + $0x570] sm:$0xff] }
  0x56   :  { %2782 = vmatprep.subr.bf16.mxu1 %v2781_v62  ;;  %2088 = vmatprep.mubr.msk.f32.mxu0 %vm170_vm0, %v3544_v31  ;;  %v2801_v62 = vpack.c.bf16 %v2200_v54, %v2192_v53  ;;  %v2124_v47 = vld [vmem:[%s5318_s1 + $0x5b8] sm:$0xff]  ;;  %v2123_v52 = vld [vmem:[%s5318_s1 + $0x5b0] sm:$0xff]  ;;  %v2130_v53 = vld [vmem:[%s5318_s1 + $0x5e8] sm:$0xff] }
  0x57   :  { %2092 = vmatprep.mubr.msk.f32.mxu1 %vm170_vm0, %v3544_v31  ;;  %427 = vmatmul.mubr.f32.gmra.mrb[6].mxu0 %v3568_v38  ;;  %v2138_v54 = vld [vmem:[%s5318_s1 + $0x628] sm:$0xff]  ;;  %v2185_v37 = vld [vmem:[%s5318_s1 + $0x7a0] sm:$0xff]  ;;  %v2179_v39 = vld [vmem:[%s5318_s1 + $0x770] sm:$0xff] }
  0x58   :  { %2748 = vmatpush1.bf16.msra.mxu0 %v2747_v4  ;;  %504 = vmatmul.mubr.f32.gmra.mrb[6].mxu1 %v3568_v38  ;;  %v2767_v4 = vpack.c.bf16 %v2197_v60, %v2189_v58  ;;  %v2853_v58 = vpack.c.bf16 %v2124_v47, %v2116_v46 }
  0x59   :  { %2784 = vmatpush1.bf16.msra.mxu1 %v2783_v5  ;;  %2750 = vmatprep.subr.bf16.mxu0 %v2749_v6  ;;  %v2803_v5 = vpack.c.bf16 %v2199_v63, %v2191_v61  ;;  %v2769_v6 = vpack.c.bf16 %v2214_v1, %v2206_v0  ;;  %v2855_v61 = vpack.c.bf16 %v2123_v52, %v2115_v51  ;;  %v2129_v63 = vld [vmem:[%s5318_s1 + $0x5e0] sm:$0xff]  ;;  %v2131_v1 = vld [vmem:[%s5318_s1 + $0x5f0] sm:$0xff] }
  0x5a   :  { %2786 = vmatprep.subr.bf16.mxu1 %v2785_v10  ;;  %2247 = vmatprep.mubr.msk.f32.mxu0 %vm170_vm0, %v3392_v28  ;;  %v2805_v10 = vpack.c.bf16 %v2216_v3, %v2208_v2  ;;  %v2137_v0 = vld [vmem:[%s5318_s1 + $0x620] sm:$0xff]  ;;  %v2139_v3 = vld [vmem:[%s5318_s1 + $0x630] sm:$0xff] }
  0x5b   :  { %2251 = vmatprep.mubr.msk.f32.mxu1 %vm170_vm0, %v3392_v28  ;;  %v2195_v51 = vld [vmem:[%s5318_s1 + $0x7f0] sm:$0xff] }
  0x5c   :  { %2752 = vmatpush1.bf16.msra.mxu0 %v2751_v16  ;;  %v2771_v16 = vpack.c.bf16 %v2213_v8, %v2205_v7  ;;  %v2156_v7 = vld [vmem:[%s5318_s1 + $0x6b8] sm:$0xff]  ;;  %v2823_v8 = vpack.c.bf16 %v2137_v0, %v2129_v63  ;;  %v2217_v63 = vld [vmem:[%s5318_s1 + $0x8a0] sm:$0xff]  ;;  %v2211_v0 = vld [vmem:[%s5318_s1 + $0x870] sm:$0xff] }
  0x5d   :  { %2788 = vmatpush1.bf16.msra.mxu1 %v2787_v17  ;;  %2754 = vmatprep.subr.bf16.mxu0 %v2753_v18  ;;  %v2807_v17 = vpack.c.bf16 %v2215_v11, %v2207_v9  ;;  %v2773_v18 = vpack.c.bf16 %v2230_v13, %v2222_v12  ;;  %v2859_v9 = vpack.c.bf16 %v2139_v3, %v2131_v1  ;;  %v2145_v11 = vld [vmem:[%s5318_s1 + $0x660] sm:$0xff]  ;;  %v2147_v13 = vld [vmem:[%s5318_s1 + $0x670] sm:$0xff]  ;;  %v2226_v3 = vld [vmem:[%s5318_s1 + $0x8e8] sm:$0xff] }
  0x5e   :  { %2790 = vmatprep.subr.bf16.mxu1 %v2789_v22  ;;  %v2223_v22 = vld [vmem:[%s5318_s1 + $0x8d0] sm:$0xff]  ;;  %v2153_v12 = vld [vmem:[%s5318_s1 + $0x6a0] sm:$0xff] }
  0x5f   :  { %v2811_v25 = vpack.c.bf16 %v2231_v23, %v2223_v22  ;;  %v2827_v20 = vpack.c.bf16 %v2153_v12, %v2145_v11  ;;  %v2161_v23 = vld [vmem:[%s5318_s1 + $0x6e0] sm:$0xff] }
  0x60   :  { %2756 = vmatpush1.bf16.msra.mxu0 %v2755_v29  ;;  %v2098_v29 = vld [vmem:[%s5318_s1 + $0x4e8] sm:$0xff]  ;;  %v2233_v11 = vld [vmem:[%s5318_s1 + $0x920] sm:$0xff] }
  0x61   :  { %2792 = vmatpush1.bf16.msra.mxu1 %v2791_v30  ;;  %2758 = vmatprep.subr.bf16.mxu0 %v2757_v32  ;;  %v2106_v30 = vld [vmem:[%s5318_s1 + $0x528] sm:$0xff]  ;;  %v2100_v32 = vld [vmem:[%s5318_s1 + $0x4f8] sm:$0xff] }
  0x62   :  { %2794 = vmatprep.subr.bf16.mxu1 %v2793_v36  ;;  %v2237_v36 = vld [vmem:[%s5318_s1 + $0x940] sm:$0x3f]  ;;  %v2813_v41 = vpack.c.bf16 %v2106_v30, %v2098_v29  ;;  %v2186_v29 = vld [vmem:[%s5318_s1 + $0x7a8] sm:$0xff]  ;;  %v2180_v30 = vld [vmem:[%s5318_s1 + $0x778] sm:$0xff] }
  0x64   :  { %2760 = vmatpush1.bf16.msra.mxu0 %v2759_v43  ;;  %v2849_v43 = vpack.c.bf16 %v2108_v33, %v2100_v32  ;;  %v2188_v32 = vld [vmem:[%s5318_s1 + $0x7b8] sm:$0xff] }
  0x65   :  { %2796 = vmatpush1.bf16.msra.mxu1 %v2795_v44  ;;  %2762 = vmatprep.subr.bf16.mxu0 %v2761_v45  ;;  %v2815_v44 = vpack.c.bf16 %v2105_v35, %v2097_v34  ;;  %v2122_v45 = vld [vmem:[%s5318_s1 + $0x5a8] sm:$0xff] }
  0x66   :  { %2798 = vmatprep.subr.bf16.mxu1 %v2797_v49  ;;  %v2113_v49 = vld [vmem:[%s5318_s1 + $0x560] sm:$0xff] }
  0x67   :  { %v2819_v60 = vpack.c.bf16 %v2121_v50, %v2113_v49  ;;  %v2193_v49 = vld [vmem:[%s5318_s1 + $0x7e0] sm:$0xff] }
  0x68   :  { %2764 = vmatpush1.bf16.msra.mxu0 %v2763_v55  ;;  %v2817_v55 = vpack.c.bf16 %v2122_v45, %v2114_v42  ;;  %v2194_v42 = vld [vmem:[%s5318_s1 + $0x7e8] sm:$0xff]  ;;  %v2204_v45 = vld [vmem:[%s5318_s1 + $0x838] sm:$0xff]  ;;  %v2201_v50 = vld [vmem:[%s5318_s1 + $0x820] sm:$0xff] }
  0x69   :  { %2800 = vmatpush1.bf16.msra.mxu1 %v2799_v56  ;;  %2766 = vmatprep.subr.bf16.mxu0 %v2765_v57  ;;  %v2132_v56 = vld [vmem:[%s5318_s1 + $0x5f8] sm:$0xff] }
  0x6a   :  { %2802 = vmatprep.subr.bf16.mxu1 %v2801_v62  ;;  %v2140_v57 = vld [vmem:[%s5318_s1 + $0x638] sm:$0xff]  ;;  %v2821_v62 = vpack.c.bf16 %v2138_v54, %v2130_v53  ;;  %v2203_v53 = vld [vmem:[%s5318_s1 + $0x830] sm:$0xff]  ;;  %v2210_v54 = vld [vmem:[%s5318_s1 + $0x868] sm:$0xff] }
  0x6b   :  { %v2857_v2 = vpack.c.bf16 %v2140_v57, %v2132_v56  ;;  %v2212_v56 = vld [vmem:[%s5318_s1 + $0x878] sm:$0xff] }
  0x6c   :  { %2768 = vmatpush1.bf16.msra.mxu0 %v2767_v4  ;;  %v2146_v4 = vld [vmem:[%s5318_s1 + $0x668] sm:$0xff]  ;;  %v2220_v57 = vld [vmem:[%s5318_s1 + $0x8b8] sm:$0xff] }
  0x6d   :  { %2804 = vmatpush1.bf16.msra.mxu1 %v2803_v5  ;;  %2770 = vmatprep.subr.bf16.mxu0 %v2769_v6  ;;  %v2154_v5 = vld [vmem:[%s5318_s1 + $0x6a8] sm:$0xff]  ;;  %v2148_v6 = vld [vmem:[%s5318_s1 + $0x678] sm:$0xff]  ;;  %v2877_v1 = vpack.c.bf16 %v2220_v57, %v2212_v56 }
  0x6e   :  { %2806 = vmatprep.subr.bf16.mxu1 %v2805_v10  ;;  %v2825_v10 = vpack.c.bf16 %v2154_v5, %v2146_v4  ;;  %v2861_v14 = vpack.c.bf16 %v2156_v7, %v2148_v6  ;;  %v2234_v4 = vld [vmem:[%s5318_s1 + $0x928] sm:$0xff]  ;;  %v2228_v5 = vld [vmem:[%s5318_s1 + $0x8f8] sm:$0xff] }
  0x6f   :  { %v2236_v6 = vld [vmem:[%s5318_s1 + $0x938] sm:$0xff]  ;;  %v2310_v56 = vld [vmem:[%s5318_s1 + $0xb08] sm:$0xff] }
  0x70   :  { %2772 = vmatpush1.bf16.msra.mxu0 %v2771_v16  ;;  %v2162_v16 = vld [vmem:[%s5318_s1 + $0x6e8] sm:$0xff]  ;;  %v2881_v12 = vpack.c.bf16 %v2236_v6, %v2228_v5  ;;  %v2328_v6 = vld [vmem:[%s5318_s1 + $0xb98] sm:$0xff] }
  0x71   :  { %2808 = vmatpush1.bf16.msra.mxu1 %v2807_v17  ;;  %2774 = vmatprep.subr.bf16.mxu0 %v2773_v18  ;;  %v2170_v17 = vld [vmem:[%s5318_s1 + $0x728] sm:$0xff]  ;;  %v2164_v18 = vld [vmem:[%s5318_s1 + $0x6f8] sm:$0xff] }
  0x72   :  { %2810 = vmatprep.subr.bf16.mxu1 %v2809_v21  ;;  %v2863_v21 = vpack.c.bf16 %v2155_v15, %v2147_v13  ;;  %v2829_v22 = vpack.c.bf16 %v2170_v17, %v2162_v16  ;;  %v2227_v13 = vld [vmem:[%s5318_s1 + $0x8f0] sm:$0xff]  ;;  %v2242_v17 = vld [vmem:[%s5318_s1 + $0x968] sm:$0x3f] }
  0x73   :  { %v2318_v57 = vld [vmem:[%s5318_s1 + $0xb48] sm:$0xff] }
  0x74   :  { %2776 = vmatpush1.bf16.msra.mxu0 %v2775_v24  ;;  %v2169_v24 = vld [vmem:[%s5318_s1 + $0x720] sm:$0xff]  ;;  %v4301_v5 = vld [vmem:[%s5319_s0 + $0x8] sm:$0xff] }
  0x75   :  { %2812 = vmatpush1.bf16.msra.mxu1 %v2811_v25  ;;  %2245 = vmatprep.subr.msk.mxu0 %vm177_vm1, %v2238_v26  ;;  %v2163_v25 = vld [vmem:[%s5318_s1 + $0x6f0] sm:$0xff]  ;;  %v2831_v33 = vpack.c.bf16 %v2169_v24, %v2161_v23  ;;  %v2261_v23 = vld [vmem:[%s5318_s1 + $0x980] sm:$0xff] }
  0x76   :  { %2249 = vmatprep.subr.msk.mxu1 %vm177_vm1, %v2240_v27  ;;  %v2171_v26 = vld [vmem:[%s5318_s1 + $0x730] sm:$0xff]  ;;  %v2178_v27 = vld [vmem:[%s5318_s1 + $0x768] sm:$0xff]  ;;  %v2269_v24 = vld [vmem:[%s5318_s1 + $0x9c0] sm:$0xff] }
  0x77   :  { %v2867_v34 = vpack.c.bf16 %v2171_v26, %v2163_v25  ;;  %v2833_v35 = vpack.c.bf16 %v2186_v29, %v2178_v27  ;;  %v2241_v25 = vld [vmem:[%s5318_s1 + $0x960] sm:$0x3f]  ;;  %v2271_v26 = vld [vmem:[%s5318_s1 + $0x9d0] sm:$0xff] }
  0x78   :  { %2246 = vmatpush1.msk.msra.mxu0 %vm177_vm1, %v2237_v36  ;;  %v2177_v36 = vld [vmem:[%s5318_s1 + $0x760] sm:$0xff]  ;;  %v2243_v27 = vld [vmem:[%s5318_s1 + $0x970] sm:$0x3f] }
  0x79   :  { %2250 = vmatpush1.msk.msra.mxu1 %vm177_vm1, %v2239_v40  ;;  %752 = vmatmul.mubr.f32.vlgmr.msra.gmra.mrb[8].mxu0 %v3472_v59  ;;  %v2869_v40 = vpack.c.bf16 %v2188_v32, %v2180_v30  ;;  %v2835_v46 = vpack.c.bf16 %v2185_v37, %v2177_v36  ;;  %v2278_v30 = vld [vmem:[%s5318_s1 + $0xa08] sm:$0xff]  ;;  %v2288_v36 = vld [vmem:[%s5318_s1 + $0xa58] sm:$0xff] }
  0x7a   :  { %829 = vmatmul.mubr.f32.vlgmr.msra.gmra.mrb[8].mxu1 %v3472_v59  ;;  %2814 = vmatprep.subr.bf16.mxu0 %v2813_v41  ;;  %v2187_v41 = vld [vmem:[%s5318_s1 + $0x7b0] sm:$0xff] }
  0x7b   :  { %2850 = vmatprep.subr.bf16.mxu1 %v2849_v43  ;;  %2816 = vmatpush1.bf16.msra.mxu0 %v2815_v44  ;;  %v2202_v43 = vld [vmem:[%s5318_s1 + $0x828] sm:$0xff]  ;;  %v2196_v44 = vld [vmem:[%s5318_s1 + $0x7f8] sm:$0xff]  ;;  %v2871_v47 = vpack.c.bf16 %v2187_v41, %v2179_v39  ;;  %v2277_v39 = vld [vmem:[%s5318_s1 + $0xa00] sm:$0xff] }
  0x7c   :  { %2852 = vmatpush1.bf16.msra.mxu1 %v2851_v48  ;;  %2248 = vmatprep.mubr.msk.f32.mxu0 %vm170_vm0, %v3544_v31  ;;  %v2837_v48 = vpack.c.bf16 %v2202_v43, %v2194_v42  ;;  %v2873_v52 = vpack.c.bf16 %v2204_v45, %v2196_v44  ;;  %v2279_v41 = vld [vmem:[%s5318_s1 + $0xa10] sm:$0xff]  ;;  %v2294_v43 = vld [vmem:[%s5318_s1 + $0xa88] sm:$0xff] }
  0x7d   :  { %2252 = vmatprep.mubr.msk.f32.mxu1 %vm170_vm0, %v3544_v31  ;;  %758 = vmatmul.mubr.f32.gmra.mrb[10].mxu0 %v3568_v38  ;;  %v2287_v42 = vld [vmem:[%s5318_s1 + $0xa50] sm:$0xff]  ;;  %v2302_v44 = vld [vmem:[%s5318_s1 + $0xac8] sm:$0xff] }
  0x7e   :  { %835 = vmatmul.mubr.f32.gmra.mrb[10].mxu1 %v3568_v38  ;;  %2818 = vmatprep.subr.bf16.mxu0 %v2817_v55  ;;  %v2218_v55 = vld [vmem:[%s5318_s1 + $0x8a8] sm:$0xff] }
  0x7f   :  { %2854 = vmatprep.subr.bf16.mxu1 %v2853_v58  ;;  %2820 = vmatpush1.bf16.msra.mxu0 %v2819_v60  ;;  %v2839_v58 = vpack.c.bf16 %v2201_v50, %v2193_v49  ;;  %v2875_v60 = vpack.c.bf16 %v2203_v53, %v2195_v51  ;;  %v2927_v50 = vpack.c.bf16 %v2287_v42, %v2279_v41  ;;  %v2293_v51 = vld [vmem:[%s5318_s1 + $0xa80] sm:$0xff]  ;;  %v2295_v53 = vld [vmem:[%s5318_s1 + $0xa90] sm:$0xff]  ;;  %v2374_v42 = vld [vmem:[%s5318_s1 + $0xd08] sm:$0xff] }
  0x80   :  { %2856 = vmatpush1.bf16.msra.mxu1 %v2855_v61  ;;  %2822 = vmatprep.subr.bf16.mxu0 %v2821_v62  ;;  %v2841_v61 = vpack.c.bf16 %v2218_v55, %v2210_v54  ;;  %v2209_v62 = vld [vmem:[%s5318_s1 + $0x860] sm:$0xff]  ;;  %v2303_v55 = vld [vmem:[%s5318_s1 + $0xad0] sm:$0xff] }
  0x81   :  { %2858 = vmatprep.subr.bf16.mxu1 %v2857_v2  ;;  %2255 = vmatprep.mubr.msk.f32.mxu0 %vm170_vm0, %v3392_v28  ;;  %v2219_v2 = vld [vmem:[%s5318_s1 + $0x8b0] sm:$0xff]  ;;  %v2843_v7 = vpack.c.bf16 %v2217_v63, %v2209_v62  ;;  %v2897_v62 = vpack.c.bf16 %v2318_v57, %v2310_v56  ;;  %v2317_v63 = vld [vmem:[%s5318_s1 + $0xb40] sm:$0xff]  ;;  %v2400_v56 = vld [vmem:[%s5318_s1 + $0xdd8] sm:$0xff] }
  0x82   :  { %2259 = vmatprep.mubr.msk.f32.mxu1 %vm170_vm0, %v3392_v28  ;;  %v2865_v28 = vpack.c.bf16 %v2172_v19, %v2164_v18  ;;  %v2244_v18 = vld [vmem:[%s5318_s1 + $0x978] sm:$0x3f]  ;;  %v2262_v19 = vld [vmem:[%s5318_s1 + $0x988] sm:$0xff]  ;;  %v2367_v41 = vld [vmem:[%s5318_s1 + $0xcd0] sm:$0xff] }
  0x83   :  { %2824 = vmatpush1.bf16.msra.mxu0 %v2823_v8  ;;  %v2879_v8 = vpack.c.bf16 %v2219_v2, %v2211_v0  ;;  %v2311_v0 = vld [vmem:[%s5318_s1 + $0xb10] sm:$0xff] }
  0x84   :  { %2860 = vmatpush1.bf16.msra.mxu1 %v2859_v9  ;;  %2826 = vmatprep.subr.bf16.mxu0 %v2825_v10  ;;  %v2845_v9 = vpack.c.bf16 %v2234_v4, %v2226_v3  ;;  %v2225_v10 = vld [vmem:[%s5318_s1 + $0x8e0] sm:$0xff]  ;;  %v2319_v2 = vld [vmem:[%s5318_s1 + $0xb50] sm:$0xff]  ;;  %v2326_v3 = vld [vmem:[%s5318_s1 + $0xb88] sm:$0xff] }
  0x85   :  { %2862 = vmatprep.subr.bf16.mxu1 %v2861_v14  ;;  %v2235_v14 = vld [vmem:[%s5318_s1 + $0x930] sm:$0xff]  ;;  %v2847_v15 = vpack.c.bf16 %v2233_v11, %v2225_v10  ;;  %v2334_v4 = vld [vmem:[%s5318_s1 + $0xbc8] sm:$0xff]  ;;  %v2325_v11 = vld [vmem:[%s5318_s1 + $0xb80] sm:$0xff] }
  0x86   :  { %v2883_v16 = vpack.c.bf16 %v2235_v14, %v2227_v13  ;;  %v2901_v10 = vpack.c.bf16 %v2334_v4, %v2326_v3  ;;  %v2327_v13 = vld [vmem:[%s5318_s1 + $0xb90] sm:$0xff]  ;;  %v2408_v3 = vld [vmem:[%s5318_s1 + $0xe18] sm:$0x3f]  ;;  %v2266_v4 = vld [vmem:[%s5318_s1 + $0x9a8] sm:$0xff] }
  0x87   :  { %2828 = vmatpush1.bf16.msra.mxu0 %v2827_v20  ;;  %v2270_v20 = vld [vmem:[%s5318_s1 + $0x9c8] sm:$0xff] }
  0x88   :  { %2864 = vmatpush1.bf16.msra.mxu1 %v2863_v21  ;;  %2830 = vmatprep.subr.bf16.mxu0 %v2829_v22  ;;  %v2264_v21 = vld [vmem:[%s5318_s1 + $0x998] sm:$0xff]  ;;  %v2885_v29 = vpack.c.bf16 %v2270_v20, %v2262_v19 }
  0x89   :  { %2866 = vmatprep.subr.bf16.mxu1 %v2865_v28  ;;  %v2272_v22 = vld [vmem:[%s5318_s1 + $0x9d8] sm:$0xff]  ;;  %v2263_v28 = vld [vmem:[%s5318_s1 + $0x990] sm:$0xff] }
  0x8a   :  { %v2921_v32 = vpack.c.bf16 %v2272_v22, %v2264_v21  ;;  %v2923_v37 = vpack.c.bf16 %v2271_v26, %v2263_v28  ;;  %v2352_v19 = vld [vmem:[%s5318_s1 + $0xc58] sm:$0xff]  ;;  %v2351_v26 = vld [vmem:[%s5318_s1 + $0xc50] sm:$0xff] }
  0x8b   :  { %2832 = vmatpush1.bf16.msra.mxu0 %v2831_v33  ;;  %v2887_v33 = vpack.c.bf16 %v2269_v24, %v2261_v23  ;;  %v2341_v23 = vld [vmem:[%s5318_s1 + $0xc00] sm:$0xff] }
  0x8c   :  { %2868 = vmatpush1.bf16.msra.mxu1 %v2867_v34  ;;  %2834 = vmatprep.subr.bf16.mxu0 %v2833_v35  ;;  %v2286_v34 = vld [vmem:[%s5318_s1 + $0xa48] sm:$0xff]  ;;  %v2280_v35 = vld [vmem:[%s5318_s1 + $0xa18] sm:$0xff]  ;;  %v2349_v24 = vld [vmem:[%s5318_s1 + $0xc40] sm:$0xff] }
  0x8d   :  { %2870 = vmatprep.subr.bf16.mxu1 %v2869_v40  ;;  %v2285_v40 = vld [vmem:[%s5318_s1 + $0xa40] sm:$0xff]  ;;  %v2889_v45 = vpack.c.bf16 %v2286_v34, %v2278_v30  ;;  %v2360_v30 = vld [vmem:[%s5318_s1 + $0xc98] sm:$0xff] }
  0x8e   :  { %v2891_v49 = vpack.c.bf16 %v2285_v40, %v2277_v39  ;;  %v2359_v39 = vld [vmem:[%s5318_s1 + $0xc90] sm:$0xff] }
  0x8f   :  { %2836 = vmatpush1.bf16.msra.mxu0 %v2835_v46  ;;  %v2296_v46 = vld [vmem:[%s5318_s1 + $0xa98] sm:$0xff] }
  0x90   :  { %2872 = vmatpush1.bf16.msra.mxu1 %v2871_v47  ;;  %2838 = vmatprep.subr.bf16.mxu0 %v2837_v48  ;;  %v2304_v47 = vld [vmem:[%s5318_s1 + $0xad8] sm:$0xff]  ;;  %v2925_v48 = vpack.c.bf16 %v2288_v36, %v2280_v35  ;;  %v2357_v36 = vld [vmem:[%s5318_s1 + $0xc80] sm:$0xff] }
  0x91   :  { %2874 = vmatprep.subr.bf16.mxu1 %v2873_v52  ;;  %v2301_v52 = vld [vmem:[%s5318_s1 + $0xac0] sm:$0xff]  ;;  %v2929_v54 = vpack.c.bf16 %v2304_v47, %v2296_v46  ;;  %v2947_v47 = vpack.c.bf16 %v2367_v41, %v2359_v39 }
  0x92   :  { %v2305_v41 = vld [vmem:[%s5318_s1 + $0xae0] sm:$0xff] }
  0x93   :  { %2840 = vmatpush1.bf16.msra.mxu0 %v2839_v58  ;;  %v2320_v58 = vld [vmem:[%s5318_s1 + $0xb58] sm:$0xff] }
  0x94   :  { %2876 = vmatpush1.bf16.msra.mxu1 %v2875_v60  ;;  %2842 = vmatprep.subr.bf16.mxu0 %v2841_v61  ;;  %v2895_v60 = vpack.c.bf16 %v2301_v52, %v2293_v51  ;;  %v2931_v61 = vpack.c.bf16 %v2303_v55, %v2295_v53  ;;  %v2383_v52 = vld [vmem:[%s5318_s1 + $0xd50] sm:$0xff]  ;;  %v2390_v53 = vld [vmem:[%s5318_s1 + $0xd88] sm:$0xff]  ;;  %v2392_v55 = vld [vmem:[%s5318_s1 + $0xd98] sm:$0xff] }
  0x95   :  { %2878 = vmatprep.subr.bf16.mxu1 %v2877_v1 }
  0x97   :  { %2844 = vmatpush1.bf16.msra.mxu0 %v2843_v7  ;;  %v2336_v7 = vld [vmem:[%s5318_s1 + $0xbd8] sm:$0xff] }
  0x98   :  { %2880 = vmatpush1.bf16.msra.mxu1 %v2879_v8  ;;  %2846 = vmatprep.subr.bf16.mxu0 %v2845_v9  ;;  %v2935_v9 = vpack.c.bf16 %v2319_v2, %v2311_v0  ;;  %v2937_v14 = vpack.c.bf16 %v2336_v7, %v2328_v6  ;;  %v2406_v2 = vld [vmem:[%s5318_s1 + $0xe08] sm:$0x3f]  ;;  %v2268_v7 = vld [vmem:[%s5318_s1 + $0x9b8] sm:$0xff] }
  0x99   :  { %2882 = vmatprep.subr.bf16.mxu1 %v2881_v12  ;;  %v2333_v12 = vld [vmem:[%s5318_s1 + $0xbc0] sm:$0xff]  ;;  %v2274_v6 = vld [vmem:[%s5318_s1 + $0x9e8] sm:$0xff] }
  0x9a   :  { %v2903_v20 = vpack.c.bf16 %v2333_v12, %v2325_v11  ;;  %v2405_v11 = vld [vmem:[%s5318_s1 + $0xe00] sm:$0x3f]  ;;  %v2267_v12 = vld [vmem:[%s5318_s1 + $0x9b0] sm:$0xff] }
  0x9b   :  { %2848 = vmatpush1.bf16.msra.mxu0 %v2847_v15  ;;  %v2335_v15 = vld [vmem:[%s5318_s1 + $0xbd0] sm:$0xff] }
  0x9c   :  { %2884 = vmatpush1.bf16.msra.mxu1 %v2883_v16  ;;  %2253 = vmatprep.subr.msk.mxu0 %vm177_vm1, %v2242_v17  ;;  %v2342_v16 = vld [vmem:[%s5318_s1 + $0xc08] sm:$0xff]  ;;  %v2939_v21 = vpack.c.bf16 %v2335_v15, %v2327_v13  ;;  %v2275_v13 = vld [vmem:[%s5318_s1 + $0x9f0] sm:$0xff]  ;;  %v2957_v15 = vpack.c.bf16 %v2274_v6, %v2266_v4 }
  0x9d   :  { %2257 = vmatprep.subr.msk.mxu1 %vm177_vm1, %v2244_v18  ;;  %v2350_v17 = vld [vmem:[%s5318_s1 + $0xc48] sm:$0xff]  ;;  %v2344_v18 = vld [vmem:[%s5318_s1 + $0xc18] sm:$0xff] }
  0x9e   :  { %v2905_v22 = vpack.c.bf16 %v2350_v17, %v2342_v16  ;;  %v2941_v28 = vpack.c.bf16 %v2352_v19, %v2344_v18  ;;  %v2282_v16 = vld [vmem:[%s5318_s1 + $0xa28] sm:$0xff] }
  0x9f   :  { %2254 = vmatpush1.msk.msra.mxu0 %vm177_vm1, %v2241_v25  ;;  %v2343_v25 = vld [vmem:[%s5318_s1 + $0xc10] sm:$0xff]  ;;  %v2290_v19 = vld [vmem:[%s5318_s1 + $0xa68] sm:$0xff] }
  0xa0   :  { %2258 = vmatpush1.msk.msra.mxu1 %vm177_vm1, %v2243_v27  ;;  %906 = vmatmul.mubr.f32.vlgmr.msra.gmra.mrb[12].mxu0 %v3472_v59  ;;  %v2358_v27 = vld [vmem:[%s5318_s1 + $0xc88] sm:$0xff]  ;;  %v2943_v34 = vpack.c.bf16 %v2351_v26, %v2343_v25  ;;  %v2283_v25 = vld [vmem:[%s5318_s1 + $0xa30] sm:$0xff] }
  0xa1   :  { %983 = vmatmul.mubr.f32.vlgmr.msra.gmra.mrb[12].mxu1 %v3472_v59  ;;  %2886 = vmatprep.subr.bf16.mxu0 %v2885_v29  ;;  %v2893_v59 = vpack.c.bf16 %v2302_v44, %v2294_v43  ;;  %v2366_v29 = vld [vmem:[%s5318_s1 + $0xcc8] sm:$0xff]  ;;  %v2376_v44 = vld [vmem:[%s5318_s1 + $0xd18] sm:$0xff]  ;;  %v2291_v26 = vld [vmem:[%s5318_s1 + $0xa70] sm:$0xff] }
  0xa2   :  { %2922 = vmatprep.subr.bf16.mxu1 %v2921_v32  ;;  %2888 = vmatpush1.bf16.msra.mxu0 %v2887_v33  ;;  %v2368_v32 = vld [vmem:[%s5318_s1 + $0xcd8] sm:$0xff]  ;;  %v2907_v33 = vpack.c.bf16 %v2349_v24, %v2341_v23  ;;  %v2909_v35 = vpack.c.bf16 %v2366_v29, %v2358_v27  ;;  %v2382_v43 = vld [vmem:[%s5318_s1 + $0xd48] sm:$0xff]  ;;  %v2281_v23 = vld [vmem:[%s5318_s1 + $0xa20] sm:$0xff] }
  0xa3   :  { %2924 = vmatpush1.bf16.msra.mxu1 %v2923_v37  ;;  %2256 = vmatprep.mubr.msk.f32.mxu0 %vm170_vm0, %v3544_v31  ;;  %v2365_v37 = vld [vmem:[%s5318_s1 + $0xcc0] sm:$0xff]  ;;  %v2945_v40 = vpack.c.bf16 %v2368_v32, %v2360_v30  ;;  %v2298_v27 = vld [vmem:[%s5318_s1 + $0xaa8] sm:$0xff]  ;;  %v2961_v30 = vpack.c.bf16 %v2290_v19, %v2282_v16  ;;  %v2300_v32 = vld [vmem:[%s5318_s1 + $0xab8] sm:$0xff] }
  0xa4   :  { %2260 = vmatprep.mubr.msk.f32.mxu1 %vm170_vm0, %v3544_v31  ;;  %912 = vmatmul.mubr.f32.gmra.mrb[14].mxu0 %v3568_v38  ;;  %v2312_v31 = vld [vmem:[%s5318_s1 + $0xb18] sm:$0xff]  ;;  %v2911_v46 = vpack.c.bf16 %v2365_v37, %v2357_v36  ;;  %v2289_v24 = vld [vmem:[%s5318_s1 + $0xa60] sm:$0xff]  ;;  %v2306_v29 = vld [vmem:[%s5318_s1 + $0xae8] sm:$0xff]  ;;  %v2999_v37 = vpack.c.bf16 %v2291_v26, %v2283_v25 }
  0xa5   :  { %989 = vmatmul.mubr.f32.gmra.mrb[14].mxu1 %v3568_v38  ;;  %2890 = vmatprep.subr.bf16.mxu0 %v2889_v45  ;;  %v2309_v38 = vld [vmem:[%s5318_s1 + $0xb00] sm:$0xff]  ;;  %v2933_v1 = vpack.c.bf16 %v2320_v58, %v2312_v31  ;;  %v2384_v45 = vld [vmem:[%s5318_s1 + $0xd58] sm:$0xff]  ;;  %v2965_v39 = vpack.c.bf16 %v2306_v29, %v2298_v27  ;;  %v2346_v4 = vld [vmem:[%s5318_s1 + $0xc28] sm:$0xff] }
  0xa6   :  { %2926 = vmatprep.subr.bf16.mxu1 %v2925_v48  ;;  %2892 = vmatpush1.bf16.msra.mxu0 %v2891_v49  ;;  %v2899_v8 = vpack.c.bf16 %v2317_v63, %v2309_v38  ;;  %v2913_v48 = vpack.c.bf16 %v2382_v43, %v2374_v42  ;;  %v2373_v49 = vld [vmem:[%s5318_s1 + $0xd00] sm:$0xff]  ;;  %v2949_v51 = vpack.c.bf16 %v2384_v45, %v2376_v44  ;;  %v2391_v38 = vld [vmem:[%s5318_s1 + $0xd90] sm:$0xff]  ;;  %v4507_v36 = vld [vmem:[%s5319_s0 + $0x18] sm:$0xff] }
  0xa7   :  { %2928 = vmatpush1.bf16.msra.mxu1 %v2927_v50  ;;  %2894 = vmatprep.subr.bf16.mxu0 %v2893_v59  ;;  %v2381_v50 = vld [vmem:[%s5318_s1 + $0xd40] sm:$0xff]  ;;  %v2375_v59 = vld [vmem:[%s5318_s1 + $0xd10] sm:$0xff]  ;;  %v2354_v6 = vld [vmem:[%s5318_s1 + $0xc68] sm:$0xff] }
  0xa8   :  { %2930 = vmatprep.subr.bf16.mxu1 %v2929_v54  ;;  %2415 = vmatprep.mubr.msk.f32.mxu0 %vm170_vm0, %v4301_v5  ;;  %v2398_v54 = vld [vmem:[%s5318_s1 + $0xdc8] sm:$0xff]  ;;  %v2915_v57 = vpack.c.bf16 %v2381_v50, %v2373_v49  ;;  %v2951_v31 = vpack.c.bf16 %v2383_v52, %v2375_v59  ;;  %v2399_v63 = vld [vmem:[%s5318_s1 + $0xdd0] sm:$0xff]  ;;  %v2324_v49 = vld [vmem:[%s5318_s1 + $0xb78] sm:$0xff] }
  0xa9   :  { %2419 = vmatprep.mubr.msk.f32.mxu1 %vm170_vm0, %v4301_v5  ;;  %v2917_v58 = vpack.c.bf16 %v2398_v54, %v2390_v53  ;;  %v2299_v42 = vld [vmem:[%s5318_s1 + $0xab0] sm:$0xff]  ;;  %v2313_v52 = vld [vmem:[%s5318_s1 + $0xb20] sm:$0xff] }
  0xaa   :  { %2896 = vmatpush1.bf16.msra.mxu0 %v2895_v60  ;;  %v2389_v60 = vld [vmem:[%s5318_s1 + $0xd80] sm:$0xff]  ;;  %v4525_v43 = vld [vmem:[%s5319_s0 + $0x10] sm:$0xff] }
  0xab   :  { %2932 = vmatpush1.bf16.msra.mxu1 %v2931_v61  ;;  %2898 = vmatprep.subr.bf16.mxu0 %v2897_v62  ;;  %v2397_v61 = vld [vmem:[%s5318_s1 + $0xdc0] sm:$0xff]  ;;  %v2953_v62 = vpack.c.bf16 %v2400_v56, %v2392_v55  ;;  %v2307_v45 = vld [vmem:[%s5318_s1 + $0xaf0] sm:$0xff] }
  0xac   :  { %2934 = vmatprep.subr.bf16.mxu1 %v2933_v1  ;;  %v2919_v0 = vpack.c.bf16 %v2397_v61, %v2389_v60  ;;  %v2955_v1 = vpack.c.bf16 %v2399_v63, %v2391_v38  ;;  %v3003_v59 = vpack.c.bf16 %v2307_v45, %v2299_v42  ;;  %v2321_v53 = vld [vmem:[%s5318_s1 + $0xb60] sm:$0xff]  ;;  %v2315_v54 = vld [vmem:[%s5318_s1 + $0xb30] sm:$0xff]  ;;  %v2340_v60 = vld [vmem:[%s5318_s1 + $0xbf8] sm:$0xff] }
  0xad   :  { %v2323_v56 = vld [vmem:[%s5318_s1 + $0xb70] sm:$0xff]  ;;  %v2971_v61 = vpack.c.bf16 %v2321_v53, %v2313_v52  ;;  %v2329_v63 = vld [vmem:[%s5318_s1 + $0xba0] sm:$0xff] }
  0xae   :  { %2900 = vmatpush1.bf16.msra.mxu0 %v2899_v8  ;;  %v2276_v8 = vld [vmem:[%s5318_s1 + $0x9f8] sm:$0xff]  ;;  %v2347_v16 = vld [vmem:[%s5318_s1 + $0xc30] sm:$0xff]  ;;  %v2361_v27 = vld [vmem:[%s5318_s1 + $0xca0] sm:$0xff] }
  0xaf   :  { %2936 = vmatpush1.bf16.msra.mxu1 %v2935_v9  ;;  %2902 = vmatprep.subr.bf16.mxu0 %v2901_v10  ;;  %v2265_v9 = vld [vmem:[%s5318_s1 + $0x9a0] sm:$0xff]  ;;  %v2993_v17 = vpack.c.bf16 %v2276_v8, %v2268_v7  ;;  %v2348_v7 = vld [vmem:[%s5318_s1 + $0xc38] sm:$0xff]  ;;  %v2355_v19 = vld [vmem:[%s5318_s1 + $0xc70] sm:$0xff] }
  0xb0   :  { %2938 = vmatprep.subr.bf16.mxu1 %v2937_v14  ;;  %v2273_v10 = vld [vmem:[%s5318_s1 + $0x9e0] sm:$0xff]  ;;  %v2407_v14 = vld [vmem:[%s5318_s1 + $0xe10] sm:$0x3f]  ;;  %v2356_v8 = vld [vmem:[%s5318_s1 + $0xc78] sm:$0xff]  ;;  %v3015_v25 = vpack.c.bf16 %v2355_v19, %v2347_v16 }
  0xb1   :  { %v2959_v18 = vpack.c.bf16 %v2273_v10, %v2265_v9  ;;  %v3179_v9 = vmov 0   ;;  %v2013_v10 = vld [vmem:[%s5320_s2] sm:$0xff]  ;;  %v2456_v16 = vld [vmem:[%s5318_s1 + $0xf18] sm:$0xff] }
  0xb2   :  { %2904 = vmatpush1.bf16.msra.mxu0 %v2903_v20  ;;  %v2284_v20 = vld [vmem:[%s5318_s1 + $0xa38] sm:$0xff]  ;;  %3174 = vset.pattern.permute.xlu0 %v3179_v9  ;;  %v2369_v29 = vld [vmem:[%s5318_s1 + $0xce0] sm:$0xff]  ;;  %v2411_v9 = vld [vmem:[%s5318_s1 + $0xe30] sm:$0x3f] }
  0xb3   :  { %2940 = vmatpush1.bf16.msra.mxu1 %v2939_v21  ;;  %2906 = vmatprep.subr.bf16.mxu0 %v2905_v22  ;;  %v2292_v21 = vld [vmem:[%s5318_s1 + $0xa78] sm:$0xff]  ;;  %v2995_v22 = vpack.c.bf16 %v2275_v13, %v2267_v12  ;;  %v2345_v12 = vld [vmem:[%s5318_s1 + $0xc20] sm:$0xff] }
  0xb4   :  { %2942 = vmatprep.subr.bf16.mxu1 %v2941_v28  ;;  %v4485_v28 = vld [vmem:[%s5319_s0] sm:$0xff]  ;;  %2017 = vperm.xlu0 %3174, %v2013_v10  }
  0xb5   :  { %v2385_v45 = vld [vmem:[%s5318_s1 + $0xd60] sm:$0xff] }
  0xb6   :  { %2908 = vmatpush1.bf16.msra.mxu0 %v2907_v33  ;;  %v2308_v33 = vld [vmem:[%s5318_s1 + $0xaf8] sm:$0xff]  ;;  %v2453_v19 = vld [vmem:[%s5318_s1 + $0xf00] sm:$0xff] }
  0xb7   :  { %2944 = vmatpush1.bf16.msra.mxu1 %v2943_v34  ;;  %2910 = vmatprep.subr.bf16.mxu0 %v2909_v35  ;;  %v2997_v34 = vpack.c.bf16 %v2292_v21, %v2284_v20  ;;  %v2963_v35 = vpack.c.bf16 %v2289_v24, %v2281_v23  ;;  %v3001_v44 = vpack.c.bf16 %v2308_v33, %v2300_v32  ;;  %v2362_v20 = vld [vmem:[%s5318_s1 + $0xca8] sm:$0xff]  ;;  %v2372_v23 = vld [vmem:[%s5318_s1 + $0xcf8] sm:$0xff]  ;;  %v2371_v33 = vld [vmem:[%s5318_s1 + $0xcf0] sm:$0xff] }
  0xb8   :  { %2946 = vmatprep.subr.bf16.mxu1 %v2945_v40  ;;  %v2297_v40 = vld [vmem:[%s5318_s1 + $0xaa0] sm:$0xff]  ;;  %v2370_v21 = vld [vmem:[%s5318_s1 + $0xce8] sm:$0xff] }
  0xb9   :  { %v2967_v50 = vpack.c.bf16 %v2305_v41, %v2297_v40  ;;  %v2981_v26 = vpack.c.bf16 %v2370_v21, %v2362_v20  ;;  %v2983_v40 = vpack.c.bf16 %v2369_v29, %v2361_v27  ;;  %v2447_v20 = vld [vmem:[%s5318_s1 + $0xed0] sm:$0xff] }
  0xba   :  { %2912 = vmatpush1.bf16.msra.mxu0 %v2911_v46  ;;  %v2314_v46 = vld [vmem:[%s5318_s1 + $0xb28] sm:$0xff]  ;;  %v2455_v21 = vld [vmem:[%s5318_s1 + $0xf10] sm:$0xff] }
  0xbb   :  { %2948 = vmatpush1.bf16.msra.mxu1 %v2947_v47  ;;  %2914 = vmatprep.subr.bf16.mxu0 %v2913_v48  ;;  %v2322_v47 = vld [vmem:[%s5318_s1 + $0xb68] sm:$0xff]  ;;  %v2316_v48 = vld [vmem:[%s5318_s1 + $0xb38] sm:$0xff] }
  0xbc   :  { %2950 = vmatprep.subr.bf16.mxu1 %v2949_v51  ;;  %v2969_v51 = vpack.c.bf16 %v2322_v47, %v2314_v46  ;;  %v3005_v55 = vpack.c.bf16 %v2324_v49, %v2316_v48  ;;  %v2379_v46 = vld [vmem:[%s5318_s1 + $0xd30] sm:$0xff]  ;;  %v2394_v49 = vld [vmem:[%s5318_s1 + $0xda8] sm:$0xff] }
  0xbd   :  { %v2387_v48 = vld [vmem:[%s5318_s1 + $0xd70] sm:$0xff] }
  0xbe   :  { %2916 = vmatpush1.bf16.msra.mxu0 %v2915_v57  ;;  %v2330_v57 = vld [vmem:[%s5318_s1 + $0xba8] sm:$0xff]  ;;  %v3023_v53 = vpack.c.bf16 %v2387_v48, %v2379_v46  ;;  %v2477_v48 = vld [vmem:[%s5318_s1 + $0xfc0] sm:$0xff] }
  0xbf   :  { %2952 = vmatpush1.bf16.msra.mxu1 %v2951_v31  ;;  %2918 = vmatprep.subr.bf16.mxu0 %v2917_v58  ;;  %v2338_v31 = vld [vmem:[%s5318_s1 + $0xbe8] sm:$0xff]  ;;  %v2332_v58 = vld [vmem:[%s5318_s1 + $0xbb8] sm:$0xff] }
  0xc0   :  { %2954 = vmatprep.subr.bf16.mxu1 %v2953_v62  ;;  %v3007_v62 = vpack.c.bf16 %v2323_v56, %v2315_v54  ;;  %v2973_v38 = vpack.c.bf16 %v2338_v31, %v2330_v57  ;;  %v2401_v56 = vld [vmem:[%s5318_s1 + $0xde0] sm:$0xff]  ;;  %v2395_v31 = vld [vmem:[%s5318_s1 + $0xdb0] sm:$0xff] }
  0xc2   :  { %2920 = vmatpush1.bf16.msra.mxu0 %v2919_v0  ;;  %v2337_v0 = vld [vmem:[%s5318_s1 + $0xbe0] sm:$0xff] }
  0xc3   :  { %2956 = vmatpush1.bf16.msra.mxu1 %v2955_v1  ;;  %2413 = vmatprep.subr.msk.mxu0 %vm177_vm1, %v2406_v2  ;;  %v2331_v1 = vld [vmem:[%s5318_s1 + $0xbb0] sm:$0xff]  ;;  %v3009_v2 = vpack.c.bf16 %v2340_v60, %v2332_v58 }
  0xc4   :  { %2417 = vmatprep.subr.msk.mxu1 %vm177_vm1, %v2408_v3  ;;  %v2339_v3 = vld [vmem:[%s5318_s1 + $0xbf0] sm:$0xff] }
  0xc5   :  { %v3011_v13 = vpack.c.bf16 %v2339_v3, %v2331_v1  ;;  %v2403_v58 = vld [vmem:[%s5318_s1 + $0xdf0] sm:$0xff]  ;;  %v2432_v1 = vld [vmem:[%s5318_s1 + $0xe58] sm:$0xff]  ;;  %v2429_v3 = vld [vmem:[%s5318_s1 + $0xe40] sm:$0xff] }
  0xc6   :  { %2414 = vmatpush1.msk.msra.mxu0 %vm177_vm1, %v2405_v11  ;;  %v2975_v11 = vpack.c.bf16 %v2337_v0, %v2329_v63  ;;  %v2430_v63 = vld [vmem:[%s5318_s1 + $0xe48] sm:$0xff] }
  0xc7   :  { %2418 = vmatpush1.msk.msra.mxu1 %vm177_vm1, %v2407_v14  ;;  %1253 = vmatmul.mubr.f32.vlgmr.msra.gmra.mrb[16].mxu0 %v4485_v28  ;;  %v2977_v14 = vpack.c.bf16 %v2354_v6, %v2346_v4  ;;  %v2438_v0 = vld [vmem:[%s5318_s1 + $0xe88] sm:$0xff]  ;;  %v2437_v4 = vld [vmem:[%s5318_s1 + $0xe80] sm:$0xff] }
  0xc8   :  { %1330 = vmatmul.mubr.f32.vlgmr.msra.gmra.mrb[16].mxu1 %v4485_v28  ;;  %2958 = vmatprep.subr.bf16.mxu0 %v2957_v15  ;;  %v2353_v15 = vld [vmem:[%s5318_s1 + $0xc60] sm:$0xff]  ;;  %v3029_v10 = vpack.c.bf16 %v2438_v0, %v2430_v63  ;;  %v2510_v63 = vld [vmem:[%s5318_s1 + $0x10c8] sm:$0xff] }
  0xc9   :  { %2994 = vmatprep.subr.bf16.mxu1 %v2993_v17  ;;  %2960 = vmatpush1.bf16.msra.mxu0 %v2959_v18  ;;  %v2014_v17 = vld [vmem:[%s5320_s2 + $0x8] sm:$0xff]  ;;  %v3013_v18 = vpack.c.bf16 %v2356_v8, %v2348_v7  ;;  %v2979_v24 = vpack.c.bf16 %v2353_v15, %v2345_v12  ;;  %v2409_v6 = vld [vmem:[%s5318_s1 + $0xe20] sm:$0x3f]  ;;  %v2431_v7 = vld [vmem:[%s5318_s1 + $0xe50] sm:$0xff] }
  0xca   :  { %2996 = vmatpush1.bf16.msra.mxu1 %v2995_v22  ;;  %2416 = vmatprep.mubr.msk.f32.mxu0 %vm170_vm0, %v4507_v36  ;;  %v2364_v22 = vld [vmem:[%s5318_s1 + $0xcb8] sm:$0xff]  ;;  %v2439_v8 = vld [vmem:[%s5318_s1 + $0xe90] sm:$0xff]  ;;  %v2518_v0 = vld [vmem:[%s5318_s1 + $0x1108] sm:$0xff] }
  0xcb   :  { %2420 = vmatprep.mubr.msk.f32.mxu1 %vm170_vm0, %v4507_v36  ;;  %1259 = vmatmul.mubr.f32.gmra.mrb[18].mxu0 %v4525_v43  ;;  %v3017_v32 = vpack.c.bf16 %v2372_v23, %v2364_v22  ;;  %v2448_v15 = vld [vmem:[%s5318_s1 + $0xed8] sm:$0xff]  ;;  %v2462_v22 = vld [vmem:[%s5318_s1 + $0xf48] sm:$0xff] }
  0xcc   :  { %1336 = vmatmul.mubr.f32.gmra.mrb[18].mxu1 %v4525_v43  ;;  %2962 = vmatprep.subr.bf16.mxu0 %v2961_v30  ;;  %v2363_v30 = vld [vmem:[%s5318_s1 + $0xcb0] sm:$0xff]  ;;  %v2470_v23 = vld [vmem:[%s5318_s1 + $0xf88] sm:$0xff]  ;;  %v3069_v27 = vpack.c.bf16 %v2456_v16, %v2448_v15 }
  0xcd   :  { %2998 = vmatprep.subr.bf16.mxu1 %v2997_v34  ;;  %2964 = vmatpush1.bf16.msra.mxu0 %v2963_v35  ;;  %v2378_v34 = vld [vmem:[%s5318_s1 + $0xd28] sm:$0xff]  ;;  %v3019_v41 = vpack.c.bf16 %v2371_v33, %v2363_v30  ;;  %v3071_v30 = vpack.c.bf16 %v2455_v21, %v2447_v20  ;;  %v2461_v33 = vld [vmem:[%s5318_s1 + $0xf40] sm:$0xff] }
  0xce   :  { %3000 = vmatpush1.bf16.msra.mxu1 %v2999_v37  ;;  %2966 = vmatprep.subr.bf16.mxu0 %v2965_v39  ;;  %v2386_v35 = vld [vmem:[%s5318_s1 + $0xd68] sm:$0xff]  ;;  %v2380_v37 = vld [vmem:[%s5318_s1 + $0xd38] sm:$0xff] }
  0xcf   :  { %3002 = vmatprep.subr.bf16.mxu1 %v3001_v44  ;;  %2423 = vmatprep.mubr.msk.f32.mxu0 %vm170_vm0, %v4301_v5  ;;  %v2388_v39 = vld [vmem:[%s5318_s1 + $0xd78] sm:$0xff]  ;;  %v2985_v42 = vpack.c.bf16 %v2386_v35, %v2378_v34  ;;  %v2377_v44 = vld [vmem:[%s5318_s1 + $0xd20] sm:$0xff]  ;;  %v2463_v35 = vld [vmem:[%s5318_s1 + $0xf50] sm:$0xff] }
  0xd0   :  { %2427 = vmatprep.mubr.msk.f32.mxu1 %vm170_vm0, %v4301_v5  ;;  %2022 = vperm.xlu0 %3174, %v2014_v17   ;;  %v3021_v47 = vpack.c.bf16 %v2388_v39, %v2380_v37  ;;  %v2987_v52 = vpack.c.bf16 %v2385_v45, %v2377_v44  ;;  %v3067_v17 = vpack.c.bf16 %v2439_v8, %v2431_v7  ;;  %v2469_v34 = vld [vmem:[%s5318_s1 + $0xf80] sm:$0xff]  ;;  %v2471_v39 = vld [vmem:[%s5318_s1 + $0xf90] sm:$0xff]  ;;  %v2488_v44 = vld [vmem:[%s5318_s1 + $0x1018] sm:$0xff] }
  0xd1   :  { %2968 = vmatpush1.bf16.msra.mxu0 %v2967_v50  ;;  %v2402_v50 = vld [vmem:[%s5318_s1 + $0xde8] sm:$0xff]  ;;  %v3039_v45 = vpack.c.bf16 %v2469_v34, %v2461_v33  ;;  %v3075_v46 = vpack.c.bf16 %v2471_v39, %v2463_v35  ;;  %v2509_v7 = vld [vmem:[%s5318_s1 + $0x10c0] sm:$0xff]  ;;  %v2552_v33 = vld [vmem:[%s5318_s1 + $0x1218] sm:$0xff] }
  0xd2   :  { %3004 = vmatpush1.bf16.msra.mxu1 %v3003_v59  ;;  %2970 = vmatprep.subr.bf16.mxu0 %v2969_v51  ;;  %v2396_v59 = vld [vmem:[%s5318_s1 + $0xdb8] sm:$0xff]  ;;  %v2989_v54 = vpack.c.bf16 %v2402_v50, %v2394_v49  ;;  %v2485_v49 = vld [vmem:[%s5318_s1 + $0x1000] sm:$0xff]  ;;  %v2479_v50 = vld [vmem:[%s5318_s1 + $0xfd0] sm:$0xff] }
  0xd3   :  { %3006 = vmatprep.subr.bf16.mxu1 %v3005_v55  ;;  %v2404_v51 = vld [vmem:[%s5318_s1 + $0xdf8] sm:$0xff]  ;;  %v2393_v55 = vld [vmem:[%s5318_s1 + $0xda0] sm:$0xff] }
  0xd4   :  { %v3025_v57 = vpack.c.bf16 %v2404_v51, %v2396_v59  ;;  %v2991_v60 = vpack.c.bf16 %v2401_v56, %v2393_v55  ;;  %v2487_v51 = vld [vmem:[%s5318_s1 + $0x1010] sm:$0xff]  ;;  %v2504_v55 = vld [vmem:[%s5318_s1 + $0x1098] sm:$0xff]  ;;  %v3043_v56 = vpack.c.bf16 %v2485_v49, %v2477_v48  ;;  %v2517_v8 = vld [vmem:[%s5318_s1 + $0x1100] sm:$0xff] }
  0xd5   :  { %2972 = vmatpush1.bf16.msra.mxu0 %v2971_v61  ;;  %v3027_v61 = vpack.c.bf16 %v2403_v58, %v2395_v31  ;;  %v2493_v58 = vld [vmem:[%s5318_s1 + $0x1040] sm:$0xff]  ;;  %v2568_v48 = vld [vmem:[%s5318_s1 + $0x1298] sm:$0xff] }
  0xd6   :  { %3008 = vmatpush1.bf16.msra.mxu1 %v3007_v62  ;;  %2974 = vmatprep.subr.bf16.mxu0 %v2973_v38  ;;  %v2410_v62 = vld [vmem:[%s5318_s1 + $0xe28] sm:$0x3f]  ;;  %v2412_v38 = vld [vmem:[%s5318_s1 + $0xe38] sm:$0x3f]  ;;  %v2541_v39 = vld [vmem:[%s5318_s1 + $0x11c0] sm:$0xff] }
  0xd7   :  { %3010 = vmatprep.subr.bf16.mxu1 %v3009_v2  ;;  %v2440_v2 = vld [vmem:[%s5318_s1 + $0xe98] sm:$0xff] }
  0xd8   :  { %v3065_v12 = vpack.c.bf16 %v2440_v2, %v2432_v1  ;;  %v2512_v1 = vld [vmem:[%s5318_s1 + $0x10d8] sm:$0xff] }
  0xd9   :  { %2976 = vmatpush1.bf16.msra.mxu0 %v2975_v11  ;;  %v2446_v11 = vld [vmem:[%s5318_s1 + $0xec8] sm:$0xff]  ;;  %v2520_v2 = vld [vmem:[%s5318_s1 + $0x1118] sm:$0xff] }
  0xda   :  { %3012 = vmatpush1.bf16.msra.mxu1 %v3011_v13  ;;  %2978 = vmatprep.subr.bf16.mxu0 %v2977_v14  ;;  %v3031_v13 = vpack.c.bf16 %v2437_v4, %v2429_v3  ;;  %v2454_v14 = vld [vmem:[%s5318_s1 + $0xf08] sm:$0xff] }
  0xdb   :  { %3014 = vmatprep.subr.bf16.mxu1 %v3013_v18  ;;  %v2445_v18 = vld [vmem:[%s5318_s1 + $0xec0] sm:$0xff] }
  0xdc   :  { %v3035_v29 = vpack.c.bf16 %v2453_v19, %v2445_v18  ;;  %v2536_v18 = vld [vmem:[%s5318_s1 + $0x1198] sm:$0xff]  ;;  %v3051_v19 = vpack.c.bf16 %v2517_v8, %v2509_v7  ;;  %v2435_v7 = vld [vmem:[%s5318_s1 + $0xe70] sm:$0xff] }
  0xdd   :  { %2980 = vmatpush1.bf16.msra.mxu0 %v2979_v24  ;;  %v3033_v24 = vpack.c.bf16 %v2454_v14, %v2446_v11  ;;  %v2534_v14 = vld [vmem:[%s5318_s1 + $0x1188] sm:$0xff]  ;;  %v2443_v8 = vld [vmem:[%s5318_s1 + $0xeb0] sm:$0xff] }
  0xde   :  { %3016 = vmatpush1.bf16.msra.mxu1 %v3015_v25  ;;  %2982 = vmatprep.subr.bf16.mxu0 %v2981_v26  ;;  %v2464_v25 = vld [vmem:[%s5318_s1 + $0xf58] sm:$0xff] }
  0xdf   :  { %3018 = vmatprep.subr.bf16.mxu1 %v3017_v32  ;;  %v2472_v26 = vld [vmem:[%s5318_s1 + $0xf98] sm:$0xff]  ;;  %v3037_v32 = vpack.c.bf16 %v2470_v23, %v2462_v22  ;;  %v2525_v23 = vld [vmem:[%s5318_s1 + $0x1140] sm:$0xff] }
  0xe0   :  { %v3073_v37 = vpack.c.bf16 %v2472_v26, %v2464_v25  ;;  %v2527_v25 = vld [vmem:[%s5318_s1 + $0x1150] sm:$0xff] }
  0xe1   :  { %2984 = vmatpush1.bf16.msra.mxu0 %v2983_v40  ;;  %v2478_v40 = vld [vmem:[%s5318_s1 + $0xfc8] sm:$0xff] }
  0xe2   :  { %3020 = vmatpush1.bf16.msra.mxu1 %v3019_v41  ;;  %2986 = vmatprep.subr.bf16.mxu0 %v2985_v42  ;;  %v2486_v41 = vld [vmem:[%s5318_s1 + $0x1008] sm:$0xff]  ;;  %v2480_v42 = vld [vmem:[%s5318_s1 + $0xfd8] sm:$0xff] }
  0xe3   :  { %3022 = vmatprep.subr.bf16.mxu1 %v3021_v47  ;;  %v3041_v47 = vpack.c.bf16 %v2486_v41, %v2478_v40  ;;  %v3077_v59 = vpack.c.bf16 %v2488_v44, %v2480_v42  ;;  %v2549_v40 = vld [vmem:[%s5318_s1 + $0x1200] sm:$0xff]  ;;  %v2543_v41 = vld [vmem:[%s5318_s1 + $0x11d0] sm:$0xff] }
  0xe4   :  { %v2551_v44 = vld [vmem:[%s5318_s1 + $0x1210] sm:$0xff]  ;;  %v3059_v49 = vpack.c.bf16 %v2549_v40, %v2541_v39  ;;  %v2465_v39 = vld [vmem:[%s5318_s1 + $0xf60] sm:$0xff] }
  0xe5   :  { %2988 = vmatpush1.bf16.msra.mxu0 %v2987_v52  ;;  %v2494_v52 = vld [vmem:[%s5318_s1 + $0x1048] sm:$0xff]  ;;  %v2473_v40 = vld [vmem:[%s5318_s1 + $0xfa0] sm:$0xff] }
  0xe6   :  { %3024 = vmatpush1.bf16.msra.mxu1 %v3023_v53  ;;  %2990 = vmatprep.subr.bf16.mxu0 %v2989_v54  ;;  %v2502_v53 = vld [vmem:[%s5318_s1 + $0x1088] sm:$0xff]  ;;  %v2496_v54 = vld [vmem:[%s5318_s1 + $0x1058] sm:$0xff] }
  0xe7   :  { %3026 = vmatprep.subr.bf16.mxu1 %v3025_v57  ;;  %v3079_v57 = vpack.c.bf16 %v2487_v51, %v2479_v50  ;;  %v3045_v31 = vpack.c.bf16 %v2502_v53, %v2494_v52  ;;  %v2557_v52 = vld [vmem:[%s5318_s1 + $0x1240] sm:$0xff] }
  0xe8   :  { %v2565_v53 = vld [vmem:[%s5318_s1 + $0x1280] sm:$0xff] }
  0xe9   :  { %2992 = vmatpush1.bf16.msra.mxu0 %v2991_v60  ;;  %v2501_v60 = vld [vmem:[%s5318_s1 + $0x1080] sm:$0xff] }
  0xea   :  { %3028 = vmatpush1.bf16.msra.mxu1 %v3027_v61  ;;  %2421 = vmatprep.subr.msk.mxu0 %vm177_vm1, %v2410_v62  ;;  %v2495_v61 = vld [vmem:[%s5318_s1 + $0x1050] sm:$0xff]  ;;  %v3081_v62 = vpack.c.bf16 %v2504_v55, %v2496_v54  ;;  %v3047_v3 = vpack.c.bf16 %v2501_v60, %v2493_v58  ;;  %v3063_v60 = vpack.c.bf16 %v2565_v53, %v2557_v52  ;;  %v2481_v52 = vld [vmem:[%s5318_s1 + $0xfe0] sm:$0xff] }
  0xeb   :  { %2425 = vmatprep.subr.msk.mxu1 %vm177_vm1, %v2412_v38  ;;  %v2503_v38 = vld [vmem:[%s5318_s1 + $0x1090] sm:$0xff]  ;;  %v2489_v53 = vld [vmem:[%s5318_s1 + $0x1020] sm:$0xff] }
  0xec   :  { %v3083_v4 = vpack.c.bf16 %v2503_v38, %v2495_v61  ;;  %v2576_v38 = vld [vmem:[%s5318_s1 + $0x12d8] sm:$0x3f] }
  0xed   :  { %2422 = vmatpush1.msk.msra.mxu0 %vm177_vm1, %v2409_v6  ;;  %v3049_v6 = vpack.c.bf16 %v2518_v0, %v2510_v63  ;;  %v2434_v63 = vld [vmem:[%s5318_s1 + $0xe68] sm:$0xff] }
  0xee   :  { %2426 = vmatpush1.msk.msra.mxu1 %vm177_vm1, %v2411_v9  ;;  %1407 = vmatmul.mubr.f32.vlgmr.msra.gmra.mrb[20].mxu0 %v4485_v28  ;;  %v2511_v9 = vld [vmem:[%s5318_s1 + $0x10d0] sm:$0xff]  ;;  %v2442_v0 = vld [vmem:[%s5318_s1 + $0xea8] sm:$0xff] }
  0xef   :  { %1484 = vmatmul.mubr.f32.vlgmr.msra.gmra.mrb[20].mxu1 %v4485_v28  ;;  %3030 = vmatprep.subr.bf16.mxu0 %v3029_v10  ;;  %v3085_v10 = vpack.c.bf16 %v2520_v2, %v2512_v1  ;;  %v2436_v1 = vld [vmem:[%s5318_s1 + $0xe78] sm:$0xff] }
  0xf0   :  { %3066 = vmatprep.subr.bf16.mxu1 %v3065_v12  ;;  %3032 = vmatpush1.bf16.msra.mxu0 %v3031_v13  ;;  %v2519_v12 = vld [vmem:[%s5318_s1 + $0x1110] sm:$0xff]  ;;  %v2526_v13 = vld [vmem:[%s5318_s1 + $0x1148] sm:$0xff]  ;;  %v2444_v2 = vld [vmem:[%s5318_s1 + $0xeb8] sm:$0xff] }
  0xf1   :  { %3068 = vmatpush1.bf16.msra.mxu1 %v3067_v17  ;;  %2424 = vmatprep.mubr.msk.f32.mxu0 %vm170_vm0, %v4507_v36  ;;  %v2528_v17 = vld [vmem:[%s5318_s1 + $0x1158] sm:$0xff]  ;;  %v3087_v21 = vpack.c.bf16 %v2519_v12, %v2511_v9  ;;  %v3053_v22 = vpack.c.bf16 %v2534_v14, %v2526_v13  ;;  %v2575_v9 = vld [vmem:[%s5318_s1 + $0x12d0] sm:$0x3f]  ;;  %v2450_v12 = vld [vmem:[%s5318_s1 + $0xee8] sm:$0xff]  ;;  %v3137_v13 = vpack.c.bf16 %v2444_v2, %v2436_v1 }
  0xf2   :  { %2428 = vmatprep.mubr.msk.f32.mxu1 %vm170_vm0, %v4507_v36  ;;  %1413 = vmatmul.mubr.f32.gmra.mrb[22].mxu0 %v4525_v43  ;;  %v3089_v26 = vpack.c.bf16 %v2536_v18, %v2528_v17  ;;  %v2458_v17 = vld [vmem:[%s5318_s1 + $0xf28] sm:$0xff]  ;;  %v2452_v18 = vld [vmem:[%s5318_s1 + $0xef8] sm:$0xff]  ;;  %v2497_v2 = vld [vmem:[%s5318_s1 + $0x1060] sm:$0xff] }
  0xf3   :  { %1490 = vmatmul.mubr.f32.gmra.mrb[22].mxu1 %v4525_v43  ;;  %3034 = vmatprep.subr.bf16.mxu0 %v3033_v24  ;;  %v2533_v24 = vld [vmem:[%s5318_s1 + $0x1180] sm:$0xff] }
  0xf4   :  { %3070 = vmatprep.subr.bf16.mxu1 %v3069_v27  ;;  %3036 = vmatpush1.bf16.msra.mxu0 %v3035_v29  ;;  %v2535_v27 = vld [vmem:[%s5318_s1 + $0x1190] sm:$0xff]  ;;  %v2542_v29 = vld [vmem:[%s5318_s1 + $0x11c8] sm:$0xff]  ;;  %v3055_v34 = vpack.c.bf16 %v2533_v24, %v2525_v23  ;;  %v2457_v23 = vld [vmem:[%s5318_s1 + $0xf20] sm:$0xff] }
  0xf5   :  { %3072 = vmatpush1.bf16.msra.mxu1 %v3071_v30  ;;  %3038 = vmatprep.subr.bf16.mxu0 %v3037_v32  ;;  %v2550_v30 = vld [vmem:[%s5318_s1 + $0x1208] sm:$0xff]  ;;  %v2544_v32 = vld [vmem:[%s5318_s1 + $0x11d8] sm:$0xff]  ;;  %v3091_v35 = vpack.c.bf16 %v2535_v27, %v2527_v25  ;;  %v2451_v24 = vld [vmem:[%s5318_s1 + $0xef0] sm:$0xff] }
  0xf6   :  { %3074 = vmatprep.subr.bf16.mxu1 %v3073_v37  ;;  %2583 = vmatprep.mubr.msk.f32.mxu0 %vm170_vm0, %v4301_v5  ;;  %v3057_v37 = vpack.c.bf16 %v2550_v30, %v2542_v29  ;;  %v3093_v42 = vpack.c.bf16 %v2552_v33, %v2544_v32  ;;  %v2459_v25 = vld [vmem:[%s5318_s1 + $0xf30] sm:$0xff]  ;;  %v2474_v27 = vld [vmem:[%s5318_s1 + $0xfa8] sm:$0xff]  ;;  %v3105_v29 = vpack.c.bf16 %v2458_v17, %v2450_v12  ;;  %v2468_v30 = vld [vmem:[%s5318_s1 + $0xf78] sm:$0xff] }
  0xf7   :  { %2587 = vmatprep.mubr.msk.f32.mxu1 %vm170_vm0, %v4301_v5  ;;  %v2476_v32 = vld [vmem:[%s5318_s1 + $0xfb8] sm:$0xff]  ;;  %v2513_v17 = vld [vmem:[%s5318_s1 + $0x10e0] sm:$0xff] }
  0xf8   :  { %3040 = vmatpush1.bf16.msra.mxu0 %v3039_v45  ;;  %v2558_v45 = vld [vmem:[%s5318_s1 + $0x1248] sm:$0xff] }
  0xf9   :  { %3076 = vmatpush1.bf16.msra.mxu1 %v3075_v46  ;;  %3042 = vmatprep.subr.bf16.mxu0 %v3041_v47  ;;  %v2566_v46 = vld [vmem:[%s5318_s1 + $0x1288] sm:$0xff]  ;;  %v2560_v47 = vld [vmem:[%s5318_s1 + $0x1258] sm:$0xff] }
  0xfa   :  { %3078 = vmatprep.subr.bf16.mxu1 %v3077_v59  ;;  %v3095_v59 = vpack.c.bf16 %v2551_v44, %v2543_v41  ;;  %v3061_v51 = vpack.c.bf16 %v2566_v46, %v2558_v45  ;;  %v3097_v55 = vpack.c.bf16 %v2568_v48, %v2560_v47  ;;  %v2467_v41 = vld [vmem:[%s5318_s1 + $0xf70] sm:$0xff]  ;;  %v2482_v45 = vld [vmem:[%s5318_s1 + $0xfe8] sm:$0xff]  ;;  %v2484_v47 = vld [vmem:[%s5318_s1 + $0xff8] sm:$0xff] }
  0xfb   :  { %v2475_v44 = vld [vmem:[%s5318_s1 + $0xfb0] sm:$0xff]  ;;  %v2490_v46 = vld [vmem:[%s5318_s1 + $0x1028] sm:$0xff]  ;;  %v2492_v48 = vld [vmem:[%s5318_s1 + $0x1038] sm:$0xff] }
  0xfc   :  { %3044 = vmatpush1.bf16.msra.mxu0 %v3043_v56  ;;  %v2559_v56 = vld [vmem:[%s5318_s1 + $0x1250] sm:$0xff] }
  0xfd   :  { %3080 = vmatpush1.bf16.msra.mxu1 %v3079_v57  ;;  %3046 = vmatprep.subr.bf16.mxu0 %v3045_v31  ;;  %v2567_v57 = vld [vmem:[%s5318_s1 + $0x1290] sm:$0xff] }
  0xfe   :  { %3082 = vmatprep.subr.bf16.mxu1 %v3081_v62  ;;  %v4855_v11 = vpop.f32.mrb[0].mxu0  ;;  %v3099_v61 = vpack.c.bf16 %v2567_v57, %v2559_v56  ;;  %v2574_v62 = vld [vmem:[%s5318_s1 + $0x12c8] sm:$0x3f]  ;;  %v3149_v56 = vpack.c.bf16 %v2492_v48, %v2484_v47  ;;  %v2491_v57 = vld [vmem:[%s5318_s1 + $0x1030] sm:$0xff]  ;;  %v2556_v47 = vld [vmem:[%s5318_s1 + $0x1238] sm:$0xff] }
  0xff   :  { %v4866_v15 = vpop.f32.mrb[0].mxu1  ;;  %v4868_v16 = vpop.f32.mrb[1].mxu0 }
 0x100   :  { %3048 = vmatpush1.bf16.msra.mxu0 %v3047_v3  ;;  %v4876_v20 = vpop.f32.mrb[1].mxu1  ;;  %v2433_v3 = vld [vmem:[%s5318_s1 + $0xe60] sm:$0xff] }
 0x101   :  { %3084 = vmatpush1.bf16.msra.mxu1 %v3083_v4  ;;  %3050 = vmatprep.subr.bf16.mxu0 %v3049_v6  ;;  %v2441_v4 = vld [vmem:[%s5318_s1 + $0xea0] sm:$0xff] }
 0x102   :  { %3086 = vmatprep.subr.bf16.mxu1 %v3085_v10  ;;  %v2573_v6 = vld [vmem:[%s5318_s1 + $0x12c0] sm:$0x3f]  ;;  %v3101_v10 = vpack.c.bf16 %v2442_v0, %v2434_v63  ;;  %v3103_v14 = vpack.c.bf16 %v2441_v4, %v2433_v3  ;;  %v3115_v63 = vpack.c.bf16 %v2489_v53, %v2481_v52  ;;  %v2499_v4 = vld [vmem:[%s5318_s1 + $0x1070] sm:$0xff] }
 0x103   :  { %v4942_v31 = vpop.f32.mrb[2].mxu0  ;;  %v2505_v3 = vld [vmem:[%s5318_s1 + $0x10a0] sm:$0xff] }
 0x104   :  { %3052 = vmatpush1.bf16.msra.mxu0 %v3051_v19  ;;  %v4926_v50 = vpop.f32.mrb[2].mxu1  ;;  %v4944_v58 = vpop.f32.mrb[3].mxu0  ;;  %v2460_v19 = vld [vmem:[%s5318_s1 + $0xf38] sm:$0xff]  ;;  %v3119_v12 = vpack.c.bf16 %v2505_v3, %v2497_v2 }
 0x105   :  { %3088 = vmatpush1.bf16.msra.mxu1 %v3087_v21  ;;  %3054 = vmatprep.subr.bf16.mxu0 %v3053_v22  ;;  %v4934_v54 = vpop.f32.mrb[3].mxu1  ;;  %v3139_v21 = vpack.c.bf16 %v2443_v8, %v2435_v7  ;;  %v2449_v22 = vld [vmem:[%s5318_s1 + $0xee0] sm:$0xff]  ;;  %v3141_v33 = vpack.c.bf16 %v2460_v19, %v2452_v18  ;;  %v2514_v7 = vld [vmem:[%s5318_s1 + $0x10e8] sm:$0xff]  ;;  %v2515_v19 = vld [vmem:[%s5318_s1 + $0x10f0] sm:$0xff] }
 0x106   :  { %3090 = vmatprep.subr.bf16.mxu1 %v3089_v26  ;;  %v2466_v26 = vld [vmem:[%s5318_s1 + $0xf68] sm:$0xff]  ;;  %v2521_v18 = vld [vmem:[%s5318_s1 + $0x1120] sm:$0xff] }
 0x107   :  { %v2522_v8 = vld [vmem:[%s5318_s1 + $0x1128] sm:$0xff] }
 0x108   :  { %3056 = vmatpush1.bf16.msra.mxu0 %v3055_v34  ;;  %v3107_v34 = vpack.c.bf16 %v2457_v23, %v2449_v22  ;;  %v2523_v23 = vld [vmem:[%s5318_s1 + $0x1130] sm:$0xff] }
 0x109   :  { %3092 = vmatpush1.bf16.msra.mxu1 %v3091_v35  ;;  %3058 = vmatprep.subr.bf16.mxu0 %v3057_v37  ;;  %v3143_v35 = vpack.c.bf16 %v2459_v25, %v2451_v24  ;;  %v3109_v37 = vpack.c.bf16 %v2474_v27, %v2466_v26  ;;  %v2530_v24 = vld [vmem:[%s5318_s1 + $0x1168] sm:$0xff] }
 0x10a   :  { %3094 = vmatprep.subr.bf16.mxu1 %v3093_v42  ;;  %v3145_v42 = vpack.c.bf16 %v2476_v32, %v2468_v30  ;;  %v2538_v25 = vld [vmem:[%s5318_s1 + $0x11a8] sm:$0xff]  ;;  %v2540_v30 = vld [vmem:[%s5318_s1 + $0x11b8] sm:$0xff]  ;;  %v3123_v32 = vpack.c.bf16 %v2521_v18, %v2513_v17  ;;  %v2577_v17 = vld [vmem:[%s5318_s1 + $0x12e0] sm:$0x3f] }
 0x10b   :  { %v2579_v18 = vld [vmem:[%s5318_s1 + $0x12f0] sm:$0x3f] }
 0x10c   :  { %3060 = vmatpush1.bf16.msra.mxu0 %v3059_v49  ;;  %v3111_v49 = vpack.c.bf16 %v2473_v40, %v2465_v39  ;;  %v2537_v39 = vld [vmem:[%s5318_s1 + $0x11a0] sm:$0xff]  ;;  %v2531_v40 = vld [vmem:[%s5318_s1 + $0x1170] sm:$0xff] }
 0x10d   :  { %3096 = vmatpush1.bf16.msra.mxu1 %v3095_v59  ;;  %3062 = vmatprep.subr.bf16.mxu0 %v3061_v51  ;;  %v3147_v59 = vpack.c.bf16 %v2475_v44, %v2467_v41  ;;  %v3113_v51 = vpack.c.bf16 %v2490_v46, %v2482_v45  ;;  %v2546_v44 = vld [vmem:[%s5318_s1 + $0x11e8] sm:$0xff]  ;;  %v2548_v46 = vld [vmem:[%s5318_s1 + $0x11f8] sm:$0xff] }
 0x10e   :  { %3098 = vmatprep.subr.bf16.mxu1 %v3097_v55  ;;  %v2483_v55 = vld [vmem:[%s5318_s1 + $0xff0] sm:$0xff]  ;;  %v2554_v45 = vld [vmem:[%s5318_s1 + $0x1228] sm:$0xff] }
 0x10f   :  { %v3151_v0 = vpack.c.bf16 %v2491_v57, %v2483_v55  ;;  %v3129_v53 = vpack.c.bf16 %v2554_v45, %v2546_v44  ;;  %v2545_v55 = vld [vmem:[%s5318_s1 + $0x11e0] sm:$0xff]  ;;  %v2547_v57 = vld [vmem:[%s5318_s1 + $0x11f0] sm:$0xff] }
 0x110   :  { %3064 = vmatpush1.bf16.msra.mxu0 %v3063_v60  ;;  %v2498_v60 = vld [vmem:[%s5318_s1 + $0x1068] sm:$0xff] }
 0x111   :  { %3100 = vmatpush1.bf16.msra.mxu1 %v3099_v61  ;;  %2581 = vmatprep.subr.msk.mxu0 %vm177_vm1, %v2574_v62  ;;  %v2506_v61 = vld [vmem:[%s5318_s1 + $0x10a8] sm:$0xff]  ;;  %v2500_v62 = vld [vmem:[%s5318_s1 + $0x1078] sm:$0xff] }
 0x112   :  { %2585 = vmatprep.subr.msk.mxu1 %vm177_vm1, %v2576_v38  ;;  %v2508_v38 = vld [vmem:[%s5318_s1 + $0x10b8] sm:$0xff]  ;;  %v3117_v1 = vpack.c.bf16 %v2506_v61, %v2498_v60  ;;  %v3165_v61 = vpack.c.bf16 %v2556_v47, %v2548_v46 }
 0x114   :  { %2582 = vmatpush1.msk.msra.mxu0 %vm177_vm1, %v2573_v6  ;;  %v2507_v6 = vld [vmem:[%s5318_s1 + $0x10b0] sm:$0xff] }
 0x115   :  { %2586 = vmatpush1.msk.msra.mxu1 %vm177_vm1, %v2575_v9  ;;  %1754 = vmatmul.mubr.f32.vlgmr.msra.gmra.mrb[24].mxu0 %v4485_v28  ;;  %v2516_v9 = vld [vmem:[%s5318_s1 + $0x10f8] sm:$0xff] }
 0x116   :  { %1831 = vmatmul.mubr.f32.vlgmr.msra.gmra.mrb[24].mxu1 %v4485_v28  ;;  %3102 = vmatprep.subr.bf16.mxu0 %v3101_v10  ;;  %v2524_v10 = vld [vmem:[%s5318_s1 + $0x1138] sm:$0xff] }
 0x117   :  { %3138 = vmatprep.subr.bf16.mxu1 %v3137_v13  ;;  %3104 = vmatpush1.bf16.msra.mxu0 %v3103_v14  ;;  %v3155_v13 = vpack.c.bf16 %v2507_v6, %v2499_v4  ;;  %v3121_v14 = vpack.c.bf16 %v2522_v8, %v2514_v7  ;;  %v2569_v6 = vld [vmem:[%s5318_s1 + $0x12a0] sm:$0xff]  ;;  %v2563_v8 = vld [vmem:[%s5318_s1 + $0x1270] sm:$0xff] }
 0x118   :  { %3140 = vmatpush1.bf16.msra.mxu1 %v3139_v21  ;;  %2584 = vmatprep.mubr.msk.f32.mxu0 %vm170_vm0, %v4507_v36  ;;  %v3157_v21 = vpack.c.bf16 %v2524_v10, %v2516_v9  ;;  %v2571_v9 = vld [vmem:[%s5318_s1 + $0x12b0] sm:$0xff] }
 0x119   :  { %2588 = vmatprep.mubr.msk.f32.mxu1 %vm170_vm0, %v4507_v36  ;;  %1760 = vmatmul.mubr.f32.gmra.mrb[26].mxu0 %v4525_v43 }
 0x11a   :  { %1837 = vmatmul.mubr.f32.gmra.mrb[26].mxu1 %v4525_v43  ;;  %3106 = vmatprep.subr.bf16.mxu0 %v3105_v29  ;;  %v2532_v29 = vld [vmem:[%s5318_s1 + $0x1178] sm:$0xff] }
 0x11b   :  { %3142 = vmatprep.subr.bf16.mxu1 %v3141_v33  ;;  %3108 = vmatpush1.bf16.msra.mxu0 %v3107_v34  ;;  %v3159_v34 = vpack.c.bf16 %v2523_v23, %v2515_v19  ;;  %v3161_v41 = vpack.c.bf16 %v2540_v30, %v2532_v29 }
 0x11c   :  { %3144 = vmatpush1.bf16.msra.mxu1 %v3143_v35  ;;  %3110 = vmatprep.subr.bf16.mxu0 %v3109_v37  ;;  %v3125_v35 = vpack.c.bf16 %v2538_v25, %v2530_v24  ;;  %v2529_v37 = vld [vmem:[%s5318_s1 + $0x1160] sm:$0xff] }
 0x11d   :  { %3146 = vmatprep.subr.bf16.mxu1 %v3145_v42  ;;  %2591 = vmatprep.mubr.msk.f32.mxu0 %vm170_vm0, %v4301_v5  ;;  %v2539_v42 = vld [vmem:[%s5318_s1 + $0x11b0] sm:$0xff] }
 0x11e   :  { %2595 = vmatprep.mubr.msk.f32.mxu1 %vm170_vm0, %v4301_v5  ;;  %v3153_v5 = vpack.c.bf16 %v2508_v38, %v2500_v62  ;;  %v3163_v52 = vpack.c.bf16 %v2539_v42, %v2531_v40  ;;  %v2555_v62 = vld [vmem:[%s5318_s1 + $0x1230] sm:$0xff]  ;;  %v2562_v38 = vld [vmem:[%s5318_s1 + $0x1268] sm:$0xff] }
 0x11f   :  { %3112 = vmatpush1.bf16.msra.mxu0 %v3111_v49  ;;  %v3127_v49 = vpack.c.bf16 %v2537_v39, %v2529_v37  ;;  %v3167_v3 = vpack.c.bf16 %v2555_v62, %v2547_v57 }
 0x120   :  { %3148 = vmatpush1.bf16.msra.mxu1 %v3147_v59  ;;  %3114 = vmatprep.subr.bf16.mxu0 %v3113_v51 }
 0x121   :  { %3150 = vmatprep.subr.bf16.mxu1 %v3149_v56  ;;  %v2553_v56 = vld [vmem:[%s5318_s1 + $0x1220] sm:$0xff] }
 0x122   :  { %v3131_v2 = vpack.c.bf16 %v2553_v56, %v2545_v55 }
 0x123   :  { %3116 = vmatpush1.bf16.msra.mxu0 %v3115_v63  ;;  %v2570_v63 = vld [vmem:[%s5318_s1 + $0x12a8] sm:$0xff] }
 0x124   :  { %3152 = vmatpush1.bf16.msra.mxu1 %v3151_v0  ;;  %3118 = vmatprep.subr.bf16.mxu0 %v3117_v1  ;;  %v2564_v0 = vld [vmem:[%s5318_s1 + $0x1278] sm:$0xff]  ;;  %v3133_v4 = vpack.c.bf16 %v2570_v63, %v2562_v38 }
 0x125   :  { %3154 = vmatprep.subr.bf16.mxu1 %v3153_v5  ;;  %v5115_v22 = vpop.f32.mrb[4].mxu0  ;;  %v2572_v1 = vld [vmem:[%s5318_s1 + $0x12b8] sm:$0xff]  ;;  %v2561_v5 = vld [vmem:[%s5318_s1 + $0x1260] sm:$0xff] }
 0x126   :  { %v5126_v26 = vpop.f32.mrb[4].mxu1  ;;  %v5128_v27 = vpop.f32.mrb[5].mxu0  ;;  %v3169_v7 = vpack.c.bf16 %v2572_v1, %v2564_v0  ;;  %v3135_v10 = vpack.c.bf16 %v2569_v6, %v2561_v5 }
 0x127   :  { %3120 = vmatpush1.bf16.msra.mxu0 %v3119_v12  ;;  %v5136_v33 = vpop.f32.mrb[5].mxu1  ;;  %v3171_v12 = vpack.c.bf16 %v2571_v9, %v2563_v8 }
 0x128   :  { %3156 = vmatpush1.bf16.msra.mxu1 %v3155_v13  ;;  %3122 = vmatprep.subr.bf16.mxu0 %v3121_v14  ;;  %v2578_v13 = vld [vmem:[%s5318_s1 + $0x12e8] sm:$0x3f]  ;;  %v2580_v14 = vld [vmem:[%s5318_s1 + $0x12f8] sm:$0x3f] }
 0x129   :  { %3158 = vmatprep.subr.bf16.mxu1 %v3157_v21 }
 0x12a   :  { %v5162_v48 = vpop.f32.mrb[6].mxu0 }
 0x12b   :  { %3124 = vmatpush1.bf16.msra.mxu0 %v3123_v32  ;;  %v5164_v59 = vpop.f32.mrb[6].mxu1  ;;  %v5166_v51 = vpop.f32.mrb[7].mxu0 }
 0x12c   :  { %3160 = vmatpush1.bf16.msra.mxu1 %v3159_v34  ;;  %3126 = vmatprep.subr.bf16.mxu0 %v3125_v35  ;;  %v5177_v60 = vpop.f32.mrb[7].mxu1 }
 0x12d   :  { %3162 = vmatprep.subr.bf16.mxu1 %v3161_v41 }
 0x12f   :  { %3128 = vmatpush1.bf16.msra.mxu0 %v3127_v49 }
 0x130   :  { %3164 = vmatpush1.bf16.msra.mxu1 %v3163_v52  ;;  %3130 = vmatprep.subr.bf16.mxu0 %v3129_v53 }
 0x131   :  { %3166 = vmatprep.subr.bf16.mxu1 %v3165_v61 }
 0x133   :  { %3132 = vmatpush1.bf16.msra.mxu0 %v3131_v2 }
 0x134   :  { %3168 = vmatpush1.bf16.msra.mxu1 %v3167_v3  ;;  %3134 = vmatprep.subr.bf16.mxu0 %v3133_v4 }
 0x135   :  { %3170 = vmatprep.subr.bf16.mxu1 %v3169_v7 }
 0x137   :  { %3136 = vmatpush1.bf16.msra.mxu0 %v3135_v10 }
 0x138   :  { %3172 = vmatpush1.bf16.msra.mxu1 %v3171_v12  ;;  %2589 = vmatprep.subr.msk.mxu0 %vm177_vm1, %v2578_v13 }
 0x139   :  { %2593 = vmatprep.subr.msk.mxu1 %vm177_vm1, %v2580_v14 }
 0x13b   :  { %2590 = vmatpush1.msk.msra.mxu0 %vm177_vm1, %v2577_v17 }
 0x13c   :  { %2594 = vmatpush1.msk.msra.mxu1 %vm177_vm1, %v2579_v18  ;;  %1908 = vmatmul.mubr.f32.vlgmr.msra.gmra.mrb[28].mxu0 %v4485_v28 }
 0x13d   :  { %1985 = vmatmul.mubr.f32.vlgmr.msra.gmra.mrb[28].mxu1 %v4485_v28  ;;  %2592 = vmatprep.mubr.msk.f32.mxu0 %vm170_vm0, %v4507_v36 }
 0x13e   :  { %2596 = vmatprep.mubr.msk.f32.mxu1 %vm170_vm0, %v4507_v36 }
 0x140   :  { %1914 = vmatmul.mubr.f32.gmra.mrb[30].mxu0 %v4525_v43 }
 0x141   :  { %1991 = vmatmul.mubr.f32.gmra.mrb[30].mxu1 %v4525_v43 }
 0x14c   :  { %v753_v19 = vpop.f32.mrb[8].mxu0 }
 0x14d   :  { %v995_v21 = vmax.f32 %v4855_v11, %v753_v19  ;;  %v830_v23 = vpop.f32.mrb[8].mxu1  ;;  %v755_v24 = vpop.f32.mrb[9].mxu0 }
 0x14e   :  { %v997_v25 = vmax.f32 %v4866_v15, %v830_v23  ;;  %v996_v29 = vmax.f32 %v4868_v16, %v755_v24  ;;  %v832_v28 = vpop.f32.mrb[9].mxu1  ;;  %v2018_v19 = vpop.permute.xlu0 %2017 }
 0x14f   :  { %v998_v30 = vmax.f32 %v4876_v20, %v832_v28 }
 0x150   :  { %v759_v32 = vpop.f32.mrb[10].mxu0 }
 0x151   :  { %v1003_v34 = vmax.f32 %v4942_v31, %v759_v32  ;;  %v836_v36 = vpop.f32.mrb[10].mxu1  ;;  %v761_v35 = vpop.f32.mrb[11].mxu0 }
 0x152   :  { %v1005_v37 = vmax.f32 %v4926_v50, %v836_v36  ;;  %v1004_v43 = vmax.f32 %v4944_v58, %v761_v35  ;;  %v838_v39 = vpop.f32.mrb[11].mxu1 }
 0x153   :  { %v1006_v11 = vmax.f32 %v4934_v54, %v838_v39 }
 0x173   :  { %v907_v40 = vpop.f32.mrb[12].mxu0 }
 0x174   :  { %v999_v15 = vmax.f32 %v5115_v22, %v907_v40  ;;  %v984_v41 = vpop.f32.mrb[12].mxu1  ;;  %v909_v16 = vpop.f32.mrb[13].mxu0 }
 0x175   :  { %v1001_v42 = vmax.f32 %v5126_v26, %v984_v41  ;;  %v1000_v20 = vmax.f32 %v5128_v27, %v909_v16  ;;  %v986_v44 = vpop.f32.mrb[13].mxu1 }
 0x176   :  { %v1002_v31 = vmax.f32 %v5136_v33, %v986_v44 }
 0x177   :  { %v913_v45 = vpop.f32.mrb[14].mxu0 }
 0x178   :  { %v1007_v50 = vmax.f32 %v5162_v48, %v913_v45  ;;  %v990_v46 = vpop.f32.mrb[14].mxu1  ;;  %v915_v58 = vpop.f32.mrb[15].mxu0 }
 0x179   :  { %v1009_v47 = vmax.f32 %v5164_v59, %v990_v46  ;;  %v1008_v54 = vmax.f32 %v5166_v51, %v915_v58  ;;  %v992_v49 = vpop.f32.mrb[15].mxu1 }
 0x17a   :  { %v1010_v22 = vmax.f32 %v5177_v60, %v992_v49 }
 0x19a   :  { %v1254_v52 = vpop.f32.mrb[16].mxu0 }
 0x19b   :  { %v1496_v53 = vmax.f32 %v995_v21, %v1254_v52  ;;  %v1331_v26 = vpop.f32.mrb[16].mxu1  ;;  %v1256_v55 = vpop.f32.mrb[17].mxu0 }
 0x19c   :  { %v1498_v27 = vmax.f32 %v997_v25, %v1331_v26  ;;  %v1497_v56 = vmax.f32 %v996_v29, %v1256_v55  ;;  %v1333_v57 = vpop.f32.mrb[17].mxu1 }
 0x19d   :  { %v1499_v33 = vmax.f32 %v998_v30, %v1333_v57 }
 0x19e   :  { %v1260_v61 = vpop.f32.mrb[18].mxu0 }
 0x19f   :  { %v1504_v62 = vmax.f32 %v1003_v34, %v1260_v61  ;;  %v1337_v48 = vpop.f32.mrb[18].mxu1  ;;  %v1262_v38 = vpop.f32.mrb[19].mxu0 }
 0x1a0   :  { %v1506_v63 = vmax.f32 %v1005_v37, %v1337_v48  ;;  %v1505_v0 = vmax.f32 %v1004_v43, %v1262_v38  ;;  %v1339_v59 = vpop.f32.mrb[19].mxu1  ;;  %v2023_v43 = vpop.permute.xlu0 %2022 }
 0x1a1   :  { %v1507_v1 = vmax.f32 %v1006_v11, %v1339_v59 }
 0x1c1   :  { %v1408_v51 = vpop.f32.mrb[20].mxu0 }
 0x1c2   :  { %v5246_v2 = vmax.f32 %v999_v15, %v1408_v51  ;;  %v1485_v60 = vpop.f32.mrb[20].mxu1  ;;  %v1410_v3 = vpop.f32.mrb[21].mxu0 }
 0x1c3   :  { %v5248_v4 = vmax.f32 %v1001_v42, %v1485_v60  ;;  %v5250_v5 = vmax.f32 %v1000_v20, %v1410_v3  ;;  %v1487_v6 = vpop.f32.mrb[21].mxu1 }
 0x1c4   :  { %v5252_v7 = vmax.f32 %v1002_v31, %v1487_v6 }
 0x1c5   :  { %v1414_v8 = vpop.f32.mrb[22].mxu0 }
 0x1c6   :  { %v5254_v9 = vmax.f32 %v1007_v50, %v1414_v8  ;;  %v1491_v10 = vpop.f32.mrb[22].mxu1  ;;  %v1416_v12 = vpop.f32.mrb[23].mxu0 }
 0x1c7   :  { %v5256_v13 = vmax.f32 %v1009_v47, %v1491_v10  ;;  %v5258_v14 = vmax.f32 %v1008_v54, %v1416_v12  ;;  %v1493_v17 = vpop.f32.mrb[23].mxu1 }
 0x1c8   :  { %v5260_v18 = vmax.f32 %v1010_v22, %v1493_v17 }
 0x1e8   :  { %v1755_v21 = vpop.f32.mrb[24].mxu0 }
 0x1e9   :  { %v1997_v23 = vmax.f32 %v1496_v53, %v1755_v21  ;;  %v1832_v24 = vpop.f32.mrb[24].mxu1  ;;  %v1757_v25 = vpop.f32.mrb[25].mxu0 }
 0x1ea   :  { %v1999_v29 = vmax.f32 %v1498_v27, %v1832_v24  ;;  %v1998_v28 = vmax.f32 %v1497_v56, %v1757_v25  ;;  %v1834_v30 = vpop.f32.mrb[25].mxu1 }
 0x1eb   :  { %v2000_v32 = vmax.f32 %v1499_v33, %v1834_v30  ;;  %v2025_v34 = vadd.f32 %v2018_v19, %v1997_v23 }
 0x1ec   :  { %v2026_v36 = vadd.f32 %v2018_v19, %v1998_v28  ;;  %v2027_v35 = vadd.f32 %v2018_v19, %v1999_v29  ;;  %v1761_v37 = vpop.f32.mrb[26].mxu0 }
 0x1ed   :  { %v2028_v39 = vadd.f32 %v2018_v19, %v2000_v32  ;;  %v2041_v11 = vmax.f32 %v2025_v34, 0.0  ;;  %v2005_v40 = vmax.f32 %v1504_v62, %v1761_v37  ;;  %v1838_v15 = vpop.f32.mrb[26].mxu1  ;;  %v1763_v41 = vpop.f32.mrb[27].mxu0 }
 0x1ee   :  { %v2042_v16 = vmax.f32 %v2026_v36, 0.0  ;;  %v2043_v42 = vmax.f32 %v2027_v35, 0.0  ;;  %v2007_v20 = vmax.f32 %v1506_v63, %v1838_v15  ;;  %v2006_v44 = vmax.f32 %v1505_v0, %v1763_v41  ;;  %v1840_v31 = vpop.f32.mrb[27].mxu1 }
 0x1ef   :  { %v2044_v45 = vmax.f32 %v2028_v39, 0.0  ;;  %2057 = vst [vmem:[%s5321_s3] sm:$0xff] %v2041_v11  ;;  %v2008_v50 = vmax.f32 %v1507_v1, %v1840_v31  ;;  %v2033_v46 = vadd.f32 %v2023_v43, %v2005_v40 }
 0x1f0   :  { %2058 = vst [vmem:[%s5321_s3 + $0x8] sm:$0xff] %v2042_v16  ;;  %2059 = vst [vmem:[%s5321_s3 + $0x10] sm:$0xff] %v2043_v42  ;;  %v2034_v58 = vadd.f32 %v2023_v43, %v2006_v44  ;;  %v2035_v47 = vadd.f32 %v2023_v43, %v2007_v20 }
 0x1f1   :  { %2060 = vst [vmem:[%s5321_s3 + $0x18] sm:$0xff] %v2044_v45  ;;  %v2036_v54 = vadd.f32 %v2023_v43, %v2008_v50  ;;  %v2049_v49 = vmax.f32 %v2033_v46, 0.0 }
 0x1f2   :  { %v2050_v22 = vmax.f32 %v2034_v58, 0.0  ;;  %v2051_v52 = vmax.f32 %v2035_v47, 0.0 }
 0x1f3   :  { %v2052_v53 = vmax.f32 %v2036_v54, 0.0  ;;  %2065 = vst [vmem:[%s5321_s3 + $0x40] sm:$0xff] %v2049_v49 }
 0x1f4   :  { %2066 = vst [vmem:[%s5321_s3 + $0x48] sm:$0xff] %v2050_v22  ;;  %2067 = vst [vmem:[%s5321_s3 + $0x50] sm:$0xff] %v2051_v52 }
 0x1f5   :  { %2068 = vst [vmem:[%s5321_s3 + $0x58] sm:$0xff] %v2052_v53 }
 0x20f   :  { %v1909_v26 = vpop.f32.mrb[28].mxu0 }
 0x210   :  { %v2001_v55 = vmax.f32 %v5246_v2, %v1909_v26  ;;  %v1986_v27 = vpop.f32.mrb[28].mxu1  ;;  %v1911_v56 = vpop.f32.mrb[29].mxu0 }
 0x211   :  { %v2003_v57 = vmax.f32 %v5248_v4, %v1986_v27  ;;  %v2002_v33 = vmax.f32 %v5250_v5, %v1911_v56  ;;  %v1988_v61 = vpop.f32.mrb[29].mxu1 }
 0x212   :  { %v2029_v62 = vadd.f32 %v2018_v19, %v2001_v55  ;;  %v2004_v48 = vmax.f32 %v5252_v7, %v1988_v61 }
 0x213   :  { %v2031_v38 = vadd.f32 %v2018_v19, %v2003_v57  ;;  %v2030_v63 = vadd.f32 %v2018_v19, %v2002_v33  ;;  %v1915_v0 = vpop.f32.mrb[30].mxu0 }
 0x214   :  { %v2045_v59 = vmax.f32 %v2029_v62, 0.0  ;;  %v2032_v1 = vadd.f32 %v2018_v19, %v2004_v48  ;;  %v2009_v51 = vmax.f32 %v5254_v9, %v1915_v0  ;;  %v1992_v60 = vpop.f32.mrb[30].mxu1  ;;  %v1917_v3 = vpop.f32.mrb[31].mxu0 }
 0x215   :  { %v2047_v2 = vmax.f32 %v2031_v38, 0.0  ;;  %v2046_v6 = vmax.f32 %v2030_v63, 0.0  ;;  %v2011_v8 = vmax.f32 %v5256_v13, %v1992_v60  ;;  %v2010_v4 = vmax.f32 %v5258_v14, %v1917_v3  ;;  %v1994_v5 = vpop.f32.mrb[31].mxu1 }
 0x216   :  { %2061 = vst [vmem:[%s5321_s3 + $0x20] sm:$0xff] %v2045_v59  ;;  %v2048_v7 = vmax.f32 %v2032_v1, 0.0  ;;  %v2037_v10 = vadd.f32 %v2023_v43, %v2009_v51  ;;  %v2012_v12 = vmax.f32 %v5260_v18, %v1994_v5 }
 0x217   :  { %2063 = vst [vmem:[%s5321_s3 + $0x30] sm:$0xff] %v2047_v2  ;;  %2062 = vst [vmem:[%s5321_s3 + $0x28] sm:$0xff] %v2046_v6  ;;  %v2039_v9 = vadd.f32 %v2023_v43, %v2011_v8  ;;  %v2038_v13 = vadd.f32 %v2023_v43, %v2010_v4 }
 0x218   :  { %2064 = vst [vmem:[%s5321_s3 + $0x38] sm:$0xff] %v2048_v7  ;;  %v2053_v14 = vmax.f32 %v2037_v10, 0.0  ;;  %v2040_v17 = vadd.f32 %v2023_v43, %v2012_v12 }
 0x219   :  { %v2055_v19 = vmax.f32 %v2039_v9, 0.0  ;;  %v2054_v21 = vmax.f32 %v2038_v13, 0.0 }
 0x21a   :  { %2069 = vst [vmem:[%s5321_s3 + $0x60] sm:$0xff] %v2053_v14  ;;  %v2056_v18 = vmax.f32 %v2040_v17, 0.0 }
 0x21b   :  { %2071 = vst [vmem:[%s5321_s3 + $0x70] sm:$0xff] %v2055_v19  ;;  %2070 = vst [vmem:[%s5321_s3 + $0x68] sm:$0xff] %v2054_v21 }
 0x21c   :  { %2072 = vst [vmem:[%s5321_s3 + $0x78] sm:$0xff] %v2056_v18 }

// kernel: lenet5_bn_forward.5
= control target key start
LH: loop header
LB: loop body
LE: loop exit
PB: predicated region body
PF: predicated region fallthrough
CT: control target
= control target key end

     0   :  { %v2702_v3 = vmov 0   ;;  %vm930_vm0 = vcmask 130048   ;;  %vm2704_vm1 = vmmov 0   ;;  %vm1458_vm2 = vcmask 982016   ;;  %s4428_s0 = inlined_call_operand.vmem [shape: f32[1024,16], index: 0, kind: input, shape index: {}]   ;;  %s4429_s1 = inlined_call_operand.vmem [shape: f32[120,1024], index: 1, kind: input, shape index: {}]   ;;  %s4430_s2 = inlined_call_operand.vmem [shape: f32[120,1], index: 2, kind: input, shape index: {}]   ;;  %s4431_s3 = inlined_call_operand.vmem [shape: f32[120,1], index: 3, kind: input, shape index: {}]   ;;  %s4432_s4 = inlined_call_operand.vmem [shape: f32[120,1], index: 4, kind: input, shape index: {}]   ;;  %s4433_s6 = inlined_call_operand.vmem [shape: f32[84,1], index: 6, kind: input, shape index: {}]   ;;  %s4434_s7 = inlined_call_operand.vmem [shape: f32[84,1], index: 7, kind: input, shape index: {}]   ;;  %s4435_s8 = inlined_call_operand.vmem [shape: f32[84,1], index: 8, kind: input, shape index: {}]   ;;  %s4436_s5 = inlined_call_operand.vmem [shape: f32[84,120], index: 5, kind: input, shape index: {}]   ;;  %s4437_s9 = inlined_call_operand.vmem [shape: f32[84,16], index: 9, kind: output, shape index: {}]  }
   0x1   :  { %v48_v0 = vld [vmem:[%s4428_s0 + $0x80] sm:$0xff]  ;;  %v49_v1 = vld [vmem:[%s4428_s0 + $0x88] sm:$0xff]  ;;  %2624 = vset.pattern.permute.xlu0 %v2702_v3  ;;  %2625 = vset.pattern.permute.xlu1 %v2702_v3  ;;  %v50_v12 = vld [vmem:[%s4428_s0 + $0x90] sm:$0xff]  ;;  %vm1642_vm3 = vcmask 125952  }
   0x2   :  { %v32_v2 = vld [vmem:[%s4428_s0] sm:$0xff]  ;;  %v2455_v4 = vpack.c.bf16 %v49_v1, %v48_v0  ;;  %v33_v5 = vld [vmem:[%s4428_s0 + $0x8] sm:$0xff]  ;;  %v51_v14 = vld [vmem:[%s4428_s0 + $0x98] sm:$0xff] }
   0x3   :  { %v80_v6 = vld [vmem:[%s4428_s0 + $0x180] sm:$0xff]  ;;  %v81_v7 = vld [vmem:[%s4428_s0 + $0x188] sm:$0xff]  ;;  %v2457_v8 = vpack.c.bf16 %v33_v5, %v32_v2  ;;  %v34_v15 = vld [vmem:[%s4428_s0 + $0x10] sm:$0xff]  ;;  %v2459_v17 = vpack.c.bf16 %v51_v14, %v50_v12 }
   0x4   :  { %v2487_v9 = vpack.c.bf16 %v81_v7, %v80_v6  ;;  %v64_v10 = vld [vmem:[%s4428_s0 + $0x100] sm:$0xff]  ;;  %v65_v11 = vld [vmem:[%s4428_s0 + $0x108] sm:$0xff]  ;;  %2456 = vmatprep.subr.bf16.mxu0 %v2455_v4  ;;  %v35_v16 = vld [vmem:[%s4428_s0 + $0x18] sm:$0xff] }
   0x5   :  { %v2489_v13 = vpack.c.bf16 %v65_v11, %v64_v10  ;;  %2458 = vmatpush3.bf16.msra.mxu0 %v2457_v8  ;;  %v2461_v18 = vpack.c.bf16 %v35_v16, %v34_v15  ;;  %v82_v19 = vld [vmem:[%s4428_s0 + $0x190] sm:$0xff]  ;;  %v83_v20 = vld [vmem:[%s4428_s0 + $0x198] sm:$0xff]  ;;  %v52_v24 = vld [vmem:[%s4428_s0 + $0xa0] sm:$0xff] }
   0x6   :  { %2488 = vmatprep.subr.bf16.mxu1 %v2487_v9  ;;  %v66_v21 = vld [vmem:[%s4428_s0 + $0x110] sm:$0xff]  ;;  %v2491_v22 = vpack.c.bf16 %v83_v20, %v82_v19  ;;  %v67_v23 = vld [vmem:[%s4428_s0 + $0x118] sm:$0xff]  ;;  %v53_v25 = vld [vmem:[%s4428_s0 + $0xa8] sm:$0xff]  ;;  %2460 = vmatprep.subr.bf16.mxu0 %v2459_v17 }
   0x7   :  { %2490 = vmatpush3.bf16.msra.mxu1 %v2489_v13  ;;  %v2493_v26 = vpack.c.bf16 %v67_v23, %v66_v21  ;;  %v2463_v27 = vpack.c.bf16 %v53_v25, %v52_v24  ;;  %v36_v28 = vld [vmem:[%s4428_s0 + $0x20] sm:$0xff]  ;;  %v37_v29 = vld [vmem:[%s4428_s0 + $0x28] sm:$0xff]  ;;  %v54_v36 = vld [vmem:[%s4428_s0 + $0xb0] sm:$0xff] }
   0x8   :  { %v84_v30 = vld [vmem:[%s4428_s0 + $0x1a0] sm:$0xff]  ;;  %2492 = vmatprep.subr.bf16.mxu1 %v2491_v22  ;;  %v85_v31 = vld [vmem:[%s4428_s0 + $0x1a8] sm:$0xff]  ;;  %v2465_v34 = vpack.c.bf16 %v37_v29, %v36_v28  ;;  %v55_v37 = vld [vmem:[%s4428_s0 + $0xb8] sm:$0xff] }
   0x9   :  { %v68_v32 = vld [vmem:[%s4428_s0 + $0x120] sm:$0xff]  ;;  %v69_v33 = vld [vmem:[%s4428_s0 + $0x128] sm:$0xff]  ;;  %2462 = vmatpush3.bf16.msra.mxu0 %v2461_v18  ;;  %v2495_v35 = vpack.c.bf16 %v85_v31, %v84_v30  ;;  %v38_v38 = vld [vmem:[%s4428_s0 + $0x30] sm:$0xff]  ;;  %v2467_v40 = vpack.c.bf16 %v55_v37, %v54_v36 }
   0xa   :  { %2464 = vmatprep.subr.bf16.mxu0 %v2463_v27  ;;  %v2497_v39 = vpack.c.bf16 %v69_v33, %v68_v32  ;;  %v39_v41 = vld [vmem:[%s4428_s0 + $0x38] sm:$0xff]  ;;  %v86_v42 = vld [vmem:[%s4428_s0 + $0x1b0] sm:$0xff]  ;;  %v56_v47 = vld [vmem:[%s4428_s0 + $0xc0] sm:$0xff] }
   0xb   :  { %2494 = vmatpush3.bf16.msra.mxu1 %v2493_v26  ;;  %v87_v43 = vld [vmem:[%s4428_s0 + $0x1b8] sm:$0xff]  ;;  %v70_v45 = vld [vmem:[%s4428_s0 + $0x130] sm:$0xff]  ;;  %v57_v48 = vld [vmem:[%s4428_s0 + $0xc8] sm:$0xff]  ;;  %v2469_v49 = vpack.c.bf16 %v39_v41, %v38_v38 }
   0xc   :  { %2496 = vmatprep.subr.bf16.mxu1 %v2495_v35  ;;  %v2499_v44 = vpack.c.bf16 %v87_v43, %v86_v42  ;;  %v71_v46 = vld [vmem:[%s4428_s0 + $0x138] sm:$0xff]  ;;  %v88_v50 = vld [vmem:[%s4428_s0 + $0x1c0] sm:$0xff]  ;;  %v89_v51 = vld [vmem:[%s4428_s0 + $0x1c8] sm:$0xff]  ;;  %v2471_v53 = vpack.c.bf16 %v57_v48, %v56_v47 }
   0xd   :  { %2466 = vmatpush3.bf16.msra.mxu0 %v2465_v34  ;;  %v2501_v52 = vpack.c.bf16 %v71_v46, %v70_v45  ;;  %v40_v54 = vld [vmem:[%s4428_s0 + $0x40] sm:$0xff]  ;;  %v41_v55 = vld [vmem:[%s4428_s0 + $0x48] sm:$0xff]  ;;  %v2503_v57 = vpack.c.bf16 %v89_v51, %v88_v50  ;;  %v58_v59 = vld [vmem:[%s4428_s0 + $0xd0] sm:$0xff] }
   0xe   :  { %2468 = vmatprep.subr.bf16.mxu0 %v2467_v40  ;;  %v72_v56 = vld [vmem:[%s4428_s0 + $0x140] sm:$0xff]  ;;  %v73_v58 = vld [vmem:[%s4428_s0 + $0x148] sm:$0xff]  ;;  %v59_v60 = vld [vmem:[%s4428_s0 + $0xd8] sm:$0xff]  ;;  %v2473_v63 = vpack.c.bf16 %v41_v55, %v40_v54 }
   0xf   :  { %2498 = vmatpush3.bf16.msra.mxu1 %v2497_v39  ;;  %v90_v61 = vld [vmem:[%s4428_s0 + $0x1d0] sm:$0xff]  ;;  %v91_v62 = vld [vmem:[%s4428_s0 + $0x1d8] sm:$0xff]  ;;  %v2505_v0 = vpack.c.bf16 %v73_v58, %v72_v56  ;;  %v2475_v1 = vpack.c.bf16 %v59_v60, %v58_v59  ;;  %v60_v7 = vld [vmem:[%s4428_s0 + $0xe0] sm:$0xff] }
  0x10   :  { %2500 = vmatprep.subr.bf16.mxu1 %v2499_v44  ;;  %v42_v2 = vld [vmem:[%s4428_s0 + $0x50] sm:$0xff]  ;;  %v43_v3 = vld [vmem:[%s4428_s0 + $0x58] sm:$0xff]  ;;  %v2507_v5 = vpack.c.bf16 %v91_v62, %v90_v61  ;;  %v61_v8 = vld [vmem:[%s4428_s0 + $0xe8] sm:$0xff] }
  0x11   :  { %2470 = vmatpush3.bf16.msra.mxu0 %v2469_v49  ;;  %v74_v4 = vld [vmem:[%s4428_s0 + $0x150] sm:$0xff]  ;;  %v75_v6 = vld [vmem:[%s4428_s0 + $0x158] sm:$0xff]  ;;  %v92_v9 = vld [vmem:[%s4428_s0 + $0x1e0] sm:$0xff]  ;;  %v2477_v11 = vpack.c.bf16 %v43_v3, %v42_v2  ;;  %v2479_v15 = vpack.c.bf16 %v61_v8, %v60_v7 }
  0x12   :  { %2472 = vmatprep.subr.bf16.mxu0 %v2471_v53  ;;  %v93_v10 = vld [vmem:[%s4428_s0 + $0x1e8] sm:$0xff]  ;;  %v44_v12 = vld [vmem:[%s4428_s0 + $0x60] sm:$0xff]  ;;  %v2509_v14 = vpack.c.bf16 %v75_v6, %v74_v4  ;;  %v62_v20 = vld [vmem:[%s4428_s0 + $0xf0] sm:$0xff] }
  0x13   :  { %2502 = vmatpush3.bf16.msra.mxu1 %v2501_v52  ;;  %v45_v13 = vld [vmem:[%s4428_s0 + $0x68] sm:$0xff]  ;;  %v76_v16 = vld [vmem:[%s4428_s0 + $0x160] sm:$0xff]  ;;  %v2511_v19 = vpack.c.bf16 %v93_v10, %v92_v9  ;;  %v63_v21 = vld [vmem:[%s4428_s0 + $0xf8] sm:$0xff] }
  0x14   :  { %2504 = vmatprep.subr.bf16.mxu1 %v2503_v57  ;;  %v77_v17 = vld [vmem:[%s4428_s0 + $0x168] sm:$0xff]  ;;  %v163_v22 = vld [vmem:[%s4429_s1 + $0x18] sm:$0xff]  ;;  %v94_v23 = vld [vmem:[%s4428_s0 + $0x1f0] sm:$0xff]  ;;  %v2481_v25 = vpack.c.bf16 %v45_v13, %v44_v12  ;;  %v2483_v27 = vpack.c.bf16 %v63_v21, %v62_v20 }
  0x15   :  { %2474 = vmatpush3.bf16.msra.mxu0 %v2473_v63  ;;  %v161_v18 = vld [vmem:[%s4429_s1 + $0x8] sm:$0xff]  ;;  %v95_v24 = vld [vmem:[%s4428_s0 + $0x1f8] sm:$0xff]  ;;  %574 = vmatprep.mubr.f32.mxu1 %v163_v22  ;;  %v2513_v26 = vpack.c.bf16 %v77_v17, %v76_v16  ;;  %v46_v28 = vld [vmem:[%s4428_s0 + $0x70] sm:$0xff] }
  0x16   :  { %2476 = vmatprep.subr.bf16.mxu0 %v2475_v1  ;;  %434 = vmatprep.mubr.f32.mxu0 %v161_v18  ;;  %v47_v29 = vld [vmem:[%s4428_s0 + $0x78] sm:$0xff]  ;;  %v78_v30 = vld [vmem:[%s4428_s0 + $0x170] sm:$0xff]  ;;  %v2515_v31 = vpack.c.bf16 %v95_v24, %v94_v23  ;;  %v112_v33 = vld [vmem:[%s4428_s0 + $0x280] sm:$0xff] }
  0x17   :  { %2506 = vmatpush3.bf16.msra.mxu1 %v2505_v0  ;;  %v79_v32 = vld [vmem:[%s4428_s0 + $0x178] sm:$0xff]  ;;  %v113_v34 = vld [vmem:[%s4428_s0 + $0x288] sm:$0xff]  ;;  %v144_v35 = vld [vmem:[%s4428_s0 + $0x380] sm:$0xff]  ;;  %v2485_v37 = vpack.c.bf16 %v47_v29, %v46_v28 }
  0x18   :  { %2508 = vmatprep.subr.bf16.mxu1 %v2507_v5  ;;  %v145_v36 = vld [vmem:[%s4428_s0 + $0x388] sm:$0xff]  ;;  %v2517_v38 = vpack.c.bf16 %v79_v32, %v78_v30  ;;  %v2519_v39 = vpack.c.bf16 %v113_v34, %v112_v33  ;;  %v96_v40 = vld [vmem:[%s4428_s0 + $0x200] sm:$0xff]  ;;  %v114_v45 = vld [vmem:[%s4428_s0 + $0x290] sm:$0xff] }
  0x19   :  { %2478 = vmatpush3.bf16.msra.mxu0 %v2477_v11  ;;  %v97_v41 = vld [vmem:[%s4428_s0 + $0x208] sm:$0xff]  ;;  %v2551_v42 = vpack.c.bf16 %v145_v36, %v144_v35  ;;  %v128_v43 = vld [vmem:[%s4428_s0 + $0x300] sm:$0xff]  ;;  %v115_v46 = vld [vmem:[%s4428_s0 + $0x298] sm:$0xff] }
  0x1a   :  { %2480 = vmatprep.subr.bf16.mxu0 %v2479_v15  ;;  %v129_v44 = vld [vmem:[%s4428_s0 + $0x308] sm:$0xff]  ;;  %v160_v47 = vld [vmem:[%s4429_s1] sm:$0xff]  ;;  %v146_v48 = vld [vmem:[%s4428_s0 + $0x390] sm:$0xff]  ;;  %v2521_v52 = vpack.c.bf16 %v97_v41, %v96_v40  ;;  %v2523_v55 = vpack.c.bf16 %v115_v46, %v114_v45 }
  0x1b   :  { %2510 = vmatpush3.bf16.msra.mxu1 %v2509_v14  ;;  %v147_v49 = vld [vmem:[%s4428_s0 + $0x398] sm:$0xff]  ;;  %v162_v50 = vld [vmem:[%s4429_s1 + $0x10] sm:$0xff]  ;;  %v169_v51 = vld [vmem:[%s4429_s1 + $0x48] sm:$0xff]  ;;  %v2553_v54 = vpack.c.bf16 %v129_v44, %v128_v43 }
  0x1c   :  { %2512 = vmatprep.subr.bf16.mxu1 %v2511_v19  ;;  %v171_v53 = vld [vmem:[%s4429_s1 + $0x58] sm:$0xff]  ;;  %v98_v56 = vld [vmem:[%s4428_s0 + $0x210] sm:$0xff]  ;;  %v2555_v58 = vpack.c.bf16 %v147_v49, %v146_v48  ;;  %v116_v61 = vld [vmem:[%s4428_s0 + $0x2a0] sm:$0xff] }
  0x1d   :  { %2482 = vmatpush3.bf16.msra.mxu0 %v2481_v25  ;;  %v99_v57 = vld [vmem:[%s4428_s0 + $0x218] sm:$0xff]  ;;  %v130_v59 = vld [vmem:[%s4428_s0 + $0x310] sm:$0xff]  ;;  %v168_v62 = vld [vmem:[%s4429_s1 + $0x40] sm:$0xff] }
  0x1e   :  { %2484 = vmatprep.subr.bf16.mxu0 %v2483_v27  ;;  %v131_v60 = vld [vmem:[%s4428_s0 + $0x318] sm:$0xff]  ;;  %v170_v63 = vld [vmem:[%s4429_s1 + $0x50] sm:$0xff]  ;;  %v117_v0 = vld [vmem:[%s4428_s0 + $0x2a8] sm:$0xff]  ;;  %v2525_v2 = vpack.c.bf16 %v99_v57, %v98_v56 }
  0x1f   :  { %2514 = vmatpush3.bf16.msra.mxu1 %v2513_v26  ;;  %v177_v1 = vld [vmem:[%s4429_s1 + $0x88] sm:$0xff]  ;;  %v148_v3 = vld [vmem:[%s4428_s0 + $0x3a0] sm:$0xff]  ;;  %v179_v5 = vld [vmem:[%s4429_s1 + $0x98] sm:$0xff]  ;;  %v2557_v6 = vpack.c.bf16 %v131_v60, %v130_v59  ;;  %v2527_v7 = vpack.c.bf16 %v117_v0, %v116_v61 }
  0x20   :  { %2516 = vmatprep.subr.bf16.mxu1 %v2515_v31  ;;  %v149_v4 = vld [vmem:[%s4428_s0 + $0x3a8] sm:$0xff]  ;;  %v100_v8 = vld [vmem:[%s4428_s0 + $0x220] sm:$0xff]  ;;  %v178_v14 = vld [vmem:[%s4429_s1 + $0x90] sm:$0xff] }
  0x21   :  { %2486 = vmatpush3.bf16.msra.mxu0 %v2485_v37  ;;  %v101_v9 = vld [vmem:[%s4428_s0 + $0x228] sm:$0xff]  ;;  %v2559_v10 = vpack.c.bf16 %v149_v4, %v148_v3  ;;  %v132_v11 = vld [vmem:[%s4428_s0 + $0x320] sm:$0xff]  ;;  %v187_v16 = vld [vmem:[%s4429_s1 + $0xd8] sm:$0xff] }
  0x22   :  { %2520 = vmatprep.subr.bf16.mxu0 %v2519_v39  ;;  %v133_v12 = vld [vmem:[%s4428_s0 + $0x328] sm:$0xff]  ;;  %v176_v13 = vld [vmem:[%s4429_s1 + $0x80] sm:$0xff]  ;;  %v2529_v17 = vpack.c.bf16 %v101_v9, %v100_v8  ;;  %v118_v18 = vld [vmem:[%s4428_s0 + $0x2b0] sm:$0xff] }
  0x23   :  { %2518 = vmatpush3.bf16.msra.mxu1 %v2517_v38  ;;  %v185_v15 = vld [vmem:[%s4429_s1 + $0xc8] sm:$0xff]  ;;  %v119_v19 = vld [vmem:[%s4428_s0 + $0x2b8] sm:$0xff]  ;;  %v2561_v20 = vpack.c.bf16 %v133_v12, %v132_v11  ;;  %v102_v22 = vld [vmem:[%s4428_s0 + $0x230] sm:$0xff] }
  0x24   :  { %2552 = vmatprep.subr.bf16.mxu1 %v2551_v42  ;;  %435 = vmatmul.mubr.f32.vlgmr.msra.gmra.mrb[0].mxu0 %v160_v47  ;;  %v2531_v21 = vpack.c.bf16 %v119_v19, %v118_v18  ;;  %v103_v23 = vld [vmem:[%s4428_s0 + $0x238] sm:$0xff]  ;;  %v150_v24 = vld [vmem:[%s4428_s0 + $0x3b0] sm:$0xff]  ;;  %v184_v27 = vld [vmem:[%s4429_s1 + $0xc0] sm:$0xff] }
  0x25   :  { %439 = vmatprep.mubr.f32.mxu0 %v169_v51  ;;  %2522 = vmatpush3.bf16.msra.mxu0 %v2521_v52  ;;  %v151_v25 = vld [vmem:[%s4428_s0 + $0x3b8] sm:$0xff]  ;;  %v134_v26 = vld [vmem:[%s4428_s0 + $0x330] sm:$0xff]  ;;  %v193_v31 = vld [vmem:[%s4429_s1 + $0x108] sm:$0xff]  ;;  %v2533_v32 = vpack.c.bf16 %v103_v23, %v102_v22 }
  0x26   :  { %575 = vmatmul.mubr.f32.vlgmr.msra.gmra.mrb[0].mxu1 %v162_v50  ;;  %2524 = vmatprep.subr.bf16.mxu0 %v2523_v55  ;;  %v2563_v28 = vpack.c.bf16 %v151_v25, %v150_v24  ;;  %v135_v29 = vld [vmem:[%s4428_s0 + $0x338] sm:$0xff]  ;;  %v186_v30 = vld [vmem:[%s4429_s1 + $0xd0] sm:$0xff]  ;;  %v120_v33 = vld [vmem:[%s4428_s0 + $0x2c0] sm:$0xff] }
  0x27   :  { %579 = vmatprep.mubr.f32.mxu1 %v171_v53  ;;  %2554 = vmatpush3.bf16.msra.mxu1 %v2553_v54  ;;  %v195_v34 = vld [vmem:[%s4429_s1 + $0x118] sm:$0xff]  ;;  %v2565_v35 = vpack.c.bf16 %v135_v29, %v134_v26  ;;  %v121_v36 = vld [vmem:[%s4428_s0 + $0x2c8] sm:$0xff]  ;;  %v192_v37 = vld [vmem:[%s4429_s1 + $0x100] sm:$0xff] }
  0x28   :  { %440 = vmatmul.mubr.f32.gmra.mrb[2].mxu0 %v168_v62  ;;  %2556 = vmatprep.subr.bf16.mxu1 %v2555_v58  ;;  %v2535_v38 = vpack.c.bf16 %v121_v36, %v120_v33  ;;  %v104_v39 = vld [vmem:[%s4428_s0 + $0x240] sm:$0xff]  ;;  %v105_v40 = vld [vmem:[%s4428_s0 + $0x248] sm:$0xff]  ;;  %v194_v44 = vld [vmem:[%s4429_s1 + $0x110] sm:$0xff] }
  0x29   :  { %444 = vmatprep.mubr.f32.mxu0 %v177_v1  ;;  %2526 = vmatpush3.bf16.msra.mxu0 %v2525_v2  ;;  %v152_v41 = vld [vmem:[%s4428_s0 + $0x3c0] sm:$0xff]  ;;  %v153_v42 = vld [vmem:[%s4428_s0 + $0x3c8] sm:$0xff]  ;;  %v2537_v46 = vpack.c.bf16 %v105_v40, %v104_v39  ;;  %v203_v49 = vld [vmem:[%s4429_s1 + $0x158] sm:$0xff] }
  0x2a   :  { %580 = vmatmul.mubr.f32.gmra.mrb[2].mxu1 %v170_v63  ;;  %2528 = vmatprep.subr.bf16.mxu0 %v2527_v7  ;;  %v136_v43 = vld [vmem:[%s4428_s0 + $0x340] sm:$0xff]  ;;  %v201_v45 = vld [vmem:[%s4429_s1 + $0x148] sm:$0xff]  ;;  %v2567_v47 = vpack.c.bf16 %v153_v42, %v152_v41  ;;  %v122_v52 = vld [vmem:[%s4428_s0 + $0x2d0] sm:$0xff] }
  0x2b   :  { %584 = vmatprep.mubr.f32.mxu1 %v179_v5  ;;  %2558 = vmatpush3.bf16.msra.mxu1 %v2557_v6  ;;  %v137_v48 = vld [vmem:[%s4428_s0 + $0x348] sm:$0xff]  ;;  %v200_v51 = vld [vmem:[%s4429_s1 + $0x140] sm:$0xff]  ;;  %v123_v53 = vld [vmem:[%s4428_s0 + $0x2d8] sm:$0xff] }
  0x2c   :  { %445 = vmatmul.mubr.f32.gmra.mrb[4].mxu0 %v176_v13  ;;  %2560 = vmatprep.subr.bf16.mxu1 %v2559_v10  ;;  %v2569_v50 = vpack.c.bf16 %v137_v48, %v136_v43  ;;  %v202_v54 = vld [vmem:[%s4429_s1 + $0x150] sm:$0xff]  ;;  %v2539_v55 = vpack.c.bf16 %v123_v53, %v122_v52  ;;  %v107_v57 = vld [vmem:[%s4428_s0 + $0x258] sm:$0xff]  ;;  %v209_v58 = vld [vmem:[%s4429_s1 + $0x188] sm:$0xff] }
  0x2d   :  { %449 = vmatprep.mubr.f32.mxu0 %v185_v15  ;;  %2530 = vmatpush3.bf16.msra.mxu0 %v2529_v17  ;;  %v106_v56 = vld [vmem:[%s4428_s0 + $0x250] sm:$0xff]  ;;  %v155_v61 = vld [vmem:[%s4428_s0 + $0x3d8] sm:$0xff]  ;;  %v208_v2 = vld [vmem:[%s4429_s1 + $0x180] sm:$0xff] }
  0x2e   :  { %585 = vmatmul.mubr.f32.gmra.mrb[4].mxu1 %v178_v14  ;;  %2532 = vmatprep.subr.bf16.mxu0 %v2531_v21  ;;  %v2541_v59 = vpack.c.bf16 %v107_v57, %v106_v56  ;;  %v154_v60 = vld [vmem:[%s4428_s0 + $0x3d0] sm:$0xff]  ;;  %v211_v62 = vld [vmem:[%s4429_s1 + $0x198] sm:$0xff]  ;;  %v124_v5 = vld [vmem:[%s4428_s0 + $0x2e0] sm:$0xff] }
  0x2f   :  { %589 = vmatprep.mubr.f32.mxu1 %v187_v16  ;;  %2562 = vmatpush3.bf16.msra.mxu1 %v2561_v20  ;;  %v2571_v63 = vpack.c.bf16 %v155_v61, %v154_v60  ;;  %v138_v0 = vld [vmem:[%s4428_s0 + $0x350] sm:$0xff]  ;;  %v139_v1 = vld [vmem:[%s4428_s0 + $0x358] sm:$0xff]  ;;  %v217_v6 = vld [vmem:[%s4429_s1 + $0x1c8] sm:$0xff] }
  0x30   :  { %450 = vmatmul.mubr.f32.gmra.mrb[6].mxu0 %v184_v27  ;;  %2564 = vmatprep.subr.bf16.mxu1 %v2563_v28  ;;  %v210_v3 = vld [vmem:[%s4429_s1 + $0x190] sm:$0xff]  ;;  %v2573_v4 = vpack.c.bf16 %v139_v1, %v138_v0  ;;  %v125_v7 = vld [vmem:[%s4428_s0 + $0x2e8] sm:$0xff]  ;;  %v108_v8 = vld [vmem:[%s4428_s0 + $0x260] sm:$0xff] }
  0x31   :  { %454 = vmatprep.mubr.f32.mxu0 %v193_v31  ;;  %2534 = vmatpush3.bf16.msra.mxu0 %v2533_v32  ;;  %v2543_v9 = vpack.c.bf16 %v125_v7, %v124_v5  ;;  %v109_v10 = vld [vmem:[%s4428_s0 + $0x268] sm:$0xff]  ;;  %v156_v11 = vld [vmem:[%s4428_s0 + $0x3e0] sm:$0xff]  ;;  %v219_v13 = vld [vmem:[%s4429_s1 + $0x1d8] sm:$0xff] }
  0x32   :  { %590 = vmatmul.mubr.f32.gmra.mrb[6].mxu1 %v186_v30  ;;  %2536 = vmatprep.subr.bf16.mxu0 %v2535_v38  ;;  %v157_v12 = vld [vmem:[%s4428_s0 + $0x3e8] sm:$0xff]  ;;  %v2545_v14 = vpack.c.bf16 %v109_v10, %v108_v8  ;;  %v140_v16 = vld [vmem:[%s4428_s0 + $0x360] sm:$0xff]  ;;  %v218_v19 = vld [vmem:[%s4429_s1 + $0x1d0] sm:$0xff] }
  0x33   :  { %594 = vmatprep.mubr.f32.mxu1 %v195_v34  ;;  %2566 = vmatpush3.bf16.msra.mxu1 %v2565_v35  ;;  %v2575_v15 = vpack.c.bf16 %v157_v12, %v156_v11  ;;  %v141_v17 = vld [vmem:[%s4428_s0 + $0x368] sm:$0xff]  ;;  %v216_v18 = vld [vmem:[%s4429_s1 + $0x1c0] sm:$0xff]  ;;  %v126_v21 = vld [vmem:[%s4428_s0 + $0x2f0] sm:$0xff] }
  0x34   :  { %455 = vmatmul.mubr.f32.gmra.mrb[8].mxu0 %v192_v37  ;;  %2568 = vmatprep.subr.bf16.mxu1 %v2567_v47  ;;  %v2577_v20 = vpack.c.bf16 %v141_v17, %v140_v16  ;;  %v225_v22 = vld [vmem:[%s4429_s1 + $0x208] sm:$0xff]  ;;  %v127_v23 = vld [vmem:[%s4428_s0 + $0x2f8] sm:$0xff]  ;;  %v110_v24 = vld [vmem:[%s4428_s0 + $0x270] sm:$0xff] }
  0x35   :  { %459 = vmatprep.mubr.f32.mxu0 %v201_v45  ;;  %2538 = vmatpush3.bf16.msra.mxu0 %v2537_v46  ;;  %v2547_v25 = vpack.c.bf16 %v127_v23, %v126_v21  ;;  %v111_v26 = vld [vmem:[%s4428_s0 + $0x278] sm:$0xff]  ;;  %v158_v27 = vld [vmem:[%s4428_s0 + $0x3f0] sm:$0xff]  ;;  %v224_v35 = vld [vmem:[%s4429_s1 + $0x200] sm:$0xff] }
  0x36   :  { %595 = vmatmul.mubr.f32.gmra.mrb[8].mxu1 %v194_v44  ;;  %2540 = vmatprep.subr.bf16.mxu0 %v2539_v55  ;;  %v159_v28 = vld [vmem:[%s4428_s0 + $0x3f8] sm:$0xff]  ;;  %v2549_v30 = vpack.c.bf16 %v111_v26, %v110_v24  ;;  %v142_v32 = vld [vmem:[%s4428_s0 + $0x370] sm:$0xff]  ;;  %v233_v37 = vld [vmem:[%s4429_s1 + $0x248] sm:$0xff] }
  0x37   :  { %599 = vmatprep.mubr.f32.mxu1 %v203_v49  ;;  %2570 = vmatpush3.bf16.msra.mxu1 %v2569_v50  ;;  %v227_v29 = vld [vmem:[%s4429_s1 + $0x218] sm:$0xff]  ;;  %v2579_v31 = vpack.c.bf16 %v159_v28, %v158_v27  ;;  %v226_v36 = vld [vmem:[%s4429_s1 + $0x210] sm:$0xff]  ;;  %v280_v39 = vld [vmem:[%s4430_s2] sm:$0xff] }
  0x38   :  { %460 = vmatmul.mubr.f32.gmra.mrb[10].mxu0 %v200_v51  ;;  %2572 = vmatprep.subr.bf16.mxu1 %v2571_v63  ;;  %v143_v33 = vld [vmem:[%s4428_s0 + $0x378] sm:$0xff]  ;;  %v282_v40 = vld [vmem:[%s4430_s2 + $0x10] sm:$0xff]  ;;  %v232_v41 = vld [vmem:[%s4429_s1 + $0x240] sm:$0xff] }
  0x39   :  { %464 = vmatprep.mubr.f32.mxu0 %v209_v58  ;;  %2542 = vmatpush3.bf16.msra.mxu0 %v2541_v59  ;;  %v2581_v34 = vpack.c.bf16 %v143_v33, %v142_v32  ;;  %v235_v38 = vld [vmem:[%s4429_s1 + $0x258] sm:$0xff]  ;;  %v234_v42 = vld [vmem:[%s4429_s1 + $0x250] sm:$0xff]  ;;  %v241_v43 = vld [vmem:[%s4429_s1 + $0x288] sm:$0xff] }
  0x3a   :  { %600 = vmatmul.mubr.f32.gmra.mrb[10].mxu1 %v202_v54  ;;  %2544 = vmatprep.subr.bf16.mxu0 %v2543_v9  ;;  %v243_v44 = vld [vmem:[%s4429_s1 + $0x298] sm:$0xff]  ;;  %v281_v45 = vld [vmem:[%s4430_s2 + $0x8] sm:$0xff]  ;;  %v240_v47 = vld [vmem:[%s4429_s1 + $0x280] sm:$0xff] }
  0x3b   :  { %604 = vmatprep.mubr.f32.mxu1 %v211_v62  ;;  %2574 = vmatpush3.bf16.msra.mxu1 %v2573_v4  ;;  %v283_v46 = vld [vmem:[%s4430_s2 + $0x18] sm:$0xff]  ;;  %v242_v48 = vld [vmem:[%s4429_s1 + $0x290] sm:$0xff]  ;;  %v249_v49 = vld [vmem:[%s4429_s1 + $0x2c8] sm:$0xff] }
  0x3c   :  { %465 = vmatmul.mubr.f32.gmra.mrb[12].mxu0 %v208_v2  ;;  %2576 = vmatprep.subr.bf16.mxu1 %v2575_v15  ;;  %v251_v50 = vld [vmem:[%s4429_s1 + $0x2d8] sm:$0xff]  ;;  %v284_v51 = vld [vmem:[%s4430_s2 + $0x20] sm:$0xff]  ;;  %v285_v52 = vld [vmem:[%s4430_s2 + $0x28] sm:$0xff] }
  0x3d   :  { %469 = vmatprep.mubr.f32.mxu0 %v217_v6  ;;  %2546 = vmatpush3.bf16.msra.mxu0 %v2545_v14  ;;  %v248_v53 = vld [vmem:[%s4429_s1 + $0x2c0] sm:$0xff]  ;;  %v250_v54 = vld [vmem:[%s4429_s1 + $0x2d0] sm:$0xff]  ;;  %v257_v55 = vld [vmem:[%s4429_s1 + $0x308] sm:$0xff] }
  0x3e   :  { %605 = vmatmul.mubr.f32.gmra.mrb[12].mxu1 %v210_v3  ;;  %2548 = vmatprep.subr.bf16.mxu0 %v2547_v25  ;;  %v259_v56 = vld [vmem:[%s4429_s1 + $0x318] sm:$0xff]  ;;  %v286_v57 = vld [vmem:[%s4430_s2 + $0x30] sm:$0xff]  ;;  %v256_v59 = vld [vmem:[%s4429_s1 + $0x300] sm:$0xff] }
  0x3f   :  { %609 = vmatprep.mubr.f32.mxu1 %v219_v13  ;;  %2578 = vmatpush3.bf16.msra.mxu1 %v2577_v20  ;;  %v287_v58 = vld [vmem:[%s4430_s2 + $0x38] sm:$0xff]  ;;  %v258_v60 = vld [vmem:[%s4429_s1 + $0x310] sm:$0xff]  ;;  %v265_v61 = vld [vmem:[%s4429_s1 + $0x348] sm:$0xff] }
  0x40   :  { %470 = vmatmul.mubr.f32.gmra.mrb[14].mxu0 %v216_v18  ;;  %2580 = vmatprep.subr.bf16.mxu1 %v2579_v31  ;;  %v267_v62 = vld [vmem:[%s4429_s1 + $0x358] sm:$0xff]  ;;  %v288_v63 = vld [vmem:[%s4430_s2 + $0x40] sm:$0xff]  ;;  %v289_v0 = vld [vmem:[%s4430_s2 + $0x48] sm:$0xff] }
  0x41   :  { %474 = vmatprep.mubr.f32.mxu0 %v225_v22  ;;  %2550 = vmatpush3.bf16.msra.mxu0 %v2549_v30  ;;  %v264_v1 = vld [vmem:[%s4429_s1 + $0x340] sm:$0xff]  ;;  %v266_v2 = vld [vmem:[%s4429_s1 + $0x350] sm:$0xff]  ;;  %v273_v3 = vld [vmem:[%s4429_s1 + $0x388] sm:$0xff] }
  0x42   :  { %610 = vmatmul.mubr.f32.gmra.mrb[14].mxu1 %v218_v19  ;;  %297 = vperm.xlu0 %2624, %v280_v39   ;;  %v275_v4 = vld [vmem:[%s4429_s1 + $0x398] sm:$0xff]  ;;  %v290_v5 = vld [vmem:[%s4430_s2 + $0x50] sm:$0xff]  ;;  %v272_v7 = vld [vmem:[%s4429_s1 + $0x380] sm:$0xff] }
  0x43   :  { %614 = vmatprep.mubr.f32.mxu1 %v227_v29  ;;  %2582 = vmatpush3.bf16.msra.mxu1 %v2581_v34  ;;  %v291_v6 = vld [vmem:[%s4430_s2 + $0x58] sm:$0xff]  ;;  %v274_v8 = vld [vmem:[%s4429_s1 + $0x390] sm:$0xff]  ;;  %v165_v9 = vld [vmem:[%s4429_s1 + $0x28] sm:$0xff] }
  0x44   :  { %475 = vmatmul.mubr.f32.gmra.mrb[16].mxu0 %v224_v35  ;;  %307 = vperm.xlu1 %2625, %v282_v40   ;;  %v167_v10 = vld [vmem:[%s4429_s1 + $0x38] sm:$0xff]  ;;  %v292_v11 = vld [vmem:[%s4430_s2 + $0x60] sm:$0xff]  ;;  %v293_v12 = vld [vmem:[%s4430_s2 + $0x68] sm:$0xff] }
  0x45   :  { %479 = vmatprep.mubr.f32.mxu0 %v233_v37  ;;  %v164_v13 = vld [vmem:[%s4429_s1 + $0x20] sm:$0xff]  ;;  %v166_v14 = vld [vmem:[%s4429_s1 + $0x30] sm:$0xff]  ;;  %v173_v15 = vld [vmem:[%s4429_s1 + $0x68] sm:$0xff] }
  0x46   :  { %615 = vmatmul.mubr.f32.gmra.mrb[16].mxu1 %v226_v36  ;;  %302 = vperm.xlu0 %2624, %v281_v45   ;;  %v175_v16 = vld [vmem:[%s4429_s1 + $0x78] sm:$0xff]  ;;  %v294_v17 = vld [vmem:[%s4430_s2 + $0x70] sm:$0xff]  ;;  %v1157_v18 = vld [vmem:[%s4431_s3 + $0x8] sm:$0xff] }
  0x47   :  { %619 = vmatprep.mubr.f32.mxu1 %v235_v38  ;;  %v172_v19 = vld [vmem:[%s4429_s1 + $0x60] sm:$0xff]  ;;  %v174_v20 = vld [vmem:[%s4429_s1 + $0x70] sm:$0xff]  ;;  %v181_v21 = vld [vmem:[%s4429_s1 + $0xa8] sm:$0xff] }
  0x48   :  { %480 = vmatmul.mubr.f32.gmra.mrb[18].mxu0 %v232_v41  ;;  %312 = vperm.xlu1 %2625, %v283_v46   ;;  %v183_v22 = vld [vmem:[%s4429_s1 + $0xb8] sm:$0xff]  ;;  %v1156_v23 = vld [vmem:[%s4431_s3] sm:$0xff]  ;;  %v1158_v24 = vld [vmem:[%s4431_s3 + $0x10] sm:$0xff] }
  0x49   :  { %484 = vmatprep.mubr.f32.mxu0 %v241_v43  ;;  %v180_v25 = vld [vmem:[%s4429_s1 + $0xa0] sm:$0xff]  ;;  %v182_v26 = vld [vmem:[%s4429_s1 + $0xb0] sm:$0xff]  ;;  %v189_v27 = vld [vmem:[%s4429_s1 + $0xe8] sm:$0xff] }
  0x4a   :  { %620 = vmatmul.mubr.f32.gmra.mrb[18].mxu1 %v234_v42  ;;  %317 = vperm.xlu0 %2624, %v284_v51   ;;  %v191_v28 = vld [vmem:[%s4429_s1 + $0xf8] sm:$0xff]  ;;  %v1261_v29 = vld [vmem:[%s4432_s4] sm:$0xff]  ;;  %v1263_v30 = vld [vmem:[%s4432_s4 + $0x10] sm:$0xff] }
  0x4b   :  { %624 = vmatprep.mubr.f32.mxu1 %v243_v44  ;;  %v188_v31 = vld [vmem:[%s4429_s1 + $0xe0] sm:$0xff]  ;;  %v190_v32 = vld [vmem:[%s4429_s1 + $0xf0] sm:$0xff]  ;;  %v197_v33 = vld [vmem:[%s4429_s1 + $0x128] sm:$0xff] }
  0x4c   :  { %485 = vmatmul.mubr.f32.gmra.mrb[20].mxu0 %v240_v47  ;;  %322 = vperm.xlu1 %2625, %v285_v52   ;;  %v199_v34 = vld [vmem:[%s4429_s1 + $0x138] sm:$0xff]  ;;  %v1262_v35 = vld [vmem:[%s4432_s4 + $0x8] sm:$0xff]  ;;  %v196_v37 = vld [vmem:[%s4429_s1 + $0x120] sm:$0xff] }
  0x4d   :  { %489 = vmatprep.mubr.f32.mxu0 %v249_v49  ;;  %v1264_v36 = vld [vmem:[%s4432_s4 + $0x18] sm:$0xff]  ;;  %v198_v38 = vld [vmem:[%s4429_s1 + $0x130] sm:$0xff]  ;;  %v205_v39 = vld [vmem:[%s4429_s1 + $0x168] sm:$0xff] }
  0x4e   :  { %625 = vmatmul.mubr.f32.gmra.mrb[20].mxu1 %v242_v48  ;;  %327 = vperm.xlu0 %2624, %v286_v57   ;;  %v207_v40 = vld [vmem:[%s4429_s1 + $0x178] sm:$0xff]  ;;  %v1160_v42 = vld [vmem:[%s4431_s3 + $0x20] sm:$0xff]  ;;  %v206_v44 = vld [vmem:[%s4429_s1 + $0x170] sm:$0xff] }
  0x4f   :  { %629 = vmatprep.mubr.f32.mxu1 %v251_v50  ;;  %v1159_v41 = vld [vmem:[%s4431_s3 + $0x18] sm:$0xff]  ;;  %v204_v43 = vld [vmem:[%s4429_s1 + $0x160] sm:$0xff]  ;;  %v213_v45 = vld [vmem:[%s4429_s1 + $0x1a8] sm:$0xff] }
  0x50   :  { %490 = vmatmul.mubr.f32.gmra.mrb[22].mxu0 %v248_v53  ;;  %332 = vperm.xlu1 %2625, %v287_v58   ;;  %v215_v46 = vld [vmem:[%s4429_s1 + $0x1b8] sm:$0xff]  ;;  %v1161_v47 = vld [vmem:[%s4431_s3 + $0x28] sm:$0xff]  ;;  %v1265_v48 = vld [vmem:[%s4432_s4 + $0x20] sm:$0xff] }
  0x51   :  { %494 = vmatprep.mubr.f32.mxu0 %v257_v55  ;;  %v212_v49 = vld [vmem:[%s4429_s1 + $0x1a0] sm:$0xff]  ;;  %v214_v50 = vld [vmem:[%s4429_s1 + $0x1b0] sm:$0xff]  ;;  %v221_v51 = vld [vmem:[%s4429_s1 + $0x1e8] sm:$0xff] }
  0x52   :  { %630 = vmatmul.mubr.f32.gmra.mrb[22].mxu1 %v250_v54  ;;  %337 = vperm.xlu0 %2624, %v288_v63   ;;  %v223_v52 = vld [vmem:[%s4429_s1 + $0x1f8] sm:$0xff]  ;;  %v1266_v53 = vld [vmem:[%s4432_s4 + $0x28] sm:$0xff]  ;;  %v1162_v54 = vld [vmem:[%s4431_s3 + $0x30] sm:$0xff] }
  0x53   :  { %634 = vmatprep.mubr.f32.mxu1 %v259_v56  ;;  %v220_v55 = vld [vmem:[%s4429_s1 + $0x1e0] sm:$0xff]  ;;  %v222_v56 = vld [vmem:[%s4429_s1 + $0x1f0] sm:$0xff]  ;;  %v229_v57 = vld [vmem:[%s4429_s1 + $0x228] sm:$0xff] }
  0x54   :  { %495 = vmatmul.mubr.f32.gmra.mrb[24].mxu0 %v256_v59  ;;  %342 = vperm.xlu1 %2625, %v289_v0   ;;  %v231_v58 = vld [vmem:[%s4429_s1 + $0x238] sm:$0xff]  ;;  %v237_v63 = vld [vmem:[%s4429_s1 + $0x268] sm:$0xff] }
  0x55   :  { %499 = vmatprep.mubr.f32.mxu0 %v265_v61  ;;  %v1163_v59 = vld [vmem:[%s4431_s3 + $0x38] sm:$0xff]  ;;  %v228_v61 = vld [vmem:[%s4429_s1 + $0x220] sm:$0xff] }
  0x56   :  { %635 = vmatmul.mubr.f32.gmra.mrb[24].mxu1 %v258_v60  ;;  %347 = vperm.xlu0 %2624, %v290_v5   ;;  %v1267_v60 = vld [vmem:[%s4432_s4 + $0x30] sm:$0xff]  ;;  %v239_v0 = vld [vmem:[%s4429_s1 + $0x278] sm:$0xff]  ;;  %v245_v5 = vld [vmem:[%s4429_s1 + $0x2a8] sm:$0xff] }
  0x57   :  { %639 = vmatprep.mubr.f32.mxu1 %v267_v62  ;;  %v230_v62 = vld [vmem:[%s4429_s1 + $0x230] sm:$0xff] }
  0x58   :  { %500 = vmatmul.mubr.f32.gmra.mrb[26].mxu0 %v264_v1  ;;  %352 = vperm.xlu1 %2625, %v291_v6   ;;  %v1268_v1 = vld [vmem:[%s4432_s4 + $0x38] sm:$0xff] }
  0x59   :  { %504 = vmatprep.mubr.f32.mxu0 %v273_v3  ;;  %v236_v3 = vld [vmem:[%s4429_s1 + $0x260] sm:$0xff]  ;;  %v247_v6 = vld [vmem:[%s4429_s1 + $0x2b8] sm:$0xff] }
  0x5a   :  { %640 = vmatmul.mubr.f32.gmra.mrb[26].mxu1 %v266_v2  ;;  %357 = vperm.xlu0 %2624, %v292_v11   ;;  %v1164_v2 = vld [vmem:[%s4431_s3 + $0x40] sm:$0xff]  ;;  %v253_v11 = vld [vmem:[%s4429_s1 + $0x2e8] sm:$0xff] }
  0x5b   :  { %644 = vmatprep.mubr.f32.mxu1 %v275_v4  ;;  %v238_v4 = vld [vmem:[%s4429_s1 + $0x270] sm:$0xff] }
  0x5c   :  { %505 = vmatmul.mubr.f32.gmra.mrb[28].mxu0 %v272_v7  ;;  %362 = vperm.xlu1 %2625, %v293_v12   ;;  %v1165_v7 = vld [vmem:[%s4431_s3 + $0x48] sm:$0xff]  ;;  %v255_v12 = vld [vmem:[%s4429_s1 + $0x2f8] sm:$0xff] }
  0x5d   :  { %714 = vmatprep.mubr.f32.mxu0 %v165_v9  ;;  %v244_v9 = vld [vmem:[%s4429_s1 + $0x2a0] sm:$0xff] }
  0x5e   :  { %645 = vmatmul.mubr.f32.gmra.mrb[28].mxu1 %v274_v8  ;;  %367 = vperm.xlu0 %2624, %v294_v17   ;;  %v1269_v8 = vld [vmem:[%s4432_s4 + $0x40] sm:$0xff]  ;;  %v261_v17 = vld [vmem:[%s4429_s1 + $0x328] sm:$0xff] }
  0x5f   :  { %854 = vmatprep.mubr.f32.mxu1 %v167_v10  ;;  %v246_v10 = vld [vmem:[%s4429_s1 + $0x2b0] sm:$0xff] }
  0x60   :  { %715 = vmatmul.mubr.f32.vlgmr.msra.gmra.mrb[30].mxu0 %v164_v13  ;;  %1178 = vperm.xlu1 %2625, %v1157_v18   ;;  %v1270_v13 = vld [vmem:[%s4432_s4 + $0x48] sm:$0xff]  ;;  %v263_v18 = vld [vmem:[%s4429_s1 + $0x338] sm:$0xff] }
  0x61   :  { %719 = vmatprep.mubr.f32.mxu0 %v173_v15  ;;  %v252_v15 = vld [vmem:[%s4429_s1 + $0x2e0] sm:$0xff] }
  0x62   :  { %855 = vmatmul.mubr.f32.vlgmr.msra.gmra.mrb[30].mxu1 %v166_v14  ;;  %1173 = vperm.xlu0 %2624, %v1156_v23   ;;  %v1166_v14 = vld [vmem:[%s4431_s3 + $0x50] sm:$0xff]  ;;  %v269_v23 = vld [vmem:[%s4429_s1 + $0x368] sm:$0xff] }
  0x63   :  { %859 = vmatprep.mubr.f32.mxu1 %v175_v16  ;;  %v254_v16 = vld [vmem:[%s4429_s1 + $0x2f0] sm:$0xff] }
  0x64   :  { %720 = vmatmul.mubr.f32.gmra.mrb[32].mxu0 %v172_v19  ;;  %1183 = vperm.xlu1 %2625, %v1158_v24   ;;  %v1167_v19 = vld [vmem:[%s4431_s3 + $0x58] sm:$0xff] }
  0x65   :  { %724 = vmatprep.mubr.f32.mxu0 %v181_v21  ;;  %v260_v21 = vld [vmem:[%s4429_s1 + $0x320] sm:$0xff]  ;;  %v271_v24 = vld [vmem:[%s4429_s1 + $0x378] sm:$0xff] }
  0x66   :  { %860 = vmatmul.mubr.f32.gmra.mrb[32].mxu1 %v174_v20  ;;  %1278 = vperm.xlu0 %2624, %v1261_v29   ;;  %v1271_v20 = vld [vmem:[%s4432_s4 + $0x50] sm:$0xff]  ;;  %v277_v29 = vld [vmem:[%s4429_s1 + $0x3a8] sm:$0xff] }
  0x67   :  { %864 = vmatprep.mubr.f32.mxu1 %v183_v22  ;;  %v262_v22 = vld [vmem:[%s4429_s1 + $0x330] sm:$0xff] }
  0x68   :  { %725 = vmatmul.mubr.f32.gmra.mrb[34].mxu0 %v180_v25  ;;  %1288 = vperm.xlu1 %2625, %v1263_v30   ;;  %v1272_v25 = vld [vmem:[%s4432_s4 + $0x58] sm:$0xff] }
  0x69   :  { %729 = vmatprep.mubr.f32.mxu0 %v189_v27  ;;  %v268_v27 = vld [vmem:[%s4429_s1 + $0x360] sm:$0xff]  ;;  %v279_v30 = vld [vmem:[%s4429_s1 + $0x3b8] sm:$0xff] }
  0x6a   :  { %865 = vmatmul.mubr.f32.gmra.mrb[34].mxu1 %v182_v26  ;;  %1283 = vperm.xlu0 %2624, %v1262_v35   ;;  %v1168_v26 = vld [vmem:[%s4431_s3 + $0x60] sm:$0xff]  ;;  %v1274_v35 = vld [vmem:[%s4432_s4 + $0x68] sm:$0xff] }
  0x6b   :  { %869 = vmatprep.mubr.f32.mxu1 %v191_v28  ;;  %v270_v28 = vld [vmem:[%s4429_s1 + $0x370] sm:$0xff] }
  0x6c   :  { %730 = vmatmul.mubr.f32.gmra.mrb[36].mxu0 %v188_v31  ;;  %1293 = vperm.xlu1 %2625, %v1264_v36   ;;  %v1169_v31 = vld [vmem:[%s4431_s3 + $0x68] sm:$0xff] }
  0x6d   :  { %734 = vmatprep.mubr.f32.mxu0 %v197_v33  ;;  %v276_v33 = vld [vmem:[%s4429_s1 + $0x3a0] sm:$0xff] }
  0x6e   :  { %870 = vmatmul.mubr.f32.gmra.mrb[36].mxu1 %v190_v32  ;;  %1188 = vperm.xlu0 %2624, %v1159_v41   ;;  %v1273_v32 = vld [vmem:[%s4432_s4 + $0x60] sm:$0xff] }
  0x6f   :  { %874 = vmatprep.mubr.f32.mxu1 %v199_v34  ;;  %v278_v34 = vld [vmem:[%s4429_s1 + $0x3b0] sm:$0xff] }
  0x70   :  { %735 = vmatmul.mubr.f32.gmra.mrb[38].mxu0 %v196_v37  ;;  %1193 = vperm.xlu1 %2625, %v1160_v42  }
  0x71   :  { %739 = vmatprep.mubr.f32.mxu0 %v205_v39 }
  0x72   :  { %875 = vmatmul.mubr.f32.gmra.mrb[38].mxu1 %v198_v38  ;;  %1198 = vperm.xlu0 %2624, %v1161_v47  }
  0x73   :  { %879 = vmatprep.mubr.f32.mxu1 %v207_v40 }
  0x74   :  { %740 = vmatmul.mubr.f32.gmra.mrb[40].mxu0 %v204_v43  ;;  %1298 = vperm.xlu1 %2625, %v1265_v48  }
  0x75   :  { %744 = vmatprep.mubr.f32.mxu0 %v213_v45 }
  0x76   :  { %880 = vmatmul.mubr.f32.gmra.mrb[40].mxu1 %v206_v44  ;;  %1303 = vperm.xlu0 %2624, %v1266_v53  }
  0x77   :  { %884 = vmatprep.mubr.f32.mxu1 %v215_v46 }
  0x78   :  { %745 = vmatmul.mubr.f32.gmra.mrb[42].mxu0 %v212_v49  ;;  %1203 = vperm.xlu1 %2625, %v1162_v54  }
  0x79   :  { %749 = vmatprep.mubr.f32.mxu0 %v221_v51 }
  0x7a   :  { %885 = vmatmul.mubr.f32.gmra.mrb[42].mxu1 %v214_v50  ;;  %1208 = vperm.xlu0 %2624, %v1163_v59  }
  0x7b   :  { %889 = vmatprep.mubr.f32.mxu1 %v223_v52 }
  0x7c   :  { %750 = vmatmul.mubr.f32.gmra.mrb[44].mxu0 %v220_v55  ;;  %1308 = vperm.xlu1 %2625, %v1267_v60  }
  0x7d   :  { %754 = vmatprep.mubr.f32.mxu0 %v229_v57 }
  0x7e   :  { %890 = vmatmul.mubr.f32.gmra.mrb[44].mxu1 %v222_v56  ;;  %1313 = vperm.xlu0 %2624, %v1268_v1  }
  0x7f   :  { %894 = vmatprep.mubr.f32.mxu1 %v231_v58 }
  0x80   :  { %755 = vmatmul.mubr.f32.gmra.mrb[46].mxu0 %v228_v61  ;;  %1213 = vperm.xlu1 %2625, %v1164_v2  }
  0x81   :  { %759 = vmatprep.mubr.f32.mxu0 %v237_v63 }
  0x82   :  { %895 = vmatmul.mubr.f32.gmra.mrb[46].mxu1 %v230_v62  ;;  %1218 = vperm.xlu0 %2624, %v1165_v7  }
  0x83   :  { %899 = vmatprep.mubr.f32.mxu1 %v239_v0 }
  0x84   :  { %760 = vmatmul.mubr.f32.gmra.mrb[48].mxu0 %v236_v3  ;;  %1318 = vperm.xlu1 %2625, %v1269_v8  }
  0x85   :  { %764 = vmatprep.mubr.f32.mxu0 %v245_v5 }
  0x86   :  { %900 = vmatmul.mubr.f32.gmra.mrb[48].mxu1 %v238_v4  ;;  %1323 = vperm.xlu0 %2624, %v1270_v13  }
  0x87   :  { %904 = vmatprep.mubr.f32.mxu1 %v247_v6 }
  0x88   :  { %765 = vmatmul.mubr.f32.gmra.mrb[50].mxu0 %v244_v9  ;;  %1223 = vperm.xlu1 %2625, %v1166_v14  }
  0x89   :  { %769 = vmatprep.mubr.f32.mxu0 %v253_v11 }
  0x8a   :  { %905 = vmatmul.mubr.f32.gmra.mrb[50].mxu1 %v246_v10  ;;  %1228 = vperm.xlu0 %2624, %v1167_v19  }
  0x8b   :  { %909 = vmatprep.mubr.f32.mxu1 %v255_v12 }
  0x8c   :  { %770 = vmatmul.mubr.f32.gmra.mrb[52].mxu0 %v252_v15  ;;  %1328 = vperm.xlu1 %2625, %v1271_v20  }
  0x8d   :  { %774 = vmatprep.mubr.f32.mxu0 %v261_v17 }
  0x8e   :  { %910 = vmatmul.mubr.f32.gmra.mrb[52].mxu1 %v254_v16  ;;  %1333 = vperm.xlu0 %2624, %v1272_v25  }
  0x8f   :  { %914 = vmatprep.mubr.f32.mxu1 %v263_v18 }
  0x90   :  { %775 = vmatmul.mubr.f32.gmra.mrb[54].mxu0 %v260_v21  ;;  %1233 = vperm.xlu1 %2625, %v1168_v26  }
  0x91   :  { %779 = vmatprep.mubr.f32.mxu0 %v269_v23 }
  0x92   :  { %915 = vmatmul.mubr.f32.gmra.mrb[54].mxu1 %v262_v22  ;;  %1238 = vperm.xlu0 %2624, %v1169_v31  }
  0x93   :  { %919 = vmatprep.mubr.f32.mxu1 %v271_v24 }
  0x94   :  { %780 = vmatmul.mubr.f32.gmra.mrb[56].mxu0 %v268_v27  ;;  %1338 = vperm.xlu1 %2625, %v1273_v32  }
  0x95   :  { %784 = vmatprep.mubr.f32.mxu0 %v277_v29 }
  0x96   :  { %920 = vmatmul.mubr.f32.gmra.mrb[56].mxu1 %v270_v28  ;;  %1343 = vperm.xlu0 %2624, %v1274_v35  }
  0x97   :  { %924 = vmatprep.mubr.f32.mxu1 %v279_v30 }
  0x98   :  { %785 = vmatmul.mubr.f32.gmra.mrb[58].mxu0 %v276_v33 }
  0x9a   :  { %925 = vmatmul.mubr.f32.gmra.mrb[58].mxu1 %v278_v34 }
  0xc1   :  { %v298_v36 = vpop.permute.xlu0 %297 }
  0xc3   :  { %v308_v52 = vpop.permute.xlu1 %307 }
  0xc5   :  { %v303_v50 = vpop.permute.xlu0 %302 }
  0xc7   :  { %v313_v4 = vpop.permute.xlu1 %312 }
  0xc9   :  { %v318_v13 = vpop.permute.xlu0 %317 }
  0xcb   :  { %v323_v22 = vpop.permute.xlu1 %322 }
  0xcd   :  { %v328_v31 = vpop.permute.xlu0 %327 }
  0xf7   :  { %v2090_v37 = vpop.f32.mrb[0].mxu0 }
  0xf8   :  { %v2091_v38 = vpop.f32.mrb[1].mxu0 }
  0xf9   :  { %v2167_v39 = vpop.f32.mrb[0].mxu1  ;;  %v2092_v40 = vadd.f32 %v2091_v38, %v2090_v37 }
  0xfa   :  { %v2168_v41 = vpop.f32.mrb[1].mxu1 }
  0xfb   :  { %v2169_v42 = vadd.f32 %v2168_v41, %v2167_v39  ;;  %v437_v43 = vadd.f32 %v2092_v40, %v298_v36  ;;  %v2093_v44 = vpop.f32.mrb[2].mxu0  ;;  %v333_v40 = vpop.permute.xlu1 %332 }
  0xfc   :  { %v2094_v45 = vpop.f32.mrb[3].mxu0 }
  0xfd   :  { %v2170_v46 = vpop.f32.mrb[2].mxu1  ;;  %v3629_v47 = vadd.f32 %v2169_v42, %v437_v43  ;;  %v2095_v48 = vadd.f32 %v2094_v45, %v2093_v44 }
  0xfe   :  { %v2171_v49 = vpop.f32.mrb[3].mxu1 }
  0xff   :  { %v2172_v51 = vadd.f32 %v2171_v49, %v2170_v46  ;;  %v442_v53 = vadd.f32 %v2095_v48, %v303_v50  ;;  %v2096_v54 = vpop.f32.mrb[4].mxu0  ;;  %v338_v50 = vpop.permute.xlu0 %337 }
 0x100   :  { %v2097_v55 = vpop.f32.mrb[5].mxu0 }
 0x101   :  { %v2173_v56 = vpop.f32.mrb[4].mxu1  ;;  %v3631_v57 = vadd.f32 %v2172_v51, %v442_v53  ;;  %v2098_v58 = vadd.f32 %v2097_v55, %v2096_v54 }
 0x102   :  { %v2174_v59 = vpop.f32.mrb[5].mxu1 }
 0x103   :  { %v2175_v60 = vadd.f32 %v2174_v59, %v2173_v56  ;;  %v447_v61 = vadd.f32 %v2098_v58, %v308_v52  ;;  %v2099_v62 = vpop.f32.mrb[6].mxu0 }
 0x104   :  { %v2100_v63 = vpop.f32.mrb[7].mxu0 }
 0x105   :  { %v2176_v0 = vpop.f32.mrb[6].mxu1  ;;  %v3633_v1 = vadd.f32 %v2175_v60, %v447_v61  ;;  %v2101_v2 = vadd.f32 %v2100_v63, %v2099_v62  ;;  %v343_v60 = vpop.permute.xlu1 %342 }
 0x106   :  { %v2177_v3 = vpop.f32.mrb[7].mxu1 }
 0x107   :  { %v2178_v5 = vadd.f32 %v2177_v3, %v2176_v0  ;;  %v452_v6 = vadd.f32 %v2101_v2, %v313_v4  ;;  %v2102_v7 = vpop.f32.mrb[8].mxu0 }
 0x108   :  { %v2103_v8 = vpop.f32.mrb[9].mxu0 }
 0x109   :  { %v2179_v9 = vpop.f32.mrb[8].mxu1  ;;  %v3635_v10 = vadd.f32 %v2178_v5, %v452_v6  ;;  %v2104_v11 = vadd.f32 %v2103_v8, %v2102_v7  ;;  %v348_v6 = vpop.permute.xlu0 %347 }
 0x10a   :  { %v2180_v12 = vpop.f32.mrb[9].mxu1 }
 0x10b   :  { %v2181_v14 = vadd.f32 %v2180_v12, %v2179_v9  ;;  %v457_v15 = vadd.f32 %v2104_v11, %v318_v13  ;;  %v2105_v16 = vpop.f32.mrb[10].mxu0 }
 0x10c   :  { %v2106_v17 = vpop.f32.mrb[11].mxu0 }
 0x10d   :  { %v2182_v18 = vpop.f32.mrb[10].mxu1  ;;  %v3637_v19 = vadd.f32 %v2181_v14, %v457_v15  ;;  %v2107_v20 = vadd.f32 %v2106_v17, %v2105_v16  ;;  %v353_v16 = vpop.permute.xlu1 %352 }
 0x10e   :  { %v2183_v21 = vpop.f32.mrb[11].mxu1 }
 0x10f   :  { %v2184_v23 = vadd.f32 %v2183_v21, %v2182_v18  ;;  %v462_v24 = vadd.f32 %v2107_v20, %v323_v22  ;;  %v2108_v25 = vpop.f32.mrb[12].mxu0 }
 0x110   :  { %v2109_v26 = vpop.f32.mrb[13].mxu0 }
 0x111   :  { %v2185_v27 = vpop.f32.mrb[12].mxu1  ;;  %v3639_v28 = vadd.f32 %v2184_v23, %v462_v24  ;;  %v2110_v29 = vadd.f32 %v2109_v26, %v2108_v25  ;;  %v358_v26 = vpop.permute.xlu0 %357 }
 0x112   :  { %v2186_v30 = vpop.f32.mrb[13].mxu1 }
 0x113   :  { %v2187_v32 = vadd.f32 %v2186_v30, %v2185_v27  ;;  %v467_v33 = vadd.f32 %v2110_v29, %v328_v31  ;;  %v2111_v34 = vpop.f32.mrb[14].mxu0 }
 0x114   :  { %v2112_v35 = vpop.f32.mrb[15].mxu0 }
 0x115   :  { %v2188_v36 = vpop.f32.mrb[14].mxu1  ;;  %v3641_v37 = vadd.f32 %v2187_v32, %v467_v33  ;;  %v2113_v38 = vadd.f32 %v2112_v35, %v2111_v34 }
 0x116   :  { %v2189_v39 = vpop.f32.mrb[15].mxu1 }
 0x117   :  { %v2190_v41 = vadd.f32 %v2189_v39, %v2188_v36  ;;  %v472_v42 = vadd.f32 %v2113_v38, %v333_v40  ;;  %v2114_v43 = vpop.f32.mrb[16].mxu0  ;;  %v363_v36 = vpop.permute.xlu1 %362 }
 0x118   :  { %v2115_v44 = vpop.f32.mrb[17].mxu0 }
 0x119   :  { %v2191_v45 = vpop.f32.mrb[16].mxu1  ;;  %v3643_v46 = vadd.f32 %v2190_v41, %v472_v42  ;;  %v2116_v48 = vadd.f32 %v2115_v44, %v2114_v43 }
 0x11a   :  { %v2192_v49 = vpop.f32.mrb[17].mxu1 }
 0x11b   :  { %v2193_v51 = vadd.f32 %v2192_v49, %v2191_v45  ;;  %v477_v52 = vadd.f32 %v2116_v48, %v338_v50  ;;  %v2117_v53 = vpop.f32.mrb[18].mxu0  ;;  %v368_v48 = vpop.permute.xlu0 %367 }
 0x11c   :  { %v2118_v54 = vpop.f32.mrb[19].mxu0 }
 0x11d   :  { %v2194_v55 = vpop.f32.mrb[18].mxu1  ;;  %v3645_v56 = vadd.f32 %v2193_v51, %v477_v52  ;;  %v2119_v58 = vadd.f32 %v2118_v54, %v2117_v53 }
 0x11e   :  { %v2195_v59 = vpop.f32.mrb[19].mxu1 }
 0x11f   :  { %v2196_v61 = vadd.f32 %v2195_v59, %v2194_v55  ;;  %v482_v62 = vadd.f32 %v2119_v58, %v343_v60  ;;  %v2120_v63 = vpop.f32.mrb[20].mxu0 }
 0x120   :  { %v2121_v0 = vpop.f32.mrb[21].mxu0 }
 0x121   :  { %v2197_v2 = vpop.f32.mrb[20].mxu1  ;;  %v3647_v3 = vadd.f32 %v2196_v61, %v482_v62  ;;  %v2122_v4 = vadd.f32 %v2121_v0, %v2120_v63 }
 0x122   :  { %v2198_v5 = vpop.f32.mrb[21].mxu1 }
 0x123   :  { %v2199_v7 = vadd.f32 %v2198_v5, %v2197_v2  ;;  %v487_v8 = vadd.f32 %v2122_v4, %v348_v6  ;;  %v2123_v9 = vpop.f32.mrb[22].mxu0 }
 0x124   :  { %v2124_v11 = vpop.f32.mrb[23].mxu0 }
 0x125   :  { %v2200_v12 = vpop.f32.mrb[22].mxu1  ;;  %v3649_v13 = vadd.f32 %v2199_v7, %v487_v8  ;;  %v2125_v14 = vadd.f32 %v2124_v11, %v2123_v9 }
 0x126   :  { %v2201_v15 = vpop.f32.mrb[23].mxu1 }
 0x127   :  { %v2202_v17 = vadd.f32 %v2201_v15, %v2200_v12  ;;  %v492_v18 = vadd.f32 %v2125_v14, %v353_v16  ;;  %v2126_v20 = vpop.f32.mrb[24].mxu0 }
 0x128   :  { %v2127_v21 = vpop.f32.mrb[25].mxu0 }
 0x129   :  { %v2203_v22 = vpop.f32.mrb[24].mxu1  ;;  %v3651_v23 = vadd.f32 %v2202_v17, %v492_v18  ;;  %v2128_v24 = vadd.f32 %v2127_v21, %v2126_v20 }
 0x12a   :  { %v2204_v25 = vpop.f32.mrb[25].mxu1 }
 0x12b   :  { %v2205_v27 = vadd.f32 %v2204_v25, %v2203_v22  ;;  %v497_v29 = vadd.f32 %v2128_v24, %v358_v26  ;;  %v2129_v30 = vpop.f32.mrb[26].mxu0 }
 0x12c   :  { %v2130_v31 = vpop.f32.mrb[27].mxu0 }
 0x12d   :  { %v2206_v32 = vpop.f32.mrb[26].mxu1  ;;  %v3653_v33 = vadd.f32 %v2205_v27, %v497_v29  ;;  %v2131_v34 = vadd.f32 %v2130_v31, %v2129_v30 }
 0x12e   :  { %v2207_v35 = vpop.f32.mrb[27].mxu1 }
 0x12f   :  { %v2208_v38 = vadd.f32 %v2207_v35, %v2206_v32  ;;  %v502_v39 = vadd.f32 %v2131_v34, %v363_v36  ;;  %v2132_v40 = vpop.f32.mrb[28].mxu0 }
 0x130   :  { %v2133_v41 = vpop.f32.mrb[29].mxu0 }
 0x131   :  { %v2209_v42 = vpop.f32.mrb[28].mxu1  ;;  %v3655_v43 = vadd.f32 %v2208_v38, %v502_v39  ;;  %v2134_v44 = vadd.f32 %v2133_v41, %v2132_v40 }
 0x132   :  { %v2210_v45 = vpop.f32.mrb[29].mxu1 }
 0x133   :  { %v2211_v49 = vadd.f32 %v2210_v45, %v2209_v42  ;;  %v507_v50 = vadd.f32 %v2134_v44, %v368_v48  ;;  %v2244_v51 = vpop.f32.mrb[30].mxu0 }
 0x134   :  { %v2245_v52 = vpop.f32.mrb[31].mxu0 }
 0x135   :  { %v2321_v53 = vpop.f32.mrb[30].mxu1  ;;  %v3657_v54 = vadd.f32 %v2211_v49, %v507_v50  ;;  %v2246_v55 = vadd.f32 %v2245_v52, %v2244_v51 }
 0x136   :  { %v2322_v58 = vpop.f32.mrb[31].mxu1 }
 0x137   :  { %v2323_v59 = vadd.f32 %v2322_v58, %v2321_v53  ;;  %v717_v60 = vadd.f32 %v2246_v55, %v3629_v47  ;;  %v2247_v61 = vpop.f32.mrb[32].mxu0 }
 0x138   :  { %v2248_v62 = vpop.f32.mrb[33].mxu0 }
 0x139   :  { %v2324_v63 = vpop.f32.mrb[32].mxu1  ;;  %v3660_v0 = vadd.f32 %v2323_v59, %v717_v60  ;;  %v2249_v2 = vadd.f32 %v2248_v62, %v2247_v61 }
 0x13a   :  { %v2325_v4 = vpop.f32.mrb[33].mxu1 }
 0x13b   :  { %v2326_v5 = vadd.f32 %v2325_v4, %v2324_v63  ;;  %v722_v6 = vadd.f32 %v2249_v2, %v3631_v57  ;;  %v2250_v7 = vpop.f32.mrb[34].mxu0  ;;  %v931_v8 = vsel %vm930_vm0, %v3660_v0, 0.0  ;;  %v991_v9 = vmul.f32 %v3660_v0, %v3660_v0 }
 0x13c   :  { %v2251_v11 = vpop.f32.mrb[35].mxu0  ;;  %932 = vadd.xlane.f32.xlu1 %v931_v8 }
 0x13d   :  { %v2327_v47 = vpop.f32.mrb[34].mxu1  ;;  %v3667_v12 = vadd.f32 %v2326_v5, %v722_v6  ;;  %v2252_v14 = vadd.f32 %v2251_v11, %v2250_v7  ;;  %v1006_v16 = vsel %vm930_vm0, %v991_v9, 0.0 }
 0x13e   :  { %v2328_v15 = vpop.f32.mrb[35].mxu1  ;;  %1007 = vadd.xlane.f32.xlu0 %v1006_v16 }
 0x13f   :  { %v2329_v17 = vadd.f32 %v2328_v15, %v2327_v47  ;;  %v727_v57 = vadd.f32 %v2252_v14, %v3633_v1  ;;  %v2253_v18 = vpop.f32.mrb[36].mxu0  ;;  %v992_v20 = vmul.f32 %v3667_v12, %v3667_v12  ;;  %v934_v27 = vsel %vm930_vm0, %v3667_v12, 0.0 }
 0x140   :  { %v2254_v21 = vpop.f32.mrb[37].mxu0 }
 0x141   :  { %v2330_v22 = vpop.f32.mrb[36].mxu1  ;;  %v3673_v24 = vadd.f32 %v2329_v17, %v727_v57  ;;  %v2255_v25 = vadd.f32 %v2254_v21, %v2253_v18  ;;  %v1009_v29 = vsel %vm930_vm0, %v992_v20, 0.0 }
 0x142   :  { %v2331_v26 = vpop.f32.mrb[37].mxu1  ;;  %935 = vadd.xlane.f32.xlu0 %v934_v27  ;;  %1010 = vadd.xlane.f32.xlu1 %v1009_v29 }
 0x143   :  { %v2332_v30 = vadd.f32 %v2331_v26, %v2330_v22  ;;  %v732_v1 = vadd.f32 %v2255_v25, %v3635_v10  ;;  %v2256_v31 = vpop.f32.mrb[38].mxu0  ;;  %v937_v39 = vsel %vm930_vm0, %v3673_v24, 0.0  ;;  %v993_v40 = vmul.f32 %v3673_v24, %v3673_v24 }
 0x144   :  { %v2257_v32 = vpop.f32.mrb[39].mxu0 }
 0x145   :  { %v2333_v34 = vpop.f32.mrb[38].mxu1  ;;  %v3679_v35 = vadd.f32 %v2332_v30, %v732_v1  ;;  %v2258_v36 = vadd.f32 %v2257_v32, %v2256_v31  ;;  %v1012_v53 = vsel %vm930_vm0, %v993_v40, 0.0 }
 0x146   :  { %v2334_v38 = vpop.f32.mrb[39].mxu1  ;;  %938 = vadd.xlane.f32.xlu0 %v937_v39 }
 0x147   :  { %v2335_v41 = vadd.f32 %v2334_v38, %v2333_v34  ;;  %v737_v42 = vadd.f32 %v2258_v36, %v3637_v19  ;;  %v2259_v44 = vpop.f32.mrb[40].mxu0  ;;  %v940_v10 = vsel %vm930_vm0, %v3679_v35, 0.0  ;;  %v994_v45 = vmul.f32 %v3679_v35, %v3679_v35 }
 0x148   :  { %v2260_v48 = vpop.f32.mrb[41].mxu0  ;;  %941 = vadd.xlane.f32.xlu1 %v940_v10 }
 0x149   :  { %v2336_v49 = vpop.f32.mrb[40].mxu1  ;;  %v3690_v50 = vadd.f32 %v2335_v41, %v737_v42  ;;  %v2261_v51 = vadd.f32 %v2260_v48, %v2259_v44  ;;  %v1015_v59 = vsel %vm930_vm0, %v994_v45, 0.0 }
 0x14a   :  { %v2337_v52 = vpop.f32.mrb[41].mxu1  ;;  %1013 = vadd.xlane.f32.xlu0 %v1012_v53 }
 0x14b   :  { %v2338_v55 = vadd.f32 %v2337_v52, %v2336_v49  ;;  %v742_v19 = vadd.f32 %v2261_v51, %v3639_v28  ;;  %v2262_v58 = vpop.f32.mrb[42].mxu0  ;;  %v943_v4 = vsel %vm930_vm0, %v3690_v50, 0.0  ;;  %v995_v5 = vmul.f32 %v3690_v50, %v3690_v50 }
 0x14c   :  { %v2263_v60 = vpop.f32.mrb[43].mxu0  ;;  %1016 = vadd.xlane.f32.xlu1 %v1015_v59 }
 0x14d   :  { %v2339_v61 = vpop.f32.mrb[42].mxu1  ;;  %v3695_v62 = vadd.f32 %v2338_v55, %v742_v19  ;;  %v2264_v63 = vadd.f32 %v2263_v60, %v2262_v58  ;;  %v1018_v17 = vsel %vm930_vm0, %v995_v5, 0.0 }
 0x14e   :  { %v2340_v2 = vpop.f32.mrb[43].mxu1  ;;  %944 = vadd.xlane.f32.xlu0 %v943_v4 }
 0x14f   :  { %v2341_v6 = vadd.f32 %v2340_v2, %v2339_v61  ;;  %v747_v28 = vadd.f32 %v2264_v63, %v3641_v37  ;;  %v2265_v7 = vpop.f32.mrb[44].mxu0  ;;  %v946_v8 = vsel %vm930_vm0, %v3695_v62, 0.0  ;;  %v996_v9 = vmul.f32 %v3695_v62, %v3695_v62 }
 0x150   :  { %v2266_v11 = vpop.f32.mrb[45].mxu0  ;;  %947 = vadd.xlane.f32.xlu1 %v946_v8 }
 0x151   :  { %v2342_v47 = vpop.f32.mrb[44].mxu1  ;;  %v3706_v14 = vadd.f32 %v2341_v6, %v747_v28  ;;  %v2267_v15 = vadd.f32 %v2266_v11, %v2265_v7  ;;  %v1021_v20 = vsel %vm930_vm0, %v996_v9, 0.0 }
 0x152   :  { %v2343_v16 = vpop.f32.mrb[45].mxu1  ;;  %1019 = vadd.xlane.f32.xlu0 %v1018_v17 }
 0x153   :  { %v2344_v57 = vadd.f32 %v2343_v16, %v2342_v47  ;;  %v752_v37 = vadd.f32 %v2267_v15, %v3643_v46  ;;  %v2268_v18 = vpop.f32.mrb[46].mxu0  ;;  %v949_v29 = vsel %vm930_vm0, %v3706_v14, 0.0  ;;  %v997_v30 = vmul.f32 %v3706_v14, %v3706_v14 }
 0x154   :  { %v2269_v21 = vpop.f32.mrb[47].mxu0  ;;  %1022 = vadd.xlane.f32.xlu1 %v1021_v20 }
 0x155   :  { %v2345_v22 = vpop.f32.mrb[46].mxu1  ;;  %v3711_v25 = vadd.f32 %v2344_v57, %v752_v37  ;;  %v2270_v26 = vadd.f32 %v2269_v21, %v2268_v18  ;;  %v1024_v42 = vsel %vm930_vm0, %v997_v30, 0.0 }
 0x156   :  { %v2346_v27 = vpop.f32.mrb[47].mxu1  ;;  %950 = vadd.xlane.f32.xlu0 %v949_v29 }
 0x157   :  { %v2347_v1 = vadd.f32 %v2346_v27, %v2345_v22  ;;  %v757_v46 = vadd.f32 %v2270_v26, %v3645_v56  ;;  %v2271_v31 = vpop.f32.mrb[48].mxu0  ;;  %v952_v32 = vsel %vm930_vm0, %v3711_v25, 0.0  ;;  %v998_v34 = vmul.f32 %v3711_v25, %v3711_v25 }
 0x158   :  { %v2272_v36 = vpop.f32.mrb[49].mxu0  ;;  %953 = vadd.xlane.f32.xlu1 %v952_v32 }
 0x159   :  { %v2348_v38 = vpop.f32.mrb[48].mxu1  ;;  %v3722_v39 = vadd.f32 %v2347_v1, %v757_v46  ;;  %v2273_v40 = vadd.f32 %v2272_v36, %v2271_v31  ;;  %v1027_v45 = vsel %vm930_vm0, %v998_v34, 0.0 }
 0x15a   :  { %v2349_v41 = vpop.f32.mrb[49].mxu1  ;;  %1025 = vadd.xlane.f32.xlu0 %v1024_v42 }
 0x15b   :  { %v2350_v44 = vadd.f32 %v2349_v41, %v2348_v38  ;;  %v762_v56 = vadd.f32 %v2273_v40, %v3647_v3  ;;  %v2274_v10 = vpop.f32.mrb[50].mxu0  ;;  %v955_v55 = vsel %vm930_vm0, %v3722_v39, 0.0  ;;  %v999_v19 = vmul.f32 %v3722_v39, %v3722_v39 }
 0x15c   :  { %v2275_v48 = vpop.f32.mrb[51].mxu0  ;;  %1028 = vadd.xlane.f32.xlu1 %v1027_v45 }
 0x15d   :  { %v2351_v49 = vpop.f32.mrb[50].mxu1  ;;  %v3727_v51 = vadd.f32 %v2350_v44, %v762_v56  ;;  %v2276_v52 = vadd.f32 %v2275_v48, %v2274_v10  ;;  %v1030_v28 = vsel %vm930_vm0, %v999_v19, 0.0  ;;  %v4440_v10 = vmov 0.0|0.0  }
 0x15e   :  { %v2352_v53 = vpop.f32.mrb[51].mxu1  ;;  %956 = vadd.xlane.f32.xlu0 %v955_v55  ;;  %2583 = vmatprep.subr.bf16.mxu0 %v4440_v10 }
 0x15f   :  { %v2353_v58 = vadd.f32 %v2352_v53, %v2351_v49  ;;  %v767_v3 = vadd.f32 %v2276_v52, %v3649_v13  ;;  %v2277_v59 = vpop.f32.mrb[52].mxu0  ;;  %v958_v60 = vsel %vm930_vm0, %v3727_v51, 0.0  ;;  %v1000_v61 = vmul.f32 %v3727_v51, %v3727_v51  ;;  %2604 = vmatprep.subr.bf16.mxu1 %v4440_v10 }
 0x160   :  { %v2278_v63 = vpop.f32.mrb[53].mxu0  ;;  %959 = vadd.xlane.f32.xlu1 %v958_v60 }
 0x161   :  { %v2354_v2 = vpop.f32.mrb[52].mxu1  ;;  %v3738_v4 = vadd.f32 %v2353_v58, %v767_v3  ;;  %v2279_v5 = vadd.f32 %v2278_v63, %v2277_v59  ;;  %v1033_v9 = vsel %vm930_vm0, %v1000_v61, 0.0  ;;  %v3779_v58 = vpop.permute.xlu1 %1178 }
 0x162   :  { %v2355_v6 = vpop.f32.mrb[53].mxu1  ;;  %1031 = vadd.xlane.f32.xlu0 %v1030_v28  ;;  %v3783_v59 = vpop.permute.xlu0 %1173  ;;  %v1275_v28 = vld [vmem:[%s4432_s4 + $0x70] sm:$0xff] }
 0x163   :  { %v2356_v7 = vadd.f32 %v2355_v6, %v2354_v2  ;;  %v772_v13 = vadd.f32 %v2279_v5, %v3651_v23  ;;  %v2280_v8 = vpop.f32.mrb[54].mxu0  ;;  %v961_v57 = vsel %vm930_vm0, %v3738_v4, 0.0  ;;  %v1001_v37 = vmul.f32 %v3738_v4, %v3738_v4  ;;  %v1170_v5 = vld [vmem:[%s4431_s3 + $0x70] sm:$0xff] }
 0x164   :  { %v2281_v11 = vpop.f32.mrb[55].mxu0  ;;  %1034 = vadd.xlane.f32.xlu1 %v1033_v9  ;;  %v1394_v9 = vld [vmem:[%s4433_s6 + $0x10] sm:$0xff] }
 0x165   :  { %v2357_v47 = vpop.f32.mrb[54].mxu1  ;;  %v3743_v15 = vadd.f32 %v2356_v7, %v772_v13  ;;  %v2282_v16 = vadd.f32 %v2281_v11, %v2280_v8  ;;  %v1036_v46 = vsel %vm930_vm0, %v1001_v37, 0.0  ;;  %v3785_v60 = vpop.permute.xlu1 %1183  ;;  %v1392_v7 = vld [vmem:[%s4433_s6] sm:$0xff]  ;;  %v1393_v8 = vld [vmem:[%s4433_s6 + $0x8] sm:$0xff]  ;;  %v1398_v37 = vld [vmem:[%s4433_s6 + $0x30] sm:$0xff] }
 0x166   :  { %v2358_v17 = vpop.f32.mrb[55].mxu1  ;;  %962 = vadd.xlane.f32.xlu0 %v961_v57  ;;  %v3787_v61 = vpop.permute.xlu0 %1278 }
 0x167   :  { %v2359_v18 = vadd.f32 %v2358_v17, %v2357_v47  ;;  %v777_v23 = vadd.f32 %v2282_v16, %v3653_v33  ;;  %v2283_v20 = vpop.f32.mrb[56].mxu0  ;;  %v964_v21 = vsel %vm930_vm0, %v3743_v15, 0.0  ;;  %v1002_v22 = vmul.f32 %v3743_v15, %v3743_v15  ;;  %v1396_v16 = vld [vmem:[%s4433_s6 + $0x20] sm:$0xff]  ;;  %v1397_v17 = vld [vmem:[%s4433_s6 + $0x28] sm:$0xff] }
 0x168   :  { %v2284_v26 = vpop.f32.mrb[57].mxu0  ;;  %965 = vadd.xlane.f32.xlu1 %v964_v21  ;;  %v1400_v21 = vld [vmem:[%s4433_s6 + $0x40] sm:$0xff] }
 0x169   :  { %v2360_v27 = vpop.f32.mrb[56].mxu1  ;;  %v3754_v29 = vadd.f32 %v2359_v18, %v777_v23  ;;  %v2285_v30 = vadd.f32 %v2284_v26, %v2283_v20  ;;  %v1039_v34 = vsel %vm930_vm0, %v1002_v22, 0.0  ;;  %v3789_v63 = vpop.permute.xlu1 %1288  ;;  %v1395_v18 = vld [vmem:[%s4433_s6 + $0x18] sm:$0xff] }
 0x16a   :  { %v2361_v1 = vpop.f32.mrb[57].mxu1  ;;  %1037 = vadd.xlane.f32.xlu0 %v1036_v46  ;;  %v3791_v2 = vpop.permute.xlu0 %1283  ;;  %v1399_v20 = vld [vmem:[%s4433_s6 + $0x38] sm:$0xff]  ;;  %v1779_v46 = vld [vmem:[%s4434_s7 + $0x8] sm:$0xff] }
 0x16b   :  { %v2362_v31 = vadd.f32 %v2361_v1, %v2360_v27  ;;  %v782_v33 = vadd.f32 %v2285_v30, %v3655_v43  ;;  %v2286_v32 = vpop.f32.mrb[58].mxu0  ;;  %v967_v44 = vsel %vm930_vm0, %v3754_v29, 0.0  ;;  %v1003_v56 = vmul.f32 %v3754_v29, %v3754_v29  ;;  %v1401_v27 = vld [vmem:[%s4433_s6 + $0x48] sm:$0xff]  ;;  %v1402_v30 = vld [vmem:[%s4433_s6 + $0x50] sm:$0xf] }
 0x16c   :  { %v2287_v36 = vpop.f32.mrb[59].mxu0  ;;  %1040 = vadd.xlane.f32.xlu1 %v1039_v34  ;;  %v1783_v34 = vld [vmem:[%s4434_s7 + $0x28] sm:$0xff] }
 0x16d   :  { %v2363_v38 = vpop.f32.mrb[58].mxu1  ;;  %v3759_v40 = vadd.f32 %v2362_v31, %v782_v33  ;;  %v2288_v41 = vadd.f32 %v2287_v36, %v2286_v32  ;;  %v1042_v53 = vsel %vm930_vm0, %v1003_v56, 0.0  ;;  %v3796_v6 = vpop.permute.xlu1 %1293  ;;  %v1778_v31 = vld [vmem:[%s4434_s7] sm:$0xff]  ;;  %v4438_v33 = vmov 0.0   ;;  %v1780_v36 = vld [vmem:[%s4434_s7 + $0x10] sm:$0xff] }
 0x16e   :  { %v2364_v42 = vpop.f32.mrb[59].mxu1  ;;  %968 = vadd.xlane.f32.xlu0 %v967_v44  ;;  %v3804_v13 = vpop.permute.xlu0 %1188  ;;  %2422 = vmatprep.mubr.msk.f32.mxu0 %vm2704_vm1, %v4438_v33  ;;  %v1782_v44 = vld [vmem:[%s4434_s7 + $0x20] sm:$0xff] }
 0x16f   :  { %v2365_v43 = vadd.f32 %v2364_v42, %v2363_v38  ;;  %v787_v45 = vadd.f32 %v2288_v41, %v3657_v54  ;;  %v970_v48 = vsel %vm930_vm0, %v3759_v40, 0.0  ;;  %v1004_v49 = vmul.f32 %v3759_v40, %v3759_v40  ;;  %2440 = vmatprep.mubr.msk.f32.mxu1 %vm2704_vm1, %v4438_v33  ;;  %v1781_v42 = vld [vmem:[%s4434_s7 + $0x18] sm:$0xff] }
 0x170   :  { %971 = vadd.xlane.f32.xlu1 %v970_v48 }
 0x171   :  { %v3772_v52 = vadd.f32 %v2365_v43, %v787_v45  ;;  %v1045_v55 = vsel %vm930_vm0, %v1004_v49, 0.0  ;;  %v3812_v11 = vpop.permute.xlu1 %1193  ;;  %v1786_v43 = vld [vmem:[%s4434_s7 + $0x40] sm:$0xff]  ;;  %v1784_v45 = vld [vmem:[%s4434_s7 + $0x30] sm:$0xff] }
 0x172   :  { %1043 = vadd.xlane.f32.xlu0 %v1042_v53  ;;  %v3814_v47 = vpop.permute.xlu0 %1198  ;;  %v1788_v49 = vld [vmem:[%s4434_s7 + $0x50] sm:$0xf]  ;;  %v1785_v53 = vld [vmem:[%s4434_s7 + $0x38] sm:$0xff] }
 0x173   :  { %4443 = vst [vmem:[#allocation2_spill] sm:$0xff] %v3772_v52  ;;  %v1005_v19 = vmul.f32 %v3772_v52, %v3772_v52  ;;  %v973_v3 = vsel %vm930_vm0, %v3772_v52, 0.0 }
 0x174   :  { %1046 = vadd.xlane.f32.xlu1 %v1045_v55 }
 0x175   :  { %v1048_v54 = vsel %vm930_vm0, %v1005_v19, 0.0  ;;  %v3822_v57 = vpop.permute.xlu1 %1298 }
 0x176   :  { %1049 = vadd.xlane.f32.xlu0 %v1048_v54  ;;  %v3830_v23 = vpop.permute.xlu0 %1303  ;;  %v1856_v54 = vld [vmem:[%s4435_s8 + $0x8] sm:$0xff] }
 0x178   :  { %974 = vadd.xlane.f32.xlu1 %v973_v3  ;;  %v1787_v3 = vld [vmem:[%s4434_s7 + $0x48] sm:$0xff] }
 0x179   :  { %v3838_v22 = vpop.permute.xlu1 %1203 }
 0x17a   :  { %v3840_v26 = vpop.permute.xlu0 %1208 }
 0x17d   :  { %v3848_v1 = vpop.permute.xlu1 %1308 }
 0x17e   :  { %v3860_v32 = vpop.permute.xlu0 %1313 }
 0x181   :  { %v3868_v38 = vpop.permute.xlu1 %1213 }
 0x182   :  { %v3870_v41 = vpop.permute.xlu0 %1218 }
 0x185   :  { %v3878_v56 = vpop.permute.xlu1 %1318 }
 0x186   :  { %v3886_v48 = vpop.permute.xlu0 %1323 }
 0x189   :  { %1243 = vperm.xlu1 %2625, %v1170_v5   ;;  %v3894_v55 = vpop.permute.xlu1 %1223 }
 0x18a   :  { %v3896_v19 = vpop.permute.xlu0 %1228 }
 0x18c   :  { %1348 = vperm.xlu0 %2624, %v1275_v28   ;;  %v1859_v28 = vld [vmem:[%s4435_s8 + $0x20] sm:$0xff] }
 0x18d   :  { %1405 = vperm.xlu1 %2625, %v1392_v7   ;;  %v3904_v5 = vpop.permute.xlu1 %1328  ;;  %v1855_v7 = vld [vmem:[%s4435_s8] sm:$0xff] }
 0x190   :  { %1410 = vperm.xlu0 %2624, %v1393_v8   ;;  %v3912_v8 = vpop.permute.xlu0 %1333 }
 0x191   :  { %1415 = vperm.xlu1 %2625, %v1394_v9   ;;  %v1861_v9 = vld [vmem:[%s4435_s8 + $0x30] sm:$0xff] }
 0x194   :  { %1425 = vperm.xlu0 %2624, %v1396_v16   ;;  %v1857_v16 = vld [vmem:[%s4435_s8 + $0x10] sm:$0xff] }
 0x195   :  { %1430 = vperm.xlu1 %2625, %v1397_v17   ;;  %v3920_v17 = vpop.permute.xlu1 %1233 }
 0x198   :  { %1435 = vperm.xlu0 %2624, %v1398_v37   ;;  %v3922_v37 = vpop.permute.xlu0 %1238 }
 0x199   :  { %1420 = vperm.xlu1 %2625, %v1395_v18   ;;  %v1862_v18 = vld [vmem:[%s4435_s8 + $0x38] sm:$0xff] }
 0x19c   :  { %1440 = vperm.xlu0 %2624, %v1399_v20   ;;  %v1860_v20 = vld [vmem:[%s4435_s8 + $0x28] sm:$0xff] }
 0x19d   :  { %1445 = vperm.xlu1 %2625, %v1400_v21   ;;  %v3930_v21 = vpop.permute.xlu1 %1338 }
 0x1a0   :  { %1450 = vperm.xlu0 %2624, %v1401_v27   ;;  %v1858_v27 = vld [vmem:[%s4435_s8 + $0x18] sm:$0xff] }
 0x1a1   :  { %1455 = vperm.xlu1 %2625, %v1402_v30   ;;  %v3935_v30 = vpop.permute.xlu0 %1343 }
 0x1a2   :  { %4444 = vst [vmem:[#allocation3_spill] sm:$0xff] %v3935_v30 }
 0x1a4   :  { %1796 = vperm.xlu0 %2624, %v1779_v46  }
 0x1a5   :  { %1791 = vperm.xlu1 %2625, %v1778_v31  }
 0x1a8   :  { %1816 = vperm.xlu0 %2624, %v1783_v34   ;;  %v1863_v34 = vld [vmem:[%s4435_s8 + $0x40] sm:$0xff] }
 0x1a9   :  { %1801 = vperm.xlu1 %2625, %v1780_v36  }
 0x1ac   :  { %1806 = vperm.xlu0 %2624, %v1781_v42  }
 0x1ad   :  { %1811 = vperm.xlu1 %2625, %v1782_v44  }
 0x1b0   :  { %1831 = vperm.xlu0 %2624, %v1786_v43  }
 0x1b1   :  { %1821 = vperm.xlu1 %2625, %v1784_v45  }
 0x1b4   :  { %1841 = vperm.xlu0 %2624, %v1788_v49  }
 0x1b5   :  { %1826 = vperm.xlu1 %2625, %v1785_v53  }
 0x1b8   :  { %1873 = vperm.xlu0 %2624, %v1856_v54  }
 0x1b9   :  { %1836 = vperm.xlu1 %2625, %v1787_v3  }
 0x1bc   :  { %1888 = vperm.xlu0 %2624, %v1859_v28  }
 0x1bd   :  { %1868 = vperm.xlu1 %2625, %v1855_v7  }
 0x1c0   :  { %1898 = vperm.xlu0 %2624, %v1861_v9  }
 0x1c1   :  { %1878 = vperm.xlu1 %2625, %v1857_v16  }
 0x1c4   :  { %1903 = vperm.xlu0 %2624, %v1862_v18  }
 0x1c5   :  { %1893 = vperm.xlu1 %2625, %v1860_v20  }
 0x1c9   :  { %1883 = vperm.xlu1 %2625, %v1858_v27   ;;  %v933_v46 = vpop.xlane.xlu1 %932 }
 0x1ca   :  { %v976_v31 = vmul.f32 0.0625, %v933_v46 }
 0x1cb   :  { %v1008_v36 = vpop.xlane.xlu0 %1007 }
 0x1cc   :  { %v1066_v42 = vmul.f32 %v976_v31, %v976_v31  ;;  %v1051_v44 = vmul.f32 0.0625, %v1008_v36 }
 0x1cd   :  { %1908 = vperm.xlu1 %2625, %v1863_v34  }
 0x1ce   :  { %v1081_v43 = vsub.f32 %v1051_v44, %v1066_v42 }
 0x1cf   :  { %v936_v45 = vpop.xlane.xlu0 %935  ;;  %v1011_v49 = vpop.xlane.xlu1 %1010 }
 0x1d0   :  { %v1111_v53 = vadd.f32 1e-05, %v1081_v43  ;;  %v977_v54 = vmul.f32 0.0625, %v936_v45  ;;  %v1052_v28 = vmul.f32 0.0625, %v1011_v49  ;;  %v1096_v43 = vsub.f32 %v3660_v0, %v976_v31 }
 0x1d2   :  { %2626 = vrsqrt.f32 %v1111_v53  ;;  %v1067_v3 = vmul.f32 %v977_v54, %v977_v54  ;;  %v1097_v0 = vsub.f32 %v3667_v12, %v977_v54 }
 0x1d3   :  { %v939_v7 = vpop.xlane.xlu0 %938 }
 0x1d4   :  { %v1082_v9 = vsub.f32 %v1052_v28, %v1067_v3  ;;  %v978_v16 = vmul.f32 0.0625, %v939_v7 }
 0x1d5   :  { %v942_v18 = vpop.xlane.xlu1 %941 }
 0x1d6   :  { %v1112_v20 = vadd.f32 1e-05, %v1082_v9  ;;  %v979_v27 = vmul.f32 0.0625, %v942_v18  ;;  %v1068_v33 = vmul.f32 %v978_v16, %v978_v16 }
 0x1d7   :  { %v1014_v46 = vpop.xlane.xlu0 %1013 }
 0x1d8   :  { %2628 = vrsqrt.f32 %v1112_v20  ;;  %v1053_v10 = vmul.f32 0.0625, %v1014_v46  ;;  %v1069_v34 = vmul.f32 %v979_v27, %v979_v27 }
 0x1d9   :  { %v1017_v36 = vpop.xlane.xlu1 %1016 }
 0x1da   :  { %v1083_v42 = vsub.f32 %v1053_v10, %v1068_v33  ;;  %v1054_v44 = vmul.f32 0.0625, %v1017_v36 }
 0x1db   :  { %v945_v45 = vpop.xlane.xlu0 %944 }
 0x1dc   :  { %v2627_v53 = vpop.eup %2626  ;;  %v1113_v30 = vadd.f32 1e-05, %v1083_v42  ;;  %v1084_v49 = vsub.f32 %v1054_v44, %v1069_v34  ;;  %v3941_v52 = vmul.f32 0.0625, %v945_v45 }
 0x1dd   :  { %v948_v3 = vpop.xlane.xlu1 %947  ;;  %v1141_v28 = vmul.f32 %v2627_v53, %v1096_v43 }
 0x1de   :  { %2630 = vrsqrt.f32 %v1113_v30  ;;  %v1114_v7 = vadd.f32 1e-05, %v1084_v49  ;;  %v3943_v9 = vmul.f32 0.0625, %v948_v3  ;;  %v1070_v10 = vmul.f32 %v3941_v52, %v3941_v52 }
 0x1df   :  { %v1020_v18 = vpop.xlane.xlu0 %1019  ;;  %v1246_v20 = vmul.f32 %v3783_v59, %v1141_v28  ;;  %v1098_v59 = vsub.f32 %v3673_v24, %v978_v16 }
 0x1e0   :  { %2632 = vrsqrt.f32 %v1114_v7  ;;  %v1055_v33 = vmul.f32 0.0625, %v1020_v18  ;;  %v1071_v36 = vmul.f32 %v3943_v9, %v3943_v9 }
 0x1e1   :  { %v1023_v31 = vpop.xlane.xlu1 %1022  ;;  %v1351_v12 = vadd.f32 %v3787_v61, %v1246_v20 }
 0x1e2   :  { %v2629_v46 = vpop.eup %2628  ;;  %v1085_v34 = vsub.f32 %v1055_v33, %v1070_v10  ;;  %v1056_v30 = vmul.f32 0.0625, %v1023_v31  ;;  %v1099_v31 = vsub.f32 %v3679_v35, %v979_v27 }
 0x1e3   :  { %v951_v42 = vpop.xlane.xlu0 %950  ;;  %v1142_v44 = vmul.f32 %v2629_v46, %v1097_v0  ;;  %v1366_v46 = vmax.f32 %v1351_v12, 0.0 }
 0x1e4   :  { %v1115_v43 = vadd.f32 1e-05, %v1085_v34  ;;  %v1086_v45 = vsub.f32 %v1056_v30, %v1071_v36  ;;  %v3951_v53 = vmul.f32 0.0625, %v951_v42 }
 0x1e5   :  { %v954_v49 = vpop.xlane.xlu1 %953  ;;  %v1247_v3 = vmul.f32 %v3779_v58, %v1142_v44 }
 0x1e6   :  { %2634 = vrsqrt.f32 %v1115_v43  ;;  %v1116_v54 = vadd.f32 1e-05, %v1086_v45  ;;  %v3956_v28 = vmul.f32 0.0625, %v954_v49  ;;  %v1072_v33 = vmul.f32 %v3951_v53, %v3951_v53 }
 0x1e7   :  { %v1026_v7 = vpop.xlane.xlu0 %1025  ;;  %v1352_v18 = vadd.f32 %v3791_v2, %v1247_v3 }
 0x1e8   :  { %v2631_v10 = vpop.eup %2630  ;;  %2636 = vrsqrt.f32 %v1116_v54  ;;  %v1057_v0 = vmul.f32 0.0625, %v1026_v7  ;;  %v1073_v24 = vmul.f32 %v3956_v28, %v3956_v28  ;;  %v4445_v54 = vmov 0.0|0.0  }
 0x1e9   :  { %v1029_v58 = vpop.xlane.xlu1 %1028  ;;  %v1367_v61 = vmax.f32 %v1352_v18, 0.0  ;;  %v1143_v20 = vmul.f32 %v2631_v10, %v1098_v59 }
 0x1ea   :  { %v2633_v36 = vpop.eup %2632  ;;  %v1087_v16 = vsub.f32 %v1057_v0, %v1072_v33  ;;  %v1058_v34 = vmul.f32 0.0625, %v1029_v58  ;;  %v1101_v33 = vsub.f32 %v3695_v62, %v3943_v9 }
 0x1eb   :  { %v957_v30 = vpop.xlane.xlu0 %956  ;;  %v2584_v2 = vpack.c.bf16 %v1367_v61, %v1366_v46  ;;  %v1144_v42 = vmul.f32 %v2633_v36, %v1099_v31  ;;  %v1248_v44 = vmul.f32 %v3785_v60, %v1143_v20  ;;  %v1100_v60 = vsub.f32 %v3690_v50, %v3941_v52 }
 0x1ec   :  { %v1117_v43 = vadd.f32 1e-05, %v1087_v16  ;;  %v1088_v45 = vsub.f32 %v1058_v34, %v1073_v24  ;;  %v3965_v49 = vmul.f32 0.0625, %v957_v30 }
 0x1ed   :  { %2585 = vmatpush3.bf16.msra.mxu0 %v2584_v2  ;;  %2612 = vmatpush3.bf16.msra.mxu1 %v2584_v2  ;;  %v960_v35 = vpop.xlane.xlu1 %959  ;;  %v1249_v27 = vmul.f32 %v3804_v13, %v1144_v42  ;;  %v1353_v3 = vadd.f32 %v3789_v63, %v1248_v44 }
 0x1ee   :  { %2638 = vrsqrt.f32 %v1117_v43  ;;  %v1118_v12 = vadd.f32 1e-05, %v1088_v45  ;;  %2586 = vmatprep.subr.bf16.mxu0 %v4445_v54  ;;  %2605 = vmatprep.subr.bf16.mxu1 %v4445_v54  ;;  %v3973_v59 = vmul.f32 0.0625, %v960_v35  ;;  %v1074_v13 = vmul.f32 %v3965_v49, %v3965_v49 }
 0x1ef   :  { %v1032_v7 = vpop.xlane.xlu0 %1031  ;;  %v1354_v18 = vadd.f32 %v3796_v6, %v1249_v27  ;;  %v1368_v31 = vmax.f32 %v1353_v3, 0.0  ;;  %v1103_v3 = vsub.f32 %v3711_v25, %v3956_v28 }
 0x1f0   :  { %v2635_v10 = vpop.eup %2634  ;;  %2640 = vrsqrt.f32 %v1118_v12  ;;  %v1059_v63 = vmul.f32 0.0625, %v1032_v7  ;;  %v1075_v50 = vmul.f32 %v3973_v59, %v3973_v59 }
 0x1f1   :  { %v1035_v0 = vpop.xlane.xlu1 %1034  ;;  %v1369_v58 = vmax.f32 %v1354_v18, 0.0  ;;  %v1145_v46 = vmul.f32 %v2635_v10, %v1100_v60 }
 0x1f2   :  { %v2637_v61 = vpop.eup %2636  ;;  %v1089_v52 = vsub.f32 %v1059_v63, %v1074_v13  ;;  %v1060_v20 = vmul.f32 0.0625, %v1035_v0 }
 0x1f3   :  { %v963_v6 = vpop.xlane.xlu0 %962  ;;  %v2587_v36 = vpack.c.bf16 %v1369_v58, %v1368_v31  ;;  %v1146_v24 = vmul.f32 %v2637_v61, %v1101_v33  ;;  %v1250_v16 = vmul.f32 %v3812_v11, %v1145_v46  ;;  %v1102_v11 = vsub.f32 %v3706_v14, %v3951_v53 }
 0x1f4   :  { %v1119_v34 = vadd.f32 1e-05, %v1089_v52  ;;  %v1090_v30 = vsub.f32 %v1060_v20, %v1075_v50  ;;  %v3983_v2 = vmul.f32 0.0625, %v963_v6 }
 0x1f5   :  { %2588 = vmatpush3.bf16.msra.mxu0 %v2587_v36  ;;  %2613 = vmatpush3.bf16.msra.mxu1 %v2587_v36  ;;  %v966_v62 = vpop.xlane.xlu1 %965  ;;  %v1251_v9 = vmul.f32 %v3814_v47, %v1146_v24  ;;  %v1355_v42 = vadd.f32 %v3822_v57, %v1250_v16  ;;  %v1105_v24 = vsub.f32 %v3727_v51, %v3973_v59 }
 0x1f6   :  { %2642 = vrsqrt.f32 %v1119_v34  ;;  %v1120_v44 = vadd.f32 1e-05, %v1090_v30  ;;  %2589 = vmatprep.subr.bf16.mxu0 %v4445_v54  ;;  %2606 = vmatprep.subr.bf16.mxu1 %v4445_v54  ;;  %v3991_v43 = vmul.f32 0.0625, %v966_v62  ;;  %v1076_v47 = vmul.f32 %v3983_v2, %v3983_v2 }
 0x1f7   :  { %v1038_v45 = vpop.xlane.xlu0 %1037  ;;  %v1356_v35 = vadd.f32 %v3830_v23, %v1251_v9  ;;  %v1370_v60 = vmax.f32 %v1355_v42, 0.0 }
 0x1f8   :  { %v2639_v27 = vpop.eup %2638  ;;  %2644 = vrsqrt.f32 %v1120_v44  ;;  %v1061_v57 = vmul.f32 0.0625, %v1038_v45  ;;  %v1077_v14 = vmul.f32 %v3991_v43, %v3991_v43 }
 0x1f9   :  { %v1041_v12 = vpop.xlane.xlu1 %1040  ;;  %v1371_v7 = vmax.f32 %v1356_v35, 0.0  ;;  %v1147_v18 = vmul.f32 %v2639_v27, %v1102_v11 }
 0x1fa   :  { %v2641_v10 = vpop.eup %2640  ;;  %v1091_v53 = vsub.f32 %v1061_v57, %v1076_v47  ;;  %v1062_v13 = vmul.f32 0.0625, %v1041_v12 }
 0x1fb   :  { %v969_v23 = vpop.xlane.xlu0 %968  ;;  %v2590_v63 = vpack.c.bf16 %v1371_v7, %v1370_v60  ;;  %v1148_v33 = vmul.f32 %v2641_v10, %v1103_v3  ;;  %v1252_v0 = vmul.f32 %v3838_v22, %v1147_v18  ;;  %v1104_v22 = vsub.f32 %v3722_v39, %v3965_v49 }
 0x1fc   :  { %v1121_v31 = vadd.f32 1e-05, %v1091_v53  ;;  %v1092_v58 = vsub.f32 %v1062_v13, %v1077_v14  ;;  %v4001_v46 = vmul.f32 0.0625, %v969_v23 }
 0x1fd   :  { %2591 = vmatpush3.bf16.msra.mxu0 %v2590_v63  ;;  %2614 = vmatpush3.bf16.msra.mxu1 %v2590_v63  ;;  %v972_v25 = vpop.xlane.xlu1 %971  ;;  %v1253_v28 = vmul.f32 %v3840_v26, %v1148_v33  ;;  %v1357_v61 = vadd.f32 %v3848_v1, %v1252_v0 }
 0x1fe   :  { %2646 = vrsqrt.f32 %v1121_v31  ;;  %v1122_v50 = vadd.f32 1e-05, %v1092_v58  ;;  %2592 = vmatprep.subr.bf16.mxu0 %v4445_v54  ;;  %2607 = vmatprep.subr.bf16.mxu1 %v4445_v54  ;;  %v4009_v52 = vmul.f32 0.0625, %v972_v25  ;;  %v1078_v26 = vmul.f32 %v4001_v46, %v4001_v46 }
 0x1ff   :  { %v1044_v20 = vpop.xlane.xlu0 %1043  ;;  %v1358_v6 = vadd.f32 %v3860_v32, %v1253_v28  ;;  %v1372_v34 = vmax.f32 %v1357_v61, 0.0 }
 0x200   :  { %v2643_v36 = vpop.eup %2642  ;;  %2648 = vrsqrt.f32 %v1122_v50  ;;  %v1063_v1 = vmul.f32 0.0625, %v1044_v20  ;;  %v1079_v39 = vmul.f32 %v4009_v52, %v4009_v52 }
 0x201   :  { %v1047_v16 = vpop.xlane.xlu1 %1046  ;;  %v1373_v30 = vmax.f32 %v1358_v6, 0.0  ;;  %v1149_v62 = vmul.f32 %v2643_v36, %v1104_v22 }
 0x202   :  { %v2645_v9 = vpop.eup %2644  ;;  %v1093_v49 = vsub.f32 %v1063_v1, %v1078_v26  ;;  %v1064_v42 = vmul.f32 0.0625, %v1047_v16 }
 0x203   :  { %v2593_v32 = vpack.c.bf16 %v1373_v30, %v1372_v34  ;;  %v1150_v44 = vmul.f32 %v2645_v9, %v1105_v24  ;;  %v1254_v11 = vmul.f32 %v3868_v38, %v1149_v62  ;;  %v1050_v27 = vpop.xlane.xlu0 %1049  ;;  %v1106_v38 = vsub.f32 %v3738_v4, %v3983_v2  ;;  %v1387_v34 = vld [vmem:[%s4436_s5 + $0x30] sm:$0xff]  ;;  %v1382_v30 = vld [vmem:[%s4436_s5 + $0x8] sm:$0xff]  ;;  %v1388_v62 = vld [vmem:[%s4436_s5 + $0x38] sm:$0xff] }
 0x204   :  { %v1123_v45 = vadd.f32 1e-05, %v1093_v49  ;;  %v1094_v35 = vsub.f32 %v1064_v42, %v1079_v39  ;;  %v1065_v7 = vmul.f32 0.0625, %v1050_v27  ;;  %v1383_v9 = vld [vmem:[%s4436_s5 + $0x10] sm:$0xff]  ;;  %v1389_v39 = vld [vmem:[%s4436_s5 + $0x40] sm:$0xff]  ;;  %v1384_v49 = vld [vmem:[%s4436_s5 + $0x18] sm:$0xff] }
 0x205   :  { %2594 = vmatpush3.bf16.msra.mxu0 %v2593_v32  ;;  %2615 = vmatpush3.bf16.msra.mxu1 %v2593_v32  ;;  %v975_v51 = vpop.xlane.xlu1 %974  ;;  %v1255_v59 = vmul.f32 %v3870_v41, %v1150_v44  ;;  %v1359_v47 = vadd.f32 %v3878_v56, %v1254_v11  ;;  %v1107_v41 = vsub.f32 %v3743_v15, %v3991_v43  ;;  %v1390_v42 = vld [vmem:[%s4436_s5 + $0x48] sm:$0xff]  ;;  %v1385_v32 = vld [vmem:[%s4436_s5 + $0x20] sm:$0xff]  ;;  %v1391_v44 = vld [vmem:[%s4436_s5 + $0x50] sm:$0xf] }
 0x206   :  { %2650 = vrsqrt.f32 %v1123_v45  ;;  %v1124_v57 = vadd.f32 1e-05, %v1094_v35  ;;  %v990_v3 = vmul.f32 0.0625, %v975_v51  ;;  %2595 = vmatprep.subr.bf16.mxu0 %v4445_v54  ;;  %2608 = vmatprep.subr.bf16.mxu1 %v4445_v54  ;;  %v1108_v15 = vsub.f32 %v3754_v29, %v4001_v46  ;;  %v4447_v46 = vld [vmem:[#allocation3_spill] sm:$0xff] }
 0x207   :  { %v1360_v12 = vadd.f32 %v3886_v48, %v1255_v59  ;;  %v1374_v56 = vmax.f32 %v1359_v47, 0.0  ;;  %v1386_v11 = vld [vmem:[%s4436_s5 + $0x28] sm:$0xff] }
 0x208   :  { %v2647_v60 = vpop.eup %2646  ;;  %2652 = vrsqrt.f32 %v1124_v57  ;;  %v1080_v18 = vmul.f32 %v990_v3, %v990_v3 }
 0x209   :  { %v1375_v10 = vmax.f32 %v1360_v12, 0.0  ;;  %v1151_v14 = vmul.f32 %v2647_v60, %v1106_v38  ;;  %v1244_v26 = vpop.permute.xlu1 %1243 }
 0x20a   :  { %v2649_v53 = vpop.eup %2648  ;;  %v1095_v13 = vsub.f32 %v1065_v7, %v1080_v18 }
 0x20b   :  { %v2596_v23 = vpack.c.bf16 %v1375_v10, %v1374_v56  ;;  %v1152_v63 = vmul.f32 %v2649_v53, %v1107_v41  ;;  %v1256_v33 = vmul.f32 %v3894_v55, %v1151_v14  ;;  %v1109_v55 = vsub.f32 %v3759_v40, %v4009_v52  ;;  %v1349_v24 = vpop.permute.xlu0 %1348 }
 0x20c   :  { %v1125_v0 = vadd.f32 1e-05, %v1095_v13 }
 0x20d   :  { %2597 = vmatpush3.bf16.msra.mxu0 %v2596_v23  ;;  %2616 = vmatpush3.bf16.msra.mxu1 %v2596_v23  ;;  %v1257_v4 = vmul.f32 %v3896_v19, %v1152_v63  ;;  %v1361_v48 = vadd.f32 %v3904_v5, %v1256_v33  ;;  %v1406_v45 = vpop.permute.xlu1 %1405 }
 0x20e   :  { %2654 = vrsqrt.f32 %v1125_v0  ;;  %2598 = vmatprep.subr.bf16.mxu0 %v4445_v54  ;;  %2609 = vmatprep.subr.bf16.mxu1 %v4445_v54 }
 0x20f   :  { %v1362_v2 = vadd.f32 %v3912_v8, %v1257_v4  ;;  %v1376_v31 = vmax.f32 %v1361_v48, 0.0  ;;  %v4446_v8 = vld [vmem:[#allocation2_spill] sm:$0xff]  ;;  %v1411_v35 = vpop.permute.xlu0 %1410 }
 0x210   :  { %v2651_v43 = vpop.eup %2650  ;;  %v1110_v40 = vsub.f32 %v4446_v8, %v990_v3 }
 0x211   :  { %v1377_v58 = vmax.f32 %v1362_v2, 0.0  ;;  %v1153_v25 = vmul.f32 %v2651_v43, %v1108_v15  ;;  %v1416_v27 = vpop.permute.xlu1 %1415 }
 0x212   :  { %v2653_v19 = vpop.eup %2652 }
 0x213   :  { %v2599_v28 = vpack.c.bf16 %v1377_v58, %v1376_v31  ;;  %v1154_v5 = vmul.f32 %v2653_v19, %v1109_v55  ;;  %v1258_v61 = vmul.f32 %v3920_v17, %v1153_v25  ;;  %v4109_v51 = vpop.permute.xlu0 %1425 }
 0x215   :  { %2600 = vmatpush3.bf16.msra.mxu0 %v2599_v28  ;;  %2617 = vmatpush3.bf16.msra.mxu1 %v2599_v28  ;;  %v1259_v50 = vmul.f32 %v3922_v37, %v1154_v5  ;;  %v1363_v29 = vadd.f32 %v3930_v21, %v1258_v61  ;;  %v4448_v37 = vmov 0.0   ;;  %v4111_v59 = vpop.permute.xlu1 %1430 }
 0x216   :  { %2601 = vmatprep.subr.bf16.mxu0 %v4445_v54  ;;  %2610 = vmatprep.subr.bf16.mxu1 %v4445_v54  ;;  %v1381_v54 = vld [vmem:[%s4436_s5] sm:$0xff] }
 0x217   :  { %v1364_v22 = vadd.f32 %v4447_v46, %v1259_v50  ;;  %v1378_v6 = vmax.f32 %v1363_v29, 0.0  ;;  %v1436_v47 = vpop.permute.xlu0 %1435 }
 0x218   :  { %v2655_v52 = vpop.eup %2654 }
 0x219   :  { %v1155_v20 = vmul.f32 %v2655_v52, %v1110_v40  ;;  %v1379_v36 = vmax.f32 %v1364_v22, 0.0  ;;  %v1421_v63 = vpop.permute.xlu1 %1420 }
 0x21b   :  { %v1260_v17 = vmul.f32 %v1244_v26, %v1155_v20  ;;  %v2602_v1 = vpack.c.bf16 %v1379_v36, %v1378_v6  ;;  %v1441_v33 = vpop.permute.xlu0 %1440 }
 0x21d   :  { %v1365_v16 = vadd.f32 %v1349_v24, %v1260_v17  ;;  %2603 = vmatpush3.bf16.msra.mxu0 %v2602_v1  ;;  %2618 = vmatpush3.bf16.msra.mxu1 %v2602_v1  ;;  %v1446_v8 = vpop.permute.xlu1 %1445 }
 0x21e   :  { %2420 = vmatprep.subr.mxu0 %v4448_v37  ;;  %2611 = vmatprep.subr.mxu1 %v4448_v37 }
 0x21f   :  { %v1380_v21 = vmax.f32 %v1365_v16, 0.0  ;;  %v1451_v24 = vpop.permute.xlu0 %1450 }
 0x221   :  { %2421 = vmatpush3.msra.mxu0 %v1380_v21  ;;  %2619 = vmatpush3.msra.mxu1 %v1380_v21 }
 0x222   :  { %2423 = vmatmul.mubr.msk.f32.vlgmr.msra.gmra.mrb[60].mxu0 %vm1458_vm2, %v1381_v54  ;;  %2441 = vmatmul.mubr.msk.f32.vlgmr.msra.gmra.mrb[60].mxu1 %vm1458_vm2, %v1387_v34 }
 0x223   :  { %2425 = vmatprep.mubr.msk.f32.mxu0 %vm2704_vm1, %v4448_v37  ;;  %2443 = vmatprep.mubr.msk.f32.mxu1 %vm2704_vm1, %v4448_v37 }
 0x226   :  { %2426 = vmatmul.mubr.msk.f32.gmra.mrb[62].mxu0 %vm1458_vm2, %v1382_v30  ;;  %2444 = vmatmul.mubr.msk.f32.gmra.mrb[62].mxu1 %vm1458_vm2, %v1388_v62 }
 0x227   :  { %2428 = vmatprep.mubr.msk.f32.mxu0 %vm2704_vm1, %v4448_v37  ;;  %2446 = vmatprep.mubr.msk.f32.mxu1 %vm2704_vm1, %v4448_v37 }
 0x22a   :  { %2429 = vmatmul.mubr.msk.f32.gmra.mrb[64].mxu0 %vm1458_vm2, %v1383_v9  ;;  %2447 = vmatmul.mubr.msk.f32.gmra.mrb[64].mxu1 %vm1458_vm2, %v1389_v39 }
 0x22b   :  { %2431 = vmatprep.mubr.msk.f32.mxu0 %vm2704_vm1, %v4448_v37  ;;  %2449 = vmatprep.mubr.msk.f32.mxu1 %vm2704_vm1, %v4448_v37 }
 0x22e   :  { %2432 = vmatmul.mubr.msk.f32.gmra.mrb[66].mxu0 %vm1458_vm2, %v1384_v49  ;;  %2450 = vmatmul.mubr.msk.f32.gmra.mrb[66].mxu1 %vm1458_vm2, %v1390_v42  ;;  %v1456_v42 = vpop.permute.xlu1 %1455 }
 0x22f   :  { %2434 = vmatprep.mubr.msk.f32.mxu0 %vm2704_vm1, %v4448_v37  ;;  %2452 = vmatprep.mubr.msk.f32.mxu1 %vm2704_vm1, %v4448_v37 }
 0x232   :  { %2435 = vmatmul.mubr.msk.f32.gmra.mrb[68].mxu0 %vm1458_vm2, %v1385_v32  ;;  %2453 = vmatmul.mubr.msk.f32.gmra.mrb[68].mxu1 %vm1458_vm2, %v1391_v44 }
 0x233   :  { %2437 = vmatprep.mubr.msk.f32.mxu0 %vm2704_vm1, %v4448_v37 }
 0x236   :  { %2438 = vmatmul.mubr.msk.f32.gmra.mrb[70].mxu0 %vm1458_vm2, %v1386_v11 }
 0x2f5   :  { %v1558_v57 = vpop.f32.mrb[60].mxu0  ;;  %v1588_v3 = vpop.f32.mrb[60].mxu1 }
 0x2f6   :  { %v4113_v38 = vadd.f32 %v1558_v57, %v1406_v45  ;;  %v4115_v12 = vadd.f32 %v1588_v3, %v1436_v47  ;;  %v2424_v60 = vpop.f32.mrb[61].mxu0  ;;  %v2442_v7 = vpop.f32.mrb[61].mxu1 }
 0x2f8   :  { %v1612_v18 = vsel %vm930_vm0, %v4113_v38, 0.0  ;;  %v1663_v41 = vmul.f32 %v4115_v12, %v4115_v12  ;;  %v1630_v0 = vsel %vm930_vm0, %v4115_v12, 0.0  ;;  %v1657_v4 = vmul.f32 %v4113_v38, %v4113_v38 }
 0x2f9   :  { %v1563_v56 = vpop.f32.mrb[62].mxu0  ;;  %v1593_v10 = vpop.f32.mrb[62].mxu1  ;;  %1613 = vadd.xlane.f32.xlu0 %v1612_v18 }
 0x2fa   :  { %v4121_v14 = vadd.f32 %v1563_v56, %v1411_v35  ;;  %v1686_v53 = vsel %vm930_vm0, %v1663_v41, 0.0  ;;  %v2427_v13 = vpop.f32.mrb[63].mxu0  ;;  %v2445_v23 = vpop.f32.mrb[63].mxu1  ;;  %v4128_v2 = vadd.f32 %v1593_v10, %v1441_v33  ;;  %v1668_v25 = vsel %vm930_vm0, %v1657_v4, 0.0  ;;  %v1865_v10 = vld [vmem:[%s4435_s8 + $0x50] sm:$0xf] }
 0x2fb   :  { %1687 = vadd.xlane.f32.xlu1 %v1686_v53  ;;  %v1864_v53 = vld [vmem:[%s4435_s8 + $0x48] sm:$0xff]  ;;  %v4198_v13 = vpop.permute.xlu1 %1791 }
 0x2fc   :  { %v1615_v43 = vsel %vm930_vm0, %v4121_v14, 0.0  ;;  %v1658_v58 = vmul.f32 %v4121_v14, %v4121_v14  ;;  %v1664_v29 = vmul.f32 %v4128_v2, %v4128_v2  ;;  %v1633_v46 = vsel %vm930_vm0, %v4128_v2, 0.0 }
 0x2fd   :  { %v1568_v48 = vpop.f32.mrb[64].mxu0  ;;  %v1598_v15 = vpop.f32.mrb[64].mxu1  ;;  %1631 = vadd.xlane.f32.xlu0 %v1630_v0 }
 0x2fe   :  { %v2430_v55 = vpop.f32.mrb[65].mxu0  ;;  %v2448_v31 = vpop.f32.mrb[65].mxu1  ;;  %v1671_v5 = vsel %vm930_vm0, %v1658_v58, 0.0  ;;  %v4138_v40 = vadd.f32 %v1568_v48, %v1416_v27  ;;  %v4142_v20 = vadd.f32 %v1598_v15, %v1446_v8  ;;  %v1689_v6 = vsel %vm930_vm0, %v1664_v29, 0.0 }
 0x2ff   :  { %1616 = vadd.xlane.f32.xlu1 %v1615_v43  ;;  %v4200_v23 = vpop.permute.xlu1 %1801 }
 0x300   :  { %v1618_v17 = vsel %vm930_vm0, %v4138_v40, 0.0  ;;  %v1659_v1 = vmul.f32 %v4138_v40, %v4138_v40  ;;  %v1636_v54 = vsel %vm930_vm0, %v4142_v20, 0.0  ;;  %v1665_v62 = vmul.f32 %v4142_v20, %v4142_v20 }
 0x301   :  { %v1573_v19 = vpop.f32.mrb[66].mxu0  ;;  %v1603_v28 = vpop.f32.mrb[66].mxu1  ;;  %1669 = vadd.xlane.f32.xlu0 %v1668_v25 }
 0x302   :  { %v2433_v61 = vpop.f32.mrb[67].mxu0  ;;  %v2451_v50 = vpop.f32.mrb[67].mxu1  ;;  %v4149_v37 = vadd.f32 %v1573_v19, %v1421_v63  ;;  %v4151_v21 = vadd.f32 %v1603_v28, %v1451_v24  ;;  %v1674_v30 = vsel %vm930_vm0, %v1659_v1, 0.0  ;;  %v1692_v49 = vsel %vm930_vm0, %v1665_v62, 0.0 }
 0x303   :  { %1672 = vadd.xlane.f32.xlu1 %v1671_v5  ;;  %v4202_v63 = vpop.permute.xlu0 %1796  ;;  %v4204_v33 = vpop.permute.xlu1 %1811 }
 0x304   :  { %v1621_v9 = vsel %vm930_vm0, %v4149_v37, 0.0  ;;  %v1666_v39 = vmul.f32 %v4151_v21, %v4151_v21  ;;  %v1639_v45 = vsel %vm930_vm0, %v4151_v21, 0.0  ;;  %v1660_v35 = vmul.f32 %v4149_v37, %v4149_v37 }
 0x305   :  { %v1578_v22 = vpop.f32.mrb[68].mxu0  ;;  %v1608_v52 = vpop.f32.mrb[68].mxu1  ;;  %1634 = vadd.xlane.f32.xlu0 %v1633_v46 }
 0x306   :  { %v2436_v36 = vpop.f32.mrb[69].mxu0  ;;  %v2454_v26 = vpop.f32.mrb[69].mxu1  ;;  %v4164_v32 = vadd.f32 %v1578_v22, %v4109_v51  ;;  %v4166_v44 = vadd.f32 %v1608_v52, %v1456_v42  ;;  %v1695_v11 = vsel %vm930_vm0, %v1666_v39, 0.0  ;;  %v1677_v47 = vsel %vm930_vm0, %v1660_v35, 0.0 }
 0x307   :  { %1690 = vadd.xlane.f32.xlu1 %v1689_v6  ;;  %v4206_v0 = vpop.permute.xlu0 %1816  ;;  %v4208_v4 = vpop.permute.xlu1 %1821 }
 0x308   :  { %v1643_v27 = vsel %vm1642_vm3, %v4166_v44, 0.0  ;;  %v1661_v51 = vmul.f32 %v4164_v32, %v4164_v32  ;;  %v1624_v60 = vsel %vm930_vm0, %v4164_v32, 0.0  ;;  %v1667_v7 = vmul.f32 %v4166_v44, %v4166_v44 }
 0x309   :  { %v1583_v16 = vpop.f32.mrb[70].mxu0  ;;  %1619 = vadd.xlane.f32.xlu0 %v1618_v17 }
 0x30a   :  { %v2439_v34 = vpop.f32.mrb[71].mxu0  ;;  %v4179_v57 = vadd.f32 %v1583_v16, %v4111_v59  ;;  %v1680_v3 = vsel %vm930_vm0, %v1661_v51, 0.0  ;;  %v1698_v41 = vsel %vm1642_vm3, %v1667_v7, 0.0 }
 0x30b   :  { %1637 = vadd.xlane.f32.xlu1 %v1636_v54  ;;  %v4210_v48 = vpop.permute.xlu0 %1806  ;;  %v4212_v15 = vpop.permute.xlu1 %1826 }
 0x30c   :  { %v1627_v18 = vsel %vm930_vm0, %v4179_v57, 0.0  ;;  %v1662_v59 = vmul.f32 %v4179_v57, %v4179_v57 }
 0x30d   :  { %1675 = vadd.xlane.f32.xlu0 %v1674_v30 }
 0x30e   :  { %v1683_v56 = vsel %vm930_vm0, %v1662_v59, 0.0 }
 0x30f   :  { %1622 = vadd.xlane.f32.xlu1 %v1621_v9  ;;  %v4214_v43 = vpop.permute.xlu0 %1831  ;;  %v4216_v55 = vpop.permute.xlu1 %1836 }
 0x311   :  { %1693 = vadd.xlane.f32.xlu0 %v1692_v49 }
 0x313   :  { %1696 = vadd.xlane.f32.xlu1 %v1695_v11  ;;  %v4218_v31 = vpop.permute.xlu0 %1841  ;;  %v4220_v58 = vpop.permute.xlu1 %1868 }
 0x315   :  { %1640 = vadd.xlane.f32.xlu0 %v1639_v45 }
 0x317   :  { %1644 = vadd.xlane.f32.xlu1 %v1643_v27  ;;  %v4222_v25 = vpop.permute.xlu0 %1873  ;;  %v4224_v19 = vpop.permute.xlu1 %1878 }
 0x319   :  { %1678 = vadd.xlane.f32.xlu0 %v1677_v47 }
 0x31b   :  { %1681 = vadd.xlane.f32.xlu1 %v1680_v3  ;;  %v4226_v28 = vpop.permute.xlu0 %1888  ;;  %v4228_v5 = vpop.permute.xlu1 %1893 }
 0x31c   :  { %4449 = vst [vmem:[#allocation2_spill] sm:$0xff] %v4228_v5 }
 0x31d   :  { %1625 = vadd.xlane.f32.xlu0 %v1624_v60 }
 0x31f   :  { %1628 = vadd.xlane.f32.xlu1 %v1627_v18  ;;  %v4230_v61 = vpop.permute.xlu0 %1898  ;;  %v4232_v50 = vpop.permute.xlu1 %1883 }
 0x321   :  { %1699 = vadd.xlane.f32.xlu0 %v1698_v41 }
 0x323   :  { %v4234_v29 = vpop.permute.xlu0 %1903  ;;  %v4236_v8 = vpop.permute.xlu1 %1908 }
 0x324   :  { %4450 = vst [vmem:[#allocation3_spill] sm:$0xff] %v4234_v29  ;;  %4451 = vst [vmem:[#allocation4_spill] sm:$0xff] %v4236_v8 }
 0x325   :  { %1684 = vadd.xlane.f32.xlu0 %v1683_v56 }
 0x330   :  { %1918 = vperm.xlu1 %2625, %v1865_v10  }
 0x33b   :  { %1913 = vperm.xlu0 %2624, %v1864_v53  }
 0x386   :  { %v1614_v46 = vpop.xlane.xlu0 %1613 }
 0x387   :  { %v4240_v62 = vmul.f32 0.0625, %v1614_v46 }
 0x388   :  { %v1688_v22 = vpop.xlane.xlu1 %1687 }
 0x389   :  { %v1707_v11 = vmul.f32 0.0625, %v1688_v22  ;;  %v1712_v47 = vmul.f32 %v4240_v62, %v4240_v62 }
 0x38a   :  { %v1632_v52 = vpop.xlane.xlu0 %1631 }
 0x38b   :  { %v4238_v54 = vmul.f32 0.0625, %v1632_v52 }
 0x38c   :  { %v1617_v6 = vpop.xlane.xlu1 %1616 }
 0x38d   :  { %v1718_v9 = vmul.f32 %v4238_v54, %v4238_v54  ;;  %v4244_v39 = vmul.f32 0.0625, %v1617_v6 }
 0x38e   :  { %v1670_v36 = vpop.xlane.xlu0 %1669 }
 0x38f   :  { %v1701_v45 = vmul.f32 0.0625, %v1670_v36  ;;  %v1729_v3 = vsub.f32 %v1707_v11, %v1718_v9  ;;  %v1713_v7 = vmul.f32 %v4244_v39, %v4244_v39 }
 0x390   :  { %v1673_v26 = vpop.xlane.xlu1 %1672 }
 0x391   :  { %v1702_v27 = vmul.f32 0.0625, %v1673_v26  ;;  %v1723_v10 = vsub.f32 %v1701_v45, %v1712_v47 }
 0x392   :  { %v1635_v17 = vpop.xlane.xlu0 %1634 }
 0x393   :  { %v4246_v49 = vmul.f32 0.0625, %v1635_v17  ;;  %v1724_v52 = vsub.f32 %v1702_v27, %v1713_v7  ;;  %v1751_v17 = vadd.f32 1e-05, %v1729_v3  ;;  %v1745_v9 = vadd.f32 1e-05, %v1723_v10 }
 0x394   :  { %v1691_v1 = vpop.xlane.xlu1 %1690 }
 0x395   :  { %v1719_v18 = vmul.f32 %v4246_v49, %v4246_v49  ;;  %v1708_v41 = vmul.f32 0.0625, %v1691_v1  ;;  %v1746_v45 = vadd.f32 1e-05, %v1724_v52  ;;  %2656 = vrsqrt.f32 %v1751_v17 }
 0x396   :  { %v1620_v24 = vpop.xlane.xlu0 %1619  ;;  %2658 = vrsqrt.f32 %v1745_v9 }
 0x397   :  { %v4248_v35 = vmul.f32 0.0625, %v1620_v24  ;;  %v1730_v24 = vsub.f32 %v1708_v41, %v1719_v18  ;;  %2660 = vrsqrt.f32 %v1746_v45 }
 0x398   :  { %v1638_v16 = vpop.xlane.xlu1 %1637 }
 0x399   :  { %v4256_v59 = vmul.f32 0.0625, %v1638_v16  ;;  %v1714_v53 = vmul.f32 %v4248_v35, %v4248_v35  ;;  %v1752_v3 = vadd.f32 1e-05, %v1730_v24 }
 0x39a   :  { %v1676_v34 = vpop.xlane.xlu0 %1675 }
 0x39b   :  { %v1703_v60 = vmul.f32 0.0625, %v1676_v34  ;;  %v1720_v1 = vmul.f32 %v4256_v59, %v4256_v59 }
 0x39c   :  { %v1623_v30 = vpop.xlane.xlu1 %1622 }
 0x39d   :  { %v4260_v46 = vmul.f32 0.0625, %v1623_v30  ;;  %v1725_v26 = vsub.f32 %v1703_v60, %v1714_v53 }
 0x39e   :  { %v1694_v42 = vpop.xlane.xlu0 %1693 }
 0x39f   :  { %v1709_v6 = vmul.f32 0.0625, %v1694_v42  ;;  %v1715_v30 = vmul.f32 %v4260_v46, %v4260_v46  ;;  %v1747_v7 = vadd.f32 1e-05, %v1725_v26  ;;  %v2657_v45 = vpop.eup %2656 }
 0x3a0   :  { %v1697_v51 = vpop.xlane.xlu1 %1696 }
 0x3a1   :  { %v1731_v47 = vsub.f32 %v1709_v6, %v1720_v1  ;;  %v1710_v27 = vmul.f32 0.0625, %v1697_v51  ;;  %2662 = vrsqrt.f32 %v1747_v7 }
 0x3a2   :  { %v1641_v56 = vpop.xlane.xlu0 %1640  ;;  %2664 = vrsqrt.f32 %v1752_v3  ;;  %v1740_v3 = vsub.f32 %v4115_v12, %v4238_v54  ;;  %v1742_v12 = vsub.f32 %v4142_v20, %v4256_v59 }
 0x3a3   :  { %v4262_v22 = vmul.f32 0.0625, %v1641_v56  ;;  %v1753_v8 = vadd.f32 1e-05, %v1731_v47  ;;  %v2659_v47 = vpop.eup %2658 }
 0x3a4   :  { %v1645_v36 = vpop.xlane.xlu1 %1644 }
 0x3a5   :  { %v1721_v16 = vmul.f32 %v4262_v22, %v4262_v22  ;;  %v1656_v56 = vmul.f32 0.0625, %v1645_v36  ;;  %2666 = vrsqrt.f32 %v1753_v8  ;;  %v1734_v8 = vsub.f32 %v4113_v38, %v4240_v62 }
 0x3a6   :  { %v1679_v34 = vpop.xlane.xlu0 %1678  ;;  %v1741_v38 = vsub.f32 %v4128_v2, %v4246_v49  ;;  %v1743_v54 = vsub.f32 %v4151_v21, %v4262_v22 }
 0x3a7   :  { %v1704_v11 = vmul.f32 0.0625, %v1679_v34  ;;  %v1732_v18 = vsub.f32 %v1710_v27, %v1721_v16  ;;  %v1722_v6 = vmul.f32 %v1656_v56, %v1656_v56 }
 0x3a8   :  { %v1682_v42 = vpop.xlane.xlu1 %1681 }
 0x3a9   :  { %v1726_v60 = vsub.f32 %v1704_v11, %v1715_v30  ;;  %v1705_v29 = vmul.f32 0.0625, %v1682_v42  ;;  %v1754_v52 = vadd.f32 1e-05, %v1732_v18 }
 0x3aa   :  { %v1626_v41 = vpop.xlane.xlu0 %1625 }
 0x3ab   :  { %v1650_v53 = vmul.f32 0.0625, %v1626_v41  ;;  %v1748_v5 = vadd.f32 1e-05, %v1726_v60 }
 0x3ac   :  { %v1629_v10 = vpop.xlane.xlu1 %1628 }
 0x3ad   :  { %v1716_v34 = vmul.f32 %v1650_v53, %v1650_v53  ;;  %v4270_v1 = vmul.f32 0.0625, %v1629_v10  ;;  %2668 = vrsqrt.f32 %v1748_v5  ;;  %v1736_v5 = vsub.f32 %v4138_v40, %v4248_v35 }
 0x3ae   :  { %v1700_v51 = vpop.xlane.xlu0 %1699  ;;  %2670 = vrsqrt.f32 %v1754_v52  ;;  %v1735_v52 = vsub.f32 %v4121_v14, %v4244_v39  ;;  %v1738_v40 = vsub.f32 %v4164_v32, %v1650_v53  ;;  %v1744_v14 = vsub.f32 %v4166_v44, %v1656_v56 }
 0x3af   :  { %v1727_v26 = vsub.f32 %v1705_v29, %v1716_v34  ;;  %v1711_v17 = vmul.f32 0.0625, %v1700_v51  ;;  %v1717_v9 = vmul.f32 %v4270_v1, %v4270_v1  ;;  %v2661_v29 = vpop.eup %2660  ;;  %v1773_v34 = vmul.f32 %v2657_v45, %v1740_v3 }
 0x3b0   :  { %v2663_v42 = vpop.eup %2662  ;;  %v1767_v51 = vmul.f32 %v2659_v47, %v1734_v8  ;;  %v1768_v62 = vmul.f32 %v2661_v29, %v1735_v52  ;;  %v1739_v21 = vsub.f32 %v4179_v57, %v4270_v1 }
 0x3b1   :  { %v1749_v24 = vadd.f32 1e-05, %v1727_v26  ;;  %v1733_v36 = vsub.f32 %v1711_v17, %v1722_v6  ;;  %v2665_v60 = vpop.eup %2664  ;;  %v1769_v41 = vmul.f32 %v2663_v42, %v1736_v5  ;;  %v1737_v26 = vsub.f32 %v4149_v37, %v4260_v46 }
 0x3b2   :  { %v1685_v16 = vpop.xlane.xlu0 %1684  ;;  %v2667_v18 = vpop.eup %2666  ;;  %v1850_v32 = vmul.f32 %v4208_v4, %v1773_v34  ;;  %v1774_v46 = vmul.f32 %v2665_v60, %v1741_v38  ;;  %v1844_v53 = vmul.f32 %v4198_v13, %v1767_v51  ;;  %v1845_v44 = vmul.f32 %v4202_v63, %v1768_v62 }
 0x3b3   :  { %2672 = vrsqrt.f32 %v1749_v24  ;;  %v1755_v30 = vadd.f32 1e-05, %v1733_v36  ;;  %v1706_v11 = vmul.f32 0.0625, %v1685_v16  ;;  %v1846_v24 = vmul.f32 %v4200_v23, %v1769_v41  ;;  %v1919_v16 = vpop.permute.xlu1 %1918 }
 0x3b4   :  { %v1775_v20 = vmul.f32 %v2667_v18, %v1742_v12  ;;  %v1851_v13 = vmul.f32 %v4212_v15, %v1774_v46 }
 0x3b5   :  { %2674 = vrsqrt.f32 %v1755_v30  ;;  %v1728_v27 = vsub.f32 %v1706_v11, %v1717_v9  ;;  %v1923_v4 = vadd.f32 %v4224_v19, %v1846_v24  ;;  %v1921_v9 = vadd.f32 %v4220_v58, %v1844_v53  ;;  %v4452_v11 = vld [vmem:[#allocation3_spill] sm:$0xff] }
 0x3b6   :  { %v1852_v63 = vmul.f32 %v4214_v43, %v1775_v20  ;;  %v1928_v58 = vadd.f32 %v4452_v11, %v1851_v13 }
 0x3b7   :  { %v1750_v7 = vadd.f32 1e-05, %v1728_v27  ;;  %v2669_v10 = vpop.eup %2668  ;;  %v1934_v1 = vsel %vm930_vm0, %v1923_v4, -inf  ;;  %v1932_v47 = vsel %vm930_vm0, %v1921_v9, -inf }
 0x3b8   :  { %v2671_v6 = vpop.eup %2670  ;;  %v1770_v17 = vmul.f32 %v2669_v10, %v1737_v26  ;;  %v1942_v18 = vsel %vm930_vm0, %v1928_v58, -inf }
 0x3b9   :  { %2676 = vrsqrt.f32 %v1750_v7  ;;  %v1776_v59 = vmul.f32 %v2671_v6, %v1743_v54 }
 0x3ba   :  { %v1847_v23 = vmul.f32 %v4210_v48, %v1770_v17  ;;  %v1914_v48 = vpop.permute.xlu0 %1913 }
 0x3bc   :  { %v1924_v19 = vadd.f32 %v4232_v50, %v1847_v23 }
 0x3bd   :  { %v2673_v35 = vpop.eup %2672 }
 0x3be   :  { %v1771_v39 = vmul.f32 %v2673_v35, %v1738_v40 }
 0x3bf   :  { %v2675_v37 = vpop.eup %2674 }
 0x3c0   :  { %v1848_v2 = vmul.f32 %v4204_v33, %v1771_v39  ;;  %v1777_v49 = vmul.f32 %v2675_v37, %v1744_v14  ;;  %v1927_v33 = vadd.f32 %v4230_v61, %v1850_v32 }
 0x3c2   :  { %v1925_v22 = vadd.f32 %v4226_v28, %v1848_v2  ;;  %v1854_v56 = vmul.f32 %v4218_v31, %v1777_v49  ;;  %v1853_v28 = vmul.f32 %v4216_v55, %v1776_v59  ;;  %v1922_v31 = vadd.f32 %v4222_v25, %v1845_v44  ;;  %v4453_v55 = vld [vmem:[#allocation2_spill] sm:$0xff]  ;;  %v4454_v25 = vld [vmem:[#allocation4_spill] sm:$0xff] }
 0x3c3   :  { %v2677_v36 = vpop.eup %2676  ;;  %v1940_v45 = vsel %vm930_vm0, %v1927_v33, -inf  ;;  %v1929_v29 = vadd.f32 %v4454_v25, %v1852_v63 }
 0x3c4   :  { %v4306_v30 = vadd.f32 %v1919_v16, %v1854_v56  ;;  %v1772_v57 = vmul.f32 %v2677_v36, %v1739_v21  ;;  %v1936_v61 = vsel %vm930_vm0, %v1925_v22, -inf  ;;  %v1930_v50 = vadd.f32 %v1914_v48, %v1853_v28 }
 0x3c5   :  { %v1941_v42 = vmax.f32 %v1934_v1, %v1940_v45  ;;  %v1937_v7 = vmax.f32 %v1932_v47, %v1936_v61  ;;  %v1933_v60 = vsel %vm930_vm0, %v1922_v31, -inf  ;;  %v1944_v41 = vsel %vm930_vm0, %v1929_v29, -inf }
 0x3c6   :  { %v1849_v15 = vmul.f32 %v4206_v0, %v1772_v57  ;;  %v1948_v43 = vsel %vm1642_vm3, %v4306_v30, -inf  ;;  %v1935_v0 = vsel %vm930_vm0, %v1924_v19, -inf  ;;  %v1946_v10 = vsel %vm930_vm0, %v1930_v50, -inf }
 0x3c7   :  { %v1949_v8 = vmax.f32 %v1941_v42, %v1948_v43  ;;  %v1943_v34 = vmax.f32 %v1935_v0, %v1942_v18  ;;  %v1945_v52 = vmax.f32 %v1937_v7, %v1944_v41 }
 0x3c8   :  { %v1926_v27 = vadd.f32 %v4453_v55, %v1849_v15 }
 0x3c9   :  { %v1951_v6 = vmax.f32 %v1949_v8, %v1943_v34 }
 0x3ca   :  { %v1938_v5 = vsel %vm930_vm0, %v1926_v27, -inf }
 0x3cb   :  { %v1939_v3 = vmax.f32 %v1933_v60, %v1938_v5 }
 0x3cd   :  { %v1947_v51 = vmax.f32 %v1939_v3, %v1946_v10 }
 0x3cf   :  { %v1950_v26 = vmax.f32 %v1945_v52, %v1947_v51 }
 0x3d1   :  { %v1952_v40 = vmax.f32 %v1950_v26, %v1951_v6 }
 0x3d3   :  { %v1953_v35 = vrot.slane %v1952_v40, 4 }
 0x3d5   :  { %v1954_v38 = vmax.f32 %v1952_v40, %v1953_v35 }
 0x3d7   :  { %v1955_v12 = vrot.slane %v1954_v38, 2 }
 0x3d9   :  { %v1956_v54 = vmax.f32 %v1954_v38, %v1955_v12 }
 0x3db   :  { %v1957_v62 = vrot.slane %v1956_v54, 1 }
 0x3dd   :  { %v1958_v14 = vmax.f32 %v1956_v54, %v1957_v62 }
 0x3df   :  { %v4328_v39 = vsub.f32 %v1921_v9, %v1958_v14  ;;  %v4330_v17 = vsub.f32 %v1922_v31, %v1958_v14  ;;  %v4332_v24 = vsub.f32 %v1923_v4, %v1958_v14  ;;  %v4334_v37 = vsub.f32 %v1924_v19, %v1958_v14 }
 0x3e0   :  { %v4336_v32 = vsub.f32 %v1925_v22, %v1958_v14  ;;  %v4338_v46 = vsub.f32 %v1928_v58, %v1958_v14  ;;  %v4340_v53 = vsub.f32 %v1929_v29, %v1958_v14  ;;  %v4343_v49 = vsub.f32 %v1926_v27, %v1958_v14 }
 0x3e1   :  { %v1970_v2 = vmul.f32 1.442695, %v4328_v39  ;;  %v1972_v20 = vmul.f32 1.442695, %v4330_v17  ;;  %v1974_v59 = vmul.f32 1.442695, %v4332_v24  ;;  %v4348_v44 = vsub.f32 %v1927_v33, %v1958_v14 }
 0x3e2   :  { %v1976_v21 = vmul.f32 1.442695, %v4334_v37  ;;  %v1978_v22 = vmul.f32 1.442695, %v4336_v32  ;;  %v1980_v23 = vmul.f32 1.442695, %v4343_v49  ;;  %v4353_v4 = vsub.f32 %v1930_v50, %v1958_v14 }
 0x3e3   :  { %2678 = vpow2.f32 %v1970_v2  ;;  %v1982_v56 = vmul.f32 1.442695, %v4348_v44  ;;  %v1984_v36 = vmul.f32 1.442695, %v4338_v46  ;;  %v4357_v13 = vsub.f32 %v4306_v30, %v1958_v14 }
 0x3e4   :  { %2680 = vpow2.f32 %v1972_v20  ;;  %v1986_v33 = vmul.f32 1.442695, %v4340_v53  ;;  %v1988_v57 = vmul.f32 1.442695, %v4353_v4 }
 0x3e5   :  { %2682 = vpow2.f32 %v1974_v59  ;;  %v1990_v19 = vmul.f32 1.442695, %v4357_v13 }
 0x3e6   :  { %2684 = vpow2.f32 %v1976_v21 }
 0x3e7   :  { %2686 = vpow2.f32 %v1978_v22 }
 0x3e8   :  { %2688 = vpow2.f32 %v1980_v23 }
 0x3e9   :  { %2690 = vpow2.f32 %v1982_v56 }
 0x3ea   :  { %2692 = vpow2.f32 %v1984_v36 }
 0x3eb   :  { %2694 = vpow2.f32 %v1986_v33 }
 0x3ec   :  { %2696 = vpow2.f32 %v1988_v57 }
 0x3ed   :  { %v2679_v16 = vpop.eup %2678  ;;  %2698 = vpow2.f32 %v1990_v19 }
 0x3ee   :  { %v2681_v9 = vpop.eup %2680  ;;  %v1992_v63 = vsel %vm930_vm0, %v2679_v16, 0.0 }
 0x3ef   :  { %v2683_v28 = vpop.eup %2682  ;;  %v1993_v48 = vsel %vm930_vm0, %v2681_v9, 0.0 }
 0x3f0   :  { %v2685_v31 = vpop.eup %2684  ;;  %v1994_v1 = vadd.f32 %v1993_v48, %v1992_v63  ;;  %v1995_v30 = vsel %vm930_vm0, %v2683_v28, 0.0 }
 0x3f1   :  { %v2687_v15 = vpop.eup %2686  ;;  %v1997_v11 = vsel %vm930_vm0, %v2685_v31, 0.0 }
 0x3f2   :  { %v1996_v61 = vadd.f32 %v1995_v30, %v1994_v1  ;;  %v2689_v58 = vpop.eup %2688  ;;  %v1999_v47 = vsel %vm930_vm0, %v2687_v15, 0.0 }
 0x3f3   :  { %v2691_v43 = vpop.eup %2690  ;;  %v2001_v27 = vsel %vm930_vm0, %v2689_v58, 0.0 }
 0x3f4   :  { %v1998_v45 = vadd.f32 %v1997_v11, %v1996_v61  ;;  %v2693_v25 = vpop.eup %2692  ;;  %v2003_v50 = vsel %vm930_vm0, %v2691_v43, 0.0 }
 0x3f5   :  { %v2695_v42 = vpop.eup %2694  ;;  %v2005_v0 = vsel %vm930_vm0, %v2693_v25, 0.0 }
 0x3f6   :  { %v2000_v55 = vadd.f32 %v1999_v47, %v1998_v45  ;;  %v2697_v60 = vpop.eup %2696  ;;  %v2007_v8 = vsel %vm930_vm0, %v2695_v42, 0.0 }
 0x3f7   :  { %v2699_v3 = vpop.eup %2698  ;;  %v2009_v41 = vsel %vm930_vm0, %v2697_v60, 0.0 }
 0x3f8   :  { %v2002_v29 = vadd.f32 %v2001_v27, %v2000_v55  ;;  %v2011_v34 = vsel %vm1642_vm3, %v2699_v3, 0.0 }
 0x3fa   :  { %v2004_v7 = vadd.f32 %v2003_v50, %v2002_v29 }
 0x3fc   :  { %v2006_v5 = vadd.f32 %v2005_v0, %v2004_v7 }
 0x3fe   :  { %v2008_v18 = vadd.f32 %v2007_v8, %v2006_v5 }
 0x400   :  { %v2010_v10 = vadd.f32 %v2009_v41, %v2008_v18 }
 0x402   :  { %v2012_v52 = vadd.f32 %v2011_v34, %v2010_v10 }
 0x404   :  { %v2013_v51 = vrot.slane %v2012_v52, 4 }
 0x406   :  { %v2014_v6 = vadd.f32 %v2013_v51, %v2012_v52 }
 0x408   :  { %v2015_v26 = vrot.slane %v2014_v6, 2 }
 0x40a   :  { %v2016_v40 = vadd.f32 %v2015_v26, %v2014_v6 }
 0x40c   :  { %v2017_v35 = vrot.slane %v2016_v40, 1 }
 0x40e   :  { %v2018_v38 = vadd.f32 %v2017_v35, %v2016_v40 }
 0x410   :  { %2700 = vlog2.f32 %v2018_v38 }
 0x41a   :  { %v2701_v12 = vpop.eup %2700 }
 0x41b   :  { %v2020_v54 = vmul.f32 0.6931472, %v2701_v12 }
 0x41d   :  { %v2021_v62 = vsub.f32 %v4328_v39, %v2020_v54  ;;  %v2022_v14 = vsub.f32 %v4330_v17, %v2020_v54  ;;  %v2023_v2 = vsub.f32 %v4332_v24, %v2020_v54  ;;  %v2024_v20 = vsub.f32 %v4334_v37, %v2020_v54 }
 0x41e   :  { %v2025_v59 = vsub.f32 %v4336_v32, %v2020_v54  ;;  %v2026_v21 = vsub.f32 %v4343_v49, %v2020_v54  ;;  %v2027_v22 = vsub.f32 %v4348_v44, %v2020_v54  ;;  %v2028_v23 = vsub.f32 %v4338_v46, %v2020_v54 }
 0x41f   :  { %v2029_v56 = vsub.f32 %v4340_v53, %v2020_v54  ;;  %v2030_v36 = vsub.f32 %v4353_v4, %v2020_v54  ;;  %v2031_v39 = vsub.f32 %v4357_v13, %v2020_v54  ;;  %2032 = vst.msk [vmem:[%s4437_s9] sm:$0xff] %vm930_vm0, %v2021_v62  ;;  %2033 = vst.msk [vmem:[%s4437_s9 + $0x8] sm:$0xff] %vm930_vm0, %v2022_v14 }
 0x420   :  { %2034 = vst.msk [vmem:[%s4437_s9 + $0x10] sm:$0xff] %vm930_vm0, %v2023_v2  ;;  %2035 = vst.msk [vmem:[%s4437_s9 + $0x18] sm:$0xff] %vm930_vm0, %v2024_v20 }
 0x421   :  { %2036 = vst.msk [vmem:[%s4437_s9 + $0x20] sm:$0xff] %vm930_vm0, %v2025_v59  ;;  %2037 = vst.msk [vmem:[%s4437_s9 + $0x28] sm:$0xff] %vm930_vm0, %v2026_v21 }
 0x422   :  { %2038 = vst.msk [vmem:[%s4437_s9 + $0x30] sm:$0xff] %vm930_vm0, %v2027_v22  ;;  %2039 = vst.msk [vmem:[%s4437_s9 + $0x38] sm:$0xff] %vm930_vm0, %v2028_v23 }
 0x423   :  { %2040 = vst.msk [vmem:[%s4437_s9 + $0x40] sm:$0xff] %vm930_vm0, %v2029_v56  ;;  %2041 = vst.msk [vmem:[%s4437_s9 + $0x48] sm:$0xff] %vm930_vm0, %v2030_v36 }
 0x424   :  { %2042 = vst.msk [vmem:[%s4437_s9 + $0x50] sm:$0xf] %vm1642_vm3, %v2031_v39 }

</bundles_post_ra>
